<compile_context>
chip_gen: v7x
topology: tpu7x:2x2x1
jax: 0.10.0
libtpu: 0.0.40
codegen_flags: <defaults>
</compile_context>

<pallas_src>
import functools

import jax
import jax.numpy as jnp
from jax.experimental import pallas as pl
from jax.experimental.pallas import tpu as pltpu

D = 300          # embedding_dim (f1 = Linear(300, 128) requires 2*H == 300)
D_PAD = 384      # D padded to a lane multiple (3 * 128)
H = 150          # hidden_dim
HP = 256         # per-gate padded width (lane-aligned)
F1_DIM = 128
OUT_DIM = 2
NG_FWD = 4 * HP  # fused forward-gate width  (i, f, g, o)
NG_ALL = 7 * HP  # + backward gates (i, g, o)


def rnn_kernel(ids_ref,            # SMEM [B, T] int32 token ids
               emb_ref,            # VMEM [V, 1, D_PAD] f32 embedding table
               w_in_ref,           # VMEM [D_PAD, NG_ALL] bf16 fused input weights
               b_in_ref,           # VMEM [1, NG_ALL] f32 fused input biases
               whh_ref,            # VMEM [HP, NG_FWD] bf16 fused recurrent weights
               w1_ref, b1_ref,     # VMEM [2*HP, 128] bf16, [1, 128] f32
               w2_ref, b2_ref,     # VMEM [128, OUT_DIM] f32, [1, OUT_DIM] f32
               out_ref,            # VMEM [B, OUT_DIM] f32
               x_ref,              # scratch VMEM [T*B, D_PAD] f32 (time-major)
               gx_ref,             # scratch VMEM [T, B, NG_FWD] f32
               *, T, B):
    # ---- In-kernel embedding gather, time-major rows: x[t*B+b] = emb[ids[b,t]].
    for t in range(T):
        for b in range(B):
            tok = ids_ref[b, t]                              # SMEM scalar
            x_ref[pl.ds(t * B + b, 1), :] = emb_ref[tok]     # [1, D_PAD]

    x = x_ref[...].astype(jnp.bfloat16)                      # [T*B, D_PAD]

    # ---- ONE fused input projection for all 4 fwd gates + 3 live bwd gates.
    gx = jnp.dot(x, w_in_ref[...],
                 preferred_element_type=jnp.float32) + b_in_ref[...]   # [T*B, NG_ALL]

    # Stash forward-gate pre-activations per timestep so the recurrence reads
    # them with aligned leading-dim indexing.
    for t in range(T):
        gx_ref[t] = gx[t * B:(t + 1) * B, :NG_FWD]

    # ---- Backward direction at the last output position: a single reverse
    # step on x[T-1] from the zero state (recurrent term & forget gate dead).
    gb = gx[(T - 1) * B:T * B, NG_FWD:]                      # [B, 3*HP]
    bi = jax.nn.sigmoid(gb[:, 0:HP])
    bg = jnp.tanh(gb[:, HP:2 * HP])
    bo = jax.nn.sigmoid(gb[:, 2 * HP:3 * HP])
    h_bwd = bo * jnp.tanh(bi * bg)                           # [B, HP], pad lanes = 0

    # ---- Forward recurrence, fully unrolled; one fused recurrent matmul/step.
    h = jnp.zeros((B, HP), jnp.float32)
    c = jnp.zeros((B, HP), jnp.float32)
    for t in range(T):
        g = gx_ref[t] + jnp.dot(h.astype(jnp.bfloat16), whh_ref[...],
                                preferred_element_type=jnp.float32)     # [B, NG_FWD]
        i = jax.nn.sigmoid(g[:, 0:HP])
        f = jax.nn.sigmoid(g[:, HP:2 * HP])
        gg = jnp.tanh(g[:, 2 * HP:3 * HP])
        o = jax.nn.sigmoid(g[:, 3 * HP:4 * HP])
        c = f * c + i * gg
        h = o * jnp.tanh(c)
    h_fwd = h                                                # [B, HP], pad lanes = 0

    # ---- f1: Linear(300, 128) + ReLU (dropouts identity in eval mode).
    hcat = jnp.concatenate([h_fwd, h_bwd], axis=-1).astype(jnp.bfloat16)  # [B, 2*HP]
    hid = jnp.dot(hcat, w1_ref[...],
                  preferred_element_type=jnp.float32) + b1_ref[...]
    hid = jnp.maximum(hid, 0.0)

    # ---- f2: Linear(128, 2) + Softmax(dim=1), all f32.
    logits = jnp.dot(hid, w2_ref[...],
                     preferred_element_type=jnp.float32) + b2_ref[...]
    m = jnp.max(logits, axis=-1, keepdims=True)
    e = jnp.exp(logits - m)
    out_ref[...] = e / jnp.sum(e, axis=-1, keepdims=True)


def rnn_forward(token_ids, params):
    B, T = token_ids.shape
    kernel = functools.partial(rnn_kernel, T=T, B=B)
    vmem = pl.BlockSpec(memory_space=pltpu.MemorySpace.VMEM)
    smem = pl.BlockSpec(memory_space=pltpu.MemorySpace.SMEM)
    args = (token_ids.astype(jnp.int32),
            params["emb"], params["w_in"], params["b_in"], params["whh"],
            params["w1"], params["b1"], params["w2"], params["b2"])
    return pl.pallas_call(
        kernel,
        out_shape=jax.ShapeDtypeStruct((B, OUT_DIM), jnp.float32),
        in_specs=[smem] + [vmem] * (len(args) - 1),
        out_specs=vmem,
        scratch_shapes=[
            pltpu.VMEM((T * B, D_PAD), jnp.float32),   # gathered x (time-major)
            pltpu.VMEM((T, B, NG_FWD), jnp.float32),   # fwd gate pre-activations
        ],
    )(*args)


def init_params(key, vocab_size=50):
    ks = jax.random.split(key, 14)

    def u(k, shape, scale):
        return jax.random.uniform(k, shape, jnp.float32, -scale, scale)

    # Embedding (padding_idx=0 -> zero row).
    emb = jax.random.normal(ks[0], (vocab_size, D), jnp.float32)
    emb = emb.at[0].set(0.0)

    s = 1.0 / float(H) ** 0.5
    # PyTorch-shaped LSTM params (gate order i, f, g, o along dim 0).
    w_ih_f = u(ks[1], (4 * H, D), s); w_hh_f = u(ks[2], (4 * H, H), s)
    b_ih_f = u(ks[3], (4 * H,), s);   b_hh_f = u(ks[4], (4 * H,), s)
    w_ih_b = u(ks[5], (4 * H, D), s); w_hh_b = u(ks[6], (4 * H, H), s)
    b_ih_b = u(ks[7], (4 * H,), s);   b_hh_b = u(ks[8], (4 * H,), s)

    s1 = 1.0 / float(2 * H) ** 0.5
    w1 = u(ks[9], (F1_DIM, 2 * H), s1); b1 = u(ks[10], (F1_DIM,), s1)
    s2 = 1.0 / float(F1_DIM) ** 0.5
    w2 = u(ks[11], (OUT_DIM, F1_DIM), s2); b2 = u(ks[12], (OUT_DIM,), s2)

    # ---- Fused / padded kernel layouts ----------------------------------
    emb_pad = jnp.zeros((vocab_size, 1, D_PAD), jnp.float32)
    emb_pad = emb_pad.at[:, 0, :D].set(emb)

    b_f = b_ih_f + b_hh_f
    b_b = b_ih_b + b_hh_b
    w_in = jnp.zeros((D_PAD, NG_ALL), jnp.float32)
    b_in = jnp.zeros((1, NG_ALL), jnp.float32)
    for slot, g in enumerate((0, 1, 2, 3)):                 # fwd gates i,f,g,o
        w_in = w_in.at[:D, slot * HP:slot * HP + H].set(w_ih_f[g * H:(g + 1) * H, :].T)
        b_in = b_in.at[0, slot * HP:slot * HP + H].set(b_f[g * H:(g + 1) * H])
    for j, g in enumerate((0, 2, 3)):                       # bwd gates i,g,o
        slot = 4 + j
        w_in = w_in.at[:D, slot * HP:slot * HP + H].set(w_ih_b[g * H:(g + 1) * H, :].T)
        b_in = b_in.at[0, slot * HP:slot * HP + H].set(b_b[g * H:(g + 1) * H])

    whh = jnp.zeros((HP, NG_FWD), jnp.float32)
    for g in range(4):
        whh = whh.at[:H, g * HP:g * HP + H].set(w_hh_f[g * H:(g + 1) * H, :].T)

    w1_t = w1.T                                             # [300, 128]
    w1_pad = jnp.zeros((2 * HP, F1_DIM), jnp.float32)
    w1_pad = w1_pad.at[:H, :].set(w1_t[:H, :])
    w1_pad = w1_pad.at[HP:HP + H, :].set(w1_t[H:, :])

    return {
        "emb": emb_pad,                                     # f32 [V, 1, D_PAD]
        "w_in": w_in.astype(jnp.bfloat16),                  # [D_PAD, 7*HP]
        "b_in": b_in,                                       # f32 [1, 7*HP]
        "whh": whh.astype(jnp.bfloat16),                    # [HP, 4*HP]
        "w1": w1_pad.astype(jnp.bfloat16),                  # [2*HP, 128]
        "b1": b1.reshape(1, F1_DIM),
        "w2": w2.T,                                         # f32 [128, 2]
        "b2": b2.reshape(1, OUT_DIM),
        # Raw PyTorch-shaped params, kept only for the pure-JAX reference.
        "raw": dict(embedding=emb, w_ih_f=w_ih_f, w_hh_f=w_hh_f, b_ih_f=b_ih_f,
                    b_hh_f=b_hh_f, w_ih_b=w_ih_b, w_hh_b=w_hh_b, b_ih_b=b_ih_b,
                    b_hh_b=b_hh_b, w1=w1, b1=b1, w2=w2, b2=b2),
    }


def reference_forward(token_ids, raw):
    """Pure-JAX f32 reference of the module's forward pass (eval mode)."""
    x = raw["embedding"][token_ids]                         # [B, T, D]
    B, T, _ = x.shape
    xt = jnp.transpose(x, (1, 0, 2))                        # [T, B, D]

    def lstm_dir(xs, w_ih, w_hh, b_ih, b_hh):
        h = jnp.zeros((B, H), jnp.float32)
        c = jnp.zeros((B, H), jnp.float32)
        outs = []
        for t in range(xs.shape[0]):
            gates = xs[t] @ w_ih.T + h @ w_hh.T + b_ih + b_hh
            i = jax.nn.sigmoid(gates[:, 0 * H:1 * H])
            f = jax.nn.sigmoid(gates[:, 1 * H:2 * H])
            g = jnp.tanh(gates[:, 2 * H:3 * H])
            o = jax.nn.sigmoid(gates[:, 3 * H:4 * H])
            c = f * c + i * g
            h = o * jnp.tanh(c)
            outs.append(h)
        return jnp.stack(outs)                              # [T, B, H]

    out_f = lstm_dir(xt, raw["w_ih_f"], raw["w_hh_f"], raw["b_ih_f"], raw["b_hh_f"])
    out_b = lstm_dir(xt[::-1], raw["w_ih_b"], raw["w_hh_b"],
                     raw["b_ih_b"], raw["b_hh_b"])[::-1]
    last = jnp.concatenate([out_f[-1], out_b[-1]], axis=-1)  # out[:, -1, :]
    hid = jnp.maximum(last @ raw["w1"].T + raw["b1"], 0.0)
    logits = hid @ raw["w2"].T + raw["b2"]
    return jax.nn.softmax(logits, axis=-1)


if __name__ == "__main__":
    key = jax.random.PRNGKey(0)
    pkey, dkey = jax.random.split(key)
    params = init_params(pkey)

    B, T, VOCAB = 2, 8, 50
    # Token ids in [1, VOCAB) -> no padding -> seq_len == T for every sample.
    token_ids = jax.random.randint(dkey, (B, T), 1, VOCAB, dtype=jnp.int32)

    out = rnn_forward(token_ids, params)
    out = jax.block_until_ready(out)

    assert out.shape == (B, OUT_DIM), out.shape
    assert bool(jnp.all(jnp.isfinite(out)))
    assert bool(jnp.allclose(jnp.sum(out, axis=-1), 1.0, atol=1e-5))

    ref = reference_forward(token_ids, params["raw"])
    assert bool(jnp.allclose(out, ref, atol=5e-2)), (out, ref)

    print("KERNEL_OK")
</pallas_src>

<mosaic_0001>
module attributes {stable_mosaic.version = 11 : i64} {
  func.func @rnn_kernel(%arg0: memref<2x8xi32, #tpu.memory_space<smem>>, %arg1: memref<50x1x384xf32, #tpu.memory_space<vmem>>, %arg2: memref<384x1792xbf16, #tpu.memory_space<vmem>>, %arg3: memref<1x1792xf32, #tpu.memory_space<vmem>>, %arg4: memref<256x1024xbf16, #tpu.memory_space<vmem>>, %arg5: memref<512x128xbf16, #tpu.memory_space<vmem>>, %arg6: memref<1x128xf32, #tpu.memory_space<vmem>>, %arg7: memref<128x2xf32, #tpu.memory_space<vmem>>, %arg8: memref<1x2xf32, #tpu.memory_space<vmem>>, %arg9: memref<2x2xf32, #tpu.memory_space<vmem>>, %arg10: memref<16x384xf32, #tpu.memory_space<vmem>>, %arg11: memref<8x2x1024xf32, #tpu.memory_space<vmem>>) attributes {dimension_semantics = [], scalar_prefetch = 0 : i64, scratch_operands = 2 : i64, tpu.core_type = #tpu.core_type<tc>} {
    %c0 = arith.constant 0 : index
    %c0_0 = arith.constant 0 : index
    %0 = memref.load %arg0[%c0, %c0_0] : memref<2x8xi32, #tpu.memory_space<smem>>
    %1 = arith.index_cast %0 : i32 to index
    %c0_1 = arith.constant 0 : index
    %c0_2 = arith.constant 0 : index
    %2 = vector.load %arg1[%1, %c0_1, %c0_2] : memref<50x1x384xf32, #tpu.memory_space<vmem>>, vector<1x1x384xf32>
    %3 = vector.shape_cast %2 : vector<1x1x384xf32> to vector<1x384xf32>
    %c0_3 = arith.constant 0 : index
    %c0_4 = arith.constant 0 : index
    %4 = vector.load %arg10[%c0_3, %c0_4] : memref<16x384xf32, #tpu.memory_space<vmem>>, vector<1x384xf32>
    tpu.vector_store %arg10[%c0_3, %c0_4], %3 {strides = array<i32>} : memref<16x384xf32, #tpu.memory_space<vmem>>, vector<1x384xf32>,
    %c1 = arith.constant 1 : index
    %c0_5 = arith.constant 0 : index
    %5 = memref.load %arg0[%c1, %c0_5] : memref<2x8xi32, #tpu.memory_space<smem>>
    %6 = arith.index_cast %5 : i32 to index
    %c0_6 = arith.constant 0 : index
    %c0_7 = arith.constant 0 : index
    %7 = vector.load %arg1[%6, %c0_6, %c0_7] : memref<50x1x384xf32, #tpu.memory_space<vmem>>, vector<1x1x384xf32>
    %8 = vector.shape_cast %7 : vector<1x1x384xf32> to vector<1x384xf32>
    %c1_8 = arith.constant 1 : index
    %c0_9 = arith.constant 0 : index
    %9 = vector.load %arg10[%c1_8, %c0_9] : memref<16x384xf32, #tpu.memory_space<vmem>>, vector<1x384xf32>
    tpu.vector_store %arg10[%c1_8, %c0_9], %8 {strides = array<i32>} : memref<16x384xf32, #tpu.memory_space<vmem>>, vector<1x384xf32>,
    %c0_10 = arith.constant 0 : index
    %c1_11 = arith.constant 1 : index
    %10 = memref.load %arg0[%c0_10, %c1_11] : memref<2x8xi32, #tpu.memory_space<smem>>
    %11 = arith.index_cast %10 : i32 to index
    %c0_12 = arith.constant 0 : index
    %c0_13 = arith.constant 0 : index
    %12 = vector.load %arg1[%11, %c0_12, %c0_13] : memref<50x1x384xf32, #tpu.memory_space<vmem>>, vector<1x1x384xf32>
    %13 = vector.shape_cast %12 : vector<1x1x384xf32> to vector<1x384xf32>
    %c2 = arith.constant 2 : index
    %c0_14 = arith.constant 0 : index
    %14 = vector.load %arg10[%c2, %c0_14] : memref<16x384xf32, #tpu.memory_space<vmem>>, vector<1x384xf32>
    tpu.vector_store %arg10[%c2, %c0_14], %13 {strides = array<i32>} : memref<16x384xf32, #tpu.memory_space<vmem>>, vector<1x384xf32>,
    %c1_15 = arith.constant 1 : index
    %c1_16 = arith.constant 1 : index
    %15 = memref.load %arg0[%c1_15, %c1_16] : memref<2x8xi32, #tpu.memory_space<smem>>
    %16 = arith.index_cast %15 : i32 to index
    %c0_17 = arith.constant 0 : index
    %c0_18 = arith.constant 0 : index
    %17 = vector.load %arg1[%16, %c0_17, %c0_18] : memref<50x1x384xf32, #tpu.memory_space<vmem>>, vector<1x1x384xf32>
    %18 = vector.shape_cast %17 : vector<1x1x384xf32> to vector<1x384xf32>
    %c3 = arith.constant 3 : index
    %c0_19 = arith.constant 0 : index
    %19 = vector.load %arg10[%c3, %c0_19] : memref<16x384xf32, #tpu.memory_space<vmem>>, vector<1x384xf32>
    tpu.vector_store %arg10[%c3, %c0_19], %18 {strides = array<i32>} : memref<16x384xf32, #tpu.memory_space<vmem>>, vector<1x384xf32>,
    %c0_20 = arith.constant 0 : index
    %c2_21 = arith.constant 2 : index
    %20 = memref.load %arg0[%c0_20, %c2_21] : memref<2x8xi32, #tpu.memory_space<smem>>
    %21 = arith.index_cast %20 : i32 to index
    %c0_22 = arith.constant 0 : index
    %c0_23 = arith.constant 0 : index
    %22 = vector.load %arg1[%21, %c0_22, %c0_23] : memref<50x1x384xf32, #tpu.memory_space<vmem>>, vector<1x1x384xf32>
    %23 = vector.shape_cast %22 : vector<1x1x384xf32> to vector<1x384xf32>
    %c4 = arith.constant 4 : index
    %c0_24 = arith.constant 0 : index
    %24 = vector.load %arg10[%c4, %c0_24] : memref<16x384xf32, #tpu.memory_space<vmem>>, vector<1x384xf32>
    tpu.vector_store %arg10[%c4, %c0_24], %23 {strides = array<i32>} : memref<16x384xf32, #tpu.memory_space<vmem>>, vector<1x384xf32>,
    %c1_25 = arith.constant 1 : index
    %c2_26 = arith.constant 2 : index
    %25 = memref.load %arg0[%c1_25, %c2_26] : memref<2x8xi32, #tpu.memory_space<smem>>
    %26 = arith.index_cast %25 : i32 to index
    %c0_27 = arith.constant 0 : index
    %c0_28 = arith.constant 0 : index
    %27 = vector.load %arg1[%26, %c0_27, %c0_28] : memref<50x1x384xf32, #tpu.memory_space<vmem>>, vector<1x1x384xf32>
    %28 = vector.shape_cast %27 : vector<1x1x384xf32> to vector<1x384xf32>
    %c5 = arith.constant 5 : index
    %c0_29 = arith.constant 0 : index
    %29 = vector.load %arg10[%c5, %c0_29] : memref<16x384xf32, #tpu.memory_space<vmem>>, vector<1x384xf32>
    tpu.vector_store %arg10[%c5, %c0_29], %28 {strides = array<i32>} : memref<16x384xf32, #tpu.memory_space<vmem>>, vector<1x384xf32>,
    %c0_30 = arith.constant 0 : index
    %c3_31 = arith.constant 3 : index
    %30 = memref.load %arg0[%c0_30, %c3_31] : memref<2x8xi32, #tpu.memory_space<smem>>
    %31 = arith.index_cast %30 : i32 to index
    %c0_32 = arith.constant 0 : index
    %c0_33 = arith.constant 0 : index
    %32 = vector.load %arg1[%31, %c0_32, %c0_33] : memref<50x1x384xf32, #tpu.memory_space<vmem>>, vector<1x1x384xf32>
    %33 = vector.shape_cast %32 : vector<1x1x384xf32> to vector<1x384xf32>
    %c6 = arith.constant 6 : index
    %c0_34 = arith.constant 0 : index
    %34 = vector.load %arg10[%c6, %c0_34] : memref<16x384xf32, #tpu.memory_space<vmem>>, vector<1x384xf32>
    tpu.vector_store %arg10[%c6, %c0_34], %33 {strides = array<i32>} : memref<16x384xf32, #tpu.memory_space<vmem>>, vector<1x384xf32>,
    %c1_35 = arith.constant 1 : index
    %c3_36 = arith.constant 3 : index
    %35 = memref.load %arg0[%c1_35, %c3_36] : memref<2x8xi32, #tpu.memory_space<smem>>
    %36 = arith.index_cast %35 : i32 to index
    %c0_37 = arith.constant 0 : index
    %c0_38 = arith.constant 0 : index
    %37 = vector.load %arg1[%36, %c0_37, %c0_38] : memref<50x1x384xf32, #tpu.memory_space<vmem>>, vector<1x1x384xf32>
    %38 = vector.shape_cast %37 : vector<1x1x384xf32> to vector<1x384xf32>
    %c7 = arith.constant 7 : index
    %c0_39 = arith.constant 0 : index
    %39 = vector.load %arg10[%c7, %c0_39] : memref<16x384xf32, #tpu.memory_space<vmem>>, vector<1x384xf32>
    tpu.vector_store %arg10[%c7, %c0_39], %38 {strides = array<i32>} : memref<16x384xf32, #tpu.memory_space<vmem>>, vector<1x384xf32>,
    %c0_40 = arith.constant 0 : index
    %c4_41 = arith.constant 4 : index
    %40 = memref.load %arg0[%c0_40, %c4_41] : memref<2x8xi32, #tpu.memory_space<smem>>
    %41 = arith.index_cast %40 : i32 to index
    %c0_42 = arith.constant 0 : index
    %c0_43 = arith.constant 0 : index
    %42 = vector.load %arg1[%41, %c0_42, %c0_43] : memref<50x1x384xf32, #tpu.memory_space<vmem>>, vector<1x1x384xf32>
    %43 = vector.shape_cast %42 : vector<1x1x384xf32> to vector<1x384xf32>
    %c8 = arith.constant 8 : index
    %c0_44 = arith.constant 0 : index
    %44 = vector.load %arg10[%c8, %c0_44] : memref<16x384xf32, #tpu.memory_space<vmem>>, vector<1x384xf32>
    tpu.vector_store %arg10[%c8, %c0_44], %43 {strides = array<i32>} : memref<16x384xf32, #tpu.memory_space<vmem>>, vector<1x384xf32>,
    %c1_45 = arith.constant 1 : index
    %c4_46 = arith.constant 4 : index
    %45 = memref.load %arg0[%c1_45, %c4_46] : memref<2x8xi32, #tpu.memory_space<smem>>
    %46 = arith.index_cast %45 : i32 to index
    %c0_47 = arith.constant 0 : index
    %c0_48 = arith.constant 0 : index
    %47 = vector.load %arg1[%46, %c0_47, %c0_48] : memref<50x1x384xf32, #tpu.memory_space<vmem>>, vector<1x1x384xf32>
    %48 = vector.shape_cast %47 : vector<1x1x384xf32> to vector<1x384xf32>
    %c9 = arith.constant 9 : index
    %c0_49 = arith.constant 0 : index
    %49 = vector.load %arg10[%c9, %c0_49] : memref<16x384xf32, #tpu.memory_space<vmem>>, vector<1x384xf32>
    tpu.vector_store %arg10[%c9, %c0_49], %48 {strides = array<i32>} : memref<16x384xf32, #tpu.memory_space<vmem>>, vector<1x384xf32>,
    %c0_50 = arith.constant 0 : index
    %c5_51 = arith.constant 5 : index
    %50 = memref.load %arg0[%c0_50, %c5_51] : memref<2x8xi32, #tpu.memory_space<smem>>
    %51 = arith.index_cast %50 : i32 to index
    %c0_52 = arith.constant 0 : index
    %c0_53 = arith.constant 0 : index
    %52 = vector.load %arg1[%51, %c0_52, %c0_53] : memref<50x1x384xf32, #tpu.memory_space<vmem>>, vector<1x1x384xf32>
    %53 = vector.shape_cast %52 : vector<1x1x384xf32> to vector<1x384xf32>
    %c10 = arith.constant 10 : index
    %c0_54 = arith.constant 0 : index
    %54 = vector.load %arg10[%c10, %c0_54] : memref<16x384xf32, #tpu.memory_space<vmem>>, vector<1x384xf32>
    tpu.vector_store %arg10[%c10, %c0_54], %53 {strides = array<i32>} : memref<16x384xf32, #tpu.memory_space<vmem>>, vector<1x384xf32>,
    %c1_55 = arith.constant 1 : index
    %c5_56 = arith.constant 5 : index
    %55 = memref.load %arg0[%c1_55, %c5_56] : memref<2x8xi32, #tpu.memory_space<smem>>
    %56 = arith.index_cast %55 : i32 to index
    %c0_57 = arith.constant 0 : index
    %c0_58 = arith.constant 0 : index
    %57 = vector.load %arg1[%56, %c0_57, %c0_58] : memref<50x1x384xf32, #tpu.memory_space<vmem>>, vector<1x1x384xf32>
    %58 = vector.shape_cast %57 : vector<1x1x384xf32> to vector<1x384xf32>
    %c11 = arith.constant 11 : index
    %c0_59 = arith.constant 0 : index
    %59 = vector.load %arg10[%c11, %c0_59] : memref<16x384xf32, #tpu.memory_space<vmem>>, vector<1x384xf32>
    tpu.vector_store %arg10[%c11, %c0_59], %58 {strides = array<i32>} : memref<16x384xf32, #tpu.memory_space<vmem>>, vector<1x384xf32>,
    %c0_60 = arith.constant 0 : index
    %c6_61 = arith.constant 6 : index
    %60 = memref.load %arg0[%c0_60, %c6_61] : memref<2x8xi32, #tpu.memory_space<smem>>
    %61 = arith.index_cast %60 : i32 to index
    %c0_62 = arith.constant 0 : index
    %c0_63 = arith.constant 0 : index
    %62 = vector.load %arg1[%61, %c0_62, %c0_63] : memref<50x1x384xf32, #tpu.memory_space<vmem>>, vector<1x1x384xf32>
    %63 = vector.shape_cast %62 : vector<1x1x384xf32> to vector<1x384xf32>
    %c12 = arith.constant 12 : index
    %c0_64 = arith.constant 0 : index
    %64 = vector.load %arg10[%c12, %c0_64] : memref<16x384xf32, #tpu.memory_space<vmem>>, vector<1x384xf32>
    tpu.vector_store %arg10[%c12, %c0_64], %63 {strides = array<i32>} : memref<16x384xf32, #tpu.memory_space<vmem>>, vector<1x384xf32>,
    %c1_65 = arith.constant 1 : index
    %c6_66 = arith.constant 6 : index
    %65 = memref.load %arg0[%c1_65, %c6_66] : memref<2x8xi32, #tpu.memory_space<smem>>
    %66 = arith.index_cast %65 : i32 to index
    %c0_67 = arith.constant 0 : index
    %c0_68 = arith.constant 0 : index
    %67 = vector.load %arg1[%66, %c0_67, %c0_68] : memref<50x1x384xf32, #tpu.memory_space<vmem>>, vector<1x1x384xf32>
    %68 = vector.shape_cast %67 : vector<1x1x384xf32> to vector<1x384xf32>
    %c13 = arith.constant 13 : index
    %c0_69 = arith.constant 0 : index
    %69 = vector.load %arg10[%c13, %c0_69] : memref<16x384xf32, #tpu.memory_space<vmem>>, vector<1x384xf32>
    tpu.vector_store %arg10[%c13, %c0_69], %68 {strides = array<i32>} : memref<16x384xf32, #tpu.memory_space<vmem>>, vector<1x384xf32>,
    %c0_70 = arith.constant 0 : index
    %c7_71 = arith.constant 7 : index
    %70 = memref.load %arg0[%c0_70, %c7_71] : memref<2x8xi32, #tpu.memory_space<smem>>
    %71 = arith.index_cast %70 : i32 to index
    %c0_72 = arith.constant 0 : index
    %c0_73 = arith.constant 0 : index
    %72 = vector.load %arg1[%71, %c0_72, %c0_73] : memref<50x1x384xf32, #tpu.memory_space<vmem>>, vector<1x1x384xf32>
    %73 = vector.shape_cast %72 : vector<1x1x384xf32> to vector<1x384xf32>
    %c14 = arith.constant 14 : index
    %c0_74 = arith.constant 0 : index
    %74 = vector.load %arg10[%c14, %c0_74] : memref<16x384xf32, #tpu.memory_space<vmem>>, vector<1x384xf32>
    tpu.vector_store %arg10[%c14, %c0_74], %73 {strides = array<i32>} : memref<16x384xf32, #tpu.memory_space<vmem>>, vector<1x384xf32>,
    %c1_75 = arith.constant 1 : index
    %c7_76 = arith.constant 7 : index
    %75 = memref.load %arg0[%c1_75, %c7_76] : memref<2x8xi32, #tpu.memory_space<smem>>
    %76 = arith.index_cast %75 : i32 to index
    %c0_77 = arith.constant 0 : index
    %c0_78 = arith.constant 0 : index
    %77 = vector.load %arg1[%76, %c0_77, %c0_78] : memref<50x1x384xf32, #tpu.memory_space<vmem>>, vector<1x1x384xf32>
    %78 = vector.shape_cast %77 : vector<1x1x384xf32> to vector<1x384xf32>
    %c15 = arith.constant 15 : index
    %c0_79 = arith.constant 0 : index
    %79 = vector.load %arg10[%c15, %c0_79] : memref<16x384xf32, #tpu.memory_space<vmem>>, vector<1x384xf32>
    tpu.vector_store %arg10[%c15, %c0_79], %78 {strides = array<i32>} : memref<16x384xf32, #tpu.memory_space<vmem>>, vector<1x384xf32>,
    %c0_80 = arith.constant 0 : index
    %c0_81 = arith.constant 0 : index
    %80 = vector.load %arg10[%c0_80, %c0_81] : memref<16x384xf32, #tpu.memory_space<vmem>>, vector<16x384xf32>
    %81 = arith.truncf %80 : vector<16x384xf32> to vector<16x384xbf16>
    %c0_82 = arith.constant 0 : index
    %c0_83 = arith.constant 0 : index
    %82 = vector.load %arg2[%c0_82, %c0_83] : memref<384x1792xbf16, #tpu.memory_space<vmem>>, vector<384x1792xbf16>
    %cst = arith.constant dense<0.000000e+00> : vector<16x1792xf32>
    %83 = tpu.matmul %81, %82, %cst {dimension_numbers = #tpu.dot_dimension_numbers<[1], [0], [0], [1], [0, 0, 1, 1], [], []>} : vector<16x384xbf16>, vector<384x1792xbf16>, vector<16x1792xf32> -> vector<16x1792xf32>
    %c0_84 = arith.constant 0 : index
    %c0_85 = arith.constant 0 : index
    %84 = vector.load %arg3[%c0_84, %c0_85] : memref<1x1792xf32, #tpu.memory_space<vmem>>, vector<1x1792xf32>
    %85 = vector.broadcast %84 : vector<1x1792xf32> to vector<16x1792xf32>
    %86 = arith.addf %83, %85 : vector<16x1792xf32>
    %87 = vector.extract_strided_slice %86 {offsets = [0, 0], sizes = [2, 1024], strides = [1, 1]} : vector<16x1792xf32> to vector<2x1024xf32>
    %c0_86 = arith.constant 0 : index
    %c0_87 = arith.constant 0 : index
    %c0_88 = arith.constant 0 : index
    %88 = vector.load %arg11[%c0_86, %c0_87, %c0_88] : memref<8x2x1024xf32, #tpu.memory_space<vmem>>, vector<1x2x1024xf32>
    %89 = vector.shape_cast %88 : vector<1x2x1024xf32> to vector<2x1024xf32>
    %90 = vector.shape_cast %87 : vector<2x1024xf32> to vector<1x2x1024xf32>
    tpu.vector_store %arg11[%c0_86, %c0_87, %c0_88], %90 {strides = array<i32>} : memref<8x2x1024xf32, #tpu.memory_space<vmem>>, vector<1x2x1024xf32>,
    %91 = vector.extract_strided_slice %86 {offsets = [2, 0], sizes = [2, 1024], strides = [1, 1]} : vector<16x1792xf32> to vector<2x1024xf32>
    %c1_89 = arith.constant 1 : index
    %c0_90 = arith.constant 0 : index
    %c0_91 = arith.constant 0 : index
    %92 = vector.load %arg11[%c1_89, %c0_90, %c0_91] : memref<8x2x1024xf32, #tpu.memory_space<vmem>>, vector<1x2x1024xf32>
    %93 = vector.shape_cast %92 : vector<1x2x1024xf32> to vector<2x1024xf32>
    %94 = vector.shape_cast %91 : vector<2x1024xf32> to vector<1x2x1024xf32>
    tpu.vector_store %arg11[%c1_89, %c0_90, %c0_91], %94 {strides = array<i32>} : memref<8x2x1024xf32, #tpu.memory_space<vmem>>, vector<1x2x1024xf32>,
    %95 = vector.extract_strided_slice %86 {offsets = [4, 0], sizes = [2, 1024], strides = [1, 1]} : vector<16x1792xf32> to vector<2x1024xf32>
    %c2_92 = arith.constant 2 : index
    %c0_93 = arith.constant 0 : index
    %c0_94 = arith.constant 0 : index
    %96 = vector.load %arg11[%c2_92, %c0_93, %c0_94] : memref<8x2x1024xf32, #tpu.memory_space<vmem>>, vector<1x2x1024xf32>
    %97 = vector.shape_cast %96 : vector<1x2x1024xf32> to vector<2x1024xf32>
    %98 = vector.shape_cast %95 : vector<2x1024xf32> to vector<1x2x1024xf32>
    tpu.vector_store %arg11[%c2_92, %c0_93, %c0_94], %98 {strides = array<i32>} : memref<8x2x1024xf32, #tpu.memory_space<vmem>>, vector<1x2x1024xf32>,
    %99 = vector.extract_strided_slice %86 {offsets = [6, 0], sizes = [2, 1024], strides = [1, 1]} : vector<16x1792xf32> to vector<2x1024xf32>
    %c3_95 = arith.constant 3 : index
    %c0_96 = arith.constant 0 : index
    %c0_97 = arith.constant 0 : index
    %100 = vector.load %arg11[%c3_95, %c0_96, %c0_97] : memref<8x2x1024xf32, #tpu.memory_space<vmem>>, vector<1x2x1024xf32>
    %101 = vector.shape_cast %100 : vector<1x2x1024xf32> to vector<2x1024xf32>
    %102 = vector.shape_cast %99 : vector<2x1024xf32> to vector<1x2x1024xf32>
    tpu.vector_store %arg11[%c3_95, %c0_96, %c0_97], %102 {strides = array<i32>} : memref<8x2x1024xf32, #tpu.memory_space<vmem>>, vector<1x2x1024xf32>,
    %103 = vector.extract_strided_slice %86 {offsets = [8, 0], sizes = [2, 1024], strides = [1, 1]} : vector<16x1792xf32> to vector<2x1024xf32>
    %c4_98 = arith.constant 4 : index
    %c0_99 = arith.constant 0 : index
    %c0_100 = arith.constant 0 : index
    %104 = vector.load %arg11[%c4_98, %c0_99, %c0_100] : memref<8x2x1024xf32, #tpu.memory_space<vmem>>, vector<1x2x1024xf32>
    %105 = vector.shape_cast %104 : vector<1x2x1024xf32> to vector<2x1024xf32>
    %106 = vector.shape_cast %103 : vector<2x1024xf32> to vector<1x2x1024xf32>
    tpu.vector_store %arg11[%c4_98, %c0_99, %c0_100], %106 {strides = array<i32>} : memref<8x2x1024xf32, #tpu.memory_space<vmem>>, vector<1x2x1024xf32>,
    %107 = vector.extract_strided_slice %86 {offsets = [10, 0], sizes = [2, 1024], strides = [1, 1]} : vector<16x1792xf32> to vector<2x1024xf32>
    %c5_101 = arith.constant 5 : index
    %c0_102 = arith.constant 0 : index
    %c0_103 = arith.constant 0 : index
    %108 = vector.load %arg11[%c5_101, %c0_102, %c0_103] : memref<8x2x1024xf32, #tpu.memory_space<vmem>>, vector<1x2x1024xf32>
    %109 = vector.shape_cast %108 : vector<1x2x1024xf32> to vector<2x1024xf32>
    %110 = vector.shape_cast %107 : vector<2x1024xf32> to vector<1x2x1024xf32>
    tpu.vector_store %arg11[%c5_101, %c0_102, %c0_103], %110 {strides = array<i32>} : memref<8x2x1024xf32, #tpu.memory_space<vmem>>, vector<1x2x1024xf32>,
    %111 = vector.extract_strided_slice %86 {offsets = [12, 0], sizes = [2, 1024], strides = [1, 1]} : vector<16x1792xf32> to vector<2x1024xf32>
    %c6_104 = arith.constant 6 : index
    %c0_105 = arith.constant 0 : index
    %c0_106 = arith.constant 0 : index
    %112 = vector.load %arg11[%c6_104, %c0_105, %c0_106] : memref<8x2x1024xf32, #tpu.memory_space<vmem>>, vector<1x2x1024xf32>
    %113 = vector.shape_cast %112 : vector<1x2x1024xf32> to vector<2x1024xf32>
    %114 = vector.shape_cast %111 : vector<2x1024xf32> to vector<1x2x1024xf32>
    tpu.vector_store %arg11[%c6_104, %c0_105, %c0_106], %114 {strides = array<i32>} : memref<8x2x1024xf32, #tpu.memory_space<vmem>>, vector<1x2x1024xf32>,
    %115 = vector.extract_strided_slice %86 {offsets = [14, 0], sizes = [2, 1024], strides = [1, 1]} : vector<16x1792xf32> to vector<2x1024xf32>
    %c7_107 = arith.constant 7 : index
    %c0_108 = arith.constant 0 : index
    %c0_109 = arith.constant 0 : index
    %116 = vector.load %arg11[%c7_107, %c0_108, %c0_109] : memref<8x2x1024xf32, #tpu.memory_space<vmem>>, vector<1x2x1024xf32>
    %117 = vector.shape_cast %116 : vector<1x2x1024xf32> to vector<2x1024xf32>
    %118 = vector.shape_cast %115 : vector<2x1024xf32> to vector<1x2x1024xf32>
    tpu.vector_store %arg11[%c7_107, %c0_108, %c0_109], %118 {strides = array<i32>} : memref<8x2x1024xf32, #tpu.memory_space<vmem>>, vector<1x2x1024xf32>,
    %119 = vector.extract_strided_slice %86 {offsets = [14, 1024], sizes = [2, 768], strides = [1, 1]} : vector<16x1792xf32> to vector<2x768xf32>
    %120 = vector.extract_strided_slice %119 {offsets = [0, 0], sizes = [2, 256], strides = [1, 1]} : vector<2x768xf32> to vector<2x256xf32>
    %121 = arith.negf %120 : vector<2x256xf32>
    %122 = math.exp %121 : vector<2x256xf32>
    %cst_110 = arith.constant 1.000000e+00 : f32
    %123 = vector.broadcast %cst_110 : f32 to vector<2x256xf32>
    %124 = arith.addf %123, %122 : vector<2x256xf32>
    %125 = arith.divf %123, %124 : vector<2x256xf32>
    %126 = vector.extract_strided_slice %119 {offsets = [0, 256], sizes = [2, 256], strides = [1, 1]} : vector<2x768xf32> to vector<2x256xf32>
    %127 = math.tanh %126 : vector<2x256xf32>
    %128 = vector.extract_strided_slice %119 {offsets = [0, 512], sizes = [2, 256], strides = [1, 1]} : vector<2x768xf32> to vector<2x256xf32>
    %129 = arith.negf %128 : vector<2x256xf32>
    %130 = math.exp %129 : vector<2x256xf32>
    %cst_111 = arith.constant 1.000000e+00 : f32
    %131 = vector.broadcast %cst_111 : f32 to vector<2x256xf32>
    %132 = arith.addf %131, %130 : vector<2x256xf32>
    %133 = arith.divf %131, %132 : vector<2x256xf32>
    %134 = arith.mulf %125, %127 : vector<2x256xf32>
    %135 = math.tanh %134 : vector<2x256xf32>
    %136 = arith.mulf %133, %135 : vector<2x256xf32>
    %cst_112 = arith.constant 0.000000e+00 : f32
    %137 = vector.broadcast %cst_112 : f32 to vector<2x256xf32>
    %cst_113 = arith.constant 0.000000e+00 : f32
    %138 = vector.broadcast %cst_113 : f32 to vector<2x256xf32>
    %c0_114 = arith.constant 0 : index
    %c0_115 = arith.constant 0 : index
    %c0_116 = arith.constant 0 : index
    %139 = vector.load %arg11[%c0_114, %c0_115, %c0_116] : memref<8x2x1024xf32, #tpu.memory_space<vmem>>, vector<1x2x1024xf32>
    %140 = vector.shape_cast %139 : vector<1x2x1024xf32> to vector<2x1024xf32>
    %141 = arith.truncf %137 : vector<2x256xf32> to vector<2x256xbf16>
    %c0_117 = arith.constant 0 : index
    %c0_118 = arith.constant 0 : index
    %142 = vector.load %arg4[%c0_117, %c0_118] : memref<256x1024xbf16, #tpu.memory_space<vmem>>, vector<256x1024xbf16>
    %cst_119 = arith.constant dense<0.000000e+00> : vector<2x1024xf32>
    %143 = tpu.matmul %141, %142, %cst_119 {dimension_numbers = #tpu.dot_dimension_numbers<[1], [0], [0], [1], [0, 0, 1, 1], [], []>} : vector<2x256xbf16>, vector<256x1024xbf16>, vector<2x1024xf32> -> vector<2x1024xf32>
    %144 = arith.addf %140, %143 : vector<2x1024xf32>
    %145 = vector.extract_strided_slice %144 {offsets = [0, 0], sizes = [2, 256], strides = [1, 1]} : vector<2x1024xf32> to vector<2x256xf32>
    %146 = arith.negf %145 : vector<2x256xf32>
    %147 = math.exp %146 : vector<2x256xf32>
    %cst_120 = arith.constant 1.000000e+00 : f32
    %148 = vector.broadcast %cst_120 : f32 to vector<2x256xf32>
    %149 = arith.addf %148, %147 : vector<2x256xf32>
    %150 = arith.divf %148, %149 : vector<2x256xf32>
    %151 = vector.extract_strided_slice %144 {offsets = [0, 256], sizes = [2, 256], strides = [1, 1]} : vector<2x1024xf32> to vector<2x256xf32>
    %152 = arith.negf %151 : vector<2x256xf32>
    %153 = math.exp %152 : vector<2x256xf32>
    %cst_121 = arith.constant 1.000000e+00 : f32
    %154 = vector.broadcast %cst_121 : f32 to vector<2x256xf32>
    %155 = arith.addf %154, %153 : vector<2x256xf32>
    %156 = arith.divf %154, %155 : vector<2x256xf32>
    %157 = vector.extract_strided_slice %144 {offsets = [0, 512], sizes = [2, 256], strides = [1, 1]} : vector<2x1024xf32> to vector<2x256xf32>
    %158 = math.tanh %157 : vector<2x256xf32>
    %159 = vector.extract_strided_slice %144 {offsets = [0, 768], sizes = [2, 256], strides = [1, 1]} : vector<2x1024xf32> to vector<2x256xf32>
    %160 = arith.negf %159 : vector<2x256xf32>
    %161 = math.exp %160 : vector<2x256xf32>
    %cst_122 = arith.constant 1.000000e+00 : f32
    %162 = vector.broadcast %cst_122 : f32 to vector<2x256xf32>
    %163 = arith.addf %162, %161 : vector<2x256xf32>
    %164 = arith.divf %162, %163 : vector<2x256xf32>
    %165 = arith.mulf %156, %138 : vector<2x256xf32>
    %166 = arith.mulf %150, %158 : vector<2x256xf32>
    %167 = arith.addf %165, %166 : vector<2x256xf32>
    %168 = math.tanh %167 : vector<2x256xf32>
    %169 = arith.mulf %164, %168 : vector<2x256xf32>
    %c1_123 = arith.constant 1 : index
    %c0_124 = arith.constant 0 : index
    %c0_125 = arith.constant 0 : index
    %170 = vector.load %arg11[%c1_123, %c0_124, %c0_125] : memref<8x2x1024xf32, #tpu.memory_space<vmem>>, vector<1x2x1024xf32>
    %171 = vector.shape_cast %170 : vector<1x2x1024xf32> to vector<2x1024xf32>
    %172 = arith.truncf %169 : vector<2x256xf32> to vector<2x256xbf16>
    %c0_126 = arith.constant 0 : index
    %c0_127 = arith.constant 0 : index
    %173 = vector.load %arg4[%c0_126, %c0_127] : memref<256x1024xbf16, #tpu.memory_space<vmem>>, vector<256x1024xbf16>
    %cst_128 = arith.constant dense<0.000000e+00> : vector<2x1024xf32>
    %174 = tpu.matmul %172, %173, %cst_128 {dimension_numbers = #tpu.dot_dimension_numbers<[1], [0], [0], [1], [0, 0, 1, 1], [], []>} : vector<2x256xbf16>, vector<256x1024xbf16>, vector<2x1024xf32> -> vector<2x1024xf32>
    %175 = arith.addf %171, %174 : vector<2x1024xf32>
    %176 = vector.extract_strided_slice %175 {offsets = [0, 0], sizes = [2, 256], strides = [1, 1]} : vector<2x1024xf32> to vector<2x256xf32>
    %177 = arith.negf %176 : vector<2x256xf32>
    %178 = math.exp %177 : vector<2x256xf32>
    %cst_129 = arith.constant 1.000000e+00 : f32
    %179 = vector.broadcast %cst_129 : f32 to vector<2x256xf32>
    %180 = arith.addf %179, %178 : vector<2x256xf32>
    %181 = arith.divf %179, %180 : vector<2x256xf32>
    %182 = vector.extract_strided_slice %175 {offsets = [0, 256], sizes = [2, 256], strides = [1, 1]} : vector<2x1024xf32> to vector<2x256xf32>
    %183 = arith.negf %182 : vector<2x256xf32>
    %184 = math.exp %183 : vector<2x256xf32>
    %cst_130 = arith.constant 1.000000e+00 : f32
    %185 = vector.broadcast %cst_130 : f32 to vector<2x256xf32>
    %186 = arith.addf %185, %184 : vector<2x256xf32>
    %187 = arith.divf %185, %186 : vector<2x256xf32>
    %188 = vector.extract_strided_slice %175 {offsets = [0, 512], sizes = [2, 256], strides = [1, 1]} : vector<2x1024xf32> to vector<2x256xf32>
    %189 = math.tanh %188 : vector<2x256xf32>
    %190 = vector.extract_strided_slice %175 {offsets = [0, 768], sizes = [2, 256], strides = [1, 1]} : vector<2x1024xf32> to vector<2x256xf32>
    %191 = arith.negf %190 : vector<2x256xf32>
    %192 = math.exp %191 : vector<2x256xf32>
    %cst_131 = arith.constant 1.000000e+00 : f32
    %193 = vector.broadcast %cst_131 : f32 to vector<2x256xf32>
    %194 = arith.addf %193, %192 : vector<2x256xf32>
    %195 = arith.divf %193, %194 : vector<2x256xf32>
    %196 = arith.mulf %187, %167 : vector<2x256xf32>
    %197 = arith.mulf %181, %189 : vector<2x256xf32>
    %198 = arith.addf %196, %197 : vector<2x256xf32>
    %199 = math.tanh %198 : vector<2x256xf32>
    %200 = arith.mulf %195, %199 : vector<2x256xf32>
    %c2_132 = arith.constant 2 : index
    %c0_133 = arith.constant 0 : index
    %c0_134 = arith.constant 0 : index
    %201 = vector.load %arg11[%c2_132, %c0_133, %c0_134] : memref<8x2x1024xf32, #tpu.memory_space<vmem>>, vector<1x2x1024xf32>
    %202 = vector.shape_cast %201 : vector<1x2x1024xf32> to vector<2x1024xf32>
    %203 = arith.truncf %200 : vector<2x256xf32> to vector<2x256xbf16>
    %c0_135 = arith.constant 0 : index
    %c0_136 = arith.constant 0 : index
    %204 = vector.load %arg4[%c0_135, %c0_136] : memref<256x1024xbf16, #tpu.memory_space<vmem>>, vector<256x1024xbf16>
    %cst_137 = arith.constant dense<0.000000e+00> : vector<2x1024xf32>
    %205 = tpu.matmul %203, %204, %cst_137 {dimension_numbers = #tpu.dot_dimension_numbers<[1], [0], [0], [1], [0, 0, 1, 1], [], []>} : vector<2x256xbf16>, vector<256x1024xbf16>, vector<2x1024xf32> -> vector<2x1024xf32>
    %206 = arith.addf %202, %205 : vector<2x1024xf32>
    %207 = vector.extract_strided_slice %206 {offsets = [0, 0], sizes = [2, 256], strides = [1, 1]} : vector<2x1024xf32> to vector<2x256xf32>
    %208 = arith.negf %207 : vector<2x256xf32>
    %209 = math.exp %208 : vector<2x256xf32>
    %cst_138 = arith.constant 1.000000e+00 : f32
    %210 = vector.broadcast %cst_138 : f32 to vector<2x256xf32>
    %211 = arith.addf %210, %209 : vector<2x256xf32>
    %212 = arith.divf %210, %211 : vector<2x256xf32>
    %213 = vector.extract_strided_slice %206 {offsets = [0, 256], sizes = [2, 256], strides = [1, 1]} : vector<2x1024xf32> to vector<2x256xf32>
    %214 = arith.negf %213 : vector<2x256xf32>
    %215 = math.exp %214 : vector<2x256xf32>
    %cst_139 = arith.constant 1.000000e+00 : f32
    %216 = vector.broadcast %cst_139 : f32 to vector<2x256xf32>
    %217 = arith.addf %216, %215 : vector<2x256xf32>
    %218 = arith.divf %216, %217 : vector<2x256xf32>
    %219 = vector.extract_strided_slice %206 {offsets = [0, 512], sizes = [2, 256], strides = [1, 1]} : vector<2x1024xf32> to vector<2x256xf32>
    %220 = math.tanh %219 : vector<2x256xf32>
    %221 = vector.extract_strided_slice %206 {offsets = [0, 768], sizes = [2, 256], strides = [1, 1]} : vector<2x1024xf32> to vector<2x256xf32>
    %222 = arith.negf %221 : vector<2x256xf32>
    %223 = math.exp %222 : vector<2x256xf32>
    %cst_140 = arith.constant 1.000000e+00 : f32
    %224 = vector.broadcast %cst_140 : f32 to vector<2x256xf32>
    %225 = arith.addf %224, %223 : vector<2x256xf32>
    %226 = arith.divf %224, %225 : vector<2x256xf32>
    %227 = arith.mulf %218, %198 : vector<2x256xf32>
    %228 = arith.mulf %212, %220 : vector<2x256xf32>
    %229 = arith.addf %227, %228 : vector<2x256xf32>
    %230 = math.tanh %229 : vector<2x256xf32>
    %231 = arith.mulf %226, %230 : vector<2x256xf32>
    %c3_141 = arith.constant 3 : index
    %c0_142 = arith.constant 0 : index
    %c0_143 = arith.constant 0 : index
    %232 = vector.load %arg11[%c3_141, %c0_142, %c0_143] : memref<8x2x1024xf32, #tpu.memory_space<vmem>>, vector<1x2x1024xf32>
    %233 = vector.shape_cast %232 : vector<1x2x1024xf32> to vector<2x1024xf32>
    %234 = arith.truncf %231 : vector<2x256xf32> to vector<2x256xbf16>
    %c0_144 = arith.constant 0 : index
    %c0_145 = arith.constant 0 : index
    %235 = vector.load %arg4[%c0_144, %c0_145] : memref<256x1024xbf16, #tpu.memory_space<vmem>>, vector<256x1024xbf16>
    %cst_146 = arith.constant dense<0.000000e+00> : vector<2x1024xf32>
    %236 = tpu.matmul %234, %235, %cst_146 {dimension_numbers = #tpu.dot_dimension_numbers<[1], [0], [0], [1], [0, 0, 1, 1], [], []>} : vector<2x256xbf16>, vector<256x1024xbf16>, vector<2x1024xf32> -> vector<2x1024xf32>
    %237 = arith.addf %233, %236 : vector<2x1024xf32>
    %238 = vector.extract_strided_slice %237 {offsets = [0, 0], sizes = [2, 256], strides = [1, 1]} : vector<2x1024xf32> to vector<2x256xf32>
    %239 = arith.negf %238 : vector<2x256xf32>
    %240 = math.exp %239 : vector<2x256xf32>
    %cst_147 = arith.constant 1.000000e+00 : f32
    %241 = vector.broadcast %cst_147 : f32 to vector<2x256xf32>
    %242 = arith.addf %241, %240 : vector<2x256xf32>
    %243 = arith.divf %241, %242 : vector<2x256xf32>
    %244 = vector.extract_strided_slice %237 {offsets = [0, 256], sizes = [2, 256], strides = [1, 1]} : vector<2x1024xf32> to vector<2x256xf32>
    %245 = arith.negf %244 : vector<2x256xf32>
    %246 = math.exp %245 : vector<2x256xf32>
    %cst_148 = arith.constant 1.000000e+00 : f32
    %247 = vector.broadcast %cst_148 : f32 to vector<2x256xf32>
    %248 = arith.addf %247, %246 : vector<2x256xf32>
    %249 = arith.divf %247, %248 : vector<2x256xf32>
    %250 = vector.extract_strided_slice %237 {offsets = [0, 512], sizes = [2, 256], strides = [1, 1]} : vector<2x1024xf32> to vector<2x256xf32>
    %251 = math.tanh %250 : vector<2x256xf32>
    %252 = vector.extract_strided_slice %237 {offsets = [0, 768], sizes = [2, 256], strides = [1, 1]} : vector<2x1024xf32> to vector<2x256xf32>
    %253 = arith.negf %252 : vector<2x256xf32>
    %254 = math.exp %253 : vector<2x256xf32>
    %cst_149 = arith.constant 1.000000e+00 : f32
    %255 = vector.broadcast %cst_149 : f32 to vector<2x256xf32>
    %256 = arith.addf %255, %254 : vector<2x256xf32>
    %257 = arith.divf %255, %256 : vector<2x256xf32>
    %258 = arith.mulf %249, %229 : vector<2x256xf32>
    %259 = arith.mulf %243, %251 : vector<2x256xf32>
    %260 = arith.addf %258, %259 : vector<2x256xf32>
    %261 = math.tanh %260 : vector<2x256xf32>
    %262 = arith.mulf %257, %261 : vector<2x256xf32>
    %c4_150 = arith.constant 4 : index
    %c0_151 = arith.constant 0 : index
    %c0_152 = arith.constant 0 : index
    %263 = vector.load %arg11[%c4_150, %c0_151, %c0_152] : memref<8x2x1024xf32, #tpu.memory_space<vmem>>, vector<1x2x1024xf32>
    %264 = vector.shape_cast %263 : vector<1x2x1024xf32> to vector<2x1024xf32>
    %265 = arith.truncf %262 : vector<2x256xf32> to vector<2x256xbf16>
    %c0_153 = arith.constant 0 : index
    %c0_154 = arith.constant 0 : index
    %266 = vector.load %arg4[%c0_153, %c0_154] : memref<256x1024xbf16, #tpu.memory_space<vmem>>, vector<256x1024xbf16>
    %cst_155 = arith.constant dense<0.000000e+00> : vector<2x1024xf32>
    %267 = tpu.matmul %265, %266, %cst_155 {dimension_numbers = #tpu.dot_dimension_numbers<[1], [0], [0], [1], [0, 0, 1, 1], [], []>} : vector<2x256xbf16>, vector<256x1024xbf16>, vector<2x1024xf32> -> vector<2x1024xf32>
    %268 = arith.addf %264, %267 : vector<2x1024xf32>
    %269 = vector.extract_strided_slice %268 {offsets = [0, 0], sizes = [2, 256], strides = [1, 1]} : vector<2x1024xf32> to vector<2x256xf32>
    %270 = arith.negf %269 : vector<2x256xf32>
    %271 = math.exp %270 : vector<2x256xf32>
    %cst_156 = arith.constant 1.000000e+00 : f32
    %272 = vector.broadcast %cst_156 : f32 to vector<2x256xf32>
    %273 = arith.addf %272, %271 : vector<2x256xf32>
    %274 = arith.divf %272, %273 : vector<2x256xf32>
    %275 = vector.extract_strided_slice %268 {offsets = [0, 256], sizes = [2, 256], strides = [1, 1]} : vector<2x1024xf32> to vector<2x256xf32>
    %276 = arith.negf %275 : vector<2x256xf32>
    %277 = math.exp %276 : vector<2x256xf32>
    %cst_157 = arith.constant 1.000000e+00 : f32
    %278 = vector.broadcast %cst_157 : f32 to vector<2x256xf32>
    %279 = arith.addf %278, %277 : vector<2x256xf32>
    %280 = arith.divf %278, %279 : vector<2x256xf32>
    %281 = vector.extract_strided_slice %268 {offsets = [0, 512], sizes = [2, 256], strides = [1, 1]} : vector<2x1024xf32> to vector<2x256xf32>
    %282 = math.tanh %281 : vector<2x256xf32>
    %283 = vector.extract_strided_slice %268 {offsets = [0, 768], sizes = [2, 256], strides = [1, 1]} : vector<2x1024xf32> to vector<2x256xf32>
    %284 = arith.negf %283 : vector<2x256xf32>
    %285 = math.exp %284 : vector<2x256xf32>
    %cst_158 = arith.constant 1.000000e+00 : f32
    %286 = vector.broadcast %cst_158 : f32 to vector<2x256xf32>
    %287 = arith.addf %286, %285 : vector<2x256xf32>
    %288 = arith.divf %286, %287 : vector<2x256xf32>
    %289 = arith.mulf %280, %260 : vector<2x256xf32>
    %290 = arith.mulf %274, %282 : vector<2x256xf32>
    %291 = arith.addf %289, %290 : vector<2x256xf32>
    %292 = math.tanh %291 : vector<2x256xf32>
    %293 = arith.mulf %288, %292 : vector<2x256xf32>
    %c5_159 = arith.constant 5 : index
    %c0_160 = arith.constant 0 : index
    %c0_161 = arith.constant 0 : index
    %294 = vector.load %arg11[%c5_159, %c0_160, %c0_161] : memref<8x2x1024xf32, #tpu.memory_space<vmem>>, vector<1x2x1024xf32>
    %295 = vector.shape_cast %294 : vector<1x2x1024xf32> to vector<2x1024xf32>
    %296 = arith.truncf %293 : vector<2x256xf32> to vector<2x256xbf16>
    %c0_162 = arith.constant 0 : index
    %c0_163 = arith.constant 0 : index
    %297 = vector.load %arg4[%c0_162, %c0_163] : memref<256x1024xbf16, #tpu.memory_space<vmem>>, vector<256x1024xbf16>
    %cst_164 = arith.constant dense<0.000000e+00> : vector<2x1024xf32>
    %298 = tpu.matmul %296, %297, %cst_164 {dimension_numbers = #tpu.dot_dimension_numbers<[1], [0], [0], [1], [0, 0, 1, 1], [], []>} : vector<2x256xbf16>, vector<256x1024xbf16>, vector<2x1024xf32> -> vector<2x1024xf32>
    %299 = arith.addf %295, %298 : vector<2x1024xf32>
    %300 = vector.extract_strided_slice %299 {offsets = [0, 0], sizes = [2, 256], strides = [1, 1]} : vector<2x1024xf32> to vector<2x256xf32>
    %301 = arith.negf %300 : vector<2x256xf32>
    %302 = math.exp %301 : vector<2x256xf32>
    %cst_165 = arith.constant 1.000000e+00 : f32
    %303 = vector.broadcast %cst_165 : f32 to vector<2x256xf32>
    %304 = arith.addf %303, %302 : vector<2x256xf32>
    %305 = arith.divf %303, %304 : vector<2x256xf32>
    %306 = vector.extract_strided_slice %299 {offsets = [0, 256], sizes = [2, 256], strides = [1, 1]} : vector<2x1024xf32> to vector<2x256xf32>
    %307 = arith.negf %306 : vector<2x256xf32>
    %308 = math.exp %307 : vector<2x256xf32>
    %cst_166 = arith.constant 1.000000e+00 : f32
    %309 = vector.broadcast %cst_166 : f32 to vector<2x256xf32>
    %310 = arith.addf %309, %308 : vector<2x256xf32>
    %311 = arith.divf %309, %310 : vector<2x256xf32>
    %312 = vector.extract_strided_slice %299 {offsets = [0, 512], sizes = [2, 256], strides = [1, 1]} : vector<2x1024xf32> to vector<2x256xf32>
    %313 = math.tanh %312 : vector<2x256xf32>
    %314 = vector.extract_strided_slice %299 {offsets = [0, 768], sizes = [2, 256], strides = [1, 1]} : vector<2x1024xf32> to vector<2x256xf32>
    %315 = arith.negf %314 : vector<2x256xf32>
    %316 = math.exp %315 : vector<2x256xf32>
    %cst_167 = arith.constant 1.000000e+00 : f32
    %317 = vector.broadcast %cst_167 : f32 to vector<2x256xf32>
    %318 = arith.addf %317, %316 : vector<2x256xf32>
    %319 = arith.divf %317, %318 : vector<2x256xf32>
    %320 = arith.mulf %311, %291 : vector<2x256xf32>
    %321 = arith.mulf %305, %313 : vector<2x256xf32>
    %322 = arith.addf %320, %321 : vector<2x256xf32>
    %323 = math.tanh %322 : vector<2x256xf32>
    %324 = arith.mulf %319, %323 : vector<2x256xf32>
    %c6_168 = arith.constant 6 : index
    %c0_169 = arith.constant 0 : index
    %c0_170 = arith.constant 0 : index
    %325 = vector.load %arg11[%c6_168, %c0_169, %c0_170] : memref<8x2x1024xf32, #tpu.memory_space<vmem>>, vector<1x2x1024xf32>
    %326 = vector.shape_cast %325 : vector<1x2x1024xf32> to vector<2x1024xf32>
    %327 = arith.truncf %324 : vector<2x256xf32> to vector<2x256xbf16>
    %c0_171 = arith.constant 0 : index
    %c0_172 = arith.constant 0 : index
    %328 = vector.load %arg4[%c0_171, %c0_172] : memref<256x1024xbf16, #tpu.memory_space<vmem>>, vector<256x1024xbf16>
    %cst_173 = arith.constant dense<0.000000e+00> : vector<2x1024xf32>
    %329 = tpu.matmul %327, %328, %cst_173 {dimension_numbers = #tpu.dot_dimension_numbers<[1], [0], [0], [1], [0, 0, 1, 1], [], []>} : vector<2x256xbf16>, vector<256x1024xbf16>, vector<2x1024xf32> -> vector<2x1024xf32>
    %330 = arith.addf %326, %329 : vector<2x1024xf32>
    %331 = vector.extract_strided_slice %330 {offsets = [0, 0], sizes = [2, 256], strides = [1, 1]} : vector<2x1024xf32> to vector<2x256xf32>
    %332 = arith.negf %331 : vector<2x256xf32>
    %333 = math.exp %332 : vector<2x256xf32>
    %cst_174 = arith.constant 1.000000e+00 : f32
    %334 = vector.broadcast %cst_174 : f32 to vector<2x256xf32>
    %335 = arith.addf %334, %333 : vector<2x256xf32>
    %336 = arith.divf %334, %335 : vector<2x256xf32>
    %337 = vector.extract_strided_slice %330 {offsets = [0, 256], sizes = [2, 256], strides = [1, 1]} : vector<2x1024xf32> to vector<2x256xf32>
    %338 = arith.negf %337 : vector<2x256xf32>
    %339 = math.exp %338 : vector<2x256xf32>
    %cst_175 = arith.constant 1.000000e+00 : f32
    %340 = vector.broadcast %cst_175 : f32 to vector<2x256xf32>
    %341 = arith.addf %340, %339 : vector<2x256xf32>
    %342 = arith.divf %340, %341 : vector<2x256xf32>
    %343 = vector.extract_strided_slice %330 {offsets = [0, 512], sizes = [2, 256], strides = [1, 1]} : vector<2x1024xf32> to vector<2x256xf32>
    %344 = math.tanh %343 : vector<2x256xf32>
    %345 = vector.extract_strided_slice %330 {offsets = [0, 768], sizes = [2, 256], strides = [1, 1]} : vector<2x1024xf32> to vector<2x256xf32>
    %346 = arith.negf %345 : vector<2x256xf32>
    %347 = math.exp %346 : vector<2x256xf32>
    %cst_176 = arith.constant 1.000000e+00 : f32
    %348 = vector.broadcast %cst_176 : f32 to vector<2x256xf32>
    %349 = arith.addf %348, %347 : vector<2x256xf32>
    %350 = arith.divf %348, %349 : vector<2x256xf32>
    %351 = arith.mulf %342, %322 : vector<2x256xf32>
    %352 = arith.mulf %336, %344 : vector<2x256xf32>
    %353 = arith.addf %351, %352 : vector<2x256xf32>
    %354 = math.tanh %353 : vector<2x256xf32>
    %355 = arith.mulf %350, %354 : vector<2x256xf32>
    %c7_177 = arith.constant 7 : index
    %c0_178 = arith.constant 0 : index
    %c0_179 = arith.constant 0 : index
    %356 = vector.load %arg11[%c7_177, %c0_178, %c0_179] : memref<8x2x1024xf32, #tpu.memory_space<vmem>>, vector<1x2x1024xf32>
    %357 = vector.shape_cast %356 : vector<1x2x1024xf32> to vector<2x1024xf32>
    %358 = arith.truncf %355 : vector<2x256xf32> to vector<2x256xbf16>
    %c0_180 = arith.constant 0 : index
    %c0_181 = arith.constant 0 : index
    %359 = vector.load %arg4[%c0_180, %c0_181] : memref<256x1024xbf16, #tpu.memory_space<vmem>>, vector<256x1024xbf16>
    %cst_182 = arith.constant dense<0.000000e+00> : vector<2x1024xf32>
    %360 = tpu.matmul %358, %359, %cst_182 {dimension_numbers = #tpu.dot_dimension_numbers<[1], [0], [0], [1], [0, 0, 1, 1], [], []>} : vector<2x256xbf16>, vector<256x1024xbf16>, vector<2x1024xf32> -> vector<2x1024xf32>
    %361 = arith.addf %357, %360 : vector<2x1024xf32>
    %362 = vector.extract_strided_slice %361 {offsets = [0, 0], sizes = [2, 256], strides = [1, 1]} : vector<2x1024xf32> to vector<2x256xf32>
    %363 = arith.negf %362 : vector<2x256xf32>
    %364 = math.exp %363 : vector<2x256xf32>
    %cst_183 = arith.constant 1.000000e+00 : f32
    %365 = vector.broadcast %cst_183 : f32 to vector<2x256xf32>
    %366 = arith.addf %365, %364 : vector<2x256xf32>
    %367 = arith.divf %365, %366 : vector<2x256xf32>
    %368 = vector.extract_strided_slice %361 {offsets = [0, 256], sizes = [2, 256], strides = [1, 1]} : vector<2x1024xf32> to vector<2x256xf32>
    %369 = arith.negf %368 : vector<2x256xf32>
    %370 = math.exp %369 : vector<2x256xf32>
    %cst_184 = arith.constant 1.000000e+00 : f32
    %371 = vector.broadcast %cst_184 : f32 to vector<2x256xf32>
    %372 = arith.addf %371, %370 : vector<2x256xf32>
    %373 = arith.divf %371, %372 : vector<2x256xf32>
    %374 = vector.extract_strided_slice %361 {offsets = [0, 512], sizes = [2, 256], strides = [1, 1]} : vector<2x1024xf32> to vector<2x256xf32>
    %375 = math.tanh %374 : vector<2x256xf32>
    %376 = vector.extract_strided_slice %361 {offsets = [0, 768], sizes = [2, 256], strides = [1, 1]} : vector<2x1024xf32> to vector<2x256xf32>
    %377 = arith.negf %376 : vector<2x256xf32>
    %378 = math.exp %377 : vector<2x256xf32>
    %cst_185 = arith.constant 1.000000e+00 : f32
    %379 = vector.broadcast %cst_185 : f32 to vector<2x256xf32>
    %380 = arith.addf %379, %378 : vector<2x256xf32>
    %381 = arith.divf %379, %380 : vector<2x256xf32>
    %382 = arith.mulf %373, %353 : vector<2x256xf32>
    %383 = arith.mulf %367, %375 : vector<2x256xf32>
    %384 = arith.addf %382, %383 : vector<2x256xf32>
    %385 = math.tanh %384 : vector<2x256xf32>
    %386 = arith.mulf %381, %385 : vector<2x256xf32>
    %387 = tpu.concatenate %386, %136 in 1 : vector<2x256xf32>, vector<2x256xf32> -> vector<2x512xf32>
    %388 = arith.truncf %387 : vector<2x512xf32> to vector<2x512xbf16>
    %c0_186 = arith.constant 0 : index
    %c0_187 = arith.constant 0 : index
    %389 = vector.load %arg5[%c0_186, %c0_187] : memref<512x128xbf16, #tpu.memory_space<vmem>>, vector<512x128xbf16>
    %cst_188 = arith.constant dense<0.000000e+00> : vector<2x128xf32>
    %390 = tpu.matmul %388, %389, %cst_188 {dimension_numbers = #tpu.dot_dimension_numbers<[1], [0], [0], [1], [0, 0, 1, 1], [], []>} : vector<2x512xbf16>, vector<512x128xbf16>, vector<2x128xf32> -> vector<2x128xf32>
    %c0_189 = arith.constant 0 : index
    %c0_190 = arith.constant 0 : index
    %391 = vector.load %arg6[%c0_189, %c0_190] : memref<1x128xf32, #tpu.memory_space<vmem>>, vector<1x128xf32>
    %392 = vector.broadcast %391 : vector<1x128xf32> to vector<2x128xf32>
    %393 = arith.addf %390, %392 : vector<2x128xf32>
    %cst_191 = arith.constant 0.000000e+00 : f32
    %394 = vector.broadcast %cst_191 : f32 to vector<2x128xf32>
    %395 = arith.maximumf %393, %394 : vector<2x128xf32>
    %c0_192 = arith.constant 0 : index
    %c0_193 = arith.constant 0 : index
    %396 = vector.load %arg7[%c0_192, %c0_193] : memref<128x2xf32, #tpu.memory_space<vmem>>, vector<128x2xf32>
    %cst_194 = arith.constant dense<0.000000e+00> : vector<2x2xf32>
    %397 = tpu.matmul %395, %396, %cst_194 {dimension_numbers = #tpu.dot_dimension_numbers<[1], [0], [0], [1], [0, 0, 1, 1], [], []>} : vector<2x128xf32>, vector<128x2xf32>, vector<2x2xf32> -> vector<2x2xf32>
    %c0_195 = arith.constant 0 : index
    %c0_196 = arith.constant 0 : index
    %398 = vector.load %arg8[%c0_195, %c0_196] : memref<1x2xf32, #tpu.memory_space<vmem>>, vector<1x2xf32>
    %399 = vector.broadcast %398 : vector<1x2xf32> to vector<2x2xf32>
    %400 = arith.addf %397, %399 : vector<2x2xf32>
    %cst_197 = arith.constant dense<0xFF800000> : vector<2xf32>
    %401 = vector.multi_reduction <maximumf>, %400, %cst_197 [1] : vector<2x2xf32> to vector<2xf32>
    %402 = vector.shape_cast %401 : vector<2xf32> to vector<2x1xf32>
    %403 = vector.broadcast %402 : vector<2x1xf32> to vector<2x2xf32>
    %404 = arith.subf %400, %403 : vector<2x2xf32>
    %405 = math.exp %404 : vector<2x2xf32>
    %cst_198 = arith.constant dense<0.000000e+00> : vector<2xf32>
    %406 = vector.multi_reduction <add>, %405, %cst_198 [1] : vector<2x2xf32> to vector<2xf32>
    %407 = vector.shape_cast %406 : vector<2xf32> to vector<2x1xf32>
    %408 = vector.broadcast %407 : vector<2x1xf32> to vector<2x2xf32>
    %409 = arith.divf %405, %408 : vector<2x2xf32>
    %c0_199 = arith.constant 0 : index
    %c0_200 = arith.constant 0 : index
    %410 = vector.load %arg9[%c0_199, %c0_200] : memref<2x2xf32, #tpu.memory_space<vmem>>, vector<2x2xf32>
    tpu.vector_store %arg9[%c0_199, %c0_200], %409 {strides = array<i32>} : memref<2x2xf32, #tpu.memory_space<vmem>>, vector<2x2xf32>,
    return
  }
}

</mosaic_0001>

<bundles_post_ra>
// kernel: tpu_custom_call.1
= control target key start
LH: loop header
LB: loop body
LE: loop exit
PB: predicated region body
PF: predicated region fallthrough
CT: control target
= control target key end

     0   :  { %14 = vsyncpa [#allocation7], 0  ;;  %s10078_s0 = inlined_call_operand.hbm [shape: s32[2,8], index: 0, kind: input, shape index: {}]   ;;  %s10079_s1 = inlined_call_operand.hbm [shape: f32[50,1,384], index: 1, kind: input, shape index: {}]   ;;  %s10080_s2 = inlined_call_operand.hbm [shape: bf16[384,1792], index: 2, kind: input, shape index: {}]   ;;  %s10081_s3 = inlined_call_operand.hbm [shape: f32[1,1792], index: 3, kind: input, shape index: {}]   ;;  %s10082_s4 = inlined_call_operand.hbm [shape: bf16[256,1024], index: 4, kind: input, shape index: {}]   ;;  %s10083_s5 = inlined_call_operand.hbm [shape: bf16[512,128], index: 5, kind: input, shape index: {}]   ;;  %s10084_s6 = inlined_call_operand.hbm [shape: f32[1,128], index: 6, kind: input, shape index: {}]   ;;  %s10085_s7 = inlined_call_operand.vmem [shape: f32[128,2], index: 7, kind: input, shape index: {}]   ;;  %s10086_s8 = inlined_call_operand.hbm [shape: f32[1,2], index: 8, kind: input, shape index: {}]   ;;  %s10087_s9 = inlined_call_operand.hbm [shape: f32[2,2], index: 9, kind: output, shape index: {}]  }
   0x1   :  { %15 = vsyncpa [#allocation5], 0 }
   0x2   :  { %16 = vsyncpa [#allocation10], 0 }
   0x3   :  { %17 = vsyncpa [#allocation13], 0 }
   0x4   :  { %18 = vsyncpa [#allocation16], 0 }
   0x5   :  { %19 = vsyncpa [#allocation6], 0  ;;  %s8109_s30 = smov [#allocation9]   ;;  %s7911_s13 = scalar_lea.hbm %s10080_s2, 43008 }
   0x6   :  { %s45_s10 = sshll.u32 %s8109_s30, 4  ;;  %p7912_p0 = scmp.ne.s32.totalorder %s10080_s2, %s7911_s13  ;;  %s46_s10 = int_to_ptr.vmem [resolvable:$true] %s45_s10 }
   0x7   :  { %p7915_p1 = scmp.lt.u32.totalorder %s7911_s13, %s10080_s2 }
   0x9   :  { %p7917_p2 = pnand %p7915_p1, %p7912_p0 }
   0xb   :  { %7920 = shalt.err (!%p7917_p2)
}
   0xc   :  { %s7921_s18 = scalar_lea.vmem %s46_s10, 43008  ;;  %p7926_p4 = scmp.lt.s32.totalorder %s46_s10, %s46_s10 }
   0xd   :  { %p7922_p3 = scmp.ne.s32.totalorder %s46_s10, %s7921_s18  ;;  %p7927_p5 = scmp.lt.s32.totalorder %s7921_s18, %s7921_s18 }
   0xf   :  { %p7928_p6 = por %p7927_p5, %p7926_p4 }
  0x11   :  { %p7929_p7 = pnand %p7928_p6, %p7922_p3 }
  0x13   :  { %7932 = shalt.err (!%p7929_p7)
}
  0x14   :  { %s8110_s19 = smov 896   ;;  %s8111_s20 = smov 56  }
  0x15   :  { %51 = dma.hbm_to_vmem [thread:$0]  %s10080_s2, 43008, %s46_s10, [#allocation10], %s8110_s19, %s8110_s19, %s8111_s20  }
  0x16   :  { %s8112_s23 = smov [#allocation12]   ;;  %s7933_s27 = scalar_lea.hbm %s10082_s4, 16384 }
  0x17   :  { %s67_s24 = sshll.u32 %s8112_s23, 4  ;;  %p7934_p8 = scmp.ne.s32.totalorder %s10082_s4, %s7933_s27  ;;  %s68_s24 = int_to_ptr.vmem [resolvable:$true] %s67_s24 }
  0x18   :  { %p7937_p9 = scmp.lt.u32.totalorder %s7933_s27, %s10082_s4 }
  0x1a   :  { %p7939_p10 = pnand %p7937_p9, %p7934_p8 }
  0x1c   :  { %7942 = shalt.err (!%p7939_p10)
}
  0x1d   :  { %s7943_s12 = scalar_lea.vmem %s68_s24, 16384  ;;  %p7948_p12 = scmp.lt.s32.totalorder %s68_s24, %s68_s24 }
  0x1e   :  { %p7944_p11 = scmp.ne.s32.totalorder %s68_s24, %s7943_s12  ;;  %p7949_p13 = scmp.lt.s32.totalorder %s7943_s12, %s7943_s12 }
  0x20   :  { %p7950_p0 = por %p7949_p13, %p7948_p12 }
  0x22   :  { %p7951_p1 = pnand %p7950_p0, %p7944_p11 }
  0x24   :  { %7954 = shalt.err (!%p7951_p1)
}
  0x25   :  { %s8113_s2 = smov 512   ;;  %s8114_s10 = smov 32  }
  0x26   :  { %73 = dma.hbm_to_vmem [thread:$0]  %s10082_s4, 16384, %s68_s24, [#allocation13], %s8113_s2, %s8113_s2, %s8114_s10  }
  0x27   :  { %s8115_s15 = smov [#allocation15]   ;;  %s8116_s17 = smov [#allocation8]  }
  0x28   :  { %s92_s16 = sshll.u32 %s8115_s15, 4  ;;  %s33_s18 = sshll.u32 %s8116_s17, 4  ;;  %s93_s16 = int_to_ptr.vmem [resolvable:$true] %s92_s16  ;;  %s34_s18 = int_to_ptr.vmem [resolvable:$true] %s33_s18 }
  0x29   :  { %s7955_s21 = scalar_lea.hbm %s10084_s6, 16 }
  0x2a   :  { %p7956_p2 = scmp.ne.s32.totalorder %s10084_s6, %s7955_s21  ;;  %p7959_p3 = scmp.lt.u32.totalorder %s7955_s21, %s10084_s6 }
  0x2c   :  { %p7961_p4 = pnand %p7959_p3, %p7956_p2 }
  0x2e   :  { %7964 = shalt.err (!%p7961_p4)
}
  0x2f   :  { %s7965_s4 = scalar_lea.vmem %s93_s16, 16  ;;  %s7969_s24 = scalar_lea.vmem %s93_s16, 32 }
  0x30   :  { %p7966_p5 = scmp.ne.s32.totalorder %s93_s16, %s7965_s4  ;;  %p7970_p6 = scmp.lt.s32.totalorder %s93_s16, %s93_s16 }
  0x31   :  { %p7971_p7 = scmp.lt.s32.totalorder %s7969_s24, %s7965_s4 }
  0x33   :  { %p7972_p8 = por %p7971_p7, %p7970_p6 }
  0x35   :  { %p7973_p9 = pnand %p7972_p8, %p7966_p5 }
  0x37   :  { %7976 = shalt.err (!%p7973_p9)
}
  0x38   :  { %95 = dma.hbm_to_vmem [thread:$0]  %s10084_s6, 16, %s93_s16, [#allocation16]  }
  0x39   :  { %s7977_s11 = scalar_lea.hbm %s10078_s0, 32 }
  0x3a   :  { %p7978_p10 = scmp.ne.s32.totalorder %s10078_s0, %s7977_s11  ;;  %p7981_p11 = scmp.lt.u32.totalorder %s7977_s11, %s10078_s0 }
  0x3c   :  { %p7983_p12 = pnand %p7981_p11, %p7978_p10 }
  0x3e   :  { %7986 = shalt.err (!%p7983_p12)
}
  0x3f   :  { %s8117_s14 = smov [#allocation4]   ;;  %s7987_s19 = scalar_lea.hbm %s10079_s1, 2400 }
  0x40   :  { %27 = dma.hbm_to_smem %s10078_s0, 32, %s8117_s14, [#allocation7]  }
  0x41   :  { %p7988_p13 = scmp.ne.s32.totalorder %s10079_s1, %s7987_s19  ;;  %p7991_p0 = scmp.lt.u32.totalorder %s7987_s19, %s10079_s1 }
  0x43   :  { %p7993_p1 = pnand %p7991_p0, %p7988_p13 }
  0x45   :  { %7996 = shalt.err (!%p7993_p1)
}
  0x46   :  { %s7997_s25 = scalar_lea.vmem %s34_s18, 2400  ;;  %p8002_p3 = scmp.lt.s32.totalorder %s34_s18, %s34_s18 }
  0x47   :  { %p7998_p2 = scmp.ne.s32.totalorder %s34_s18, %s7997_s25  ;;  %p8003_p4 = scmp.lt.s32.totalorder %s7997_s25, %s7997_s25 }
  0x49   :  { %p8004_p5 = por %p8003_p4, %p8002_p3 }
  0x4b   :  { %p8005_p6 = pnand %p8004_p5, %p7998_p2 }
  0x4d   :  { %8008 = shalt.err (!%p8005_p6)
}
  0x4e   :  { %s8118_s0 = smov 48   ;;  %s8119_s26 = smov 3  }
  0x4f   :  { %39 = dma.hbm_to_vmem [thread:$0]  %s10079_s1, 2400, %s34_s18, [#allocation5], %s8118_s0, %s8118_s0, %s8119_s26  }
  0x50   :  { %s8120_s27 = smov [#allocation11]   ;;  %s8121_s29 = smov [#allocation14]  }
  0x51   :  { %s58_s28 = sshll.u32 %s8120_s27, 4  ;;  %s79_s30 = sshll.u32 %s8121_s29, 4  ;;  %s59_s28 = int_to_ptr.vmem [resolvable:$true] %s58_s28  ;;  %s80_s30 = int_to_ptr.vmem [resolvable:$true] %s79_s30 }
  0x52   :  { %s8009_s2 = scalar_lea.hbm %s10081_s3, 224 }
  0x53   :  { %p8010_p7 = scmp.ne.s32.totalorder %s10081_s3, %s8009_s2  ;;  %p8013_p8 = scmp.lt.u32.totalorder %s8009_s2, %s10081_s3 }
  0x55   :  { %p8015_p9 = pnand %p8013_p8, %p8010_p7 }
  0x57   :  { %8018 = shalt.err (!%p8015_p9)
}
  0x58   :  { %s8019_s1 = scalar_lea.vmem %s59_s28, 224  ;;  %p8024_p11 = scmp.lt.s32.totalorder %s59_s28, %s59_s28 }
  0x59   :  { %p8020_p10 = scmp.ne.s32.totalorder %s59_s28, %s8019_s1  ;;  %p8025_p12 = scmp.lt.s32.totalorder %s8019_s1, %s8019_s1 }
  0x5b   :  { %p8026_p13 = por %p8025_p12, %p8024_p11 }
  0x5d   :  { %p8027_p0 = pnand %p8026_p13, %p8020_p10 }
  0x5f   :  { %8030 = shalt.err (!%p8027_p0)
}
  0x60   :  { %61 = dma.hbm_to_vmem [thread:$0]  %s10081_s3, 224, %s59_s28, [#allocation10]  }
  0x61   :  { %s8031_s19 = scalar_lea.hbm %s10083_s5, 4096 }
  0x62   :  { %p8032_p1 = scmp.ne.s32.totalorder %s10083_s5, %s8031_s19  ;;  %p8035_p2 = scmp.lt.u32.totalorder %s8031_s19, %s10083_s5 }
  0x64   :  { %p8037_p3 = pnand %p8035_p2, %p8032_p1 }
  0x66   :  { %8040 = shalt.err (!%p8037_p3)
}
  0x67   :  { %s8041_s25 = scalar_lea.vmem %s80_s30, 4096  ;;  %p8046_p5 = scmp.lt.s32.totalorder %s80_s30, %s80_s30 }
  0x68   :  { %p8042_p4 = scmp.ne.s32.totalorder %s80_s30, %s8041_s25  ;;  %p8047_p6 = scmp.lt.s32.totalorder %s8041_s25, %s8041_s25 }
  0x6a   :  { %p8048_p7 = por %p8047_p6, %p8046_p5 }
  0x6c   :  { %p8049_p8 = pnand %p8048_p7, %p8042_p4 }
  0x6e   :  { %8052 = shalt.err (!%p8049_p8)
}
  0x6f   :  { %s8122_s3 = smov 64   ;;  %s8123_s0 = smov 4  }
  0x70   :  { %85 = dma.hbm_to_vmem [thread:$0]  %s10083_s5, 4096, %s80_s30, [#allocation13], %s8122_s3, %s8122_s3, %s8123_s0  }
  0x71   :  { %s8124_s24 = smov [#allocation17]   ;;  %s8053_s11 = scalar_lea.hbm %s10086_s8, 16 }
  0x72   :  { %s104_s27 = sshll.u32 %s8124_s24, 4  ;;  %p8054_p9 = scmp.ne.s32.totalorder %s10086_s8, %s8053_s11  ;;  %s105_s27 = int_to_ptr.vmem [resolvable:$true] %s104_s27 }
  0x73   :  { %p8057_p10 = scmp.lt.u32.totalorder %s8053_s11, %s10086_s8 }
  0x75   :  { %p8059_p11 = pnand %p8057_p10, %p8054_p9 }
  0x77   :  { %8062 = shalt.err (!%p8059_p11)
}
  0x78   :  { %s8063_s14 = scalar_lea.vmem %s105_s27, 16  ;;  %s8067_s5 = scalar_lea.vmem %s105_s27, 32 }
  0x79   :  { %p8064_p12 = scmp.ne.s32.totalorder %s105_s27, %s8063_s14  ;;  %p8068_p13 = scmp.lt.s32.totalorder %s105_s27, %s105_s27 }
  0x7a   :  { %p8069_p0 = scmp.lt.s32.totalorder %s8067_s5, %s8063_s14 }
  0x7c   :  { %p8070_p1 = por %p8069_p0, %p8068_p13 }
  0x7e   :  { %p8071_p2 = pnand %p8070_p1, %p8064_p12 }
  0x80   :  { %8074 = shalt.err (!%p8071_p2)
}
  0x81   :  { %107 = dma.hbm_to_vmem [thread:$0]  %s10086_s8, 16, %s105_s27, [#allocation16]  }
  0x82   :  { %8097 = dma.done.wait [#allocation7], 32  }
  0x83   :  { %8098 = vsyncadd [#allocation7], 4294967264 }
  0x84   :  { %8099 = dma.done.wait [#allocation5], 2400  }
  0x85   :  { %8100 = vsyncadd [#allocation5], 4294964896 }
  0x86   :  { %8101 = dma.done.wait [#allocation10], 43232  }
  0x87   :  { %8102 = vsyncadd [#allocation10], 4294924064 }
  0x88   :  { %8103 = dma.done.wait [#allocation13], 20480  }
  0x89   :  { %8104 = vsyncadd [#allocation13], 4294946816 }
  0x8a   :  { %8105 = dma.done.wait [#allocation16], 32  }
  0x8b   :  { %8106 = vsyncadd [#allocation16], 4294967264 }
  0x8c   :  { %132 = sfence }
  0x8d   :  { %v7219_v0 = vld [vmem:[#allocation9 + $0x4] ss:$56 sps:$4 sm:$0xff]   ;;  %v7223_v2 = vld [vmem:[#allocation9] ss:$56 sps:$4 sm:$0xff]   ;;  %v7225_v4 = vld [vmem:[#allocation9 + $0x74] ss:$56 sps:$4 sm:$0xff]   ;;  %v138_v38 = vlaneseq }
  0x8e   :  { %v7221_v1 = vld [vmem:[#allocation9 + $0xc] ss:$56 sps:$4 sm:$0xff]   ;;  %2348 = vmatprep.subr.bf16.mxu0 %v7219_v0  ;;  %v7224_v3 = vld [vmem:[#allocation9 + $0x8] ss:$56 sps:$4 sm:$0xff]   ;;  %v7227_v5 = vld [vmem:[#allocation9 + $0x7c] ss:$56 sps:$4 sm:$0xff]  }
  0x8f   :  { %2434 = vmatprep.subr.bf16.mxu1 %v7221_v1  ;;  %2349 = vmatpush1.bf16.msra.mxu0 %v7223_v2  ;;  %v7229_v6 = vld [vmem:[#allocation9 + $0x70] ss:$56 sps:$4 sm:$0xff]   ;;  %v7231_v8 = vld [vmem:[#allocation9 + $0xe4] ss:$56 sps:$4 sm:$0xff]   ;;  %v7235_v10 = vld [vmem:[#allocation9 + $0xe0] ss:$56 sps:$4 sm:$0xff]  }
  0x90   :  { %2435 = vmatpush1.bf16.msra.mxu1 %v7224_v3  ;;  %2350 = vmatprep.subr.bf16.mxu0 %v7225_v4  ;;  %v7230_v7 = vld [vmem:[#allocation9 + $0x78] ss:$56 sps:$4 sm:$0xff]   ;;  %v7233_v9 = vld [vmem:[#allocation9 + $0xec] ss:$56 sps:$4 sm:$0xff]   ;;  %v7236_v11 = vld [vmem:[#allocation9 + $0xe8] ss:$56 sps:$4 sm:$0xff]  }
  0x91   :  { %2436 = vmatprep.subr.bf16.mxu1 %v7227_v5  ;;  %v7237_v12 = vld [vmem:[#allocation9 + $0x154] ss:$56 sps:$4 sm:$0xff]   ;;  %v7241_v14 = vld [vmem:[#allocation9 + $0x150] ss:$56 sps:$4 sm:$0xff]   ;;  %s8277_s8 = sld [smem:[#allocation4]]  ;;  %s8281_s18 = sld [smem:[#allocation4 + $0x1]] }
  0x92   :  { %v7239_v13 = vld [vmem:[#allocation9 + $0x15c] ss:$56 sps:$4 sm:$0xff]   ;;  %v7242_v15 = vld [vmem:[#allocation9 + $0x158] ss:$56 sps:$4 sm:$0xff]   ;;  %v7245_v17 = vld [vmem:[#allocation9 + $0x1cc] ss:$56 sps:$4 sm:$0xff]  }
  0x93   :  { %2351 = vmatpush1.bf16.msra.mxu0 %v7229_v6  ;;  %v7243_v16 = vld [vmem:[#allocation9 + $0x1c4] ss:$56 sps:$4 sm:$0xff]   ;;  %s8279_s1 = sld [smem:[#allocation4 + $0x80]]  ;;  %v7247_v18 = vld [vmem:[#allocation9 + $0x1c0] ss:$56 sps:$4 sm:$0xff]   ;;  %s8283_s17 = sld [smem:[#allocation4 + $0x81]] }
  0x94   :  { %2437 = vmatpush1.bf16.msra.mxu1 %v7230_v7  ;;  %2352 = vmatprep.subr.bf16.mxu0 %v7231_v8  ;;  %v7248_v19 = vld [vmem:[#allocation9 + $0x1c8] ss:$56 sps:$4 sm:$0xff]   ;;  %v7249_v20 = vld [vmem:[#allocation9 + $0x234] ss:$56 sps:$4 sm:$0xff]   ;;  %v7254_v23 = vld [vmem:[#allocation9 + $0x238] ss:$56 sps:$4 sm:$0xff]  }
  0x95   :  { %2438 = vmatprep.subr.bf16.mxu1 %v7233_v9  ;;  %v7251_v21 = vld [vmem:[#allocation9 + $0x23c] ss:$56 sps:$4 sm:$0xff]   ;;  %v7253_v22 = vld [vmem:[#allocation9 + $0x230] ss:$56 sps:$4 sm:$0xff]   ;;  %v7257_v25 = vld [vmem:[#allocation9 + $0x2ac] ss:$56 sps:$4 sm:$0xff]  }
  0x96   :  { %v7255_v24 = vld [vmem:[#allocation9 + $0x2a4] ss:$56 sps:$4 sm:$0xff]   ;;  %s8286_s16 = sld [smem:[#allocation4 + $0x2]]  ;;  %v7259_v26 = vld [vmem:[#allocation9 + $0x2a0] ss:$56 sps:$4 sm:$0xff]   ;;  %s8292_s22 = sld [smem:[#allocation4 + $0x3]] }
  0x97   :  { %2353 = vmatpush1.bf16.msra.mxu0 %v7235_v10  ;;  %s135_s6 = smul.u32 3, %s8277_s8  ;;  %s8289_s20 = sld [smem:[#allocation4 + $0x82]]  ;;  %v7260_v27 = vld [vmem:[#allocation9 + $0x2a8] ss:$56 sps:$4 sm:$0xff]   ;;  %v7261_v28 = vld [vmem:[#allocation9 + $0x314] ss:$56 sps:$4 sm:$0xff]  }
  0x98   :  { %2439 = vmatpush1.bf16.msra.mxu1 %v7236_v11  ;;  %2354 = vmatprep.subr.bf16.mxu0 %v7237_v12  ;;  %s152_s21 = smul.u32 3, %s8281_s18  ;;  %v7263_v29 = vld [vmem:[#allocation9 + $0x31c] ss:$56 sps:$4 sm:$0xff]   ;;  %v7265_v30 = vld [vmem:[#allocation9 + $0x310] ss:$56 sps:$4 sm:$0xff]   ;;  %s8295_s25 = sld [smem:[#allocation4 + $0x83]] }
  0x99   :  { %2440 = vmatprep.subr.bf16.mxu1 %v7239_v13  ;;  %s145_s19 = smul.u32 3, %s8279_s1  ;;  %v7266_v31 = vld [vmem:[#allocation9 + $0x318] ss:$56 sps:$4 sm:$0xff]   ;;  %v7267_v32 = vld [vmem:[#allocation9 + $0x384] ss:$56 sps:$4 sm:$0xff]   ;;  %s8297_s3 = sld [smem:[#allocation4 + $0x4]] }
  0x9a   :  { %s159_s23 = smul.u32 3, %s8283_s17  ;;  %v7269_v33 = vld [vmem:[#allocation9 + $0x38c] ss:$56 sps:$4 sm:$0xff]   ;;  %s8301_s4 = sld [smem:[#allocation4 + $0x84]]  ;;  %v7271_v34 = vld [vmem:[#allocation9 + $0x380] ss:$56 sps:$4 sm:$0xff]  }
  0x9b   :  { %2355 = vmatpush1.bf16.msra.mxu0 %v7241_v14  ;;  %v7272_v35 = vld [vmem:[#allocation9 + $0x388] ss:$56 sps:$4 sm:$0xff]   ;;  %v7273_v36 = vld [vmem:[#allocation9 + $0x3f4] ss:$56 sps:$4 sm:$0xff]   ;;  %s8304_s27 = sld [smem:[#allocation4 + $0x5]]  ;;  %s8309_s11 = sld [smem:[#allocation4 + $0x6]] }
  0x9c   :  { %2441 = vmatpush1.bf16.msra.mxu1 %v7242_v15  ;;  %2356 = vmatprep.subr.bf16.mxu0 %v7243_v16  ;;  %s166_s0 = smul.u32 3, %s8286_s16  ;;  %v7275_v37 = vld [vmem:[#allocation9 + $0x3fc] ss:$56 sps:$4 sm:$0xff]   ;;  %s8306_s28 = sld [smem:[#allocation4 + $0x85]]  ;;  %v7277_v39 = vld [vmem:[#allocation9 + $0x3f0] ss:$56 sps:$4 sm:$0xff]  }
  0x9d   :  { %2442 = vmatprep.subr.bf16.mxu1 %v7245_v17  ;;  %s173_s26 = smul.u32 3, %s8289_s20  ;;  %v7278_v40 = vld [vmem:[#allocation9 + $0x3f8] ss:$56 sps:$4 sm:$0xff]   ;;  %v7279_v41 = vld [vmem:[#allocation9 + $0x464] ss:$56 sps:$4 sm:$0xff]   ;;  %vm8314_vm0 = vcmp.lt.s32.totalorder %v138_v38, 384 }
  0x9e   :  { %s180_s24 = smul.u32 3, %s8292_s22  ;;  %v7281_v42 = vld [vmem:[#allocation9 + $0x46c] ss:$56 sps:$4 sm:$0xff]   ;;  %v7283_v44 = vld [vmem:[#allocation9 + $0x460] ss:$56 sps:$4 sm:$0xff]   ;;  %s8319_s13 = sld [smem:[#allocation4 + $0x86]] }
  0x9f   :  { %2357 = vmatpush1.bf16.msra.mxu0 %v7247_v18  ;;  %s187_s29 = smul.u32 3, %s8295_s25  ;;  %v7284_v45 = vld [vmem:[#allocation9 + $0x468] ss:$56 sps:$4 sm:$0xff]   ;;  %v7285_v46 = vld [vmem:[#allocation9 + $0x4d4] ss:$56 sps:$4 sm:$0xff]   ;;  %s136_s5 = scalar_lea.vmem [#allocation8], %s135_s6 }
  0xa0   :  { %2443 = vmatpush1.bf16.msra.mxu1 %v7248_v19  ;;  %2358 = vmatprep.subr.bf16.mxu0 %v7249_v20  ;;  %s194_s12 = smul.u32 3, %s8297_s3  ;;  %v7287_v47 = vld [vmem:[#allocation9 + $0x4dc] ss:$56 sps:$4 sm:$0xff]   ;;  %v7289_v48 = vld [vmem:[#allocation9 + $0x4d0] ss:$56 sps:$4 sm:$0xff]   ;;  %s146_s15 = scalar_lea.vmem [#allocation8], %s145_s19 }
  0xa1   :  { %2444 = vmatprep.subr.bf16.mxu1 %v7251_v21  ;;  %s201_s2 = smul.u32 3, %s8301_s4  ;;  %v7290_v49 = vld [vmem:[#allocation9 + $0x4d8] ss:$56 sps:$4 sm:$0xff]   ;;  %v7291_v51 = vld [vmem:[#allocation9 + $0x544] ss:$56 sps:$4 sm:$0xff]   ;;  %s153_s10 = scalar_lea.vmem [#allocation8], %s152_s21 }
  0xa2   :  { %v137_v50 = vld [vmem:[%s136_s5] sm:$0x7]  ;;  %s222_s30 = smul.u32 3, %s8309_s11  ;;  %v7293_v52 = vld [vmem:[#allocation9 + $0x54c] ss:$56 sps:$4 sm:$0xff]   ;;  %s160_s14 = scalar_lea.vmem [#allocation8], %s159_s23 }
  0xa3   :  { %2359 = vmatpush1.bf16.msra.mxu0 %v7253_v22  ;;  %142 = vst.msk [vmem:[#allocation2] ss:$8 sm:$0x7] %vm8314_vm0, %v137_v50  ;;  %v147_v53 = vld [vmem:[%s146_s15] sm:$0x7]  ;;  %s167_s8 = scalar_lea.vmem [#allocation8], %s166_s0 }
  0xa4   :  { %2445 = vmatpush1.bf16.msra.mxu1 %v7254_v23  ;;  %2360 = vmatprep.subr.bf16.mxu0 %v7255_v24  ;;  %v154_v54 = vld [vmem:[%s153_s10] sm:$0x7]  ;;  %149 = vst.msk [vmem:[#allocation2 + $0x1] ss:$8 sm:$0x7] %vm8314_vm0, %v147_v53  ;;  %s174_s1 = scalar_lea.vmem [#allocation8], %s173_s26 }
  0xa5   :  { %2446 = vmatprep.subr.bf16.mxu1 %v7257_v25  ;;  %v161_v55 = vld [vmem:[%s160_s14] sm:$0x7]  ;;  %156 = vst.msk [vmem:[#allocation2 + $0x2] ss:$8 sm:$0x7] %vm8314_vm0, %v154_v54  ;;  %s181_s18 = scalar_lea.vmem [#allocation8], %s180_s24 }
  0xa6   :  { %163 = vst.msk [vmem:[#allocation2 + $0x3] ss:$8 sm:$0x7] %vm8314_vm0, %v161_v55  ;;  %v168_v56 = vld [vmem:[%s167_s8] sm:$0x7]  ;;  %s188_s17 = scalar_lea.vmem [#allocation8], %s187_s29 }
  0xa7   :  { %2361 = vmatpush1.bf16.msra.mxu0 %v7259_v26  ;;  %v175_v57 = vld [vmem:[%s174_s1] sm:$0x7]  ;;  %170 = vst.msk [vmem:[#allocation2 + $0x4] ss:$8 sm:$0x7] %vm8314_vm0, %v168_v56  ;;  %s195_s6 = scalar_lea.vmem [#allocation8], %s194_s12 }
  0xa8   :  { %2447 = vmatpush1.bf16.msra.mxu1 %v7260_v27  ;;  %2362 = vmatprep.subr.bf16.mxu0 %v7261_v28  ;;  %v182_v58 = vld [vmem:[%s181_s18] sm:$0x7]  ;;  %177 = vst.msk [vmem:[#allocation2 + $0x5] ss:$8 sm:$0x7] %vm8314_vm0, %v175_v57  ;;  %s202_s16 = scalar_lea.vmem [#allocation8], %s201_s2 }
  0xa9   :  { %2448 = vmatprep.subr.bf16.mxu1 %v7263_v29  ;;  %184 = vst.msk [vmem:[#allocation2 + $0x6] ss:$8 sm:$0x7] %vm8314_vm0, %v182_v58  ;;  %v189_v59 = vld [vmem:[%s188_s17] sm:$0x7]  ;;  %s10378_s19 = smul.u32 3, %s8304_s27 }
  0xaa   :  { %v196_v60 = vld [vmem:[%s195_s6] sm:$0x7]  ;;  %191 = vst.msk [vmem:[#allocation2 + $0x7] ss:$8 sm:$0x7] %vm8314_vm0, %v189_v59  ;;  %s10379_s21 = smul.u32 3, %s8306_s28 }
  0xab   :  { %2363 = vmatpush1.bf16.msra.mxu0 %v7265_v30  ;;  %v203_v61 = vld [vmem:[%s202_s16] sm:$0x7]  ;;  %198 = vst.msk [vmem:[#allocation2 + $0x18] ss:$8 sm:$0x7] %vm8314_vm0, %v196_v60  ;;  %s209_s20 = scalar_lea.vmem [#allocation8], %s10378_s19 }
  0xac   :  { %2449 = vmatpush1.bf16.msra.mxu1 %v7266_v31  ;;  %2364 = vmatprep.subr.bf16.mxu0 %v7267_v32  ;;  %v7295_v62 = vld [vmem:[#allocation9 + $0x540] ss:$56 sps:$4 sm:$0xff]   ;;  %205 = vst.msk [vmem:[#allocation2 + $0x19] ss:$8 sm:$0x7] %vm8314_vm0, %v203_v61  ;;  %s216_s22 = scalar_lea.vmem [#allocation8], %s10379_s21 }
  0xad   :  { %2450 = vmatprep.subr.bf16.mxu1 %v7269_v33  ;;  %v210_v63 = vld [vmem:[%s209_s20] sm:$0x7]  ;;  %s223_s23 = scalar_lea.vmem [#allocation8], %s222_s30  ;;  %s229_s25 = smul.u32 3, %s8319_s13  ;;  %v7296_v2 = vld [vmem:[#allocation9 + $0x548] ss:$56 sps:$4 sm:$0xff]  }
  0xae   :  { %212 = vst.msk [vmem:[#allocation2 + $0x1a] ss:$8 sm:$0x7] %vm8314_vm0, %v210_v63  ;;  %v217_v0 = vld [vmem:[%s216_s22] sm:$0x7]  ;;  %s6499_s3 = sld [smem:[#allocation4 + $0x7]] }
  0xaf   :  { %2365 = vmatpush1.bf16.msra.mxu0 %v7271_v34  ;;  %v224_v1 = vld [vmem:[%s223_s23] sm:$0x7]  ;;  %219 = vst.msk [vmem:[#allocation2 + $0x1b] ss:$8 sm:$0x7] %vm8314_vm0, %v217_v0  ;;  %s8376_s0 = sld [smem:[#allocation4 + $0x87]] }
  0xb0   :  { %2451 = vmatpush1.bf16.msra.mxu1 %v7272_v35  ;;  %2366 = vmatprep.subr.bf16.mxu0 %v7273_v36  ;;  %226 = vst.msk [vmem:[#allocation2 + $0x1c] ss:$8 sm:$0x7] %vm8314_vm0, %v224_v1  ;;  %v7297_v3 = vld [vmem:[#allocation9 + $0x5b4] ss:$56 sps:$4 sm:$0xff]   ;;  %s230_s26 = scalar_lea.vmem [#allocation8], %s229_s25 }
  0xb1   :  { %2452 = vmatprep.subr.bf16.mxu1 %v7275_v37  ;;  %v7299_v4 = vld [vmem:[#allocation9 + $0x5bc] ss:$56 sps:$4 sm:$0xff]   ;;  %v7301_v6 = vld [vmem:[#allocation9 + $0x5b0] ss:$56 sps:$4 sm:$0xff]   ;;  %v7305_v9 = vld [vmem:[#allocation9 + $0x62c] ss:$56 sps:$4 sm:$0xff]  }
  0xb2   :  { %v231_v5 = vld [vmem:[%s230_s26] sm:$0x7]  ;;  %v7308_v11 = vld [vmem:[#allocation9 + $0x628] ss:$56 sps:$4 sm:$0xff]   ;;  %v7309_v12 = vld [vmem:[#allocation9 + $0x694] ss:$56 sps:$4 sm:$0xff]  }
  0xb3   :  { %2367 = vmatpush1.bf16.msra.mxu0 %v7277_v39  ;;  %233 = vst.msk [vmem:[#allocation2 + $0x1d] ss:$8 sm:$0x7] %vm8314_vm0, %v231_v5  ;;  %v7302_v7 = vld [vmem:[#allocation9 + $0x5b8] ss:$56 sps:$4 sm:$0xff]   ;;  %v250_v20 = vld [vmem:[#allocation2 + $0x8] sm:$0xff] }
  0xb4   :  { %2453 = vmatpush1.bf16.msra.mxu1 %v7278_v40  ;;  %2368 = vmatprep.subr.bf16.mxu0 %v7279_v41  ;;  %v7303_v8 = vld [vmem:[#allocation9 + $0x624] ss:$56 sps:$4 sm:$0xff]   ;;  %s236_s4 = smul.u32 3, %s6499_s3  ;;  %v7307_v10 = vld [vmem:[#allocation9 + $0x620] ss:$56 sps:$4 sm:$0xff]   ;;  %v10092_v34 = vmov 0  }
  0xb5   :  { %2454 = vmatprep.subr.bf16.mxu1 %v7281_v42  ;;  %s243_s24 = smul.u32 3, %s8376_s0  ;;  %v7311_v13 = vld [vmem:[#allocation9 + $0x69c] ss:$56 sps:$4 sm:$0xff]   ;;  %v7313_v16 = vld [vmem:[#allocation9 + $0x690] ss:$56 sps:$4 sm:$0xff]   ;;  %vm8128_vm1 = vmmov 0  }
  0xb6   :  { %s237_s27 = scalar_lea.vmem [#allocation8], %s236_s4  ;;  %v7314_v17 = vld [vmem:[#allocation9 + $0x698] ss:$56 sps:$4 sm:$0xff]   ;;  %v7317_v18 = vld [vmem:[#allocation9 + $0x704] ss:$56 sps:$4 sm:$0xff]   ;;  %vm6422_vm2 = vcmask 9216  }
  0xb7   :  { %2369 = vmatpush1.bf16.msra.mxu0 %v7283_v44  ;;  %v238_v14 = vld [vmem:[%s237_s27] sm:$0x7]  ;;  %s244_s28 = scalar_lea.vmem [#allocation8], %s243_s24  ;;  %v7320_v19 = vld [vmem:[#allocation9 + $0x70c] ss:$56 sps:$4 sm:$0xff]  }
  0xb8   :  { %2455 = vmatpush1.bf16.msra.mxu1 %v7284_v45  ;;  %2370 = vmatprep.subr.bf16.mxu0 %v7285_v46  ;;  %240 = vst.msk [vmem:[#allocation2 + $0x1e] ss:$8 sm:$0x7] %vm8314_vm0, %v238_v14  ;;  %v245_v15 = vld [vmem:[%s244_s28] sm:$0x7]  ;;  %v251_v58 = vld [vmem:[#allocation2 + $0x10] sm:$0xff] }
  0xb9   :  { %2456 = vmatprep.subr.bf16.mxu1 %v7287_v47  ;;  %247 = vst.msk [vmem:[#allocation2 + $0x1f] ss:$8 sm:$0x7] %vm8314_vm0, %v245_v15  ;;  %v249_v21 = vld [vmem:[#allocation2] sm:$0xff]  ;;  %v7323_v28 = vld [vmem:[#allocation9 + $0x774] ss:$56 sps:$4 sm:$0xff]  }
  0xba   :  { %v7315_v23 = vld [vmem:[#allocation9 + $0x700] ss:$56 sps:$4 sm:$0xff]   ;;  %v7326_v29 = vld [vmem:[#allocation9 + $0x77c] ss:$56 sps:$4 sm:$0xff]   ;;  %v7321_v30 = vld [vmem:[#allocation9 + $0x770] ss:$56 sps:$4 sm:$0xff]  }
  0xbb   :  { %2371 = vmatpush1.bf16.msra.mxu0 %v7289_v48  ;;  %v7318_v26 = vld [vmem:[#allocation9 + $0x708] ss:$56 sps:$4 sm:$0xff]   ;;  %v7324_v31 = vld [vmem:[#allocation9 + $0x778] ss:$56 sps:$4 sm:$0xff]   ;;  %v7329_v32 = vld [vmem:[#allocation9 + $0x7e4] ss:$56 sps:$4 sm:$0xff]  }
  0xbc   :  { %2457 = vmatpush1.bf16.msra.mxu1 %v7290_v49  ;;  %2372 = vmatprep.subr.bf16.mxu0 %v7291_v51  ;;  %v7332_v33 = vld [vmem:[#allocation9 + $0x7ec] ss:$56 sps:$4 sm:$0xff]   ;;  %v7327_v35 = vld [vmem:[#allocation9 + $0x7e0] ss:$56 sps:$4 sm:$0xff]   ;;  %v7338_v39 = vld [vmem:[#allocation9 + $0x85c] ss:$56 sps:$4 sm:$0xff]  }
  0xbd   :  { %2458 = vmatprep.subr.bf16.mxu1 %v7293_v52  ;;  %v7330_v36 = vld [vmem:[#allocation9 + $0x7e8] ss:$56 sps:$4 sm:$0xff]   ;;  %v7335_v37 = vld [vmem:[#allocation9 + $0x854] ss:$56 sps:$4 sm:$0xff]   ;;  %v7336_v41 = vld [vmem:[#allocation9 + $0x858] ss:$56 sps:$4 sm:$0xff]  }
  0xbe   :  { %v7333_v40 = vld [vmem:[#allocation9 + $0x850] ss:$56 sps:$4 sm:$0xff]   ;;  %v7341_v42 = vld [vmem:[#allocation9 + $0x8c4] ss:$56 sps:$4 sm:$0xff]   ;;  %v7339_v44 = vld [vmem:[#allocation9 + $0x8c0] ss:$56 sps:$4 sm:$0xff]  }
  0xbf   :  { %2373 = vmatpush1.bf16.msra.mxu0 %v7295_v62  ;;  %v7344_v43 = vld [vmem:[#allocation9 + $0x8cc] ss:$56 sps:$4 sm:$0xff]   ;;  %v7342_v45 = vld [vmem:[#allocation9 + $0x8c8] ss:$56 sps:$4 sm:$0xff]   ;;  %v7350_v47 = vld [vmem:[#allocation9 + $0x93c] ss:$56 sps:$4 sm:$0xff]  }
  0xc0   :  { %2459 = vmatpush1.bf16.msra.mxu1 %v7296_v2  ;;  %2374 = vmatprep.subr.bf16.mxu0 %v7297_v3  ;;  %v253_v22 = vld [vmem:[#allocation2 + $0x20] sm:$0xff]  ;;  %v252_v24 = vld [vmem:[#allocation2 + $0x18] sm:$0xff]  ;;  %v7356_v51 = vld [vmem:[#allocation9 + $0x9ac] ss:$56 sps:$4 sm:$0xff]  }
  0xc1   :  { %2460 = vmatprep.subr.bf16.mxu1 %v7299_v4  ;;  %v8385_v25 = vpack.c.bf16 %v253_v22, %v250_v20  ;;  %v8387_v27 = vpack.c.bf16 %v252_v24, %v249_v21  ;;  %v7347_v46 = vld [vmem:[#allocation9 + $0x934] ss:$56 sps:$4 sm:$0xff]   ;;  %v7345_v48 = vld [vmem:[#allocation9 + $0x930] ss:$56 sps:$4 sm:$0xff]   ;;  %v7353_v50 = vld [vmem:[#allocation9 + $0x9a4] ss:$56 sps:$4 sm:$0xff]  }
  0xc2   :  { %v7348_v49 = vld [vmem:[#allocation9 + $0x938] ss:$56 sps:$4 sm:$0xff]   ;;  %v7354_v53 = vld [vmem:[#allocation9 + $0x9a8] ss:$56 sps:$4 sm:$0xff]   ;;  %v7359_v54 = vld [vmem:[#allocation9 + $0xa14] ss:$56 sps:$4 sm:$0xff]  }
  0xc3   :  { %2375 = vmatpush1.bf16.msra.mxu0 %v7301_v6  ;;  %2380 = vmatprep.mubr.bf16.mxu0 %v8385_v25  ;;  %v7351_v52 = vld [vmem:[#allocation9 + $0x9a0] ss:$56 sps:$4 sm:$0xff]   ;;  %v7362_v55 = vld [vmem:[#allocation9 + $0xa1c] ss:$56 sps:$4 sm:$0xff]   ;;  %v7357_v56 = vld [vmem:[#allocation9 + $0xa10] ss:$56 sps:$4 sm:$0xff]  }
  0xc4   :  { %2461 = vmatpush1.bf16.msra.mxu1 %v7302_v7  ;;  %2376 = vmatprep.subr.bf16.mxu0 %v7303_v8  ;;  %v7360_v57 = vld [vmem:[#allocation9 + $0xa18] ss:$56 sps:$4 sm:$0xff]   ;;  %v254_v59 = vld [vmem:[#allocation2 + $0x28] sm:$0xff]  ;;  %v7365_v60 = vld [vmem:[#allocation9 + $0x14] ss:$56 sps:$4 sm:$0xff]  }
  0xc5   :  { %2462 = vmatprep.subr.bf16.mxu1 %v7305_v9  ;;  %2466 = vmatprep.mubr.bf16.mxu1 %v8385_v25  ;;  %v7368_v61 = vld [vmem:[#allocation9 + $0x1c] ss:$56 sps:$4 sm:$0xff]   ;;  %v8395_v62 = vpack.c.bf16 %v254_v59, %v251_v58  ;;  %v7363_v63 = vld [vmem:[#allocation9 + $0x10] ss:$56 sps:$4 sm:$0xff]   ;;  %v7374_v2 = vld [vmem:[#allocation9 + $0x8c] ss:$56 sps:$4 sm:$0xff]  }
  0xc6   :  { %v7366_v0 = vld [vmem:[#allocation9 + $0x18] ss:$56 sps:$4 sm:$0xff]   ;;  %v7371_v1 = vld [vmem:[#allocation9 + $0x84] ss:$56 sps:$4 sm:$0xff]   ;;  %v7372_v4 = vld [vmem:[#allocation9 + $0x88] ss:$56 sps:$4 sm:$0xff]  }
  0xc7   :  { %2377 = vmatpush1.bf16.msra.mxu0 %v7307_v10  ;;  %v7369_v3 = vld [vmem:[#allocation9 + $0x80] ss:$56 sps:$4 sm:$0xff]   ;;  %v7377_v5 = vld [vmem:[#allocation9 + $0xf4] ss:$56 sps:$4 sm:$0xff]   ;;  %v7375_v7 = vld [vmem:[#allocation9 + $0xf0] ss:$56 sps:$4 sm:$0xff]  }
  0xc8   :  { %2463 = vmatpush1.bf16.msra.mxu1 %v7308_v11  ;;  %2378 = vmatprep.subr.bf16.mxu0 %v7309_v12  ;;  %v7380_v6 = vld [vmem:[#allocation9 + $0xfc] ss:$56 sps:$4 sm:$0xff]   ;;  %v7378_v8 = vld [vmem:[#allocation9 + $0xf8] ss:$56 sps:$4 sm:$0xff]   ;;  %v7386_v10 = vld [vmem:[#allocation9 + $0x16c] ss:$56 sps:$4 sm:$0xff]  }
  0xc9   :  { %2464 = vmatprep.subr.bf16.mxu1 %v7311_v13  ;;  %v7383_v9 = vld [vmem:[#allocation9 + $0x164] ss:$56 sps:$4 sm:$0xff]   ;;  %v7381_v11 = vld [vmem:[#allocation9 + $0x160] ss:$56 sps:$4 sm:$0xff]   ;;  %v7389_v13 = vld [vmem:[#allocation9 + $0x1d4] ss:$56 sps:$4 sm:$0xff]  }
  0xca   :  { %v7384_v12 = vld [vmem:[#allocation9 + $0x168] ss:$56 sps:$4 sm:$0xff]   ;;  %v7392_v14 = vld [vmem:[#allocation9 + $0x1dc] ss:$56 sps:$4 sm:$0xff]   ;;  %v7402_v24 = vld [vmem:[#allocation9 + $0x2b8] ss:$56 sps:$4 sm:$0xff]  }
  0xcb   :  { %2379 = vmatpush1.bf16.msra.mxu0 %v7313_v16  ;;  %v7387_v15 = vld [vmem:[#allocation9 + $0x1d0] ss:$56 sps:$4 sm:$0xff]   ;;  %v7401_v21 = vld [vmem:[#allocation9 + $0x2b4] ss:$56 sps:$4 sm:$0xff]  }
  0xcc   :  { %2465 = vmatpush1.bf16.msra.mxu1 %v7314_v17  ;;  %2391 = vmatprep.subr.bf16.mxu0 %v7317_v18  ;;  %v7390_v16 = vld [vmem:[#allocation9 + $0x1d8] ss:$56 sps:$4 sm:$0xff]   ;;  %v7395_v17 = vld [vmem:[#allocation9 + $0x244] ss:$56 sps:$4 sm:$0xff]   ;;  %v7396_v20 = vld [vmem:[#allocation9 + $0x248] ss:$56 sps:$4 sm:$0xff]  }
  0xcd   :  { %2477 = vmatprep.subr.bf16.mxu1 %v7320_v19  ;;  %v7398_v18 = vld [vmem:[#allocation9 + $0x24c] ss:$56 sps:$4 sm:$0xff]   ;;  %v7393_v19 = vld [vmem:[#allocation9 + $0x240] ss:$56 sps:$4 sm:$0xff]   ;;  %v7404_v22 = vld [vmem:[#allocation9 + $0x2bc] ss:$56 sps:$4 sm:$0xff]  }
  0xce   :  { %2381 = vmatmul.mubr.bf16.vlgmr.msra.gmra.mrb[0].mxu0 %v8387_v27  ;;  %v7452_v58 = vld [vmem:[#allocation9 + $0x63c] ss:$56 sps:$4 sm:$0xff]   ;;  %v7447_v59 = vld [vmem:[#allocation9 + $0x630] ss:$56 sps:$4 sm:$0xff]  }
  0xcf   :  { %2467 = vmatmul.mubr.bf16.vlgmr.msra.gmra.mrb[0].mxu1 %v8387_v27  ;;  %2392 = vmatpush1.bf16.msra.mxu0 %v7315_v23  ;;  %v7399_v23 = vld [vmem:[#allocation9 + $0x2b0] ss:$56 sps:$4 sm:$0xff]  }
  0xd0   :  { %2478 = vmatpush1.bf16.msra.mxu1 %v7318_v26  ;;  %2393 = vmatprep.subr.bf16.mxu0 %v7323_v28  ;;  %v7407_v26 = vld [vmem:[#allocation9 + $0x324] ss:$56 sps:$4 sm:$0xff]  }
  0xd1   :  { %2479 = vmatprep.subr.bf16.mxu1 %v7326_v29  ;;  %2423 = vmatprep.mubr.bf16.mxu0 %v10092_v34  ;;  %v7410_v28 = vld [vmem:[#allocation9 + $0x32c] ss:$56 sps:$4 sm:$0xff]   ;;  %v7405_v29 = vld [vmem:[#allocation9 + $0x320] ss:$56 sps:$4 sm:$0xff]  }
  0xd2   :  { %2509 = vmatprep.mubr.bf16.mxu1 %v10092_v34 }
  0xd3   :  { %2394 = vmatpush1.bf16.msra.mxu0 %v7321_v30  ;;  %v7408_v30 = vld [vmem:[#allocation9 + $0x328] ss:$56 sps:$4 sm:$0xff]  }
  0xd4   :  { %2480 = vmatpush1.bf16.msra.mxu1 %v7324_v31  ;;  %2395 = vmatprep.subr.bf16.mxu0 %v7329_v32  ;;  %v7413_v31 = vld [vmem:[#allocation9 + $0x394] ss:$56 sps:$4 sm:$0xff]  }
  0xd5   :  { %2481 = vmatprep.subr.bf16.mxu1 %v7332_v33  ;;  %v7416_v32 = vld [vmem:[#allocation9 + $0x39c] ss:$56 sps:$4 sm:$0xff]   ;;  %v7411_v33 = vld [vmem:[#allocation9 + $0x390] ss:$56 sps:$4 sm:$0xff]  }
  0xd7   :  { %2396 = vmatpush1.bf16.msra.mxu0 %v7327_v35  ;;  %v7414_v35 = vld [vmem:[#allocation9 + $0x398] ss:$56 sps:$4 sm:$0xff]  }
  0xd8   :  { %2482 = vmatpush1.bf16.msra.mxu1 %v7330_v36  ;;  %2397 = vmatprep.subr.bf16.mxu0 %v7335_v37  ;;  %v7419_v36 = vld [vmem:[#allocation9 + $0x404] ss:$56 sps:$4 sm:$0xff]  }
  0xd9   :  { %2483 = vmatprep.subr.bf16.mxu1 %v7338_v39  ;;  %v7422_v37 = vld [vmem:[#allocation9 + $0x40c] ss:$56 sps:$4 sm:$0xff]   ;;  %v7417_v39 = vld [vmem:[#allocation9 + $0x400] ss:$56 sps:$4 sm:$0xff]  }
  0xdb   :  { %2398 = vmatpush1.bf16.msra.mxu0 %v7333_v40  ;;  %v7420_v40 = vld [vmem:[#allocation9 + $0x408] ss:$56 sps:$4 sm:$0xff]  }
  0xdc   :  { %2484 = vmatpush1.bf16.msra.mxu1 %v7336_v41  ;;  %2399 = vmatprep.subr.bf16.mxu0 %v7341_v42  ;;  %v7425_v41 = vld [vmem:[#allocation9 + $0x474] ss:$56 sps:$4 sm:$0xff]  }
  0xdd   :  { %2485 = vmatprep.subr.bf16.mxu1 %v7344_v43  ;;  %v7428_v42 = vld [vmem:[#allocation9 + $0x47c] ss:$56 sps:$4 sm:$0xff]   ;;  %v7423_v43 = vld [vmem:[#allocation9 + $0x470] ss:$56 sps:$4 sm:$0xff]  }
  0xdf   :  { %2400 = vmatpush1.bf16.msra.mxu0 %v7339_v44  ;;  %v7426_v44 = vld [vmem:[#allocation9 + $0x478] ss:$56 sps:$4 sm:$0xff]  }
  0xe0   :  { %2486 = vmatpush1.bf16.msra.mxu1 %v7342_v45  ;;  %2401 = vmatprep.subr.bf16.mxu0 %v7347_v46  ;;  %v7431_v45 = vld [vmem:[#allocation9 + $0x4e4] ss:$56 sps:$4 sm:$0xff]  }
  0xe1   :  { %2487 = vmatprep.subr.bf16.mxu1 %v7350_v47  ;;  %v7434_v46 = vld [vmem:[#allocation9 + $0x4ec] ss:$56 sps:$4 sm:$0xff]   ;;  %v7429_v47 = vld [vmem:[#allocation9 + $0x4e0] ss:$56 sps:$4 sm:$0xff]  }
  0xe3   :  { %2402 = vmatpush1.bf16.msra.mxu0 %v7345_v48  ;;  %v7432_v48 = vld [vmem:[#allocation9 + $0x4e8] ss:$56 sps:$4 sm:$0xff]  }
  0xe4   :  { %2488 = vmatpush1.bf16.msra.mxu1 %v7348_v49  ;;  %2403 = vmatprep.subr.bf16.mxu0 %v7353_v50  ;;  %v7437_v49 = vld [vmem:[#allocation9 + $0x554] ss:$56 sps:$4 sm:$0xff]  }
  0xe5   :  { %2489 = vmatprep.subr.bf16.mxu1 %v7356_v51  ;;  %v7440_v50 = vld [vmem:[#allocation9 + $0x55c] ss:$56 sps:$4 sm:$0xff]   ;;  %v7435_v51 = vld [vmem:[#allocation9 + $0x550] ss:$56 sps:$4 sm:$0xff]  }
  0xe7   :  { %2404 = vmatpush1.bf16.msra.mxu0 %v7351_v52  ;;  %v7438_v52 = vld [vmem:[#allocation9 + $0x558] ss:$56 sps:$4 sm:$0xff]  }
  0xe8   :  { %2490 = vmatpush1.bf16.msra.mxu1 %v7354_v53  ;;  %2405 = vmatprep.subr.bf16.mxu0 %v7359_v54  ;;  %v7443_v53 = vld [vmem:[#allocation9 + $0x5c4] ss:$56 sps:$4 sm:$0xff]  }
  0xe9   :  { %2491 = vmatprep.subr.bf16.mxu1 %v7362_v55  ;;  %v7446_v54 = vld [vmem:[#allocation9 + $0x5cc] ss:$56 sps:$4 sm:$0xff]   ;;  %v7441_v55 = vld [vmem:[#allocation9 + $0x5c0] ss:$56 sps:$4 sm:$0xff]  }
  0xeb   :  { %2406 = vmatpush1.bf16.msra.mxu0 %v7357_v56  ;;  %v7444_v56 = vld [vmem:[#allocation9 + $0x5c8] ss:$56 sps:$4 sm:$0xff]  }
  0xec   :  { %2492 = vmatpush1.bf16.msra.mxu1 %v7360_v57  ;;  %2520 = vmatprep.subr.bf16.mxu0 %v7365_v60  ;;  %v7449_v57 = vld [vmem:[#allocation9 + $0x634] ss:$56 sps:$4 sm:$0xff]   ;;  %v7450_v60 = vld [vmem:[#allocation9 + $0x638] ss:$56 sps:$4 sm:$0xff]  }
  0xed   :  { %2606 = vmatprep.subr.bf16.mxu1 %v7368_v61  ;;  %v7455_v61 = vld [vmem:[#allocation9 + $0x6a4] ss:$56 sps:$4 sm:$0xff]  }
  0xee   :  { %2424 = vmatmul.mubr.bf16.vlgmr.msra.gmra.mrb[0].mxu0 %v8395_v62 }
  0xef   :  { %2510 = vmatmul.mubr.bf16.vlgmr.msra.gmra.mrb[0].mxu1 %v8395_v62  ;;  %2521 = vmatpush1.bf16.msra.mxu0 %v7363_v63  ;;  %v7458_v63 = vld [vmem:[#allocation9 + $0x6ac] ss:$56 sps:$4 sm:$0xff]  }
  0xf0   :  { %2607 = vmatpush1.bf16.msra.mxu1 %v7366_v0  ;;  %2522 = vmatprep.subr.bf16.mxu0 %v7371_v1  ;;  %v7453_v0 = vld [vmem:[#allocation9 + $0x6a0] ss:$56 sps:$4 sm:$0xff]  }
  0xf1   :  { %2608 = vmatprep.subr.bf16.mxu1 %v7374_v2  ;;  %2552 = vmatprep.mubr.bf16.mxu0 %v8385_v25  ;;  %v7456_v1 = vld [vmem:[#allocation9 + $0x6a8] ss:$56 sps:$4 sm:$0xff]   ;;  %v7461_v2 = vld [vmem:[#allocation9 + $0x714] ss:$56 sps:$4 sm:$0xff]  }
  0xf2   :  { %2638 = vmatprep.mubr.bf16.mxu1 %v8385_v25 }
  0xf3   :  { %2523 = vmatpush1.bf16.msra.mxu0 %v7369_v3  ;;  %v7464_v3 = vld [vmem:[#allocation9 + $0x71c] ss:$56 sps:$4 sm:$0xff]  }
  0xf4   :  { %2609 = vmatpush1.bf16.msra.mxu1 %v7372_v4  ;;  %2524 = vmatprep.subr.bf16.mxu0 %v7377_v5  ;;  %v7459_v4 = vld [vmem:[#allocation9 + $0x710] ss:$56 sps:$4 sm:$0xff]  }
  0xf5   :  { %2610 = vmatprep.subr.bf16.mxu1 %v7380_v6  ;;  %v7462_v5 = vld [vmem:[#allocation9 + $0x718] ss:$56 sps:$4 sm:$0xff]   ;;  %v7467_v6 = vld [vmem:[#allocation9 + $0x784] ss:$56 sps:$4 sm:$0xff]  }
  0xf7   :  { %2525 = vmatpush1.bf16.msra.mxu0 %v7375_v7  ;;  %v7470_v7 = vld [vmem:[#allocation9 + $0x78c] ss:$56 sps:$4 sm:$0xff]  }
  0xf8   :  { %2611 = vmatpush1.bf16.msra.mxu1 %v7378_v8  ;;  %2526 = vmatprep.subr.bf16.mxu0 %v7383_v9  ;;  %v7465_v8 = vld [vmem:[#allocation9 + $0x780] ss:$56 sps:$4 sm:$0xff]  }
  0xf9   :  { %2612 = vmatprep.subr.bf16.mxu1 %v7386_v10  ;;  %v7468_v9 = vld [vmem:[#allocation9 + $0x788] ss:$56 sps:$4 sm:$0xff]   ;;  %v7473_v10 = vld [vmem:[#allocation9 + $0x7f4] ss:$56 sps:$4 sm:$0xff]  }
  0xfb   :  { %2527 = vmatpush1.bf16.msra.mxu0 %v7381_v11  ;;  %v7476_v11 = vld [vmem:[#allocation9 + $0x7fc] ss:$56 sps:$4 sm:$0xff]  }
  0xfc   :  { %2613 = vmatpush1.bf16.msra.mxu1 %v7384_v12  ;;  %2528 = vmatprep.subr.bf16.mxu0 %v7389_v13  ;;  %v7471_v12 = vld [vmem:[#allocation9 + $0x7f0] ss:$56 sps:$4 sm:$0xff]  }
  0xfd   :  { %2614 = vmatprep.subr.bf16.mxu1 %v7392_v14  ;;  %v7474_v13 = vld [vmem:[#allocation9 + $0x7f8] ss:$56 sps:$4 sm:$0xff]   ;;  %v7479_v14 = vld [vmem:[#allocation9 + $0x864] ss:$56 sps:$4 sm:$0xff]  }
  0xff   :  { %2529 = vmatpush1.bf16.msra.mxu0 %v7387_v15  ;;  %v7482_v15 = vld [vmem:[#allocation9 + $0x86c] ss:$56 sps:$4 sm:$0xff]  }
 0x100   :  { %2615 = vmatpush1.bf16.msra.mxu1 %v7390_v16  ;;  %2530 = vmatprep.subr.bf16.mxu0 %v7395_v17  ;;  %v7477_v16 = vld [vmem:[#allocation9 + $0x860] ss:$56 sps:$4 sm:$0xff]  }
 0x101   :  { %2616 = vmatprep.subr.bf16.mxu1 %v7398_v18  ;;  %v7480_v17 = vld [vmem:[#allocation9 + $0x868] ss:$56 sps:$4 sm:$0xff]   ;;  %v7485_v18 = vld [vmem:[#allocation9 + $0x8d4] ss:$56 sps:$4 sm:$0xff]  }
 0x103   :  { %2531 = vmatpush1.bf16.msra.mxu0 %v7393_v19  ;;  %v7488_v19 = vld [vmem:[#allocation9 + $0x8dc] ss:$56 sps:$4 sm:$0xff]  }
 0x104   :  { %2617 = vmatpush1.bf16.msra.mxu1 %v7396_v20  ;;  %2532 = vmatprep.subr.bf16.mxu0 %v7401_v21  ;;  %v7483_v20 = vld [vmem:[#allocation9 + $0x8d0] ss:$56 sps:$4 sm:$0xff]  }
 0x105   :  { %2618 = vmatprep.subr.bf16.mxu1 %v7404_v22  ;;  %v7486_v21 = vld [vmem:[#allocation9 + $0x8d8] ss:$56 sps:$4 sm:$0xff]   ;;  %v7491_v22 = vld [vmem:[#allocation9 + $0x944] ss:$56 sps:$4 sm:$0xff]  }
 0x107   :  { %2533 = vmatpush1.bf16.msra.mxu0 %v7399_v23  ;;  %v7494_v23 = vld [vmem:[#allocation9 + $0x94c] ss:$56 sps:$4 sm:$0xff]  }
 0x108   :  { %2619 = vmatpush1.bf16.msra.mxu1 %v7402_v24  ;;  %2534 = vmatprep.subr.bf16.mxu0 %v7407_v26  ;;  %v7489_v24 = vld [vmem:[#allocation9 + $0x940] ss:$56 sps:$4 sm:$0xff]  }
 0x109   :  { %2620 = vmatprep.subr.bf16.mxu1 %v7410_v28  ;;  %v7492_v26 = vld [vmem:[#allocation9 + $0x948] ss:$56 sps:$4 sm:$0xff]   ;;  %v7497_v28 = vld [vmem:[#allocation9 + $0x9b4] ss:$56 sps:$4 sm:$0xff]  }
 0x10b   :  { %2535 = vmatpush1.bf16.msra.mxu0 %v7405_v29  ;;  %v7500_v29 = vld [vmem:[#allocation9 + $0x9bc] ss:$56 sps:$4 sm:$0xff]  }
 0x10c   :  { %2621 = vmatpush1.bf16.msra.mxu1 %v7408_v30  ;;  %2536 = vmatprep.subr.bf16.mxu0 %v7413_v31  ;;  %v7495_v30 = vld [vmem:[#allocation9 + $0x9b0] ss:$56 sps:$4 sm:$0xff]  }
 0x10d   :  { %2622 = vmatprep.subr.bf16.mxu1 %v7416_v32  ;;  %v7498_v31 = vld [vmem:[#allocation9 + $0x9b8] ss:$56 sps:$4 sm:$0xff]   ;;  %v7503_v32 = vld [vmem:[#allocation9 + $0xa24] ss:$56 sps:$4 sm:$0xff]  }
 0x10f   :  { %2537 = vmatpush1.bf16.msra.mxu0 %v7411_v33  ;;  %v7506_v33 = vld [vmem:[#allocation9 + $0xa2c] ss:$56 sps:$4 sm:$0xff]  }
 0x110   :  { %2623 = vmatpush1.bf16.msra.mxu1 %v7414_v35  ;;  %2538 = vmatprep.subr.bf16.mxu0 %v7419_v36  ;;  %v7501_v35 = vld [vmem:[#allocation9 + $0xa20] ss:$56 sps:$4 sm:$0xff]  }
 0x111   :  { %2624 = vmatprep.subr.bf16.mxu1 %v7422_v37  ;;  %v7504_v36 = vld [vmem:[#allocation9 + $0xa28] ss:$56 sps:$4 sm:$0xff]   ;;  %v7509_v37 = vld [vmem:[#allocation9 + $0x24] ss:$56 sps:$4 sm:$0xff]  }
 0x113   :  { %2539 = vmatpush1.bf16.msra.mxu0 %v7417_v39  ;;  %v7512_v39 = vld [vmem:[#allocation9 + $0x2c] ss:$56 sps:$4 sm:$0xff]  }
 0x114   :  { %2625 = vmatpush1.bf16.msra.mxu1 %v7420_v40  ;;  %2540 = vmatprep.subr.bf16.mxu0 %v7425_v41  ;;  %v7507_v40 = vld [vmem:[#allocation9 + $0x20] ss:$56 sps:$4 sm:$0xff]  }
 0x115   :  { %2626 = vmatprep.subr.bf16.mxu1 %v7428_v42  ;;  %v7510_v41 = vld [vmem:[#allocation9 + $0x28] ss:$56 sps:$4 sm:$0xff]   ;;  %v7515_v42 = vld [vmem:[#allocation9 + $0x94] ss:$56 sps:$4 sm:$0xff]  }
 0x117   :  { %2541 = vmatpush1.bf16.msra.mxu0 %v7423_v43  ;;  %v7518_v43 = vld [vmem:[#allocation9 + $0x9c] ss:$56 sps:$4 sm:$0xff]  }
 0x118   :  { %2627 = vmatpush1.bf16.msra.mxu1 %v7426_v44  ;;  %2542 = vmatprep.subr.bf16.mxu0 %v7431_v45  ;;  %v7513_v44 = vld [vmem:[#allocation9 + $0x90] ss:$56 sps:$4 sm:$0xff]  }
 0x119   :  { %2628 = vmatprep.subr.bf16.mxu1 %v7434_v46  ;;  %v7516_v45 = vld [vmem:[#allocation9 + $0x98] ss:$56 sps:$4 sm:$0xff]   ;;  %v7521_v46 = vld [vmem:[#allocation9 + $0x104] ss:$56 sps:$4 sm:$0xff]  }
 0x11b   :  { %2543 = vmatpush1.bf16.msra.mxu0 %v7429_v47  ;;  %v7524_v47 = vld [vmem:[#allocation9 + $0x10c] ss:$56 sps:$4 sm:$0xff]  }
 0x11c   :  { %2629 = vmatpush1.bf16.msra.mxu1 %v7432_v48  ;;  %2544 = vmatprep.subr.bf16.mxu0 %v7437_v49  ;;  %v7519_v48 = vld [vmem:[#allocation9 + $0x100] ss:$56 sps:$4 sm:$0xff]  }
 0x11d   :  { %2630 = vmatprep.subr.bf16.mxu1 %v7440_v50  ;;  %v7522_v49 = vld [vmem:[#allocation9 + $0x108] ss:$56 sps:$4 sm:$0xff]   ;;  %v7527_v50 = vld [vmem:[#allocation9 + $0x174] ss:$56 sps:$4 sm:$0xff]  }
 0x11f   :  { %2545 = vmatpush1.bf16.msra.mxu0 %v7435_v51  ;;  %v7530_v51 = vld [vmem:[#allocation9 + $0x17c] ss:$56 sps:$4 sm:$0xff]  }
 0x120   :  { %2631 = vmatpush1.bf16.msra.mxu1 %v7438_v52  ;;  %2546 = vmatprep.subr.bf16.mxu0 %v7443_v53  ;;  %v7525_v52 = vld [vmem:[#allocation9 + $0x170] ss:$56 sps:$4 sm:$0xff]  }
 0x121   :  { %2632 = vmatprep.subr.bf16.mxu1 %v7446_v54  ;;  %v7528_v53 = vld [vmem:[#allocation9 + $0x178] ss:$56 sps:$4 sm:$0xff]   ;;  %v7533_v54 = vld [vmem:[#allocation9 + $0x1e4] ss:$56 sps:$4 sm:$0xff]  }
 0x123   :  { %2547 = vmatpush1.bf16.msra.mxu0 %v7441_v55  ;;  %v7536_v55 = vld [vmem:[#allocation9 + $0x1ec] ss:$56 sps:$4 sm:$0xff]  }
 0x124   :  { %2633 = vmatpush1.bf16.msra.mxu1 %v7444_v56  ;;  %2548 = vmatprep.subr.bf16.mxu0 %v7449_v57  ;;  %v7531_v56 = vld [vmem:[#allocation9 + $0x1e0] ss:$56 sps:$4 sm:$0xff]  }
 0x125   :  { %2634 = vmatprep.subr.bf16.mxu1 %v7452_v58  ;;  %v7534_v57 = vld [vmem:[#allocation9 + $0x1e8] ss:$56 sps:$4 sm:$0xff]   ;;  %v7539_v58 = vld [vmem:[#allocation9 + $0x254] ss:$56 sps:$4 sm:$0xff]  }
 0x127   :  { %2549 = vmatpush1.bf16.msra.mxu0 %v7447_v59  ;;  %v7542_v59 = vld [vmem:[#allocation9 + $0x25c] ss:$56 sps:$4 sm:$0xff]  }
 0x128   :  { %2635 = vmatpush1.bf16.msra.mxu1 %v7450_v60  ;;  %2550 = vmatprep.subr.bf16.mxu0 %v7455_v61  ;;  %v7537_v60 = vld [vmem:[#allocation9 + $0x250] ss:$56 sps:$4 sm:$0xff]  }
 0x129   :  { %2636 = vmatprep.subr.bf16.mxu1 %v7458_v63  ;;  %v7540_v61 = vld [vmem:[#allocation9 + $0x258] ss:$56 sps:$4 sm:$0xff]   ;;  %v7545_v63 = vld [vmem:[#allocation9 + $0x2c4] ss:$56 sps:$4 sm:$0xff]  }
 0x12b   :  { %2551 = vmatpush1.bf16.msra.mxu0 %v7453_v0  ;;  %v7548_v0 = vld [vmem:[#allocation9 + $0x2cc] ss:$56 sps:$4 sm:$0xff]  }
 0x12c   :  { %2637 = vmatpush1.bf16.msra.mxu1 %v7456_v1  ;;  %2563 = vmatprep.subr.bf16.mxu0 %v7461_v2  ;;  %v7543_v1 = vld [vmem:[#allocation9 + $0x2c0] ss:$56 sps:$4 sm:$0xff]  }
 0x12d   :  { %2649 = vmatprep.subr.bf16.mxu1 %v7464_v3  ;;  %v7546_v2 = vld [vmem:[#allocation9 + $0x2c8] ss:$56 sps:$4 sm:$0xff]   ;;  %v7551_v3 = vld [vmem:[#allocation9 + $0x334] ss:$56 sps:$4 sm:$0xff]  }
 0x12e   :  { %2553 = vmatmul.mubr.bf16.vlgmr.msra.gmra.mrb[4].mxu0 %v8387_v27 }
 0x12f   :  { %2639 = vmatmul.mubr.bf16.vlgmr.msra.gmra.mrb[4].mxu1 %v8387_v27  ;;  %2564 = vmatpush1.bf16.msra.mxu0 %v7459_v4  ;;  %v7554_v4 = vld [vmem:[#allocation9 + $0x33c] ss:$56 sps:$4 sm:$0xff]  }
 0x130   :  { %2650 = vmatpush1.bf16.msra.mxu1 %v7462_v5  ;;  %2565 = vmatprep.subr.bf16.mxu0 %v7467_v6  ;;  %v7549_v5 = vld [vmem:[#allocation9 + $0x330] ss:$56 sps:$4 sm:$0xff]  }
 0x131   :  { %2651 = vmatprep.subr.bf16.mxu1 %v7470_v7  ;;  %2595 = vmatprep.mubr.bf16.mxu0 %v10092_v34  ;;  %v7552_v6 = vld [vmem:[#allocation9 + $0x338] ss:$56 sps:$4 sm:$0xff]   ;;  %v7557_v7 = vld [vmem:[#allocation9 + $0x3a4] ss:$56 sps:$4 sm:$0xff]  }
 0x132   :  { %2681 = vmatprep.mubr.bf16.mxu1 %v10092_v34 }
 0x133   :  { %2566 = vmatpush1.bf16.msra.mxu0 %v7465_v8  ;;  %v7560_v8 = vld [vmem:[#allocation9 + $0x3ac] ss:$56 sps:$4 sm:$0xff]  }
 0x134   :  { %2652 = vmatpush1.bf16.msra.mxu1 %v7468_v9  ;;  %2567 = vmatprep.subr.bf16.mxu0 %v7473_v10  ;;  %v7555_v9 = vld [vmem:[#allocation9 + $0x3a0] ss:$56 sps:$4 sm:$0xff]  }
 0x135   :  { %2653 = vmatprep.subr.bf16.mxu1 %v7476_v11  ;;  %v7558_v10 = vld [vmem:[#allocation9 + $0x3a8] ss:$56 sps:$4 sm:$0xff]   ;;  %v7563_v11 = vld [vmem:[#allocation9 + $0x414] ss:$56 sps:$4 sm:$0xff]  }
 0x137   :  { %2568 = vmatpush1.bf16.msra.mxu0 %v7471_v12  ;;  %v7566_v12 = vld [vmem:[#allocation9 + $0x41c] ss:$56 sps:$4 sm:$0xff]  }
 0x138   :  { %2654 = vmatpush1.bf16.msra.mxu1 %v7474_v13  ;;  %2569 = vmatprep.subr.bf16.mxu0 %v7479_v14  ;;  %v7561_v13 = vld [vmem:[#allocation9 + $0x410] ss:$56 sps:$4 sm:$0xff]  }
 0x139   :  { %2655 = vmatprep.subr.bf16.mxu1 %v7482_v15  ;;  %v7564_v14 = vld [vmem:[#allocation9 + $0x418] ss:$56 sps:$4 sm:$0xff]   ;;  %v7569_v15 = vld [vmem:[#allocation9 + $0x484] ss:$56 sps:$4 sm:$0xff]  }
 0x13b   :  { %2570 = vmatpush1.bf16.msra.mxu0 %v7477_v16  ;;  %v7572_v16 = vld [vmem:[#allocation9 + $0x48c] ss:$56 sps:$4 sm:$0xff]  }
 0x13c   :  { %2656 = vmatpush1.bf16.msra.mxu1 %v7480_v17  ;;  %2571 = vmatprep.subr.bf16.mxu0 %v7485_v18  ;;  %v7567_v17 = vld [vmem:[#allocation9 + $0x480] ss:$56 sps:$4 sm:$0xff]  }
 0x13d   :  { %2657 = vmatprep.subr.bf16.mxu1 %v7488_v19  ;;  %v7570_v18 = vld [vmem:[#allocation9 + $0x488] ss:$56 sps:$4 sm:$0xff]   ;;  %v7575_v19 = vld [vmem:[#allocation9 + $0x4f4] ss:$56 sps:$4 sm:$0xff]  }
 0x13f   :  { %2572 = vmatpush1.bf16.msra.mxu0 %v7483_v20  ;;  %v7578_v20 = vld [vmem:[#allocation9 + $0x4fc] ss:$56 sps:$4 sm:$0xff]  }
 0x140   :  { %2658 = vmatpush1.bf16.msra.mxu1 %v7486_v21  ;;  %2573 = vmatprep.subr.bf16.mxu0 %v7491_v22  ;;  %v7573_v21 = vld [vmem:[#allocation9 + $0x4f0] ss:$56 sps:$4 sm:$0xff]  }
 0x141   :  { %2659 = vmatprep.subr.bf16.mxu1 %v7494_v23  ;;  %v7576_v22 = vld [vmem:[#allocation9 + $0x4f8] ss:$56 sps:$4 sm:$0xff]   ;;  %v7581_v23 = vld [vmem:[#allocation9 + $0x564] ss:$56 sps:$4 sm:$0xff]  }
 0x143   :  { %2574 = vmatpush1.bf16.msra.mxu0 %v7489_v24  ;;  %v7584_v24 = vld [vmem:[#allocation9 + $0x56c] ss:$56 sps:$4 sm:$0xff]  }
 0x144   :  { %2660 = vmatpush1.bf16.msra.mxu1 %v7492_v26  ;;  %2575 = vmatprep.subr.bf16.mxu0 %v7497_v28  ;;  %v7579_v26 = vld [vmem:[#allocation9 + $0x560] ss:$56 sps:$4 sm:$0xff]  }
 0x145   :  { %2661 = vmatprep.subr.bf16.mxu1 %v7500_v29  ;;  %v7582_v28 = vld [vmem:[#allocation9 + $0x568] ss:$56 sps:$4 sm:$0xff]   ;;  %v7587_v29 = vld [vmem:[#allocation9 + $0x5d4] ss:$56 sps:$4 sm:$0xff]  }
 0x147   :  { %2576 = vmatpush1.bf16.msra.mxu0 %v7495_v30  ;;  %v7590_v30 = vld [vmem:[#allocation9 + $0x5dc] ss:$56 sps:$4 sm:$0xff]  }
 0x148   :  { %2662 = vmatpush1.bf16.msra.mxu1 %v7498_v31  ;;  %2577 = vmatprep.subr.bf16.mxu0 %v7503_v32  ;;  %v7585_v31 = vld [vmem:[#allocation9 + $0x5d0] ss:$56 sps:$4 sm:$0xff]  }
 0x149   :  { %2663 = vmatprep.subr.bf16.mxu1 %v7506_v33  ;;  %v7588_v32 = vld [vmem:[#allocation9 + $0x5d8] ss:$56 sps:$4 sm:$0xff]   ;;  %v7593_v33 = vld [vmem:[#allocation9 + $0x644] ss:$56 sps:$4 sm:$0xff]  }
 0x14b   :  { %2578 = vmatpush1.bf16.msra.mxu0 %v7501_v35  ;;  %v7596_v35 = vld [vmem:[#allocation9 + $0x64c] ss:$56 sps:$4 sm:$0xff]  }
 0x14c   :  { %2664 = vmatpush1.bf16.msra.mxu1 %v7504_v36  ;;  %2692 = vmatprep.subr.bf16.mxu0 %v7509_v37  ;;  %v7591_v36 = vld [vmem:[#allocation9 + $0x640] ss:$56 sps:$4 sm:$0xff]  }
 0x14d   :  { %2774 = vmatprep.subr.bf16.mxu1 %v7512_v39  ;;  %v7594_v37 = vld [vmem:[#allocation9 + $0x648] ss:$56 sps:$4 sm:$0xff]   ;;  %v7599_v39 = vld [vmem:[#allocation9 + $0x6b4] ss:$56 sps:$4 sm:$0xff]  }
 0x14e   :  { %2596 = vmatmul.mubr.bf16.vlgmr.msra.gmra.mrb[4].mxu0 %v8395_v62 }
 0x14f   :  { %2682 = vmatmul.mubr.bf16.vlgmr.msra.gmra.mrb[4].mxu1 %v8395_v62  ;;  %2693 = vmatpush1.bf16.msra.mxu0 %v7507_v40  ;;  %v7602_v40 = vld [vmem:[#allocation9 + $0x6bc] ss:$56 sps:$4 sm:$0xff]  }
 0x150   :  { %2775 = vmatpush1.bf16.msra.mxu1 %v7510_v41  ;;  %2694 = vmatprep.subr.bf16.mxu0 %v7515_v42  ;;  %v7597_v41 = vld [vmem:[#allocation9 + $0x6b0] ss:$56 sps:$4 sm:$0xff]  }
 0x151   :  { %2776 = vmatprep.subr.bf16.mxu1 %v7518_v43  ;;  %2724 = vmatprep.mubr.bf16.mxu0 %v8385_v25  ;;  %v7600_v42 = vld [vmem:[#allocation9 + $0x6b8] ss:$56 sps:$4 sm:$0xff]   ;;  %v7605_v43 = vld [vmem:[#allocation9 + $0x724] ss:$56 sps:$4 sm:$0xff]  }
 0x152   :  { %2806 = vmatprep.mubr.bf16.mxu1 %v8385_v25 }
 0x153   :  { %2695 = vmatpush1.bf16.msra.mxu0 %v7513_v44  ;;  %v7608_v44 = vld [vmem:[#allocation9 + $0x72c] ss:$56 sps:$4 sm:$0xff]  }
 0x154   :  { %2777 = vmatpush1.bf16.msra.mxu1 %v7516_v45  ;;  %2696 = vmatprep.subr.bf16.mxu0 %v7521_v46  ;;  %v7603_v45 = vld [vmem:[#allocation9 + $0x720] ss:$56 sps:$4 sm:$0xff]  }
 0x155   :  { %2778 = vmatprep.subr.bf16.mxu1 %v7524_v47  ;;  %v7606_v46 = vld [vmem:[#allocation9 + $0x728] ss:$56 sps:$4 sm:$0xff]   ;;  %v7611_v47 = vld [vmem:[#allocation9 + $0x794] ss:$56 sps:$4 sm:$0xff]  }
 0x157   :  { %2697 = vmatpush1.bf16.msra.mxu0 %v7519_v48  ;;  %v7614_v48 = vld [vmem:[#allocation9 + $0x79c] ss:$56 sps:$4 sm:$0xff]  }
 0x158   :  { %2779 = vmatpush1.bf16.msra.mxu1 %v7522_v49  ;;  %2698 = vmatprep.subr.bf16.mxu0 %v7527_v50  ;;  %v7609_v49 = vld [vmem:[#allocation9 + $0x790] ss:$56 sps:$4 sm:$0xff]  }
 0x159   :  { %2780 = vmatprep.subr.bf16.mxu1 %v7530_v51  ;;  %v7612_v50 = vld [vmem:[#allocation9 + $0x798] ss:$56 sps:$4 sm:$0xff]   ;;  %v7617_v51 = vld [vmem:[#allocation9 + $0x804] ss:$56 sps:$4 sm:$0xff]  }
 0x15b   :  { %2699 = vmatpush1.bf16.msra.mxu0 %v7525_v52  ;;  %v7620_v52 = vld [vmem:[#allocation9 + $0x80c] ss:$56 sps:$4 sm:$0xff]  }
 0x15c   :  { %2781 = vmatpush1.bf16.msra.mxu1 %v7528_v53  ;;  %2700 = vmatprep.subr.bf16.mxu0 %v7533_v54  ;;  %v7615_v53 = vld [vmem:[#allocation9 + $0x800] ss:$56 sps:$4 sm:$0xff]  }
 0x15d   :  { %2782 = vmatprep.subr.bf16.mxu1 %v7536_v55  ;;  %v7618_v54 = vld [vmem:[#allocation9 + $0x808] ss:$56 sps:$4 sm:$0xff]   ;;  %v7623_v55 = vld [vmem:[#allocation9 + $0x874] ss:$56 sps:$4 sm:$0xff]  }
 0x15f   :  { %2701 = vmatpush1.bf16.msra.mxu0 %v7531_v56  ;;  %v7626_v56 = vld [vmem:[#allocation9 + $0x87c] ss:$56 sps:$4 sm:$0xff]  }
 0x160   :  { %2783 = vmatpush1.bf16.msra.mxu1 %v7534_v57  ;;  %2702 = vmatprep.subr.bf16.mxu0 %v7539_v58  ;;  %v7621_v57 = vld [vmem:[#allocation9 + $0x870] ss:$56 sps:$4 sm:$0xff]  }
 0x161   :  { %2784 = vmatprep.subr.bf16.mxu1 %v7542_v59  ;;  %v7624_v58 = vld [vmem:[#allocation9 + $0x878] ss:$56 sps:$4 sm:$0xff]   ;;  %v7629_v59 = vld [vmem:[#allocation9 + $0x8e4] ss:$56 sps:$4 sm:$0xff]  }
 0x163   :  { %2703 = vmatpush1.bf16.msra.mxu0 %v7537_v60  ;;  %v7632_v60 = vld [vmem:[#allocation9 + $0x8ec] ss:$56 sps:$4 sm:$0xff]  }
 0x164   :  { %2785 = vmatpush1.bf16.msra.mxu1 %v7540_v61  ;;  %2704 = vmatprep.subr.bf16.mxu0 %v7545_v63  ;;  %v7627_v61 = vld [vmem:[#allocation9 + $0x8e0] ss:$56 sps:$4 sm:$0xff]  }
 0x165   :  { %2786 = vmatprep.subr.bf16.mxu1 %v7548_v0  ;;  %v7630_v63 = vld [vmem:[#allocation9 + $0x8e8] ss:$56 sps:$4 sm:$0xff]   ;;  %v7635_v0 = vld [vmem:[#allocation9 + $0x954] ss:$56 sps:$4 sm:$0xff]  }
 0x167   :  { %2705 = vmatpush1.bf16.msra.mxu0 %v7543_v1  ;;  %v7638_v1 = vld [vmem:[#allocation9 + $0x95c] ss:$56 sps:$4 sm:$0xff]  }
 0x168   :  { %2787 = vmatpush1.bf16.msra.mxu1 %v7546_v2  ;;  %2706 = vmatprep.subr.bf16.mxu0 %v7551_v3  ;;  %v7633_v2 = vld [vmem:[#allocation9 + $0x950] ss:$56 sps:$4 sm:$0xff]  }
 0x169   :  { %2788 = vmatprep.subr.bf16.mxu1 %v7554_v4  ;;  %v7636_v3 = vld [vmem:[#allocation9 + $0x958] ss:$56 sps:$4 sm:$0xff]   ;;  %v7641_v4 = vld [vmem:[#allocation9 + $0x9c4] ss:$56 sps:$4 sm:$0xff]  }
 0x16b   :  { %2707 = vmatpush1.bf16.msra.mxu0 %v7549_v5  ;;  %v7644_v5 = vld [vmem:[#allocation9 + $0x9cc] ss:$56 sps:$4 sm:$0xff]  }
 0x16c   :  { %2789 = vmatpush1.bf16.msra.mxu1 %v7552_v6  ;;  %2708 = vmatprep.subr.bf16.mxu0 %v7557_v7  ;;  %v7639_v6 = vld [vmem:[#allocation9 + $0x9c0] ss:$56 sps:$4 sm:$0xff]  }
 0x16d   :  { %2790 = vmatprep.subr.bf16.mxu1 %v7560_v8  ;;  %v7642_v7 = vld [vmem:[#allocation9 + $0x9c8] ss:$56 sps:$4 sm:$0xff]   ;;  %v7647_v8 = vld [vmem:[#allocation9 + $0xa34] ss:$56 sps:$4 sm:$0xff]  }
 0x16f   :  { %2709 = vmatpush1.bf16.msra.mxu0 %v7555_v9  ;;  %v7650_v9 = vld [vmem:[#allocation9 + $0xa3c] ss:$56 sps:$4 sm:$0xff]  }
 0x170   :  { %2791 = vmatpush1.bf16.msra.mxu1 %v7558_v10  ;;  %2710 = vmatprep.subr.bf16.mxu0 %v7563_v11  ;;  %v3171_v10 = vld [vmem:[#allocation12] sm:$0xff] }
 0x171   :  { %2792 = vmatprep.subr.bf16.mxu1 %v7566_v12  ;;  %v3175_v11 = vld [vmem:[#allocation12 + $0x20] sm:$0xff] }
 0x172   :  { %v7645_v12 = vld [vmem:[#allocation9 + $0xa30] ss:$56 sps:$4 sm:$0xff]  }
 0x173   :  { %2711 = vmatpush1.bf16.msra.mxu0 %v7561_v13  ;;  %v7648_v13 = vld [vmem:[#allocation9 + $0xa38] ss:$56 sps:$4 sm:$0xff]  }
 0x174   :  { %2793 = vmatpush1.bf16.msra.mxu1 %v7564_v14  ;;  %2712 = vmatprep.subr.bf16.mxu0 %v7569_v15  ;;  %v7653_v14 = vld [vmem:[#allocation9 + $0x34] ss:$56 sps:$4 sm:$0xff]   ;;  %v8413_v15 = vcombine.high %v3171_v10, %v3175_v11 }
 0x175   :  { %2794 = vmatprep.subr.bf16.mxu1 %v7572_v16  ;;  %v3179_v16 = vld [vmem:[#allocation12 + $0x40] sm:$0xff] }
 0x176   :  { %10380 = vst [vmem:[#allocation25_spill] sm:$0xff] %v8413_v15 }
 0x177   :  { %2713 = vmatpush1.bf16.msra.mxu0 %v7567_v17  ;;  %v3183_v17 = vld [vmem:[#allocation12 + $0x60] sm:$0xff] }
 0x178   :  { %2795 = vmatpush1.bf16.msra.mxu1 %v7570_v18  ;;  %2714 = vmatprep.subr.bf16.mxu0 %v7575_v19  ;;  %v7651_v18 = vld [vmem:[#allocation9 + $0x30] ss:$56 sps:$4 sm:$0xff]   ;;  %v8415_v19 = vcombine.low %v3171_v10, %v3175_v11 }
 0x179   :  { %2796 = vmatprep.subr.bf16.mxu1 %v7578_v20  ;;  %v7656_v20 = vld [vmem:[#allocation9 + $0xa4] ss:$56 sps:$4 sm:$0xff]  }
 0x17a   :  { %10381 = vst [vmem:[#allocation26_spill] sm:$0xff] %v8415_v19 }
 0x17b   :  { %2715 = vmatpush1.bf16.msra.mxu0 %v7573_v21  ;;  %v8418_v21 = vcombine.high %v3179_v16, %v3183_v17 }
 0x17c   :  { %2797 = vmatpush1.bf16.msra.mxu1 %v7576_v22  ;;  %2716 = vmatprep.subr.bf16.mxu0 %v7581_v23  ;;  %v3187_v22 = vld [vmem:[#allocation12 + $0x80] sm:$0xff] }
 0x17d   :  { %2798 = vmatprep.subr.bf16.mxu1 %v7584_v24  ;;  %10382 = vst [vmem:[#allocation27_spill] sm:$0xff] %v8418_v21  ;;  %v3191_v23 = vld [vmem:[#allocation12 + $0xa0] sm:$0xff]  ;;  %v7654_v24 = vld [vmem:[#allocation9 + $0xa0] ss:$56 sps:$4 sm:$0xff]  }
 0x17f   :  { %2717 = vmatpush1.bf16.msra.mxu0 %v7579_v26  ;;  %v8423_v26 = vcombine.low %v3179_v16, %v3183_v17 }
 0x180   :  { %2799 = vmatpush1.bf16.msra.mxu1 %v7582_v28  ;;  %2718 = vmatprep.subr.bf16.mxu0 %v7587_v29  ;;  %v7659_v28 = vld [vmem:[#allocation9 + $0x114] ss:$56 sps:$4 sm:$0xff]   ;;  %v8426_v29 = vcombine.high %v3187_v22, %v3191_v23 }
 0x181   :  { %2800 = vmatprep.subr.bf16.mxu1 %v7590_v30  ;;  %10383 = vst [vmem:[#allocation28_spill] sm:$0xff] %v8423_v26  ;;  %v3195_v30 = vld [vmem:[#allocation12 + $0xc0] sm:$0xff] }
 0x182   :  { %10384 = vst [vmem:[#allocation29_spill] sm:$0xff] %v8426_v29 }
 0x183   :  { %2719 = vmatpush1.bf16.msra.mxu0 %v7585_v31  ;;  %v3199_v31 = vld [vmem:[#allocation12 + $0xe0] sm:$0xff] }
 0x184   :  { %2801 = vmatpush1.bf16.msra.mxu1 %v7588_v32  ;;  %2720 = vmatprep.subr.bf16.mxu0 %v7593_v33  ;;  %v7657_v32 = vld [vmem:[#allocation9 + $0x110] ss:$56 sps:$4 sm:$0xff]   ;;  %v8431_v33 = vcombine.low %v3187_v22, %v3191_v23 }
 0x185   :  { %2802 = vmatprep.subr.bf16.mxu1 %v7596_v35  ;;  %v7662_v35 = vld [vmem:[#allocation9 + $0x184] ss:$56 sps:$4 sm:$0xff]   ;;  %v3235_v22 = vld [vmem:[#allocation12 + $0x200] sm:$0xff] }
 0x186   :  { %10385 = vst [vmem:[#allocation30_spill] sm:$0xff] %v8431_v33  ;;  %v3239_v23 = vld [vmem:[#allocation12 + $0x220] sm:$0xff] }
 0x187   :  { %2721 = vmatpush1.bf16.msra.mxu0 %v7591_v36  ;;  %v8434_v36 = vcombine.high %v3195_v30, %v3199_v31 }
 0x188   :  { %2803 = vmatpush1.bf16.msra.mxu1 %v7594_v37  ;;  %2722 = vmatprep.subr.bf16.mxu0 %v7599_v39  ;;  %v3203_v37 = vld [vmem:[#allocation12 + $0x100] sm:$0xff] }
 0x189   :  { %2804 = vmatprep.subr.bf16.mxu1 %v7602_v40  ;;  %10386 = vst [vmem:[#allocation31_spill] sm:$0xff] %v8434_v36  ;;  %v3207_v39 = vld [vmem:[#allocation12 + $0x120] sm:$0xff]  ;;  %v8437_v40 = vshrl.u32 %v138_v38, 7  ;;  %v8126_v38 = vmov 1983009808  }
 0x18b   :  { %2723 = vmatpush1.bf16.msra.mxu0 %v7597_v41  ;;  %10387 = vst [vmem:[#allocation32_spill] sm:$0xff] %v8437_v40  ;;  %v8440_v41 = vcombine.low %v3195_v30, %v3199_v31 }
 0x18c   :  { %2805 = vmatpush1.bf16.msra.mxu1 %v7600_v42  ;;  %2733 = vmatprep.subr.bf16.mxu0 %v7605_v43  ;;  %v7665_v42 = vld [vmem:[#allocation9 + $0x1f4] ss:$56 sps:$4 sm:$0xff]   ;;  %v8443_v43 = vcombine.high %v3203_v37, %v3207_v39 }
 0x18d   :  { %2815 = vmatprep.subr.bf16.mxu1 %v7608_v44  ;;  %10388 = vst [vmem:[#allocation33_spill] sm:$0xff] %v8440_v41  ;;  %v3211_v44 = vld [vmem:[#allocation12 + $0x140] sm:$0xff] }
 0x18e   :  { %2725 = vmatmul.mubr.bf16.vlgmr.msra.gmra.mrb[8].mxu0 %v8387_v27  ;;  %10389 = vst [vmem:[#allocation34_spill] sm:$0xff] %v8443_v43 }
 0x18f   :  { %2807 = vmatmul.mubr.bf16.vlgmr.msra.gmra.mrb[8].mxu1 %v8387_v27  ;;  %2734 = vmatpush1.bf16.msra.mxu0 %v7603_v45  ;;  %v3215_v45 = vld [vmem:[#allocation12 + $0x160] sm:$0xff] }
 0x190   :  { %2816 = vmatpush1.bf16.msra.mxu1 %v7606_v46  ;;  %2735 = vmatprep.subr.bf16.mxu0 %v7611_v47  ;;  %v10091_v46 = vsub.s32 0, %v8437_v40  ;;  %v10089_v47 = vsub.s32 2, %v8437_v40 }
 0x191   :  { %2817 = vmatprep.subr.bf16.mxu1 %v7614_v48  ;;  %2765 = vmatprep.mubr.bf16.mxu0 %v10092_v34  ;;  %v2949_v48 = vunpack.c.l.s4 %v8126_v38 }
 0x192   :  { %2847 = vmatprep.mubr.bf16.mxu1 %v10092_v34 }
 0x193   :  { %2736 = vmatpush1.bf16.msra.mxu0 %v7609_v49  ;;  %v7663_v49 = vld [vmem:[#allocation9 + $0x1f0] ss:$56 sps:$4 sm:$0xff]  }
 0x194   :  { %2818 = vmatpush1.bf16.msra.mxu1 %v7612_v50  ;;  %2737 = vmatprep.subr.bf16.mxu0 %v7617_v51  ;;  %v8448_v50 = vcombine.low %v3203_v37, %v3207_v39  ;;  %v8450_v51 = vld [vmem:[#allocation11] sm:$0xff] }
 0x195   :  { %2819 = vmatprep.subr.bf16.mxu1 %v7620_v52  ;;  %v10090_v52 = vsub.s32 1, %v8437_v40 }
 0x196   :  { %10390 = vst [vmem:[#allocation35_spill] sm:$0xff] %v8448_v50 }
 0x197   :  { %2738 = vmatpush1.bf16.msra.mxu0 %v7615_v53  ;;  %v10088_v53 = vsub.s32 3, %v8437_v40 }
 0x198   :  { %2820 = vmatpush1.bf16.msra.mxu1 %v7618_v54  ;;  %2739 = vmatprep.subr.bf16.mxu0 %v7623_v55  ;;  %v7668_v54 = vld [vmem:[#allocation9 + $0x264] ss:$56 sps:$4 sm:$0xff]   ;;  %v8455_v55 = vcombine.high %v3211_v44, %v3215_v45 }
 0x199   :  { %2821 = vmatprep.subr.bf16.mxu1 %v7626_v56  ;;  %v3219_v56 = vld [vmem:[#allocation12 + $0x180] sm:$0xff] }
 0x19a   :  { %10391 = vst [vmem:[#allocation36_spill] sm:$0xff] %v8455_v55 }
 0x19b   :  { %2740 = vmatpush1.bf16.msra.mxu0 %v7621_v57  ;;  %v3223_v57 = vld [vmem:[#allocation12 + $0x1a0] sm:$0xff] }
 0x19c   :  { %2822 = vmatpush1.bf16.msra.mxu1 %v7624_v58  ;;  %2741 = vmatprep.subr.bf16.mxu0 %v7629_v59  ;;  %v601_v58 = vrot.slane %v8450_v51, %v10091_v46  ;;  %v609_v59 = vrot.slane %v8450_v51, %v10089_v47  ;;  %v3208_v47 = vld [vmem:[#allocation12 + $0x128] sm:$0xff] }
 0x19d   :  { %2823 = vmatprep.subr.bf16.mxu1 %v7632_v60  ;;  %v2950_v60 = vunpack.c.0.s8 %v2949_v48  ;;  %v8486_v48 = vcombine.high %v3235_v22, %v3239_v23 }
 0x19f   :  { %2742 = vmatpush1.bf16.msra.mxu0 %v7627_v61  ;;  %v605_v61 = vrot.slane %v8450_v51, %v10090_v52  ;;  %v8476_v11 = vsub.s32 %v2950_v60, %v8437_v40  ;;  %10397 = vst [vmem:[#allocation42_spill] sm:$0xff] %v8486_v48  ;;  %v7708_v52 = vld [vmem:[#allocation9 + $0x880] ss:$56 sps:$4 sm:$0xff]  }
 0x1a0   :  { %2824 = vmatpush1.bf16.msra.mxu1 %v7630_v63  ;;  %2743 = vmatprep.subr.bf16.mxu0 %v7635_v0  ;;  %v613_v63 = vrot.slane %v8450_v51, %v10088_v53  ;;  %v7666_v0 = vld [vmem:[#allocation9 + $0x260] ss:$56 sps:$4 sm:$0xff]   ;;  %v7705_v53 = vld [vmem:[#allocation9 + $0x810] ss:$56 sps:$4 sm:$0xff]  }
 0x1a1   :  { %2825 = vmatprep.subr.bf16.mxu1 %v7638_v1  ;;  %v8470_v1 = vcombine.low %v3211_v44, %v3215_v45 }
 0x1a3   :  { %2744 = vmatpush1.bf16.msra.mxu0 %v7633_v2  ;;  %10392 = vst [vmem:[#allocation37_spill] sm:$0xff] %v8470_v1  ;;  %v7671_v2 = vld [vmem:[#allocation9 + $0x2d4] ss:$56 sps:$4 sm:$0xff]  }
 0x1a4   :  { %2826 = vmatpush1.bf16.msra.mxu1 %v7636_v3  ;;  %2745 = vmatprep.subr.bf16.mxu0 %v7641_v4  ;;  %v8473_v3 = vcombine.high %v3219_v56, %v3223_v57 }
 0x1a5   :  { %2827 = vmatprep.subr.bf16.mxu1 %v7644_v5 }
 0x1a6   :  { %10393 = vst [vmem:[#allocation38_spill] sm:$0xff] %v8473_v3 }
 0x1a7   :  { %2746 = vmatpush1.bf16.msra.mxu0 %v7639_v6  ;;  %v3227_v6 = vld [vmem:[#allocation12 + $0x1c0] sm:$0xff] }
 0x1a8   :  { %2828 = vmatpush1.bf16.msra.mxu1 %v7642_v7  ;;  %2747 = vmatprep.subr.bf16.mxu0 %v7647_v8  ;;  %v3231_v7 = vld [vmem:[#allocation12 + $0x1e0] sm:$0xff] }
 0x1a9   :  { %2829 = vmatprep.subr.bf16.mxu1 %v7650_v9  ;;  %v8484_v38 = vcombine.low %v3227_v6, %v3231_v7 }
 0x1ab   :  { %2748 = vmatpush1.bf16.msra.mxu0 %v7645_v12  ;;  %10396 = vst [vmem:[#allocation41_spill] sm:$0xff] %v8484_v38 }
 0x1ac   :  { %2830 = vmatpush1.bf16.msra.mxu1 %v7648_v13  ;;  %2856 = vmatprep.subr.bf16.mxu0 %v7653_v14 }
 0x1ad   :  { %3939 = vmatprep.subr.bf16.mxu1 %v8413_v15 }
 0x1ae   :  { %2766 = vmatmul.mubr.bf16.vlgmr.msra.gmra.mrb[8].mxu0 %v8395_v62 }
 0x1af   :  { %2848 = vmatmul.mubr.bf16.vlgmr.msra.gmra.mrb[8].mxu1 %v8395_v62  ;;  %2857 = vmatpush1.bf16.msra.mxu0 %v7651_v18  ;;  %v7669_v18 = vld [vmem:[#allocation9 + $0x2d0] ss:$56 sps:$4 sm:$0xff]  }
 0x1b0   :  { %3940 = vmatpush1.bf16.msra.mxu1 %v8415_v19  ;;  %2858 = vmatprep.subr.bf16.mxu0 %v7656_v20  ;;  %v8479_v20 = vcombine.low %v3219_v56, %v3223_v57 }
 0x1b1   :  { %3941 = vmatprep.subr.bf16.mxu1 %v8418_v21  ;;  %3971 = vmatprep.mubr.bf16.mxu1 %v10092_v34 }
 0x1b2   :  { %2888 = vmatprep.mubr.bf16.mxu0 %v8385_v25  ;;  %v7660_v25 = vld [vmem:[#allocation9 + $0x180] ss:$56 sps:$4 sm:$0xff]   ;;  %10394 = vst [vmem:[#allocation39_spill] sm:$0xff] %v8479_v20 }
 0x1b3   :  { %2859 = vmatpush1.bf16.msra.mxu0 %v7654_v24 }
 0x1b4   :  { %3942 = vmatpush1.bf16.msra.mxu1 %v8423_v26  ;;  %2860 = vmatprep.subr.bf16.mxu0 %v7659_v28 }
 0x1b5   :  { %3943 = vmatprep.subr.bf16.mxu1 %v8426_v29 }
 0x1b7   :  { %2861 = vmatpush1.bf16.msra.mxu0 %v7657_v32  ;;  %v8482_v32 = vcombine.high %v3227_v6, %v3231_v7  ;;  %v7677_v6 = vld [vmem:[#allocation9 + $0x3b4] ss:$56 sps:$4 sm:$0xff]  }
 0x1b8   :  { %3944 = vmatpush1.bf16.msra.mxu1 %v8431_v33  ;;  %2862 = vmatprep.subr.bf16.mxu0 %v7662_v35 }
 0x1b9   :  { %3945 = vmatprep.subr.bf16.mxu1 %v8434_v36  ;;  %10395 = vst [vmem:[#allocation40_spill] sm:$0xff] %v8482_v32 }
 0x1bb   :  { %2863 = vmatpush1.bf16.msra.mxu0 %v7660_v25 }
 0x1bc   :  { %3946 = vmatpush1.bf16.msra.mxu1 %v8440_v41  ;;  %2864 = vmatprep.subr.bf16.mxu0 %v7665_v42  ;;  %v7674_v42 = vld [vmem:[#allocation9 + $0x344] ss:$56 sps:$4 sm:$0xff]  }
 0x1bd   :  { %3947 = vmatprep.subr.bf16.mxu1 %v8443_v43 }
 0x1bf   :  { %2865 = vmatpush1.bf16.msra.mxu0 %v7663_v49 }
 0x1c0   :  { %3948 = vmatpush1.bf16.msra.mxu1 %v8448_v50  ;;  %2866 = vmatprep.subr.bf16.mxu0 %v7668_v54 }
 0x1c1   :  { %3949 = vmatprep.subr.bf16.mxu1 %v8455_v55  ;;  %v2425_v4 = vpop.f32.mrb[0].mxu0 }
 0x1c2   :  { %v2511_v5 = vpop.f32.mrb[0].mxu1  ;;  %v7147_v8 = vadd.f32 %v2425_v4, %v601_v58  ;;  %v2427_v10 = vpop.f32.mrb[1].mxu0  ;;  %v7699_v4 = vld [vmem:[#allocation9 + $0x730] ss:$56 sps:$4 sm:$0xff]  }
 0x1c3   :  { %v7151_v9 = vadd.f32 %v2511_v5, %v609_v59  ;;  %v2513_v12 = vpop.f32.mrb[1].mxu1  ;;  %v7148_v13 = vadd.f32 %v2427_v10, %v605_v61  ;;  %v2429_v16 = vpop.f32.mrb[2].mxu0  ;;  %2867 = vmatpush1.bf16.msra.mxu0 %v7666_v0  ;;  %v7702_v0 = vld [vmem:[#allocation9 + $0x7a0] ss:$56 sps:$4 sm:$0xff]  }
 0x1c4   :  { %v7152_v14 = vadd.f32 %v2513_v12, %v613_v63  ;;  %v2515_v17 = vpop.f32.mrb[2].mxu1  ;;  %3950 = vmatpush1.bf16.msra.mxu1 %v8470_v1  ;;  %v7149_v24 = vadd.f32 %v2429_v16, %v601_v58  ;;  %v2431_v30 = vpop.f32.mrb[3].mxu0  ;;  %2868 = vmatprep.subr.bf16.mxu0 %v7671_v2  ;;  %v7672_v58 = vld [vmem:[#allocation9 + $0x340] ss:$56 sps:$4 sm:$0xff]   ;;  %v3243_v12 = vld [vmem:[#allocation12 + $0x240] sm:$0xff]  ;;  %v8522_v16 = vcombine.low %v3235_v22, %v3239_v23 }
 0x1c5   :  { %v7153_v28 = vadd.f32 %v2515_v17, %v609_v59  ;;  %v2517_v31 = vpop.f32.mrb[3].mxu1  ;;  %3951 = vmatprep.subr.bf16.mxu1 %v8473_v3  ;;  %v2946_v35 = vcombine.low %v7147_v8, %v7148_v13  ;;  %v2991_v37 = vcombine.high %v7147_v8, %v7148_v13  ;;  %v7150_v44 = vadd.f32 %v2431_v30, %v605_v61  ;;  %v3247_v13 = vld [vmem:[#allocation12 + $0x260] sm:$0xff]  ;;  %v7680_v30 = vld [vmem:[#allocation9 + $0x424] ss:$56 sps:$4 sm:$0xff]   ;;  %v7696_v17 = vld [vmem:[#allocation9 + $0x6c0] ss:$56 sps:$4 sm:$0xff]  }
 0x1c6   :  { %v2947_v39 = vcombine.low %v7151_v9, %v7152_v14  ;;  %v2992_v25 = vcombine.high %v7151_v9, %v7152_v14  ;;  %v7154_v45 = vadd.f32 %v2517_v31, %v613_v63  ;;  %v7675_v14 = vld [vmem:[#allocation9 + $0x3b0] ss:$56 sps:$4 sm:$0xff]   ;;  %10406 = vst [vmem:[#allocation51_spill] sm:$0xff] %v8522_v16  ;;  %v8534_v22 = vcombine.high %v3243_v12, %v3247_v13 }
 0x1c7   :  { %v8489_v49 = vrot.slane %v2946_v35, %v8476_v11  ;;  %v8492_v54 = vrot.slane %v2991_v37, %v8476_v11  ;;  %2869 = vmatpush1.bf16.msra.mxu0 %v7669_v18  ;;  %v3045_v59 = vcombine.low %v7149_v24, %v7150_v44  ;;  %v3091_v60 = vcombine.high %v7149_v24, %v7150_v44  ;;  %v3251_v23 = vld [vmem:[#allocation12 + $0x280] sm:$0xff]  ;;  %v7678_v35 = vld [vmem:[#allocation9 + $0x420] ss:$56 sps:$4 sm:$0xff]  }
 0x1c8   :  { %v8495_v56 = vrot.slane %v2947_v39, %v8476_v11  ;;  %v8498_v57 = vrot.slane %v2992_v25, %v8476_v11  ;;  %v3046_v61 = vcombine.low %v7153_v28, %v7154_v45  ;;  %v3092_v63 = vcombine.high %v7153_v28, %v7154_v45  ;;  %3952 = vmatpush1.bf16.msra.mxu1 %v8479_v20  ;;  %v3255_v31 = vld [vmem:[#allocation12 + $0x2a0] sm:$0xff] }
 0x1c9   :  { %10398 = vst [vmem:[#allocation43_spill] sm:$0xff] %v8489_v49  ;;  %10399 = vst [vmem:[#allocation44_spill] sm:$0xff] %v8492_v54  ;;  %2870 = vmatprep.subr.bf16.mxu0 %v7674_v42  ;;  %v8510_v7 = vrot.slane %v3045_v59, %v8476_v11  ;;  %v8513_v8 = vrot.slane %v3091_v60, %v8476_v11  ;;  %3953 = vmatprep.subr.bf16.mxu1 %v8482_v32  ;;  %v7683_v39 = vld [vmem:[#allocation9 + $0x494] ss:$56 sps:$4 sm:$0xff]   ;;  %v7681_v45 = vld [vmem:[#allocation9 + $0x490] ss:$56 sps:$4 sm:$0xff]  }
 0x1ca   :  { %10400 = vst [vmem:[#allocation45_spill] sm:$0xff] %v8495_v56  ;;  %10401 = vst [vmem:[#allocation46_spill] sm:$0xff] %v8498_v57  ;;  %v8516_v9 = vrot.slane %v3046_v61, %v8476_v11  ;;  %v8519_v10 = vrot.slane %v3092_v63, %v8476_v11  ;;  %v8537_v37 = vcombine.low %v3243_v12, %v3247_v13  ;;  %v3259_v42 = vld [vmem:[#allocation12 + $0x2c0] sm:$0xff]  ;;  %v7686_v59 = vld [vmem:[#allocation9 + $0x504] ss:$56 sps:$4 sm:$0xff]  }
 0x1cb   :  { %10402 = vst [vmem:[#allocation47_spill] sm:$0xff] %v8510_v7  ;;  %10403 = vst [vmem:[#allocation48_spill] sm:$0xff] %v8513_v8  ;;  %2871 = vmatpush1.bf16.msra.mxu0 %v7672_v58  ;;  %v8540_v25 = vcombine.high %v3251_v23, %v3255_v31  ;;  %v3263_v44 = vld [vmem:[#allocation12 + $0x2e0] sm:$0xff]  ;;  %v8543_v58 = vcombine.low %v3251_v23, %v3255_v31  ;;  %v7714_v8 = vld [vmem:[#allocation9 + $0x960] ss:$56 sps:$4 sm:$0xff]  }
 0x1cc   :  { %10404 = vst [vmem:[#allocation49_spill] sm:$0xff] %v8516_v9  ;;  %10405 = vst [vmem:[#allocation50_spill] sm:$0xff] %v8519_v10  ;;  %3954 = vmatpush1.bf16.msra.mxu1 %v8484_v38  ;;  %2872 = vmatprep.subr.bf16.mxu0 %v7677_v6  ;;  %v8546_v60 = vcombine.high %v3259_v42, %v3263_v44  ;;  %v3267_v61 = vld [vmem:[#allocation12 + $0x300] sm:$0xff]  ;;  %v7684_v6 = vld [vmem:[#allocation9 + $0x500] ss:$56 sps:$4 sm:$0xff]   ;;  %v8549_v12 = vcombine.low %v3259_v42, %v3263_v44 }
 0x1cd   :  { %3955 = vmatprep.subr.bf16.mxu1 %v8486_v48  ;;  %10407 = vst [vmem:[#allocation52_spill] sm:$0xff] %v8534_v22  ;;  %10408 = vst [vmem:[#allocation53_spill] sm:$0xff] %v8537_v37  ;;  %v3271_v63 = vld [vmem:[#allocation12 + $0x320] sm:$0xff]  ;;  %v3236_v54 = vld [vmem:[#allocation12 + $0x208] sm:$0xff] }
 0x1ce   :  { %10409 = vst [vmem:[#allocation54_spill] sm:$0xff] %v8540_v25  ;;  %10410 = vst [vmem:[#allocation55_spill] sm:$0xff] %v8543_v58  ;;  %v7689_v13 = vld [vmem:[#allocation9 + $0x574] ss:$56 sps:$4 sm:$0xff]   ;;  %v7687_v31 = vld [vmem:[#allocation9 + $0x570] ss:$56 sps:$4 sm:$0xff]  }
 0x1cf   :  { %2873 = vmatpush1.bf16.msra.mxu0 %v7675_v14  ;;  %10411 = vst [vmem:[#allocation56_spill] sm:$0xff] %v8546_v60  ;;  %10412 = vst [vmem:[#allocation57_spill] sm:$0xff] %v8549_v12  ;;  %v8552_v14 = vcombine.high %v3267_v61, %v3271_v63  ;;  %v3279_v23 = vld [vmem:[#allocation12 + $0x360] sm:$0xff]  ;;  %v3240_v56 = vld [vmem:[#allocation12 + $0x228] sm:$0xff] }
 0x1d0   :  { %3956 = vmatpush1.bf16.msra.mxu1 %v8522_v16  ;;  %2874 = vmatprep.subr.bf16.mxu0 %v7680_v30  ;;  %v3275_v30 = vld [vmem:[#allocation12 + $0x340] sm:$0xff]  ;;  %v7720_v49 = vld [vmem:[#allocation9 + $0xa40] ss:$56 sps:$4 sm:$0xff]  }
 0x1d1   :  { %3957 = vmatprep.subr.bf16.mxu1 %v8534_v22  ;;  %10413 = vst [vmem:[#allocation58_spill] sm:$0xff] %v8552_v14  ;;  %v3283_v42 = vld [vmem:[#allocation12 + $0x380] sm:$0xff]  ;;  %v8561_v28 = vcombine.low %v3275_v30, %v3279_v23 }
 0x1d2   :  { %v3287_v44 = vld [vmem:[#allocation12 + $0x3a0] sm:$0xff] }
 0x1d3   :  { %2875 = vmatpush1.bf16.msra.mxu0 %v7678_v35  ;;  %v8555_v35 = vcombine.low %v3267_v61, %v3271_v63  ;;  %10416 = vst [vmem:[#allocation61_spill] sm:$0xff] %v8561_v28  ;;  %v3291_v61 = vld [vmem:[#allocation12 + $0x3c0] sm:$0xff]  ;;  %v8567_v18 = vcombine.low %v3283_v42, %v3287_v44 }
 0x1d4   :  { %3958 = vmatpush1.bf16.msra.mxu1 %v8537_v37  ;;  %2876 = vmatprep.subr.bf16.mxu0 %v7683_v39  ;;  %v7692_v39 = vld [vmem:[#allocation9 + $0x5e4] ss:$56 sps:$4 sm:$0xff]   ;;  %v3295_v63 = vld [vmem:[#allocation12 + $0x3e0] sm:$0xff] }
 0x1d5   :  { %3959 = vmatprep.subr.bf16.mxu1 %v8540_v25  ;;  %10414 = vst [vmem:[#allocation59_spill] sm:$0xff] %v8555_v35  ;;  %v7693_v24 = vld [vmem:[#allocation9 + $0x650] ss:$56 sps:$4 sm:$0xff]   ;;  %10418 = vst [vmem:[#allocation63_spill] sm:$0xff] %v8567_v18  ;;  %v8573_v5 = vcombine.low %v3291_v61, %v3295_v63 }
 0x1d6   :  { %v7717_v7 = vld [vmem:[#allocation9 + $0x9d0] ss:$56 sps:$4 sm:$0xff]  }
 0x1d7   :  { %2877 = vmatpush1.bf16.msra.mxu0 %v7681_v45  ;;  %v8558_v45 = vcombine.high %v3275_v30, %v3279_v23  ;;  %v3172_v30 = vld [vmem:[#allocation12 + $0x8] sm:$0xff]  ;;  %10420 = vst [vmem:[#allocation65_spill] sm:$0xff] %v8573_v5 }
 0x1d8   :  { %3960 = vmatpush1.bf16.msra.mxu1 %v8543_v58  ;;  %2878 = vmatprep.subr.bf16.mxu0 %v7686_v59  ;;  %v7690_v59 = vld [vmem:[#allocation9 + $0x5e0] ss:$56 sps:$4 sm:$0xff]  }
 0x1d9   :  { %3961 = vmatprep.subr.bf16.mxu1 %v8546_v60  ;;  %10415 = vst [vmem:[#allocation60_spill] sm:$0xff] %v8558_v45  ;;  %v3176_v23 = vld [vmem:[#allocation12 + $0x28] sm:$0xff] }
 0x1da   :  { %v8579_v2 = vcombine.low %v3172_v30, %v3176_v23 }
 0x1db   :  { %2879 = vmatpush1.bf16.msra.mxu0 %v7684_v6  ;;  %v7695_v6 = vld [vmem:[#allocation9 + $0x654] ss:$56 sps:$4 sm:$0xff]  }
 0x1dc   :  { %3962 = vmatpush1.bf16.msra.mxu1 %v8549_v12  ;;  %2880 = vmatprep.subr.bf16.mxu0 %v7689_v13  ;;  %v8564_v13 = vcombine.high %v3283_v42, %v3287_v44  ;;  %v3180_v42 = vld [vmem:[#allocation12 + $0x48] sm:$0xff]  ;;  %10422 = vst [vmem:[#allocation67_spill] sm:$0xff] %v8579_v2 }
 0x1dd   :  { %3963 = vmatprep.subr.bf16.mxu1 %v8552_v14  ;;  %v3184_v44 = vld [vmem:[#allocation12 + $0x68] sm:$0xff] }
 0x1de   :  { %10417 = vst [vmem:[#allocation62_spill] sm:$0xff] %v8564_v13 }
 0x1df   :  { %2881 = vmatpush1.bf16.msra.mxu0 %v7687_v31  ;;  %v7698_v31 = vld [vmem:[#allocation9 + $0x6c4] ss:$56 sps:$4 sm:$0xff]  }
 0x1e0   :  { %3964 = vmatpush1.bf16.msra.mxu1 %v8555_v35  ;;  %2882 = vmatprep.subr.bf16.mxu0 %v7692_v39  ;;  %v8570_v39 = vcombine.high %v3291_v61, %v3295_v63  ;;  %v3188_v61 = vld [vmem:[#allocation12 + $0x88] sm:$0xff] }
 0x1e1   :  { %3965 = vmatprep.subr.bf16.mxu1 %v8558_v45  ;;  %v3192_v63 = vld [vmem:[#allocation12 + $0xa8] sm:$0xff] }
 0x1e2   :  { %10419 = vst [vmem:[#allocation64_spill] sm:$0xff] %v8570_v39 }
 0x1e3   :  { %2883 = vmatpush1.bf16.msra.mxu0 %v7690_v59  ;;  %v7701_v59 = vld [vmem:[#allocation9 + $0x734] ss:$56 sps:$4 sm:$0xff]  }
 0x1e4   :  { %3966 = vmatpush1.bf16.msra.mxu1 %v8561_v28  ;;  %2884 = vmatprep.subr.bf16.mxu0 %v7695_v6  ;;  %v8576_v6 = vcombine.high %v3172_v30, %v3176_v23  ;;  %v7707_v30 = vld [vmem:[#allocation9 + $0x814] ss:$56 sps:$4 sm:$0xff]   ;;  %v8590_v23 = vcombine.high %v3188_v61, %v3192_v63 }
 0x1e5   :  { %3967 = vmatprep.subr.bf16.mxu1 %v8564_v13  ;;  %v3272_v13 = vld [vmem:[#allocation12 + $0x328] sm:$0xff] }
 0x1e6   :  { %10421 = vst [vmem:[#allocation66_spill] sm:$0xff] %v8576_v6  ;;  %10425 = vst [vmem:[#allocation70_spill] sm:$0xff] %v8590_v23  ;;  %v3292_v28 = vld [vmem:[#allocation12 + $0x3c8] sm:$0xff] }
 0x1e7   :  { %2885 = vmatpush1.bf16.msra.mxu0 %v7693_v24  ;;  %v7704_v24 = vld [vmem:[#allocation9 + $0x7a4] ss:$56 sps:$4 sm:$0xff]  }
 0x1e8   :  { %3968 = vmatpush1.bf16.msra.mxu1 %v8567_v18  ;;  %2886 = vmatprep.subr.bf16.mxu0 %v7698_v31  ;;  %v8582_v31 = vcombine.high %v3180_v42, %v3184_v44  ;;  %v3248_v18 = vld [vmem:[#allocation12 + $0x268] sm:$0xff] }
 0x1e9   :  { %3969 = vmatprep.subr.bf16.mxu1 %v8570_v39  ;;  %v3244_v39 = vld [vmem:[#allocation12 + $0x248] sm:$0xff] }
 0x1ea   :  { %10423 = vst [vmem:[#allocation68_spill] sm:$0xff] %v8582_v31 }
 0x1eb   :  { %2887 = vmatpush1.bf16.msra.mxu0 %v7696_v17  ;;  %v8587_v17 = vcombine.low %v3180_v42, %v3184_v44  ;;  %v7710_v42 = vld [vmem:[#allocation9 + $0x884] ss:$56 sps:$4 sm:$0xff]  }
 0x1ec   :  { %3970 = vmatpush1.bf16.msra.mxu1 %v8573_v5  ;;  %2897 = vmatprep.subr.bf16.mxu0 %v7701_v59  ;;  %v3196_v59 = vld [vmem:[#allocation12 + $0xc8] sm:$0xff] }
 0x1ed   :  { %3980 = vmatprep.subr.bf16.mxu1 %v8576_v6  ;;  %10424 = vst [vmem:[#allocation69_spill] sm:$0xff] %v8587_v17 }
 0x1ee   :  { %2889 = vmatmul.mubr.bf16.vlgmr.msra.gmra.mrb[12].mxu0 %v8387_v27  ;;  %v3200_v27 = vld [vmem:[#allocation12 + $0xe8] sm:$0xff] }
 0x1ef   :  { %3972 = vmatmul.mubr.bf16.vlgmr.msra.gmra.mrb[12].mxu1 %v10092_v34  ;;  %2898 = vmatpush1.bf16.msra.mxu0 %v7699_v4  ;;  %v8595_v4 = vcombine.low %v3188_v61, %v3192_v63  ;;  %v8598_v44 = vcombine.high %v3196_v59, %v3200_v27  ;;  %v8601_v46 = vcombine.low %v3196_v59, %v3200_v27  ;;  %v3212_v61 = vld [vmem:[#allocation12 + $0x148] sm:$0xff] }
 0x1f0   :  { %3981 = vmatpush1.bf16.msra.mxu1 %v8579_v2  ;;  %2899 = vmatprep.subr.bf16.mxu0 %v7704_v24  ;;  %v3204_v24 = vld [vmem:[#allocation12 + $0x108] sm:$0xff] }
 0x1f1   :  { %3982 = vmatprep.subr.bf16.mxu1 %v8582_v31  ;;  %2929 = vmatprep.mubr.bf16.mxu0 %v10092_v34  ;;  %10426 = vst [vmem:[#allocation71_spill] sm:$0xff] %v8595_v4  ;;  %10427 = vst [vmem:[#allocation72_spill] sm:$0xff] %v8598_v44  ;;  %v3216_v63 = vld [vmem:[#allocation12 + $0x168] sm:$0xff]  ;;  %v8607_v10 = vcombine.low %v3204_v24, %v3208_v47 }
 0x1f2   :  { %4012 = vmatprep.mubr.bf16.mxu1 %v10092_v34  ;;  %10428 = vst [vmem:[#allocation73_spill] sm:$0xff] %v8601_v46  ;;  %v7711_v34 = vld [vmem:[#allocation9 + $0x8f0] ss:$56 sps:$4 sm:$0xff]   ;;  %v3220_v59 = vld [vmem:[#allocation12 + $0x188] sm:$0xff]  ;;  %v8613_v9 = vcombine.low %v3212_v61, %v3216_v63 }
 0x1f3   :  { %2900 = vmatpush1.bf16.msra.mxu0 %v7702_v0  ;;  %v7713_v0 = vld [vmem:[#allocation9 + $0x8f4] ss:$56 sps:$4 sm:$0xff]   ;;  %10430 = vst [vmem:[#allocation75_spill] sm:$0xff] %v8607_v10 }
 0x1f4   :  { %3983 = vmatpush1.bf16.msra.mxu1 %v8587_v17  ;;  %2901 = vmatprep.subr.bf16.mxu0 %v7707_v30  ;;  %v8604_v30 = vcombine.high %v3204_v24, %v3208_v47  ;;  %v3224_v27 = vld [vmem:[#allocation12 + $0x1a8] sm:$0xff]  ;;  %10432 = vst [vmem:[#allocation77_spill] sm:$0xff] %v8613_v9 }
 0x1f5   :  { %3984 = vmatprep.subr.bf16.mxu1 %v8590_v23  ;;  %v3228_v47 = vld [vmem:[#allocation12 + $0x1c8] sm:$0xff]  ;;  %v8619_v57 = vcombine.low %v3220_v59, %v3224_v27 }
 0x1f6   :  { %10429 = vst [vmem:[#allocation74_spill] sm:$0xff] %v8604_v30  ;;  %v3232_v24 = vld [vmem:[#allocation12 + $0x1e8] sm:$0xff] }
 0x1f7   :  { %2902 = vmatpush1.bf16.msra.mxu0 %v7705_v53  ;;  %v7716_v53 = vld [vmem:[#allocation9 + $0x964] ss:$56 sps:$4 sm:$0xff]   ;;  %10434 = vst [vmem:[#allocation79_spill] sm:$0xff] %v8619_v57 }
 0x1f8   :  { %3985 = vmatpush1.bf16.msra.mxu1 %v8595_v4  ;;  %2903 = vmatprep.subr.bf16.mxu0 %v7710_v42  ;;  %v8610_v42 = vcombine.high %v3212_v61, %v3216_v63  ;;  %v3173_v61 = vld [vmem:[#allocation12 + $0x10] sm:$0xff] }
 0x1f9   :  { %3986 = vmatprep.subr.bf16.mxu1 %v8598_v44  ;;  %v3177_v63 = vld [vmem:[#allocation12 + $0x30] sm:$0xff] }
 0x1fa   :  { %10431 = vst [vmem:[#allocation76_spill] sm:$0xff] %v8610_v42  ;;  %v8627_v5 = vcombine.high %v3173_v61, %v3177_v63 }
 0x1fb   :  { %2904 = vmatpush1.bf16.msra.mxu0 %v7708_v52  ;;  %v7719_v52 = vld [vmem:[#allocation9 + $0x9d4] ss:$56 sps:$4 sm:$0xff]  }
 0x1fc   :  { %3987 = vmatpush1.bf16.msra.mxu1 %v8601_v46  ;;  %2905 = vmatprep.subr.bf16.mxu0 %v7713_v0  ;;  %v8616_v0 = vcombine.high %v3220_v59, %v3224_v27  ;;  %10437 = vst [vmem:[#allocation82_spill] sm:$0xff] %v8627_v5  ;;  %v8630_v59 = vcombine.high %v3236_v54, %v3240_v56  ;;  %v3181_v27 = vld [vmem:[#allocation12 + $0x50] sm:$0xff] }
 0x1fd   :  { %3988 = vmatprep.subr.bf16.mxu1 %v8604_v30 }
 0x1fe   :  { %10433 = vst [vmem:[#allocation78_spill] sm:$0xff] %v8616_v0  ;;  %10438 = vst [vmem:[#allocation83_spill] sm:$0xff] %v8630_v59 }
 0x1ff   :  { %2906 = vmatpush1.bf16.msra.mxu0 %v7711_v34  ;;  %v7722_v34 = vld [vmem:[#allocation9 + $0xa44] ss:$56 sps:$4 sm:$0xff]  }
 0x200   :  { %3989 = vmatpush1.bf16.msra.mxu1 %v8607_v10  ;;  %2907 = vmatprep.subr.bf16.mxu0 %v7716_v53  ;;  %v8622_v53 = vcombine.high %v3228_v47, %v3232_v24 }
 0x201   :  { %3990 = vmatprep.subr.bf16.mxu1 %v8610_v42 }
 0x202   :  { %10435 = vst [vmem:[#allocation80_spill] sm:$0xff] %v8622_v53 }
 0x203   :  { %2908 = vmatpush1.bf16.msra.mxu0 %v7714_v8  ;;  %v8625_v8 = vcombine.low %v3228_v47, %v3232_v24  ;;  %v8641_v24 = vcombine.high %v3244_v39, %v3248_v18 }
 0x204   :  { %3991 = vmatpush1.bf16.msra.mxu1 %v8613_v9  ;;  %2909 = vmatprep.subr.bf16.mxu0 %v7719_v52  ;;  %v3185_v52 = vld [vmem:[#allocation12 + $0x70] sm:$0xff]  ;;  %v10460_v9 = vsub.s32 4, %v8437_v40 }
 0x205   :  { %3992 = vmatprep.subr.bf16.mxu1 %v8616_v0  ;;  %10436 = vst [vmem:[#allocation81_spill] sm:$0xff] %v8625_v8  ;;  %v8632_v0 = vcombine.low %v3173_v61, %v3177_v63  ;;  %v8638_v47 = vcombine.high %v3181_v27, %v3185_v52  ;;  %10442 = vst [vmem:[#allocation87_spill] sm:$0xff] %v8641_v24  ;;  %v8645_v61 = vcombine.low %v3181_v27, %v3185_v52 }
 0x207   :  { %2910 = vmatpush1.bf16.msra.mxu0 %v7717_v7  ;;  %10439 = vst [vmem:[#allocation84_spill] sm:$0xff] %v8632_v0  ;;  %v8635_v7 = vcombine.low %v3236_v54, %v3240_v56  ;;  %10441 = vst [vmem:[#allocation86_spill] sm:$0xff] %v8638_v47  ;;  %v10444_v54 = vmov 0   ;;  %v8649_v56 = vcombine.low %v3244_v39, %v3248_v18 }
 0x208   :  { %3993 = vmatpush1.bf16.msra.mxu1 %v8619_v57  ;;  %2911 = vmatprep.subr.bf16.mxu0 %v7722_v34  ;;  %v3189_v34 = vld [vmem:[#allocation12 + $0x90] sm:$0xff]  ;;  %v3252_v57 = vld [vmem:[#allocation12 + $0x288] sm:$0xff]  ;;  %10443 = vst [vmem:[#allocation88_spill] sm:$0xff] %v8645_v61 }
 0x209   :  { %3994 = vmatprep.subr.bf16.mxu1 %v8622_v53  ;;  %10440 = vst [vmem:[#allocation85_spill] sm:$0xff] %v8635_v7  ;;  %v3193_v53 = vld [vmem:[#allocation12 + $0xb0] sm:$0xff]  ;;  %10445 = vst [vmem:[#allocation89_spill] sm:$0xff] %v8649_v56 }
 0x20a   :  { %v8652_v63 = vcombine.high %v3189_v34, %v3193_v53  ;;  %v8658_v27 = vcombine.low %v3189_v34, %v3193_v53 }
 0x20b   :  { %2912 = vmatpush1.bf16.msra.mxu0 %v7720_v49  ;;  %v3256_v49 = vld [vmem:[#allocation12 + $0x2a8] sm:$0xff] }
 0x20c   :  { %3995 = vmatpush1.bf16.msra.mxu1 %v8625_v8  ;;  %4021 = vmatprep.subr.bf16.mxu0 %v8627_v5  ;;  %10446 = vst [vmem:[#allocation90_spill] sm:$0xff] %v8652_v63  ;;  %v3201_v5 = vld [vmem:[#allocation12 + $0xf0] sm:$0xff]  ;;  %v3260_v8 = vld [vmem:[#allocation12 + $0x2c8] sm:$0xff]  ;;  %10448 = vst [vmem:[#allocation92_spill] sm:$0xff] %v8658_v27  ;;  %v8661_v18 = vcombine.low %v3252_v57, %v3256_v49 }
 0x20d   :  { %3996 = vmatprep.subr.bf16.mxu1 %v8630_v59  ;;  %v8655_v59 = vcombine.high %v3252_v57, %v3256_v49 }
 0x20e   :  { %2930 = vmatmul.mubr.bf16.vlgmr.msra.gmra.mrb[12].mxu0 %v8395_v62  ;;  %v3197_v62 = vld [vmem:[#allocation12 + $0xd0] sm:$0xff]  ;;  %10449 = vst [vmem:[#allocation93_spill] sm:$0xff] %v8661_v18 }
 0x20f   :  { %4022 = vmatpush1.bf16.msra.mxu0 %v8632_v0  ;;  %4053 = vmatprep.mubr.bf16.mxu0 %v10444_v54  ;;  %10447 = vst [vmem:[#allocation91_spill] sm:$0xff] %v8655_v59  ;;  %v3264_v0 = vld [vmem:[#allocation12 + $0x2e8] sm:$0xff]  ;;  %v8664_v39 = vcombine.high %v3197_v62, %v3201_v5  ;;  %v8670_v53 = vcombine.low %v3197_v62, %v3201_v5 }
 0x210   :  { %3997 = vmatpush1.bf16.msra.mxu1 %v8635_v7  ;;  %4023 = vmatprep.subr.bf16.mxu0 %v8638_v47  ;;  %v8667_v52 = vcombine.high %v3260_v8, %v3264_v0  ;;  %v3205_v47 = vld [vmem:[#allocation12 + $0x110] sm:$0xff]  ;;  %v3268_v7 = vld [vmem:[#allocation12 + $0x308] sm:$0xff]  ;;  %v8673_v57 = vcombine.low %v3260_v8, %v3264_v0  ;;  %v628_v0 = vsub.s32 7, %v8437_v40 }
 0x211   :  { %3998 = vmatprep.subr.bf16.mxu1 %v8641_v24  ;;  %10450 = vst [vmem:[#allocation94_spill] sm:$0xff] %v8664_v39  ;;  %v3209_v24 = vld [vmem:[#allocation12 + $0x130] sm:$0xff]  ;;  %10452 = vst [vmem:[#allocation96_spill] sm:$0xff] %v8670_v53  ;;  %v8679_v49 = vcombine.high %v3268_v7, %v3272_v13  ;;  %v3276_v5 = vld [vmem:[#allocation12 + $0x348] sm:$0xff] }
 0x212   :  { %10451 = vst [vmem:[#allocation95_spill] sm:$0xff] %v8667_v52  ;;  %10453 = vst [vmem:[#allocation97_spill] sm:$0xff] %v8673_v57  ;;  %v8676_v34 = vcombine.high %v3205_v47, %v3209_v24  ;;  %v3280_v62 = vld [vmem:[#allocation12 + $0x368] sm:$0xff]  ;;  %v8686_v8 = vcombine.low %v3205_v47, %v3209_v24 }
 0x213   :  { %4024 = vmatpush1.bf16.msra.mxu0 %v8645_v61  ;;  %10455 = vst [vmem:[#allocation99_spill] sm:$0xff] %v8679_v49  ;;  %v3217_v61 = vld [vmem:[#allocation12 + $0x170] sm:$0xff]  ;;  %v3284_v24 = vld [vmem:[#allocation12 + $0x388] sm:$0xff]  ;;  %v8709_v45 = vcombine.low %v3276_v5, %v3280_v62 }
 0x214   :  { %3999 = vmatpush1.bf16.msra.mxu1 %v8649_v56  ;;  %4025 = vmatprep.subr.bf16.mxu0 %v8652_v63  ;;  %10454 = vst [vmem:[#allocation98_spill] sm:$0xff] %v8676_v34  ;;  %v3213_v63 = vld [vmem:[#allocation12 + $0x150] sm:$0xff]  ;;  %10456 = vst [vmem:[#allocation100_spill] sm:$0xff] %v8686_v8 }
 0x215   :  { %4000 = vmatprep.subr.bf16.mxu1 %v8655_v59  ;;  %v8695_v59 = vcombine.high %v3276_v5, %v3280_v62  ;;  %v3221_v56 = vld [vmem:[#allocation12 + $0x190] sm:$0xff]  ;;  %v8706_v42 = vcombine.low %v3213_v63, %v3217_v61  ;;  %10463 = vst [vmem:[#allocation105_spill] sm:$0xff] %v8709_v45 }
 0x217   :  { %4026 = vmatpush1.bf16.msra.mxu0 %v8658_v27  ;;  %v624_v27 = vsub.s32 6, %v8437_v40  ;;  %10459 = vst [vmem:[#allocation103_spill] sm:$0xff] %v8695_v59  ;;  %10462 = vst [vmem:[#allocation104_spill] sm:$0xff] %v8706_v42 }
 0x218   :  { %4001 = vmatpush1.bf16.msra.mxu1 %v8661_v18  ;;  %4027 = vmatprep.subr.bf16.mxu0 %v8664_v39  ;;  %v8689_v39 = vcombine.low %v3268_v7, %v3272_v13  ;;  %v3225_v18 = vld [vmem:[#allocation12 + $0x1b0] sm:$0xff]  ;;  %v10461_v13 = vsub.s32 5, %v8437_v40 }
 0x219   :  { %4002 = vmatprep.subr.bf16.mxu1 %v8667_v52  ;;  %v8692_v52 = vcombine.high %v3213_v63, %v3217_v61  ;;  %v625_v47 = vrot.slane %v8450_v51, %v624_v27  ;;  %v8713_v27 = vld [vmem:[#allocation12 + $0x38] sm:$0xff]  ;;  %v8716_v10 = vcombine.high %v3221_v56, %v3225_v18  ;;  %v3229_v63 = vld [vmem:[#allocation12 + $0x1d0] sm:$0xff] }
 0x21a   :  { %10457 = vst [vmem:[#allocation101_spill] sm:$0xff] %v8689_v39  ;;  %v621_v7 = vrot.slane %v8450_v51, %v10461_v13 }
 0x21b   :  { %4028 = vmatpush1.bf16.msra.mxu0 %v8670_v53  ;;  %10458 = vst [vmem:[#allocation102_spill] sm:$0xff] %v8692_v52  ;;  %v617_v53 = vrot.slane %v8450_v51, %v10460_v9  ;;  %v8711_v9 = vld [vmem:[#allocation12 + $0x18] sm:$0xff]  ;;  %10464 = vst [vmem:[#allocation106_spill] sm:$0xff] %v8716_v10 }
 0x21c   :  { %4003 = vmatpush1.bf16.msra.mxu1 %v8673_v57  ;;  %4029 = vmatprep.subr.bf16.mxu0 %v8676_v34  ;;  %v3288_v57 = vld [vmem:[#allocation12 + $0x3a8] sm:$0xff]  ;;  %v629_v34 = vrot.slane %v8450_v51, %v628_v0 }
 0x21d   :  { %4004 = vmatprep.subr.bf16.mxu1 %v8679_v49  ;;  %v3296_v49 = vld [vmem:[#allocation12 + $0x3e8] sm:$0xff]  ;;  %v8719_v0 = vcombine.high %v3284_v24, %v3288_v57  ;;  %v8721_v61 = vcombine.low %v3284_v24, %v3288_v57  ;;  %v8732_v57 = vcombine.low %v3221_v56, %v3225_v18  ;;  %v3237_v24 = vld [vmem:[#allocation12 + $0x210] sm:$0xff] }
 0x21e   :  { %v8723_v35 = vcombine.high %v3292_v28, %v3296_v49  ;;  %v8725_v30 = vcombine.low %v3292_v28, %v3296_v49 }
 0x21f   :  { %4030 = vmatpush1.bf16.msra.mxu0 %v8686_v8  ;;  %10465 = vst [vmem:[#allocation107_spill] sm:$0xff] %v8719_v0  ;;  %10466 = vst [vmem:[#allocation108_spill] sm:$0xff] %v8721_v61  ;;  %v3233_v8 = vld [vmem:[#allocation12 + $0x1f0] sm:$0xff] }
 0x220   :  { %4005 = vmatpush1.bf16.msra.mxu1 %v8689_v39  ;;  %4031 = vmatprep.subr.bf16.mxu0 %v8692_v52  ;;  %10467 = vst [vmem:[#allocation109_spill] sm:$0xff] %v8723_v35  ;;  %10468 = vst [vmem:[#allocation110_spill] sm:$0xff] %v8725_v30 }
 0x221   :  { %v2597_v13 = vpop.f32.mrb[4].mxu0  ;;  %4006 = vmatprep.subr.bf16.mxu1 %v8695_v59  ;;  %v8729_v59 = vcombine.high %v8711_v9, %v8713_v27  ;;  %10470 = vst [vmem:[#allocation112_spill] sm:$0xff] %v8732_v57 }
 0x222   :  { %v2683_v51 = vpop.f32.mrb[4].mxu1  ;;  %v7155_v5 = vadd.f32 %v2597_v13, %v617_v53  ;;  %v2599_v39 = vpop.f32.mrb[5].mxu0  ;;  %v3241_v13 = vld [vmem:[#allocation12 + $0x230] sm:$0xff] }
 0x223   :  { %v7159_v62 = vadd.f32 %v2683_v51, %v625_v47  ;;  %v2685_v40 = vpop.f32.mrb[5].mxu1  ;;  %v7156_v52 = vadd.f32 %v2599_v39, %v621_v7  ;;  %v2601_v46 = vpop.f32.mrb[6].mxu0  ;;  %10469 = vst [vmem:[#allocation111_spill] sm:$0xff] %v8729_v59  ;;  %4032 = vmatpush1.bf16.msra.mxu0 %v8706_v42  ;;  %v8739_v42 = vcombine.low %v3229_v63, %v3233_v8 }
 0x224   :  { %v7160_v14 = vadd.f32 %v2685_v40, %v629_v34  ;;  %v2687_v12 = vpop.f32.mrb[6].mxu1  ;;  %v7157_v51 = vadd.f32 %v2601_v46, %v617_v53  ;;  %4007 = vmatpush1.bf16.msra.mxu1 %v8709_v45  ;;  %v2603_v28 = vpop.f32.mrb[7].mxu0  ;;  %4033 = vmatprep.subr.bf16.mxu0 %v8716_v10  ;;  %v8736_v40 = vcombine.high %v3229_v63, %v3233_v8  ;;  %v3245_v63 = vld [vmem:[#allocation12 + $0x250] sm:$0xff]  ;;  %v3234_v10 = vld [vmem:[#allocation12 + $0x1f8] sm:$0xff] }
 0x225   :  { %v7161_v44 = vadd.f32 %v2687_v12, %v625_v47  ;;  %v2689_v49 = vpop.f32.mrb[7].mxu1  ;;  %v2963_v39 = vcombine.low %v7155_v5, %v7156_v52  ;;  %v3008_v60 = vcombine.high %v7155_v5, %v7156_v52  ;;  %4008 = vmatprep.subr.bf16.mxu1 %v8719_v0  ;;  %v7158_v56 = vadd.f32 %v2603_v28, %v621_v7  ;;  %v3249_v5 = vld [vmem:[#allocation12 + $0x270] sm:$0xff] }
 0x226   :  { %10471 = vst [vmem:[#allocation113_spill] sm:$0xff] %v8736_v40  ;;  %v2964_v4 = vcombine.low %v7159_v62, %v7160_v14  ;;  %v3009_v58 = vcombine.high %v7159_v62, %v7160_v14  ;;  %v7162_v18 = vadd.f32 %v2689_v49, %v629_v34  ;;  %10472 = vst [vmem:[#allocation114_spill] sm:$0xff] %v8739_v42 }
 0x227   :  { %v8741_v46 = vcombine.high %v3237_v24, %v3241_v13  ;;  %v8744_v12 = vrot.slane %v2963_v39, %v8476_v11  ;;  %v8747_v53 = vrot.slane %v3008_v60, %v8476_v11  ;;  %4034 = vmatpush1.bf16.msra.mxu0 %v8732_v57  ;;  %v3062_v14 = vcombine.low %v7157_v51, %v7158_v56  ;;  %v3182_v39 = vld [vmem:[#allocation12 + $0x58] sm:$0xff]  ;;  %v3261_v60 = vld [vmem:[#allocation12 + $0x2d0] sm:$0xff] }
 0x228   :  { %v8750_v47 = vrot.slane %v2964_v4, %v8476_v11  ;;  %v8753_v52 = vrot.slane %v3009_v58, %v8476_v11  ;;  %v3108_v34 = vcombine.high %v7157_v51, %v7158_v56  ;;  %v3063_v8 = vcombine.low %v7161_v44, %v7162_v18  ;;  %4009 = vmatpush1.bf16.msra.mxu1 %v8721_v61  ;;  %v3186_v56 = vld [vmem:[#allocation12 + $0x78] sm:$0xff] }
 0x229   :  { %10473 = vst [vmem:[#allocation115_spill] sm:$0xff] %v8741_v46  ;;  %10474 = vst [vmem:[#allocation116_spill] sm:$0xff] %v8747_v53  ;;  %v3109_v7 = vcombine.high %v7161_v44, %v7162_v18  ;;  %4010 = vmatprep.subr.bf16.mxu1 %v8723_v35  ;;  %v8767_v44 = vrot.slane %v3062_v14, %v8476_v11  ;;  %4035 = vmatprep.subr.bf16.mxu0 %v8736_v40  ;;  %v3206_v53 = vld [vmem:[#allocation12 + $0x118] sm:$0xff] }
 0x22a   :  { %10475 = vst [vmem:[#allocation117_spill] sm:$0xff] %v8753_v52  ;;  %v8770_v51 = vrot.slane %v3108_v34, %v8476_v11  ;;  %v8773_v28 = vrot.slane %v3063_v8, %v8476_v11  ;;  %v8781_v18 = vcombine.low %v8711_v9, %v8713_v27  ;;  %v8784_v14 = vcombine.low %v3237_v24, %v3241_v13  ;;  %v3253_v27 = vld [vmem:[#allocation12 + $0x290] sm:$0xff]  ;;  %v3190_v13 = vld [vmem:[#allocation12 + $0x98] sm:$0xff] }
 0x22b   :  { %10476 = vst [vmem:[#allocation118_spill] sm:$0xff] %v8767_v44  ;;  %v8776_v49 = vrot.slane %v3109_v7, %v8476_v11  ;;  %4036 = vmatpush1.bf16.msra.mxu0 %v8739_v42  ;;  %v8786_v34 = vcombine.high %v3245_v63, %v3249_v5  ;;  %v8798_v9 = vcombine.high %v3182_v39, %v3186_v56  ;;  %v3257_v24 = vld [vmem:[#allocation12 + $0x2b0] sm:$0xff]  ;;  %v3194_v8 = vld [vmem:[#allocation12 + $0xb8] sm:$0xff] }
 0x22c   :  { %10477 = vst [vmem:[#allocation119_spill] sm:$0xff] %v8770_v51  ;;  %10478 = vst [vmem:[#allocation120_spill] sm:$0xff] %v8773_v28  ;;  %4011 = vmatpush1.bf16.msra.mxu1 %v8725_v30  ;;  %4037 = vmatprep.subr.bf16.mxu0 %v8741_v46  ;;  %v8803_v62 = vcombine.low %v3245_v63, %v3249_v5  ;;  %v8806_v58 = vcombine.low %v3182_v39, %v3186_v56  ;;  %v3198_v51 = vld [vmem:[#allocation12 + $0xd8] sm:$0xff]  ;;  %v3269_v44 = vld [vmem:[#allocation12 + $0x310] sm:$0xff] }
 0x22d   :  { %10479 = vst [vmem:[#allocation121_spill] sm:$0xff] %v8776_v49  ;;  %10480 = vst [vmem:[#allocation122_spill] sm:$0xff] %v8784_v14  ;;  %4062 = vmatprep.subr.bf16.mxu1 %v8729_v59  ;;  %v8809_v7 = vcombine.high %v3253_v27, %v3257_v24  ;;  %v8812_v4 = vcombine.high %v3190_v13, %v3194_v8  ;;  %v3265_v49 = vld [vmem:[#allocation12 + $0x2f0] sm:$0xff]  ;;  %v3202_v28 = vld [vmem:[#allocation12 + $0xf8] sm:$0xff]  ;;  %v8816_v63 = vcombine.low %v3253_v27, %v3257_v24 }
 0x22e   :  { %10481 = vst [vmem:[#allocation123_spill] sm:$0xff] %v8786_v34  ;;  %10482 = vst [vmem:[#allocation124_spill] sm:$0xff] %v8803_v62  ;;  %v8819_v5 = vcombine.low %v3190_v13, %v3194_v8  ;;  %v8822_v39 = vcombine.high %v3261_v60, %v3265_v49  ;;  %v8825_v56 = vcombine.high %v3198_v51, %v3202_v28  ;;  %v3273_v52 = vld [vmem:[#allocation12 + $0x330] sm:$0xff]  ;;  %v3218_v46 = vld [vmem:[#allocation12 + $0x178] sm:$0xff] }
 0x22f   :  { %4013 = vmatmul.mubr.bf16.vlgmr.msra.gmra.mrb[16].mxu1 %v10444_v54  ;;  %4038 = vmatpush1.bf16.msra.mxu0 %v8784_v14  ;;  %10483 = vst [vmem:[#allocation125_spill] sm:$0xff] %v8809_v7  ;;  %10484 = vst [vmem:[#allocation126_spill] sm:$0xff] %v8816_v63  ;;  %v8828_v27 = vcombine.low %v3261_v60, %v3265_v49  ;;  %v8831_v8 = vcombine.low %v3198_v51, %v3202_v28  ;;  %v3214_v14 = vld [vmem:[#allocation12 + $0x158] sm:$0xff] }
 0x230   :  { %4063 = vmatpush1.bf16.msra.mxu1 %v8781_v18  ;;  %4039 = vmatprep.subr.bf16.mxu0 %v8786_v34  ;;  %10485 = vst [vmem:[#allocation127_spill] sm:$0xff] %v8822_v39  ;;  %v3210_v34 = vld [vmem:[#allocation12 + $0x138] sm:$0xff]  ;;  %v8834_v24 = vcombine.high %v3269_v44, %v3273_v52  ;;  %v8840_v60 = vcombine.low %v3269_v44, %v3273_v52 }
 0x231   :  { %4064 = vmatprep.subr.bf16.mxu1 %v8798_v9  ;;  %4094 = vmatprep.mubr.bf16.mxu1 %v10444_v54  ;;  %10486 = vst [vmem:[#allocation128_spill] sm:$0xff] %v8828_v27  ;;  %v8837_v13 = vcombine.high %v3206_v53, %v3210_v34  ;;  %v8843_v51 = vcombine.low %v3206_v53, %v3210_v34  ;;  %v3222_v42 = vld [vmem:[#allocation12 + $0x198] sm:$0xff] }
 0x232   :  { %10487 = vst [vmem:[#allocation129_spill] sm:$0xff] %v8834_v24  ;;  %10488 = vst [vmem:[#allocation130_spill] sm:$0xff] %v8840_v60  ;;  %v8849_v49 = vcombine.high %v3214_v14, %v3218_v46  ;;  %v3226_v40 = vld [vmem:[#allocation12 + $0x1b8] sm:$0xff]  ;;  %v8855_v53 = vcombine.low %v3214_v14, %v3218_v46 }
 0x233   :  { %4040 = vmatpush1.bf16.msra.mxu0 %v8803_v62  ;;  %v3281_v62 = vld [vmem:[#allocation12 + $0x370] sm:$0xff]  ;;  %v8861_v34 = vcombine.high %v3222_v42, %v3226_v40  ;;  %v3230_v57 = vld [vmem:[#allocation12 + $0x1d8] sm:$0xff]  ;;  %v8867_v46 = vcombine.low %v3222_v42, %v3226_v40 }
 0x234   :  { %4065 = vmatpush1.bf16.msra.mxu1 %v8806_v58  ;;  %4041 = vmatprep.subr.bf16.mxu0 %v8809_v7  ;;  %v3277_v7 = vld [vmem:[#allocation12 + $0x350] sm:$0xff]  ;;  %10490 = vst [vmem:[#allocation132_spill] sm:$0xff] %v8849_v49  ;;  %10492 = vst [vmem:[#allocation134_spill] sm:$0xff] %v8855_v53  ;;  %v3246_v40 = vld [vmem:[#allocation12 + $0x258] sm:$0xff] }
 0x235   :  { %4066 = vmatprep.subr.bf16.mxu1 %v8812_v4  ;;  %v8846_v28 = vcombine.high %v3277_v7, %v3281_v62  ;;  %v8852_v52 = vcombine.low %v3277_v7, %v3281_v62  ;;  %10494 = vst [vmem:[#allocation136_spill] sm:$0xff] %v8861_v34  ;;  %10496 = vst [vmem:[#allocation138_spill] sm:$0xff] %v8867_v46  ;;  %v8873_v7 = vcombine.high %v3230_v57, %v3234_v10 }
 0x237   :  { %4042 = vmatpush1.bf16.msra.mxu0 %v8816_v63  ;;  %10489 = vst [vmem:[#allocation131_spill] sm:$0xff] %v8846_v28  ;;  %v3289_v63 = vld [vmem:[#allocation12 + $0x3b0] sm:$0xff]  ;;  %10491 = vst [vmem:[#allocation133_spill] sm:$0xff] %v8852_v52 }
 0x238   :  { %4067 = vmatpush1.bf16.msra.mxu1 %v8819_v5  ;;  %4043 = vmatprep.subr.bf16.mxu0 %v8822_v39  ;;  %v3285_v39 = vld [vmem:[#allocation12 + $0x390] sm:$0xff]  ;;  %10498 = vst [vmem:[#allocation140_spill] sm:$0xff] %v8873_v7 }
 0x239   :  { %4068 = vmatprep.subr.bf16.mxu1 %v8825_v56  ;;  %v8858_v44 = vcombine.high %v3285_v39, %v3289_v63  ;;  %v8864_v62 = vcombine.low %v3285_v39, %v3289_v63  ;;  %v8879_v63 = vcombine.low %v3230_v57, %v3234_v10  ;;  %v3250_v39 = vld [vmem:[#allocation12 + $0x278] sm:$0xff] }
 0x23a   :  { %v8891_v10 = vcombine.high %v3246_v40, %v3250_v39  ;;  %v3254_v57 = vld [vmem:[#allocation12 + $0x298] sm:$0xff] }
 0x23b   :  { %4044 = vmatpush1.bf16.msra.mxu0 %v8828_v27  ;;  %10493 = vst [vmem:[#allocation135_spill] sm:$0xff] %v8858_v44  ;;  %v3297_v27 = vld [vmem:[#allocation12 + $0x3f0] sm:$0xff]  ;;  %10495 = vst [vmem:[#allocation137_spill] sm:$0xff] %v8864_v62 }
 0x23c   :  { %4069 = vmatpush1.bf16.msra.mxu1 %v8831_v8  ;;  %4045 = vmatprep.subr.bf16.mxu0 %v8834_v24  ;;  %v3293_v24 = vld [vmem:[#allocation12 + $0x3d0] sm:$0xff]  ;;  %10500 = vst [vmem:[#allocation142_spill] sm:$0xff] %v8879_v63  ;;  %10503 = vst [vmem:[#allocation145_spill] sm:$0xff] %v8891_v10 }
 0x23d   :  { %4070 = vmatprep.subr.bf16.mxu1 %v8837_v13  ;;  %v8870_v14 = vcombine.high %v3293_v24, %v3297_v27 }
 0x23f   :  { %4046 = vmatpush1.bf16.msra.mxu0 %v8840_v60  ;;  %10497 = vst [vmem:[#allocation139_spill] sm:$0xff] %v8870_v14  ;;  %v3242_v60 = vld [vmem:[#allocation12 + $0x238] sm:$0xff] }
 0x240   :  { %4071 = vmatpush1.bf16.msra.mxu1 %v8843_v51  ;;  %4047 = vmatprep.subr.bf16.mxu0 %v8846_v28  ;;  %v3238_v28 = vld [vmem:[#allocation12 + $0x218] sm:$0xff] }
 0x241   :  { %4072 = vmatprep.subr.bf16.mxu1 %v8849_v49  ;;  %v8876_v49 = vcombine.low %v3293_v24, %v3297_v27  ;;  %v8883_v42 = vcombine.high %v3238_v28, %v3242_v60  ;;  %v3258_v27 = vld [vmem:[#allocation12 + $0x2b8] sm:$0xff]  ;;  %v8896_v24 = vcombine.low %v3246_v40, %v3250_v39 }
 0x242   :  { %v3270_v39 = vld [vmem:[#allocation12 + $0x318] sm:$0xff] }
 0x243   :  { %4048 = vmatpush1.bf16.msra.mxu0 %v8852_v52  ;;  %10499 = vst [vmem:[#allocation141_spill] sm:$0xff] %v8876_v49  ;;  %10501 = vst [vmem:[#allocation143_spill] sm:$0xff] %v8883_v42 }
 0x244   :  { %4073 = vmatpush1.bf16.msra.mxu1 %v8855_v53  ;;  %4049 = vmatprep.subr.bf16.mxu0 %v8858_v44  ;;  %v8887_v44 = vcombine.low %v3238_v28, %v3242_v60  ;;  %10504 = vst [vmem:[#allocation146_spill] sm:$0xff] %v8896_v24  ;;  %v8900_v60 = vcombine.high %v3254_v57, %v3258_v27  ;;  %v3262_v28 = vld [vmem:[#allocation12 + $0x2d8] sm:$0xff] }
 0x245   :  { %4074 = vmatprep.subr.bf16.mxu1 %v8861_v34 }
 0x246   :  { %10502 = vst [vmem:[#allocation144_spill] sm:$0xff] %v8887_v44  ;;  %10505 = vst [vmem:[#allocation147_spill] sm:$0xff] %v8900_v60 }
 0x247   :  { %4050 = vmatpush1.bf16.msra.mxu0 %v8864_v62 }
 0x248   :  { %4075 = vmatpush1.bf16.msra.mxu1 %v8867_v46  ;;  %4051 = vmatprep.subr.bf16.mxu0 %v8870_v14 }
 0x249   :  { %4076 = vmatprep.subr.bf16.mxu1 %v8873_v7 }
 0x24b   :  { %4052 = vmatpush1.bf16.msra.mxu0 %v8876_v49  ;;  %v8904_v49 = vcombine.low %v3254_v57, %v3258_v27  ;;  %v3278_v27 = vld [vmem:[#allocation12 + $0x358] sm:$0xff] }
 0x24c   :  { %4077 = vmatpush1.bf16.msra.mxu1 %v8879_v63  ;;  %4194 = vmatprep.subr.bf16.mxu0 %v8413_v15  ;;  %v3266_v15 = vld [vmem:[#allocation12 + $0x2f8] sm:$0xff] }
 0x24d   :  { %4078 = vmatprep.subr.bf16.mxu1 %v8883_v42  ;;  %10506 = vst [vmem:[#allocation148_spill] sm:$0xff] %v8904_v49  ;;  %v8908_v40 = vcombine.high %v3262_v28, %v3266_v15 }
 0x24e   :  { %4054 = vmatmul.mubr.bf16.vlgmr.msra.gmra.mrb[16].mxu0 %v10444_v54 }
 0x24f   :  { %4195 = vmatpush1.bf16.msra.mxu0 %v8415_v19  ;;  %10507 = vst [vmem:[#allocation149_spill] sm:$0xff] %v8908_v40  ;;  %v8912_v19 = vcombine.low %v3262_v28, %v3266_v15  ;;  %v3286_v28 = vld [vmem:[#allocation12 + $0x398] sm:$0xff] }
 0x250   :  { %4079 = vmatpush1.bf16.msra.mxu1 %v8887_v44  ;;  %4196 = vmatprep.subr.bf16.mxu0 %v8418_v21  ;;  %v3274_v21 = vld [vmem:[#allocation12 + $0x338] sm:$0xff] }
 0x251   :  { %4080 = vmatprep.subr.bf16.mxu1 %v8891_v10  ;;  %10508 = vst [vmem:[#allocation150_spill] sm:$0xff] %v8912_v19  ;;  %v8916_v57 = vcombine.high %v3270_v39, %v3274_v21 }
 0x253   :  { %4197 = vmatpush1.bf16.msra.mxu0 %v8423_v26  ;;  %10509 = vst [vmem:[#allocation151_spill] sm:$0xff] %v8916_v57  ;;  %v8920_v26 = vcombine.low %v3270_v39, %v3274_v21  ;;  %v3294_v39 = vld [vmem:[#allocation12 + $0x3d8] sm:$0xff] }
 0x254   :  { %4081 = vmatpush1.bf16.msra.mxu1 %v8896_v24  ;;  %4198 = vmatprep.subr.bf16.mxu0 %v8426_v29  ;;  %v3282_v29 = vld [vmem:[#allocation12 + $0x378] sm:$0xff] }
 0x255   :  { %4082 = vmatprep.subr.bf16.mxu1 %v8900_v60  ;;  %10510 = vst [vmem:[#allocation152_spill] sm:$0xff] %v8920_v26  ;;  %v8924_v15 = vcombine.high %v3278_v27, %v3282_v29 }
 0x257   :  { %4199 = vmatpush1.bf16.msra.mxu0 %v8431_v33  ;;  %10511 = vst [vmem:[#allocation153_spill] sm:$0xff] %v8924_v15  ;;  %v8928_v33 = vcombine.low %v3278_v27, %v3282_v29 }
 0x258   :  { %4083 = vmatpush1.bf16.msra.mxu1 %v8904_v49  ;;  %4200 = vmatprep.subr.bf16.mxu0 %v8434_v36  ;;  %v3290_v36 = vld [vmem:[#allocation12 + $0x3b8] sm:$0xff] }
 0x259   :  { %4084 = vmatprep.subr.bf16.mxu1 %v8908_v40  ;;  %10512 = vst [vmem:[#allocation154_spill] sm:$0xff] %v8928_v33  ;;  %v8932_v21 = vcombine.high %v3286_v28, %v3290_v36 }
 0x25b   :  { %4201 = vmatpush1.bf16.msra.mxu0 %v8440_v41  ;;  %10513 = vst [vmem:[#allocation155_spill] sm:$0xff] %v8932_v21  ;;  %v8936_v41 = vcombine.low %v3286_v28, %v3290_v36  ;;  %v10517_v36 = vld [vmem:[#allocation55_spill] sm:$0xff]  ;;  %v10520_v28 = vld [vmem:[#allocation72_spill] sm:$0xff] }
 0x25c   :  { %4085 = vmatpush1.bf16.msra.mxu1 %v8912_v19  ;;  %4202 = vmatprep.subr.bf16.mxu0 %v8443_v43  ;;  %v3298_v43 = vld [vmem:[#allocation12 + $0x3f8] sm:$0xff] }
 0x25d   :  { %4086 = vmatprep.subr.bf16.mxu1 %v8916_v57  ;;  %10514 = vst [vmem:[#allocation156_spill] sm:$0xff] %v8936_v41  ;;  %v8940_v29 = vcombine.high %v3294_v39, %v3298_v43  ;;  %v8944_v27 = vcombine.low %v3294_v39, %v3298_v43  ;;  %v10518_v43 = vld [vmem:[#allocation71_spill] sm:$0xff]  ;;  %v10521_v39 = vld [vmem:[#allocation57_spill] sm:$0xff] }
 0x25f   :  { %4203 = vmatpush1.bf16.msra.mxu0 %v8448_v50  ;;  %10515 = vst [vmem:[#allocation157_spill] sm:$0xff] %v8940_v29  ;;  %10516 = vst [vmem:[#allocation158_spill] sm:$0xff] %v8944_v27 }
 0x260   :  { %4087 = vmatpush1.bf16.msra.mxu1 %v8920_v26  ;;  %4204 = vmatprep.subr.bf16.mxu0 %v8455_v55  ;;  %v10531_v55 = vld [vmem:[#allocation76_spill] sm:$0xff] }
 0x261   :  { %4088 = vmatprep.subr.bf16.mxu1 %v8924_v15 }
 0x263   :  { %4205 = vmatpush1.bf16.msra.mxu0 %v8470_v1 }
 0x264   :  { %4089 = vmatpush1.bf16.msra.mxu1 %v8928_v33  ;;  %4206 = vmatprep.subr.bf16.mxu0 %v8473_v3 }
 0x265   :  { %4090 = vmatprep.subr.bf16.mxu1 %v8932_v21 }
 0x267   :  { %4207 = vmatpush1.bf16.msra.mxu0 %v8479_v20  ;;  %v10528_v20 = vld [vmem:[#allocation75_spill] sm:$0xff] }
 0x268   :  { %4091 = vmatpush1.bf16.msra.mxu1 %v8936_v41  ;;  %4208 = vmatprep.subr.bf16.mxu0 %v8482_v32 }
 0x269   :  { %4092 = vmatprep.subr.bf16.mxu1 %v8940_v29 }
 0x26b   :  { %4209 = vmatpush1.bf16.msra.mxu0 %v8484_v38  ;;  %v10526_v38 = vld [vmem:[#allocation32_spill] sm:$0xff] }
 0x26c   :  { %4093 = vmatpush1.bf16.msra.mxu1 %v8944_v27  ;;  %4210 = vmatprep.subr.bf16.mxu0 %v8486_v48  ;;  %v10524_v48 = vld [vmem:[#allocation74_spill] sm:$0xff]  ;;  %v10530_v1 = vsub.s32 1, %v10526_v38 }
 0x26d   :  { %4235 = vmatprep.subr.bf16.mxu1 %v8576_v6 }
 0x26f   :  { %4095 = vmatmul.mubr.bf16.vlgmr.msra.gmra.mrb[20].mxu1 %v10444_v54  ;;  %4211 = vmatpush1.bf16.msra.mxu0 %v8522_v16  ;;  %v10519_v54 = vld [vmem:[#allocation56_spill] sm:$0xff]  ;;  %v10523_v16 = vld [vmem:[#allocation58_spill] sm:$0xff] }
 0x270   :  { %4236 = vmatpush1.bf16.msra.mxu1 %v8579_v2  ;;  %4212 = vmatprep.subr.bf16.mxu0 %v8534_v22  ;;  %v10522_v22 = vld [vmem:[#allocation73_spill] sm:$0xff] }
 0x271   :  { %4237 = vmatprep.subr.bf16.mxu1 %v8582_v31  ;;  %v10536_v31 = vld [vmem:[#allocation63_spill] sm:$0xff] }
 0x273   :  { %4213 = vmatpush1.bf16.msra.mxu0 %v8537_v37  ;;  %v8968_v37 = vld [vmem:[#allocation11 + $0x8] sm:$0x3f] }
 0x274   :  { %4238 = vmatpush1.bf16.msra.mxu1 %v8587_v17  ;;  %4214 = vmatprep.subr.bf16.mxu0 %v8540_v25  ;;  %v10525_v25 = vld [vmem:[#allocation59_spill] sm:$0xff] }
 0x275   :  { %4239 = vmatprep.subr.bf16.mxu1 %v8590_v23 }
 0x277   :  { %4215 = vmatpush1.bf16.msra.mxu0 %v10517_v36  ;;  %v10527_v36 = vsub.s32 0, %v10526_v38 }
 0x278   :  { %4240 = vmatpush1.bf16.msra.mxu1 %v10518_v43  ;;  %4216 = vmatprep.subr.bf16.mxu0 %v10519_v54  ;;  %v10529_v54 = vld [vmem:[#allocation60_spill] sm:$0xff] }
 0x279   :  { %4241 = vmatprep.subr.bf16.mxu1 %v10520_v28  ;;  %v633_v32 = vrot.slane %v8968_v37, %v10527_v36  ;;  %v10532_v28 = vld [vmem:[#allocation61_spill] sm:$0xff] }
 0x27b   :  { %4217 = vmatpush1.bf16.msra.mxu0 %v10521_v39 }
 0x27c   :  { %4242 = vmatpush1.bf16.msra.mxu1 %v10522_v22  ;;  %4218 = vmatprep.subr.bf16.mxu0 %v10523_v16  ;;  %v637_v16 = vrot.slane %v8968_v37, %v10530_v1 }
 0x27d   :  { %4243 = vmatprep.subr.bf16.mxu1 %v10524_v48 }
 0x27f   :  { %4219 = vmatpush1.bf16.msra.mxu0 %v10525_v25 }
 0x280   :  { %4244 = vmatpush1.bf16.msra.mxu1 %v10528_v20  ;;  %4220 = vmatprep.subr.bf16.mxu0 %v10529_v54  ;;  %v10533_v20 = vld [vmem:[#allocation77_spill] sm:$0xff]  ;;  %v10534_v54 = vld [vmem:[#allocation62_spill] sm:$0xff] }
 0x281   :  { %v2767_v3 = vpop.f32.mrb[8].mxu0  ;;  %4245 = vmatprep.subr.bf16.mxu1 %v10531_v55 }
 0x282   :  { %v2849_v39 = vpop.f32.mrb[8].mxu1  ;;  %v2768_v50 = vpop.f32.mrb[9].mxu0 }
 0x283   :  { %v2850_v48 = vpop.f32.mrb[9].mxu1  ;;  %v2769_v22 = vpop.f32.mrb[10].mxu0  ;;  %4221 = vmatpush1.bf16.msra.mxu0 %v10532_v28  ;;  %v10535_v39 = vld [vmem:[#allocation78_spill] sm:$0xff]  ;;  %v10537_v50 = vld [vmem:[#allocation79_spill] sm:$0xff] }
 0x284   :  { %v2851_v25 = vpop.f32.mrb[10].mxu1  ;;  %v7163_v43 = vadd.f32 %v2769_v22, %v633_v32  ;;  %v2771_v36 = vpop.f32.mrb[11].mxu0  ;;  %4246 = vmatpush1.bf16.msra.mxu1 %v10533_v20  ;;  %4222 = vmatprep.subr.bf16.mxu0 %v10534_v54  ;;  %v10538_v48 = vld [vmem:[#allocation64_spill] sm:$0xff]  ;;  %v10540_v22 = vsub.s32 2, %v10526_v38  ;;  %v10541_v54 = vld [vmem:[#allocation65_spill] sm:$0xff] }
 0x285   :  { %v2853_v23 = vpop.f32.mrb[11].mxu1  ;;  %v7164_v3 = vadd.f32 %v2771_v36, %v637_v16  ;;  %4247 = vmatprep.subr.bf16.mxu1 %v10535_v39  ;;  %v10539_v32 = vld [vmem:[#allocation80_spill] sm:$0xff]  ;;  %v10542_v16 = vsub.s32 3, %v10526_v38  ;;  %v10543_v36 = vld [vmem:[#allocation81_spill] sm:$0xff] }
 0x286   :  { %v6837_v17 = vmul.f32 -1.442695, %v7163_v43  ;;  %v641_v28 = vrot.slane %v8968_v37, %v10540_v22  ;;  %v10548_v20 = vld [vmem:[#allocation89_spill] sm:$0xff] }
 0x287   :  { %v6838_v1 = vmul.f32 -1.442695, %v7164_v3  ;;  %4223 = vmatpush1.bf16.msra.mxu0 %v10536_v31  ;;  %v645_v43 = vrot.slane %v8968_v37, %v10542_v16  ;;  %v10545_v3 = vld [vmem:[#allocation83_spill] sm:$0xff]  ;;  %v10546_v31 = vld [vmem:[#allocation85_spill] sm:$0xff] }
 0x288   :  { %7755 = vpow2.f32 %v6837_v17  ;;  %4248 = vmatpush1.bf16.msra.mxu1 %v10537_v50  ;;  %4224 = vmatprep.subr.bf16.mxu0 %v10538_v48  ;;  %v10544_v17 = vld [vmem:[#allocation82_spill] sm:$0xff]  ;;  %v7165_v48 = vadd.f32 %v2851_v25, %v641_v28  ;;  %v10549_v16 = vld [vmem:[#allocation91_spill] sm:$0xff] }
 0x289   :  { %7757 = vpow2.f32 %v6838_v1  ;;  %4249 = vmatprep.subr.bf16.mxu1 %v10539_v32  ;;  %v7166_v1 = vadd.f32 %v2853_v23, %v645_v43  ;;  %v10547_v32 = vld [vmem:[#allocation87_spill] sm:$0xff]  ;;  %v10552_v23 = vld [vmem:[#allocation97_spill] sm:$0xff] }
 0x28a   :  { %7759 = vtanh.f32 %v7165_v48  ;;  %v10551_v25 = vld [vmem:[#allocation95_spill] sm:$0xff] }
 0x28b   :  { %4225 = vmatpush1.bf16.msra.mxu0 %v10541_v54  ;;  %7761 = vtanh.f32 %v7166_v1  ;;  %v10553_v43 = vld [vmem:[#allocation99_spill] sm:$0xff]  ;;  %v10554_v1 = vld [vmem:[#allocation101_spill] sm:$0xff] }
 0x28c   :  { %4250 = vmatpush1.bf16.msra.mxu1 %v10543_v36  ;;  %4276 = vmatprep.subr.bf16.mxu0 %v10544_v17  ;;  %v10550_v17 = vld [vmem:[#allocation93_spill] sm:$0xff] }
 0x28d   :  { %4251 = vmatprep.subr.bf16.mxu1 %v10545_v3 }
 0x290   :  { %4252 = vmatpush1.bf16.msra.mxu1 %v10546_v31 }
 0x291   :  { %4253 = vmatprep.subr.bf16.mxu1 %v10547_v32 }
 0x292   :  { %v7756_v50 = vpop.eup %7755 }
 0x293   :  { %v7758_v22 = vpop.eup %7757  ;;  %v3143_v39 = vadd.f32 1.0, %v7756_v50 }
 0x294   :  { %v3144_v54 = vadd.f32 1.0, %v7758_v22  ;;  %4254 = vmatpush1.bf16.msra.mxu1 %v10548_v20  ;;  %v7760_v28 = vpop.eup %7759 }
 0x295   :  { %7763 = vrcp.f32 %v3143_v39  ;;  %4255 = vmatprep.subr.bf16.mxu1 %v10549_v16  ;;  %v7762_v32 = vpop.eup %7761  ;;  %v10555_v39 = vld [vmem:[#allocation103_spill] sm:$0xff] }
 0x296   :  { %7765 = vrcp.f32 %v3144_v54 }
 0x298   :  { %4256 = vmatpush1.bf16.msra.mxu1 %v10550_v17 }
 0x299   :  { %4257 = vmatprep.subr.bf16.mxu1 %v10551_v25 }
 0x29c   :  { %4258 = vmatpush1.bf16.msra.mxu1 %v10552_v23 }
 0x29d   :  { %4259 = vmatprep.subr.bf16.mxu1 %v10553_v43 }
 0x29f   :  { %v7764_v50 = vpop.eup %7763 }
 0x2a0   :  { %v7766_v48 = vpop.eup %7765  ;;  %v3163_v22 = vmul.f32 %v7764_v50, %v7760_v28  ;;  %4260 = vmatpush1.bf16.msra.mxu1 %v10554_v1 }
 0x2a1   :  { %v3164_v20 = vmul.f32 %v7766_v48, %v7762_v32  ;;  %4261 = vmatprep.subr.bf16.mxu1 %v10555_v39  ;;  %v10556_v32 = vsub.s32 4, %v10526_v38 }
 0x2a3   :  { %v649_v48 = vrot.slane %v8968_v37, %v10556_v32  ;;  %v10560_v32 = vld [vmem:[#allocation43_spill] sm:$0xff] }
 0x2a4   :  { %4262 = vmatpush1.bf16.msra.mxu1 %v8709_v45 }
 0x2a5   :  { %4263 = vmatprep.subr.bf16.mxu1 %v8719_v0  ;;  %v10557_v0 = vsub.s32 5, %v10526_v38 }
 0x2a8   :  { %4264 = vmatpush1.bf16.msra.mxu1 %v8721_v61  ;;  %v653_v61 = vrot.slane %v8968_v37, %v10557_v0 }
 0x2a9   :  { %4265 = vmatprep.subr.bf16.mxu1 %v8723_v35 }
 0x2ac   :  { %4266 = vmatpush1.bf16.msra.mxu1 %v8725_v30 }
 0x2ad   :  { %4317 = vmatprep.subr.bf16.mxu1 %v8729_v59 }
 0x2c2   :  { %v3973_v54 = vpop.f32.mrb[12].mxu1 }
 0x2c3   :  { %v3975_v43 = vpop.f32.mrb[13].mxu1 }
 0x2c4   :  { %v4111_v28 = vcombine.low %v3973_v54, %v3975_v43  ;;  %v3977_v50 = vpop.f32.mrb[14].mxu1 }
 0x2c5   :  { %v3978_v1 = vpop.f32.mrb[15].mxu1 }
 0x2e1   :  { %v2931_v45 = vpop.f32.mrb[12].mxu0 }
 0x2e2   :  { %v2932_v39 = vpop.f32.mrb[13].mxu0 }
 0x2e3   :  { %v2933_v35 = vpop.f32.mrb[14].mxu0 }
 0x2e4   :  { %v7167_v23 = vadd.f32 %v2933_v35, %v649_v48  ;;  %v2935_v30 = vpop.f32.mrb[15].mxu0  ;;  %v10561_v48 = vld [vmem:[#allocation45_spill] sm:$0xff] }
 0x2e5   :  { %v7168_v25 = vadd.f32 %v2935_v30, %v653_v61 }
 0x2e6   :  { %v6839_v59 = vmul.f32 -1.442695, %v7167_v23  ;;  %v4119_v23 = vrot.slane %v4111_v28, %v8476_v11 }
 0x2e7   :  { %v6840_v17 = vmul.f32 -1.442695, %v7168_v25 }
 0x2e8   :  { %7767 = vpow2.f32 %v6839_v59 }
 0x2e9   :  { %7769 = vpow2.f32 %v6840_v17 }
 0x2ea   :  { %7771 = vtanh.f32 %v3163_v22 }
 0x2eb   :  { %7773 = vtanh.f32 %v3164_v20 }
 0x2f2   :  { %v7768_v43 = vpop.eup %7767 }
 0x2f3   :  { %v7770_v1 = vpop.eup %7769  ;;  %v3157_v54 = vadd.f32 1.0, %v7768_v43  ;;  %v10562_v43 = vcombine.low %v10560_v32, %v10561_v48 }
 0x2f4   :  { %v3158_v50 = vadd.f32 1.0, %v7770_v1  ;;  %v7772_v38 = vpop.eup %7771 }
 0x2f5   :  { %7775 = vrcp.f32 %v3157_v54  ;;  %v7774_v45 = vpop.eup %7773 }
 0x2f6   :  { %7777 = vrcp.f32 %v3158_v50 }
 0x2ff   :  { %v7776_v37 = vpop.eup %7775 }
 0x300   :  { %v7778_v0 = vpop.eup %7777  ;;  %v9021_v39 = vmul.f32 %v7776_v37, %v7772_v38 }
 0x301   :  { %v9023_v35 = vmul.f32 %v7778_v0, %v7774_v45 }
 0x302   :  { %10558 = vst [vmem:[#allocation32_spill] sm:$0xff] %v9021_v39  ;;  %v4014_v30 = vpop.f32.mrb[16].mxu1 }
 0x303   :  { %10559 = vst [vmem:[#allocation159_spill] sm:$0xff] %v9023_v35  ;;  %v4016_v61 = vpop.f32.mrb[17].mxu1 }
 0x304   :  { %v4112_v59 = vcombine.low %v4014_v30, %v4016_v61  ;;  %v4018_v17 = vpop.f32.mrb[18].mxu1 }
 0x305   :  { %v4019_v25 = vpop.f32.mrb[19].mxu1 }
 0x306   :  { %v4126_v20 = vrot.slane %v4112_v59, %v8476_v11 }
 0x308   :  { %v4127_v22 = vcombine.low %v4119_v23, %v4126_v20 }
 0x30a   :  { %v4147_v1 = vadd.f32 %v4127_v22, %v10562_v43 }
 0x30c   :  { %v4156_v0 = vrot.slane %v4147_v1, 4  ;;  %v6969_v35 = vmul.f32 -1.442695, %v4147_v1  ;;  %v10563_v1 = vcombine.low %v8744_v12, %v8750_v47 }
 0x30e   :  { %v6970_v39 = vmul.f32 -1.442695, %v4156_v0 }
 0x310   :  { %7779 = vpow2.f32 %v6970_v39 }
 0x311   :  { %7781 = vpow2.f32 %v6969_v35 }
 0x31a   :  { %v7780_v61 = vpop.eup %7779 }
 0x31b   :  { %v7782_v17 = vpop.eup %7781  ;;  %v4161_v22 = vadd.f32 1.0, %v7780_v61 }
 0x31d   :  { %7783 = vrcp.f32 %v4161_v22 }
 0x321   :  { %v4055_v54 = vpop.f32.mrb[16].mxu0 }
 0x322   :  { %v4057_v50 = vpop.f32.mrb[17].mxu0 }
 0x323   :  { %v4128_v38 = vcombine.low %v4055_v54, %v4057_v50  ;;  %v4059_v37 = vpop.f32.mrb[18].mxu0  ;;  %v4152_v54 = vadd.f32 1.0, %v7782_v17 }
 0x324   :  { %v4060_v45 = vpop.f32.mrb[19].mxu0 }
 0x325   :  { %v4136_v59 = vrot.slane %v4128_v38, %v8476_v11  ;;  %7785 = vrcp.f32 %v4152_v54 }
 0x327   :  { %v7784_v45 = vpop.eup %7783 }
 0x32f   :  { %v7786_v38 = vpop.eup %7785 }
 0x342   :  { %v4096_v30 = vpop.f32.mrb[20].mxu1 }
 0x343   :  { %v4098_v28 = vpop.f32.mrb[21].mxu1 }
 0x344   :  { %v4129_v25 = vcombine.low %v4096_v30, %v4098_v28  ;;  %v4100_v23 = vpop.f32.mrb[22].mxu1  ;;  %v4174_v30 = vmul.f32 0.0, %v7784_v45  ;;  %v10568_v45 = vld [vmem:[#allocation92_spill] sm:$0xff] }
 0x345   :  { %v4101_v20 = vpop.f32.mrb[23].mxu1 }
 0x346   :  { %v4143_v43 = vrot.slane %v4129_v25, %v8476_v11 }
 0x348   :  { %v4144_v50 = vcombine.low %v4136_v59, %v4143_v43 }
 0x34a   :  { %v4148_v39 = vadd.f32 %v4144_v50, %v10563_v1  ;;  %v10564_v1 = vld [vmem:[#allocation84_spill] sm:$0xff] }
 0x34c   :  { %7787 = vtanh.f32 %v4148_v39  ;;  %v4166_v35 = vrot.slane %v4148_v39, 4  ;;  %v10565_v39 = vld [vmem:[#allocation86_spill] sm:$0xff] }
 0x34e   :  { %v6971_v37 = vmul.f32 -1.442695, %v4166_v35  ;;  %v10566_v35 = vld [vmem:[#allocation88_spill] sm:$0xff] }
 0x350   :  { %7789 = vpow2.f32 %v6971_v37  ;;  %v10567_v37 = vld [vmem:[#allocation90_spill] sm:$0xff] }
 0x356   :  { %v7788_v0 = vpop.eup %7787 }
 0x357   :  { %v4175_v28 = vmul.f32 %v7788_v0, %v7786_v38  ;;  %v10569_v38 = vld [vmem:[#allocation94_spill] sm:$0xff]  ;;  %v10570_v0 = vld [vmem:[#allocation96_spill] sm:$0xff] }
 0x359   :  { %v9035_v61 = vadd.f32 %v4175_v28, %v4174_v30  ;;  %v10571_v30 = vld [vmem:[#allocation98_spill] sm:$0xff]  ;;  %v10572_v28 = vld [vmem:[#allocation100_spill] sm:$0xff] }
 0x35a   :  { %v7790_v25 = vpop.eup %7789 }
 0x35b   :  { %v4171_v17 = vadd.f32 1.0, %v7790_v25  ;;  %7791 = vtanh.f32 %v9035_v61  ;;  %v10573_v25 = vld [vmem:[#allocation102_spill] sm:$0xff] }
 0x35d   :  { %7793 = vrcp.f32 %v4171_v17  ;;  %v10574_v17 = vld [vmem:[#allocation132_spill] sm:$0xff] }
 0x365   :  { %v7792_v59 = vpop.eup %7791 }
 0x367   :  { %v7794_v23 = vpop.eup %7793 }
 0x368   :  { %v4178_v20 = vmul.f32 %v7794_v23, %v7792_v59  ;;  %v10575_v59 = vld [vmem:[#allocation104_spill] sm:$0xff]  ;;  %v10576_v23 = vld [vmem:[#allocation106_spill] sm:$0xff] }
 0x36a   :  { %v4188_v22 = vrot.slane %v4178_v20, %v8476_v11  ;;  %v10577_v20 = vld [vmem:[#allocation112_spill] sm:$0xff] }
 0x36c   :  { %v4189_v43 = vcombine.high %v4188_v22, %v4188_v22  ;;  %v9039_v50 = vpack.c.bf16 %v4188_v22, %v4188_v22  ;;  %v10578_v22 = vld [vmem:[#allocation113_spill] sm:$0xff] }
 0x36e   :  { %v4193_v54 = vpack.c.bf16 %v4189_v43, %v4189_v43  ;;  %v10579_v43 = vld [vmem:[#allocation114_spill] sm:$0xff] }
 0x370   :  { %4226 = vmatprep.mubr.bf16.mxu0 %v4193_v54  ;;  %4267 = vmatprep.mubr.bf16.mxu1 %v4193_v54 }
 0x371   :  { %4227 = vmatmul.mubr.bf16.vlgmr.msra.gmra.mrb[20].mxu0 %v9039_v50  ;;  %4268 = vmatmul.mubr.bf16.vlgmr.msra.gmra.mrb[24].mxu1 %v9039_v50 }
 0x372   :  { %4277 = vmatpush1.bf16.msra.mxu0 %v10564_v1  ;;  %4318 = vmatpush1.bf16.msra.mxu1 %v8781_v18 }
 0x373   :  { %4308 = vmatprep.mubr.bf16.mxu0 %v4193_v54  ;;  %4349 = vmatprep.mubr.bf16.mxu1 %v4193_v54  ;;  %v10580_v54 = vld [vmem:[#allocation115_spill] sm:$0xff] }
 0x374   :  { %4278 = vmatprep.subr.bf16.mxu0 %v10565_v39  ;;  %4319 = vmatprep.subr.bf16.mxu1 %v8798_v9 }
 0x376   :  { %4279 = vmatpush1.bf16.msra.mxu0 %v10566_v35  ;;  %4320 = vmatpush1.bf16.msra.mxu1 %v8806_v58 }
 0x377   :  { %4280 = vmatprep.subr.bf16.mxu0 %v10567_v37  ;;  %4321 = vmatprep.subr.bf16.mxu1 %v8812_v4 }
 0x37a   :  { %4281 = vmatpush1.bf16.msra.mxu0 %v10568_v45  ;;  %4322 = vmatpush1.bf16.msra.mxu1 %v8819_v5 }
 0x37b   :  { %4282 = vmatprep.subr.bf16.mxu0 %v10569_v38  ;;  %4323 = vmatprep.subr.bf16.mxu1 %v8825_v56 }
 0x37e   :  { %4283 = vmatpush1.bf16.msra.mxu0 %v10570_v0  ;;  %4324 = vmatpush1.bf16.msra.mxu1 %v8831_v8 }
 0x37f   :  { %4284 = vmatprep.subr.bf16.mxu0 %v10571_v30  ;;  %4325 = vmatprep.subr.bf16.mxu1 %v8837_v13 }
 0x382   :  { %4285 = vmatpush1.bf16.msra.mxu0 %v10572_v28  ;;  %4326 = vmatpush1.bf16.msra.mxu1 %v8843_v51 }
 0x383   :  { %4286 = vmatprep.subr.bf16.mxu0 %v10573_v25  ;;  %4327 = vmatprep.subr.bf16.mxu1 %v10574_v17 }
 0x386   :  { %4287 = vmatpush1.bf16.msra.mxu0 %v10575_v59  ;;  %4328 = vmatpush1.bf16.msra.mxu1 %v8855_v53  ;;  %v10581_v53 = vld [vmem:[#allocation122_spill] sm:$0xff] }
 0x387   :  { %4288 = vmatprep.subr.bf16.mxu0 %v10576_v23  ;;  %4329 = vmatprep.subr.bf16.mxu1 %v8861_v34  ;;  %v10582_v34 = vld [vmem:[#allocation123_spill] sm:$0xff] }
 0x38a   :  { %4289 = vmatpush1.bf16.msra.mxu0 %v10577_v20  ;;  %4330 = vmatpush1.bf16.msra.mxu1 %v8867_v46  ;;  %v10583_v46 = vld [vmem:[#allocation124_spill] sm:$0xff] }
 0x38b   :  { %4290 = vmatprep.subr.bf16.mxu0 %v10578_v22  ;;  %4331 = vmatprep.subr.bf16.mxu1 %v8873_v7  ;;  %v10584_v7 = vld [vmem:[#allocation125_spill] sm:$0xff] }
 0x38e   :  { %4291 = vmatpush1.bf16.msra.mxu0 %v10579_v43  ;;  %4332 = vmatpush1.bf16.msra.mxu1 %v8879_v63  ;;  %v10585_v63 = vld [vmem:[#allocation126_spill] sm:$0xff] }
 0x38f   :  { %4292 = vmatprep.subr.bf16.mxu0 %v10580_v54  ;;  %4333 = vmatprep.subr.bf16.mxu1 %v8883_v42  ;;  %v10586_v42 = vld [vmem:[#allocation127_spill] sm:$0xff] }
 0x392   :  { %4293 = vmatpush1.bf16.msra.mxu0 %v10581_v53  ;;  %4334 = vmatpush1.bf16.msra.mxu1 %v8887_v44  ;;  %v10587_v44 = vld [vmem:[#allocation128_spill] sm:$0xff] }
 0x393   :  { %4294 = vmatprep.subr.bf16.mxu0 %v10582_v34  ;;  %4335 = vmatprep.subr.bf16.mxu1 %v8891_v10  ;;  %v10588_v10 = vld [vmem:[#allocation129_spill] sm:$0xff] }
 0x396   :  { %4295 = vmatpush1.bf16.msra.mxu0 %v10583_v46  ;;  %4336 = vmatpush1.bf16.msra.mxu1 %v8896_v24  ;;  %v10589_v24 = vld [vmem:[#allocation130_spill] sm:$0xff] }
 0x397   :  { %4296 = vmatprep.subr.bf16.mxu0 %v10584_v7  ;;  %4337 = vmatprep.subr.bf16.mxu1 %v8900_v60  ;;  %v10590_v60 = vld [vmem:[#allocation131_spill] sm:$0xff] }
 0x39a   :  { %4297 = vmatpush1.bf16.msra.mxu0 %v10585_v63  ;;  %4338 = vmatpush1.bf16.msra.mxu1 %v8904_v49 }
 0x39b   :  { %4298 = vmatprep.subr.bf16.mxu0 %v10586_v42  ;;  %4339 = vmatprep.subr.bf16.mxu1 %v8908_v40  ;;  %v10591_v40 = vld [vmem:[#allocation135_spill] sm:$0xff] }
 0x39e   :  { %4299 = vmatpush1.bf16.msra.mxu0 %v10587_v44  ;;  %4340 = vmatpush1.bf16.msra.mxu1 %v8912_v19 }
 0x39f   :  { %4300 = vmatprep.subr.bf16.mxu0 %v10588_v10  ;;  %4341 = vmatprep.subr.bf16.mxu1 %v8916_v57 }
 0x3a2   :  { %4301 = vmatpush1.bf16.msra.mxu0 %v10589_v24  ;;  %4342 = vmatpush1.bf16.msra.mxu1 %v8920_v26  ;;  %v10592_v26 = vld [vmem:[#allocation141_spill] sm:$0xff] }
 0x3a3   :  { %4302 = vmatprep.subr.bf16.mxu0 %v10590_v60  ;;  %4343 = vmatprep.subr.bf16.mxu1 %v8924_v15  ;;  %v10593_v15 = vld [vmem:[#allocation25_spill] sm:$0xff] }
 0x3a6   :  { %4303 = vmatpush1.bf16.msra.mxu0 %v8852_v52  ;;  %4344 = vmatpush1.bf16.msra.mxu1 %v8928_v33 }
 0x3a7   :  { %4304 = vmatprep.subr.bf16.mxu0 %v10591_v40  ;;  %4345 = vmatprep.subr.bf16.mxu1 %v8932_v21  ;;  %v10594_v21 = vld [vmem:[#allocation26_spill] sm:$0xff] }
 0x3aa   :  { %4305 = vmatpush1.bf16.msra.mxu0 %v8864_v62  ;;  %4346 = vmatpush1.bf16.msra.mxu1 %v8936_v41  ;;  %v10595_v41 = vld [vmem:[#allocation27_spill] sm:$0xff] }
 0x3ab   :  { %4306 = vmatprep.subr.bf16.mxu0 %v8870_v14  ;;  %4347 = vmatprep.subr.bf16.mxu1 %v8940_v29  ;;  %v10596_v14 = vld [vmem:[#allocation68_spill] sm:$0xff]  ;;  %v10602_v62 = vld [vmem:[#allocation71_spill] sm:$0xff] }
 0x3ac   :  { %v10597_v29 = vld [vmem:[#allocation28_spill] sm:$0xff] }
 0x3ae   :  { %4307 = vmatpush1.bf16.msra.mxu0 %v10592_v26  ;;  %4348 = vmatpush1.bf16.msra.mxu1 %v8944_v27  ;;  %v10598_v26 = vld [vmem:[#allocation69_spill] sm:$0xff] }
 0x3af   :  { %4449 = vmatprep.subr.bf16.mxu0 %v10593_v15  ;;  %4490 = vmatprep.subr.bf16.mxu1 %v8576_v6  ;;  %v10599_v27 = vld [vmem:[#allocation29_spill] sm:$0xff]  ;;  %v10600_v15 = vld [vmem:[#allocation70_spill] sm:$0xff] }
 0x3b0   :  { %v10601_v6 = vld [vmem:[#allocation30_spill] sm:$0xff] }
 0x3b1   :  { %4309 = vmatmul.mubr.bf16.vlgmr.msra.gmra.mrb[24].mxu0 %v9039_v50  ;;  %4350 = vmatmul.mubr.bf16.vlgmr.msra.gmra.mrb[28].mxu1 %v9039_v50  ;;  %v10603_v50 = vld [vmem:[#allocation31_spill] sm:$0xff] }
 0x3b2   :  { %4450 = vmatpush1.bf16.msra.mxu0 %v10594_v21  ;;  %4491 = vmatpush1.bf16.msra.mxu1 %v8579_v2  ;;  %v10604_v21 = vld [vmem:[#allocation72_spill] sm:$0xff]  ;;  %v10605_v2 = vld [vmem:[#allocation33_spill] sm:$0xff] }
 0x3b3   :  { %4451 = vmatprep.subr.bf16.mxu0 %v10595_v41  ;;  %4492 = vmatprep.subr.bf16.mxu1 %v10596_v14  ;;  %v10606_v41 = vld [vmem:[#allocation73_spill] sm:$0xff]  ;;  %v10607_v14 = vld [vmem:[#allocation34_spill] sm:$0xff] }
 0x3b6   :  { %4452 = vmatpush1.bf16.msra.mxu0 %v10597_v29  ;;  %4493 = vmatpush1.bf16.msra.mxu1 %v10598_v26  ;;  %v10608_v29 = vld [vmem:[#allocation74_spill] sm:$0xff]  ;;  %v10609_v26 = vld [vmem:[#allocation35_spill] sm:$0xff] }
 0x3b7   :  { %4453 = vmatprep.subr.bf16.mxu0 %v10599_v27  ;;  %4494 = vmatprep.subr.bf16.mxu1 %v10600_v15  ;;  %v10610_v27 = vld [vmem:[#allocation75_spill] sm:$0xff]  ;;  %v10611_v15 = vld [vmem:[#allocation36_spill] sm:$0xff] }
 0x3ba   :  { %4454 = vmatpush1.bf16.msra.mxu0 %v10601_v6  ;;  %4495 = vmatpush1.bf16.msra.mxu1 %v10602_v62  ;;  %v10612_v62 = vld [vmem:[#allocation37_spill] sm:$0xff] }
 0x3bb   :  { %4455 = vmatprep.subr.bf16.mxu0 %v10603_v50  ;;  %4496 = vmatprep.subr.bf16.mxu1 %v10604_v21  ;;  %v10613_v50 = vld [vmem:[#allocation77_spill] sm:$0xff]  ;;  %v10614_v21 = vld [vmem:[#allocation38_spill] sm:$0xff] }
 0x3be   :  { %4456 = vmatpush1.bf16.msra.mxu0 %v10605_v2  ;;  %4497 = vmatpush1.bf16.msra.mxu1 %v10606_v41  ;;  %v10615_v2 = vld [vmem:[#allocation78_spill] sm:$0xff]  ;;  %v10616_v41 = vld [vmem:[#allocation39_spill] sm:$0xff] }
 0x3bf   :  { %4457 = vmatprep.subr.bf16.mxu0 %v10607_v14  ;;  %4498 = vmatprep.subr.bf16.mxu1 %v10608_v29  ;;  %v10617_v14 = vld [vmem:[#allocation79_spill] sm:$0xff]  ;;  %v10618_v29 = vld [vmem:[#allocation40_spill] sm:$0xff] }
 0x3c2   :  { %4458 = vmatpush1.bf16.msra.mxu0 %v10609_v26  ;;  %4499 = vmatpush1.bf16.msra.mxu1 %v10610_v27  ;;  %v10619_v26 = vld [vmem:[#allocation80_spill] sm:$0xff]  ;;  %v10620_v27 = vld [vmem:[#allocation41_spill] sm:$0xff] }
 0x3c3   :  { %4459 = vmatprep.subr.bf16.mxu0 %v10611_v15  ;;  %4500 = vmatprep.subr.bf16.mxu1 %v10531_v55  ;;  %v10621_v55 = vld [vmem:[#allocation42_spill] sm:$0xff] }
 0x3c6   :  { %4460 = vmatpush1.bf16.msra.mxu0 %v10612_v62  ;;  %4501 = vmatpush1.bf16.msra.mxu1 %v10613_v50  ;;  %v10622_v50 = vld [vmem:[#allocation51_spill] sm:$0xff] }
 0x3c7   :  { %4461 = vmatprep.subr.bf16.mxu0 %v10614_v21  ;;  %4502 = vmatprep.subr.bf16.mxu1 %v10615_v2  ;;  %v10623_v2 = vld [vmem:[#allocation52_spill] sm:$0xff] }
 0x3ca   :  { %4462 = vmatpush1.bf16.msra.mxu0 %v10616_v41  ;;  %4503 = vmatpush1.bf16.msra.mxu1 %v10617_v14  ;;  %v10624_v41 = vld [vmem:[#allocation87_spill] sm:$0xff]  ;;  %v10625_v14 = vld [vmem:[#allocation53_spill] sm:$0xff] }
 0x3cb   :  { %4463 = vmatprep.subr.bf16.mxu0 %v10618_v29  ;;  %4504 = vmatprep.subr.bf16.mxu1 %v10619_v26  ;;  %v10626_v29 = vld [vmem:[#allocation89_spill] sm:$0xff]  ;;  %v10627_v26 = vld [vmem:[#allocation54_spill] sm:$0xff] }
 0x3ce   :  { %4464 = vmatpush1.bf16.msra.mxu0 %v10620_v27  ;;  %4505 = vmatpush1.bf16.msra.mxu1 %v10543_v36  ;;  %v10628_v36 = vld [vmem:[#allocation55_spill] sm:$0xff] }
 0x3cf   :  { %4465 = vmatprep.subr.bf16.mxu0 %v10621_v55  ;;  %4506 = vmatprep.subr.bf16.mxu1 %v10545_v3  ;;  %v10629_v55 = vld [vmem:[#allocation93_spill] sm:$0xff]  ;;  %v10630_v3 = vld [vmem:[#allocation56_spill] sm:$0xff] }
 0x3d2   :  { %4466 = vmatpush1.bf16.msra.mxu0 %v10622_v50  ;;  %4507 = vmatpush1.bf16.msra.mxu1 %v10546_v31  ;;  %v10631_v50 = vld [vmem:[#allocation95_spill] sm:$0xff]  ;;  %v10632_v31 = vld [vmem:[#allocation57_spill] sm:$0xff] }
 0x3d3   :  { %4467 = vmatprep.subr.bf16.mxu0 %v10623_v2  ;;  %4508 = vmatprep.subr.bf16.mxu1 %v10624_v41  ;;  %v10633_v2 = vld [vmem:[#allocation97_spill] sm:$0xff]  ;;  %v10634_v41 = vld [vmem:[#allocation58_spill] sm:$0xff] }
 0x3d6   :  { %4468 = vmatpush1.bf16.msra.mxu0 %v10625_v14  ;;  %4509 = vmatpush1.bf16.msra.mxu1 %v10626_v29  ;;  %v10635_v14 = vld [vmem:[#allocation99_spill] sm:$0xff] }
 0x3d7   :  { %4469 = vmatprep.subr.bf16.mxu0 %v10627_v26  ;;  %4510 = vmatprep.subr.bf16.mxu1 %v10549_v16  ;;  %v10636_v29 = vld [vmem:[#allocation59_spill] sm:$0xff]  ;;  %v10637_v26 = vld [vmem:[#allocation101_spill] sm:$0xff]  ;;  %v10638_v16 = vld [vmem:[#allocation60_spill] sm:$0xff] }
 0x3da   :  { %4470 = vmatpush1.bf16.msra.mxu0 %v10628_v36  ;;  %4511 = vmatpush1.bf16.msra.mxu1 %v10629_v55  ;;  %v10639_v36 = vld [vmem:[#allocation103_spill] sm:$0xff]  ;;  %v10640_v55 = vld [vmem:[#allocation61_spill] sm:$0xff] }
 0x3db   :  { %4471 = vmatprep.subr.bf16.mxu0 %v10630_v3  ;;  %4512 = vmatprep.subr.bf16.mxu1 %v10631_v50  ;;  %v10641_v3 = vld [vmem:[#allocation105_spill] sm:$0xff]  ;;  %v10642_v50 = vld [vmem:[#allocation62_spill] sm:$0xff] }
 0x3de   :  { %4472 = vmatpush1.bf16.msra.mxu0 %v10632_v31  ;;  %4513 = vmatpush1.bf16.msra.mxu1 %v10633_v2  ;;  %v10643_v31 = vld [vmem:[#allocation107_spill] sm:$0xff] }
 0x3df   :  { %4473 = vmatprep.subr.bf16.mxu0 %v10634_v41  ;;  %4514 = vmatprep.subr.bf16.mxu1 %v10635_v14  ;;  %v10644_v2 = vld [vmem:[#allocation63_spill] sm:$0xff]  ;;  %v10645_v41 = vld [vmem:[#allocation108_spill] sm:$0xff] }
 0x3e0   :  { %v10646_v14 = vld [vmem:[#allocation64_spill] sm:$0xff] }
 0x3e2   :  { %4474 = vmatpush1.bf16.msra.mxu0 %v10636_v29  ;;  %4515 = vmatpush1.bf16.msra.mxu1 %v10637_v26  ;;  %v10647_v29 = vld [vmem:[#allocation109_spill] sm:$0xff] }
 0x3e3   :  { %4475 = vmatprep.subr.bf16.mxu0 %v10638_v16  ;;  %4516 = vmatprep.subr.bf16.mxu1 %v10639_v36  ;;  %v10648_v26 = vld [vmem:[#allocation65_spill] sm:$0xff]  ;;  %v10649_v16 = vld [vmem:[#allocation110_spill] sm:$0xff] }
 0x3e4   :  { %v10650_v36 = vld [vmem:[#allocation82_spill] sm:$0xff] }
 0x3e6   :  { %4476 = vmatpush1.bf16.msra.mxu0 %v10640_v55  ;;  %4517 = vmatpush1.bf16.msra.mxu1 %v10641_v3  ;;  %v10651_v55 = vld [vmem:[#allocation111_spill] sm:$0xff] }
 0x3e7   :  { %4477 = vmatprep.subr.bf16.mxu0 %v10642_v50  ;;  %4518 = vmatprep.subr.bf16.mxu1 %v10643_v31 }
 0x3ea   :  { %4478 = vmatpush1.bf16.msra.mxu0 %v10644_v2  ;;  %4519 = vmatpush1.bf16.msra.mxu1 %v10645_v41 }
 0x3eb   :  { %4479 = vmatprep.subr.bf16.mxu0 %v10646_v14  ;;  %4520 = vmatprep.subr.bf16.mxu1 %v10647_v29 }
 0x3ee   :  { %4480 = vmatpush1.bf16.msra.mxu0 %v10648_v26  ;;  %4521 = vmatpush1.bf16.msra.mxu1 %v10649_v16 }
 0x3ef   :  { %4531 = vmatprep.subr.bf16.mxu0 %v10650_v36  ;;  %4572 = vmatprep.subr.bf16.mxu1 %v10651_v55  ;;  %v10652_v36 = vcombine.high %v10560_v32, %v10561_v48 }
 0x444   :  { %v4228_v3 = vpop.f32.mrb[20].mxu0  ;;  %v4269_v50 = vpop.f32.mrb[24].mxu1 }
 0x445   :  { %v4230_v27 = vpop.f32.mrb[21].mxu0  ;;  %v4271_v31 = vpop.f32.mrb[25].mxu1 }
 0x446   :  { %v4366_v21 = vcombine.low %v4228_v3, %v4230_v27  ;;  %v4367_v2 = vcombine.low %v4269_v50, %v4271_v31  ;;  %v4232_v62 = vpop.f32.mrb[22].mxu0  ;;  %v4273_v41 = vpop.f32.mrb[26].mxu1 }
 0x447   :  { %v4233_v15 = vpop.f32.mrb[23].mxu0  ;;  %v4274_v14 = vpop.f32.mrb[27].mxu1 }
 0x448   :  { %v4374_v29 = vrot.slane %v4366_v21, %v8476_v11  ;;  %v4381_v26 = vrot.slane %v4367_v2, %v8476_v11 }
 0x44a   :  { %v4382_v6 = vcombine.low %v4374_v29, %v4381_v26 }
 0x44c   :  { %v4402_v16 = vadd.f32 %v4382_v6, %v10652_v36 }
 0x44e   :  { %v4411_v55 = vrot.slane %v4402_v16, 4  ;;  %v6972_v33 = vmul.f32 -1.442695, %v4402_v16 }
 0x450   :  { %v6973_v40 = vmul.f32 -1.442695, %v4411_v55 }
 0x452   :  { %7795 = vpow2.f32 %v6973_v40 }
 0x453   :  { %7797 = vpow2.f32 %v6972_v33  ;;  %v10653_v33 = vcombine.high %v8744_v12, %v8750_v47 }
 0x45c   :  { %v7796_v62 = vpop.eup %7795 }
 0x45d   :  { %v7798_v14 = vpop.eup %7797  ;;  %v4416_v52 = vadd.f32 1.0, %v7796_v62 }
 0x45e   :  { %v4407_v36 = vadd.f32 1.0, %v7798_v14 }
 0x45f   :  { %7799 = vrcp.f32 %v4416_v52 }
 0x460   :  { %7801 = vrcp.f32 %v4407_v36  ;;  %v10657_v36 = vld [vmem:[#allocation140_spill] sm:$0xff] }
 0x484   :  { %v4310_v27 = vpop.f32.mrb[24].mxu0  ;;  %v4351_v31 = vpop.f32.mrb[28].mxu1 }
 0x485   :  { %v4312_v41 = vpop.f32.mrb[25].mxu0  ;;  %v4353_v15 = vpop.f32.mrb[29].mxu1 }
 0x486   :  { %v4383_v3 = vcombine.low %v4310_v27, %v4312_v41  ;;  %v4384_v21 = vcombine.low %v4351_v31, %v4353_v15  ;;  %v4314_v50 = vpop.f32.mrb[26].mxu0  ;;  %v4355_v2 = vpop.f32.mrb[30].mxu1 }
 0x487   :  { %v4315_v26 = vpop.f32.mrb[27].mxu0  ;;  %v4356_v29 = vpop.f32.mrb[31].mxu1 }
 0x488   :  { %v4391_v6 = vrot.slane %v4383_v3, %v8476_v11  ;;  %v4398_v55 = vrot.slane %v4384_v21, %v8476_v11  ;;  %v7800_v27 = vpop.eup %7799 }
 0x489   :  { %v7802_v31 = vpop.eup %7801  ;;  %v4429_v62 = vmul.f32 %v7800_v27, %v9035_v61  ;;  %v10654_v61 = vld [vmem:[#allocation134_spill] sm:$0xff]  ;;  %v10663_v27 = vld [vmem:[#allocation147_spill] sm:$0xff] }
 0x48a   :  { %v4399_v40 = vcombine.low %v4391_v6, %v4398_v55  ;;  %v10655_v6 = vld [vmem:[#allocation136_spill] sm:$0xff]  ;;  %v10656_v55 = vld [vmem:[#allocation138_spill] sm:$0xff] }
 0x48c   :  { %v4403_v16 = vadd.f32 %v4399_v40, %v10653_v33  ;;  %v10658_v40 = vld [vmem:[#allocation142_spill] sm:$0xff]  ;;  %v10659_v33 = vld [vmem:[#allocation143_spill] sm:$0xff] }
 0x48e   :  { %7803 = vtanh.f32 %v4403_v16  ;;  %v4421_v32 = vrot.slane %v4403_v16, 4  ;;  %v10660_v16 = vld [vmem:[#allocation144_spill] sm:$0xff] }
 0x490   :  { %v6974_v48 = vmul.f32 -1.442695, %v4421_v32  ;;  %v10661_v32 = vld [vmem:[#allocation145_spill] sm:$0xff] }
 0x492   :  { %7805 = vpow2.f32 %v6974_v48  ;;  %v10662_v48 = vld [vmem:[#allocation146_spill] sm:$0xff] }
 0x498   :  { %v7804_v41 = vpop.eup %7803 }
 0x499   :  { %v4430_v15 = vmul.f32 %v7804_v41, %v7802_v31  ;;  %v10664_v31 = vld [vmem:[#allocation149_spill] sm:$0xff]  ;;  %v10665_v41 = vld [vmem:[#allocation152_spill] sm:$0xff] }
 0x49b   :  { %v9184_v3 = vadd.f32 %v4430_v15, %v4429_v62  ;;  %v10666_v62 = vld [vmem:[#allocation153_spill] sm:$0xff] }
 0x49c   :  { %v7806_v14 = vpop.eup %7805  ;;  %v10667_v15 = vld [vmem:[#allocation133_spill] sm:$0xff] }
 0x49d   :  { %v4426_v21 = vadd.f32 1.0, %v7806_v14  ;;  %7807 = vtanh.f32 %v9184_v3  ;;  %v10668_v14 = vld [vmem:[#allocation154_spill] sm:$0xff] }
 0x49f   :  { %7809 = vrcp.f32 %v4426_v21  ;;  %v10669_v21 = vld [vmem:[#allocation135_spill] sm:$0xff] }
 0x4a7   :  { %v7808_v12 = vpop.eup %7807 }
 0x4a9   :  { %v7810_v47 = vpop.eup %7809 }
 0x4aa   :  { %v4433_v52 = vmul.f32 %v7810_v47, %v7808_v12  ;;  %v10670_v12 = vld [vmem:[#allocation155_spill] sm:$0xff]  ;;  %v10671_v47 = vld [vmem:[#allocation137_spill] sm:$0xff] }
 0x4ac   :  { %v4443_v50 = vrot.slane %v4433_v52, %v8476_v11  ;;  %v10672_v52 = vld [vmem:[#allocation156_spill] sm:$0xff] }
 0x4ae   :  { %v4444_v2 = vcombine.high %v4443_v50, %v4443_v50  ;;  %v9188_v29 = vpack.c.bf16 %v4443_v50, %v4443_v50  ;;  %v10673_v50 = vld [vmem:[#allocation139_spill] sm:$0xff] }
 0x4b0   :  { %v4448_v26 = vpack.c.bf16 %v4444_v2, %v4444_v2  ;;  %v10674_v2 = vld [vmem:[#allocation157_spill] sm:$0xff] }
 0x4b2   :  { %4481 = vmatprep.mubr.bf16.mxu0 %v4448_v26  ;;  %4522 = vmatprep.mubr.bf16.mxu1 %v4448_v26 }
 0x4b3   :  { %4482 = vmatmul.mubr.bf16.vlgmr.msra.gmra.mrb[28].mxu0 %v9188_v29  ;;  %4523 = vmatmul.mubr.bf16.vlgmr.msra.gmra.mrb[32].mxu1 %v9188_v29 }
 0x4b4   :  { %4532 = vmatpush1.bf16.msra.mxu0 %v10564_v1  ;;  %4573 = vmatpush1.bf16.msra.mxu1 %v8781_v18 }
 0x4b5   :  { %4563 = vmatprep.mubr.bf16.mxu0 %v4448_v26  ;;  %4604 = vmatprep.mubr.bf16.mxu1 %v4448_v26  ;;  %v10675_v26 = vld [vmem:[#allocation141_spill] sm:$0xff] }
 0x4b6   :  { %4533 = vmatprep.subr.bf16.mxu0 %v10565_v39  ;;  %4574 = vmatprep.subr.bf16.mxu1 %v8798_v9 }
 0x4b8   :  { %4534 = vmatpush1.bf16.msra.mxu0 %v10566_v35  ;;  %4575 = vmatpush1.bf16.msra.mxu1 %v8806_v58 }
 0x4b9   :  { %4535 = vmatprep.subr.bf16.mxu0 %v10567_v37  ;;  %4576 = vmatprep.subr.bf16.mxu1 %v8812_v4 }
 0x4bc   :  { %4536 = vmatpush1.bf16.msra.mxu0 %v10568_v45  ;;  %4577 = vmatpush1.bf16.msra.mxu1 %v8819_v5 }
 0x4bd   :  { %4537 = vmatprep.subr.bf16.mxu0 %v10569_v38  ;;  %4578 = vmatprep.subr.bf16.mxu1 %v8825_v56 }
 0x4c0   :  { %4538 = vmatpush1.bf16.msra.mxu0 %v10570_v0  ;;  %4579 = vmatpush1.bf16.msra.mxu1 %v8831_v8 }
 0x4c1   :  { %4539 = vmatprep.subr.bf16.mxu0 %v10571_v30  ;;  %4580 = vmatprep.subr.bf16.mxu1 %v8837_v13 }
 0x4c4   :  { %4540 = vmatpush1.bf16.msra.mxu0 %v10572_v28  ;;  %4581 = vmatpush1.bf16.msra.mxu1 %v8843_v51 }
 0x4c5   :  { %4541 = vmatprep.subr.bf16.mxu0 %v10573_v25  ;;  %4582 = vmatprep.subr.bf16.mxu1 %v10574_v17 }
 0x4c8   :  { %4542 = vmatpush1.bf16.msra.mxu0 %v10575_v59  ;;  %4583 = vmatpush1.bf16.msra.mxu1 %v10654_v61 }
 0x4c9   :  { %4543 = vmatprep.subr.bf16.mxu0 %v10576_v23  ;;  %4584 = vmatprep.subr.bf16.mxu1 %v10655_v6 }
 0x4cc   :  { %4544 = vmatpush1.bf16.msra.mxu0 %v10577_v20  ;;  %4585 = vmatpush1.bf16.msra.mxu1 %v10656_v55 }
 0x4cd   :  { %4545 = vmatprep.subr.bf16.mxu0 %v10578_v22  ;;  %4586 = vmatprep.subr.bf16.mxu1 %v10657_v36 }
 0x4d0   :  { %4546 = vmatpush1.bf16.msra.mxu0 %v10579_v43  ;;  %4587 = vmatpush1.bf16.msra.mxu1 %v10658_v40 }
 0x4d1   :  { %4547 = vmatprep.subr.bf16.mxu0 %v10580_v54  ;;  %4588 = vmatprep.subr.bf16.mxu1 %v10659_v33 }
 0x4d4   :  { %4548 = vmatpush1.bf16.msra.mxu0 %v10581_v53  ;;  %4589 = vmatpush1.bf16.msra.mxu1 %v10660_v16 }
 0x4d5   :  { %4549 = vmatprep.subr.bf16.mxu0 %v10582_v34  ;;  %4590 = vmatprep.subr.bf16.mxu1 %v10661_v32 }
 0x4d8   :  { %4550 = vmatpush1.bf16.msra.mxu0 %v10583_v46  ;;  %4591 = vmatpush1.bf16.msra.mxu1 %v10662_v48 }
 0x4d9   :  { %4551 = vmatprep.subr.bf16.mxu0 %v10584_v7  ;;  %4592 = vmatprep.subr.bf16.mxu1 %v10663_v27 }
 0x4dc   :  { %4552 = vmatpush1.bf16.msra.mxu0 %v10585_v63  ;;  %4593 = vmatpush1.bf16.msra.mxu1 %v8904_v49 }
 0x4dd   :  { %4553 = vmatprep.subr.bf16.mxu0 %v10586_v42  ;;  %4594 = vmatprep.subr.bf16.mxu1 %v10664_v31 }
 0x4e0   :  { %4554 = vmatpush1.bf16.msra.mxu0 %v10587_v44  ;;  %4595 = vmatpush1.bf16.msra.mxu1 %v8912_v19  ;;  %v10744_v19 = vld [vmem:[#allocation46_spill] sm:$0xff] }
 0x4e1   :  { %4555 = vmatprep.subr.bf16.mxu0 %v10588_v10  ;;  %4596 = vmatprep.subr.bf16.mxu1 %v8916_v57 }
 0x4e4   :  { %4556 = vmatpush1.bf16.msra.mxu0 %v10589_v24  ;;  %4597 = vmatpush1.bf16.msra.mxu1 %v10665_v41 }
 0x4e5   :  { %4557 = vmatprep.subr.bf16.mxu0 %v10590_v60  ;;  %4598 = vmatprep.subr.bf16.mxu1 %v10666_v62  ;;  %v10676_v60 = vld [vmem:[#allocation158_spill] sm:$0xff]  ;;  %v10677_v62 = vld [vmem:[#allocation25_spill] sm:$0xff] }
 0x4e8   :  { %4558 = vmatpush1.bf16.msra.mxu0 %v10667_v15  ;;  %4599 = vmatpush1.bf16.msra.mxu1 %v10668_v14  ;;  %v10678_v15 = vld [vmem:[#allocation66_spill] sm:$0xff] }
 0x4e9   :  { %4559 = vmatprep.subr.bf16.mxu0 %v10669_v21  ;;  %4600 = vmatprep.subr.bf16.mxu1 %v10670_v12  ;;  %v10679_v12 = vld [vmem:[#allocation26_spill] sm:$0xff]  ;;  %v10688_v21 = vld [vmem:[#allocation71_spill] sm:$0xff] }
 0x4ec   :  { %4560 = vmatpush1.bf16.msra.mxu0 %v10671_v47  ;;  %4601 = vmatpush1.bf16.msra.mxu1 %v10672_v52  ;;  %v10680_v47 = vld [vmem:[#allocation67_spill] sm:$0xff] }
 0x4ed   :  { %4561 = vmatprep.subr.bf16.mxu0 %v10673_v50  ;;  %4602 = vmatprep.subr.bf16.mxu1 %v10674_v2  ;;  %v10681_v52 = vld [vmem:[#allocation27_spill] sm:$0xff]  ;;  %v10682_v50 = vld [vmem:[#allocation68_spill] sm:$0xff] }
 0x4ee   :  { %v10683_v2 = vld [vmem:[#allocation28_spill] sm:$0xff] }
 0x4f0   :  { %4562 = vmatpush1.bf16.msra.mxu0 %v10675_v26  ;;  %4603 = vmatpush1.bf16.msra.mxu1 %v10676_v60  ;;  %v10684_v26 = vld [vmem:[#allocation69_spill] sm:$0xff] }
 0x4f1   :  { %4704 = vmatprep.subr.bf16.mxu0 %v10677_v62  ;;  %4745 = vmatprep.subr.bf16.mxu1 %v10678_v15  ;;  %v10685_v60 = vld [vmem:[#allocation29_spill] sm:$0xff]  ;;  %v10686_v62 = vld [vmem:[#allocation70_spill] sm:$0xff] }
 0x4f2   :  { %v10687_v15 = vld [vmem:[#allocation30_spill] sm:$0xff] }
 0x4f3   :  { %4564 = vmatmul.mubr.bf16.vlgmr.msra.gmra.mrb[32].mxu0 %v9188_v29  ;;  %4605 = vmatmul.mubr.bf16.vlgmr.msra.gmra.mrb[36].mxu1 %v9188_v29  ;;  %v10689_v29 = vld [vmem:[#allocation31_spill] sm:$0xff] }
 0x4f4   :  { %4705 = vmatpush1.bf16.msra.mxu0 %v10679_v12  ;;  %4746 = vmatpush1.bf16.msra.mxu1 %v10680_v47  ;;  %v10690_v12 = vld [vmem:[#allocation72_spill] sm:$0xff]  ;;  %v10691_v47 = vld [vmem:[#allocation33_spill] sm:$0xff] }
 0x4f5   :  { %4706 = vmatprep.subr.bf16.mxu0 %v10681_v52  ;;  %4747 = vmatprep.subr.bf16.mxu1 %v10682_v50  ;;  %v10692_v52 = vld [vmem:[#allocation73_spill] sm:$0xff]  ;;  %v10693_v50 = vld [vmem:[#allocation34_spill] sm:$0xff] }
 0x4f8   :  { %4707 = vmatpush1.bf16.msra.mxu0 %v10683_v2  ;;  %4748 = vmatpush1.bf16.msra.mxu1 %v10684_v26  ;;  %v10694_v2 = vld [vmem:[#allocation74_spill] sm:$0xff]  ;;  %v10695_v26 = vld [vmem:[#allocation35_spill] sm:$0xff] }
 0x4f9   :  { %4708 = vmatprep.subr.bf16.mxu0 %v10685_v60  ;;  %4749 = vmatprep.subr.bf16.mxu1 %v10686_v62  ;;  %v10696_v60 = vld [vmem:[#allocation75_spill] sm:$0xff]  ;;  %v10697_v62 = vld [vmem:[#allocation36_spill] sm:$0xff] }
 0x4fc   :  { %4709 = vmatpush1.bf16.msra.mxu0 %v10687_v15  ;;  %4750 = vmatpush1.bf16.msra.mxu1 %v10688_v21  ;;  %v10698_v15 = vld [vmem:[#allocation76_spill] sm:$0xff]  ;;  %v10699_v21 = vld [vmem:[#allocation37_spill] sm:$0xff] }
 0x4fd   :  { %4710 = vmatprep.subr.bf16.mxu0 %v10689_v29  ;;  %4751 = vmatprep.subr.bf16.mxu1 %v10690_v12  ;;  %v10700_v29 = vld [vmem:[#allocation77_spill] sm:$0xff]  ;;  %v10701_v12 = vld [vmem:[#allocation38_spill] sm:$0xff] }
 0x500   :  { %4711 = vmatpush1.bf16.msra.mxu0 %v10691_v47  ;;  %4752 = vmatpush1.bf16.msra.mxu1 %v10692_v52  ;;  %v10702_v47 = vld [vmem:[#allocation78_spill] sm:$0xff]  ;;  %v10703_v52 = vld [vmem:[#allocation39_spill] sm:$0xff] }
 0x501   :  { %4712 = vmatprep.subr.bf16.mxu0 %v10693_v50  ;;  %4753 = vmatprep.subr.bf16.mxu1 %v10694_v2  ;;  %v10704_v50 = vld [vmem:[#allocation79_spill] sm:$0xff]  ;;  %v10705_v2 = vld [vmem:[#allocation40_spill] sm:$0xff] }
 0x504   :  { %4713 = vmatpush1.bf16.msra.mxu0 %v10695_v26  ;;  %4754 = vmatpush1.bf16.msra.mxu1 %v10696_v60  ;;  %v10706_v26 = vld [vmem:[#allocation80_spill] sm:$0xff]  ;;  %v10707_v60 = vld [vmem:[#allocation41_spill] sm:$0xff] }
 0x505   :  { %4714 = vmatprep.subr.bf16.mxu0 %v10697_v62  ;;  %4755 = vmatprep.subr.bf16.mxu1 %v10698_v15  ;;  %v10708_v62 = vld [vmem:[#allocation81_spill] sm:$0xff]  ;;  %v10709_v15 = vld [vmem:[#allocation42_spill] sm:$0xff] }
 0x508   :  { %4715 = vmatpush1.bf16.msra.mxu0 %v10699_v21  ;;  %4756 = vmatpush1.bf16.msra.mxu1 %v10700_v29  ;;  %v10710_v21 = vld [vmem:[#allocation83_spill] sm:$0xff] }
 0x509   :  { %4716 = vmatprep.subr.bf16.mxu0 %v10701_v12  ;;  %4757 = vmatprep.subr.bf16.mxu1 %v10702_v47  ;;  %v10711_v29 = vld [vmem:[#allocation51_spill] sm:$0xff]  ;;  %v10712_v12 = vld [vmem:[#allocation85_spill] sm:$0xff]  ;;  %v10713_v47 = vld [vmem:[#allocation52_spill] sm:$0xff] }
 0x50c   :  { %4717 = vmatpush1.bf16.msra.mxu0 %v10703_v52  ;;  %4758 = vmatpush1.bf16.msra.mxu1 %v10704_v50  ;;  %v10714_v52 = vld [vmem:[#allocation87_spill] sm:$0xff]  ;;  %v10715_v50 = vld [vmem:[#allocation53_spill] sm:$0xff] }
 0x50d   :  { %4718 = vmatprep.subr.bf16.mxu0 %v10705_v2  ;;  %4759 = vmatprep.subr.bf16.mxu1 %v10706_v26  ;;  %v10716_v2 = vld [vmem:[#allocation89_spill] sm:$0xff]  ;;  %v10717_v26 = vld [vmem:[#allocation54_spill] sm:$0xff] }
 0x510   :  { %4719 = vmatpush1.bf16.msra.mxu0 %v10707_v60  ;;  %4760 = vmatpush1.bf16.msra.mxu1 %v10708_v62  ;;  %v10718_v60 = vld [vmem:[#allocation91_spill] sm:$0xff] }
 0x511   :  { %4720 = vmatprep.subr.bf16.mxu0 %v10709_v15  ;;  %4761 = vmatprep.subr.bf16.mxu1 %v10710_v21  ;;  %v10719_v62 = vld [vmem:[#allocation55_spill] sm:$0xff]  ;;  %v10720_v15 = vld [vmem:[#allocation93_spill] sm:$0xff]  ;;  %v10721_v21 = vld [vmem:[#allocation56_spill] sm:$0xff] }
 0x514   :  { %4721 = vmatpush1.bf16.msra.mxu0 %v10711_v29  ;;  %4762 = vmatpush1.bf16.msra.mxu1 %v10712_v12  ;;  %v10722_v29 = vld [vmem:[#allocation95_spill] sm:$0xff]  ;;  %v10723_v12 = vld [vmem:[#allocation57_spill] sm:$0xff] }
 0x515   :  { %4722 = vmatprep.subr.bf16.mxu0 %v10713_v47  ;;  %4763 = vmatprep.subr.bf16.mxu1 %v10714_v52  ;;  %v10724_v47 = vld [vmem:[#allocation97_spill] sm:$0xff]  ;;  %v10725_v52 = vld [vmem:[#allocation58_spill] sm:$0xff] }
 0x518   :  { %4723 = vmatpush1.bf16.msra.mxu0 %v10715_v50  ;;  %4764 = vmatpush1.bf16.msra.mxu1 %v10716_v2  ;;  %v10726_v50 = vld [vmem:[#allocation99_spill] sm:$0xff] }
 0x519   :  { %4724 = vmatprep.subr.bf16.mxu0 %v10717_v26  ;;  %4765 = vmatprep.subr.bf16.mxu1 %v10718_v60  ;;  %v10727_v2 = vld [vmem:[#allocation59_spill] sm:$0xff]  ;;  %v10728_v26 = vld [vmem:[#allocation101_spill] sm:$0xff]  ;;  %v10729_v60 = vld [vmem:[#allocation60_spill] sm:$0xff] }
 0x51c   :  { %4725 = vmatpush1.bf16.msra.mxu0 %v10719_v62  ;;  %4766 = vmatpush1.bf16.msra.mxu1 %v10720_v15  ;;  %v10730_v62 = vld [vmem:[#allocation103_spill] sm:$0xff]  ;;  %v10731_v15 = vld [vmem:[#allocation61_spill] sm:$0xff] }
 0x51d   :  { %4726 = vmatprep.subr.bf16.mxu0 %v10721_v21  ;;  %4767 = vmatprep.subr.bf16.mxu1 %v10722_v29  ;;  %v10732_v21 = vld [vmem:[#allocation105_spill] sm:$0xff]  ;;  %v10733_v29 = vld [vmem:[#allocation62_spill] sm:$0xff] }
 0x520   :  { %4727 = vmatpush1.bf16.msra.mxu0 %v10723_v12  ;;  %4768 = vmatpush1.bf16.msra.mxu1 %v10724_v47  ;;  %v10734_v12 = vld [vmem:[#allocation107_spill] sm:$0xff] }
 0x521   :  { %4728 = vmatprep.subr.bf16.mxu0 %v10725_v52  ;;  %4769 = vmatprep.subr.bf16.mxu1 %v10726_v50  ;;  %v10735_v47 = vld [vmem:[#allocation63_spill] sm:$0xff]  ;;  %v10736_v52 = vld [vmem:[#allocation108_spill] sm:$0xff] }
 0x522   :  { %v10737_v50 = vld [vmem:[#allocation64_spill] sm:$0xff] }
 0x524   :  { %4729 = vmatpush1.bf16.msra.mxu0 %v10727_v2  ;;  %4770 = vmatpush1.bf16.msra.mxu1 %v10728_v26  ;;  %v10738_v2 = vld [vmem:[#allocation109_spill] sm:$0xff] }
 0x525   :  { %4730 = vmatprep.subr.bf16.mxu0 %v10729_v60  ;;  %4771 = vmatprep.subr.bf16.mxu1 %v10730_v62  ;;  %v10739_v26 = vld [vmem:[#allocation65_spill] sm:$0xff]  ;;  %v10740_v60 = vld [vmem:[#allocation110_spill] sm:$0xff] }
 0x526   :  { %v10741_v62 = vld [vmem:[#allocation82_spill] sm:$0xff] }
 0x528   :  { %4731 = vmatpush1.bf16.msra.mxu0 %v10731_v15  ;;  %4772 = vmatpush1.bf16.msra.mxu1 %v10732_v21  ;;  %v10742_v15 = vld [vmem:[#allocation111_spill] sm:$0xff] }
 0x529   :  { %4732 = vmatprep.subr.bf16.mxu0 %v10733_v29  ;;  %4773 = vmatprep.subr.bf16.mxu1 %v10734_v12 }
 0x52c   :  { %4733 = vmatpush1.bf16.msra.mxu0 %v10735_v47  ;;  %4774 = vmatpush1.bf16.msra.mxu1 %v10736_v52 }
 0x52d   :  { %4734 = vmatprep.subr.bf16.mxu0 %v10737_v50  ;;  %4775 = vmatprep.subr.bf16.mxu1 %v10738_v2 }
 0x530   :  { %4735 = vmatpush1.bf16.msra.mxu0 %v10739_v26  ;;  %4776 = vmatpush1.bf16.msra.mxu1 %v10740_v60  ;;  %v10743_v60 = vld [vmem:[#allocation44_spill] sm:$0xff] }
 0x531   :  { %4786 = vmatprep.subr.bf16.mxu0 %v10741_v62  ;;  %4827 = vmatprep.subr.bf16.mxu1 %v10742_v15  ;;  %v10745_v62 = vcombine.low %v10743_v60, %v10744_v19 }
 0x586   :  { %v4483_v21 = vpop.f32.mrb[28].mxu0  ;;  %v4524_v29 = vpop.f32.mrb[32].mxu1 }
 0x587   :  { %v4485_v14 = vpop.f32.mrb[29].mxu0  ;;  %v4526_v12 = vpop.f32.mrb[33].mxu1 }
 0x588   :  { %v4621_v41 = vcombine.low %v4483_v21, %v4485_v14  ;;  %v4622_v47 = vcombine.low %v4524_v29, %v4526_v12  ;;  %v4487_v24 = vpop.f32.mrb[30].mxu0  ;;  %v4528_v52 = vpop.f32.mrb[34].mxu1 }
 0x589   :  { %v4488_v57 = vpop.f32.mrb[31].mxu0  ;;  %v4529_v50 = vpop.f32.mrb[35].mxu1 }
 0x58a   :  { %v4629_v2 = vrot.slane %v4621_v41, %v8476_v11  ;;  %v4636_v26 = vrot.slane %v4622_v47, %v8476_v11 }
 0x58c   :  { %v4637_v10 = vcombine.low %v4629_v2, %v4636_v26 }
 0x58e   :  { %v4657_v44 = vadd.f32 %v4637_v10, %v10745_v62 }
 0x590   :  { %v4666_v15 = vrot.slane %v4657_v44, 4  ;;  %v6975_v42 = vmul.f32 -1.442695, %v4657_v44 }
 0x592   :  { %v6976_v31 = vmul.f32 -1.442695, %v4666_v15  ;;  %v10747_v15 = vld [vmem:[#allocation117_spill] sm:$0xff] }
 0x594   :  { %7811 = vpow2.f32 %v6976_v31 }
 0x595   :  { %7813 = vpow2.f32 %v6975_v42  ;;  %v10746_v42 = vld [vmem:[#allocation116_spill] sm:$0xff] }
 0x596   :  { %v10748_v19 = vcombine.low %v10746_v42, %v10747_v15 }
 0x59e   :  { %v7812_v24 = vpop.eup %7811 }
 0x59f   :  { %v7814_v52 = vpop.eup %7813  ;;  %v4671_v49 = vadd.f32 1.0, %v7812_v24 }
 0x5a0   :  { %v4662_v44 = vadd.f32 1.0, %v7814_v52 }
 0x5a1   :  { %7815 = vrcp.f32 %v4671_v49 }
 0x5a2   :  { %7817 = vrcp.f32 %v4662_v44  ;;  %v10750_v44 = vld [vmem:[#allocation127_spill] sm:$0xff] }
 0x5c6   :  { %v4565_v14 = vpop.f32.mrb[32].mxu0  ;;  %v4606_v21 = vpop.f32.mrb[36].mxu1 }
 0x5c7   :  { %v4567_v12 = vpop.f32.mrb[33].mxu0  ;;  %v4608_v57 = vpop.f32.mrb[37].mxu1 }
 0x5c8   :  { %v4638_v50 = vcombine.low %v4565_v14, %v4567_v12  ;;  %v4639_v41 = vcombine.low %v4606_v21, %v4608_v57  ;;  %v4569_v29 = vpop.f32.mrb[34].mxu0  ;;  %v4610_v47 = vpop.f32.mrb[38].mxu1 }
 0x5c9   :  { %v4570_v2 = vpop.f32.mrb[35].mxu0  ;;  %v4611_v26 = vpop.f32.mrb[39].mxu1 }
 0x5ca   :  { %v4646_v10 = vrot.slane %v4638_v50, %v8476_v11  ;;  %v4653_v62 = vrot.slane %v4639_v41, %v8476_v11  ;;  %v7816_v12 = vpop.eup %7815 }
 0x5cb   :  { %v7818_v57 = vpop.eup %7817  ;;  %v4684_v24 = vmul.f32 %v7816_v12, %v9184_v3  ;;  %v10749_v3 = vld [vmem:[#allocation148_spill] sm:$0xff]  ;;  %v10754_v12 = vld [vmem:[#allocation129_spill] sm:$0xff] }
 0x5cc   :  { %v4654_v31 = vcombine.low %v4646_v10, %v4653_v62 }
 0x5ce   :  { %v4658_v60 = vadd.f32 %v4654_v31, %v10748_v19  ;;  %v10751_v31 = vld [vmem:[#allocation149_spill] sm:$0xff] }
 0x5d0   :  { %7819 = vtanh.f32 %v4658_v60  ;;  %v4676_v14 = vrot.slane %v4658_v60, 4 }
 0x5d2   :  { %v6977_v21 = vmul.f32 -1.442695, %v4676_v14  ;;  %v10752_v14 = vld [vmem:[#allocation128_spill] sm:$0xff] }
 0x5d4   :  { %7821 = vpow2.f32 %v6977_v21  ;;  %v10753_v21 = vld [vmem:[#allocation150_spill] sm:$0xff] }
 0x5da   :  { %v7820_v29 = vpop.eup %7819 }
 0x5db   :  { %v4685_v50 = vmul.f32 %v7820_v29, %v7818_v57  ;;  %v10755_v57 = vld [vmem:[#allocation151_spill] sm:$0xff]  ;;  %v10756_v29 = vld [vmem:[#allocation130_spill] sm:$0xff] }
 0x5dd   :  { %v9333_v47 = vadd.f32 %v4685_v50, %v4684_v24  ;;  %v10757_v24 = vld [vmem:[#allocation152_spill] sm:$0xff]  ;;  %v10758_v50 = vld [vmem:[#allocation131_spill] sm:$0xff] }
 0x5de   :  { %v7822_v52 = vpop.eup %7821 }
 0x5df   :  { %v4681_v41 = vadd.f32 1.0, %v7822_v52  ;;  %7823 = vtanh.f32 %v9333_v47  ;;  %v10759_v52 = vld [vmem:[#allocation153_spill] sm:$0xff] }
 0x5e1   :  { %7825 = vrcp.f32 %v4681_v41  ;;  %v10760_v41 = vld [vmem:[#allocation133_spill] sm:$0xff] }
 0x5e9   :  { %v7824_v49 = vpop.eup %7823 }
 0x5eb   :  { %v7826_v19 = vpop.eup %7825 }
 0x5ec   :  { %v4688_v2 = vmul.f32 %v7826_v19, %v7824_v49  ;;  %v10761_v49 = vld [vmem:[#allocation154_spill] sm:$0xff]  ;;  %v10762_v19 = vld [vmem:[#allocation135_spill] sm:$0xff] }
 0x5ee   :  { %v4698_v60 = vrot.slane %v4688_v2, %v8476_v11  ;;  %v10763_v2 = vld [vmem:[#allocation155_spill] sm:$0xff] }
 0x5f0   :  { %v4699_v26 = vcombine.high %v4698_v60, %v4698_v60  ;;  %v9337_v62 = vpack.c.bf16 %v4698_v60, %v4698_v60  ;;  %v10764_v60 = vld [vmem:[#allocation137_spill] sm:$0xff] }
 0x5f2   :  { %v4703_v10 = vpack.c.bf16 %v4699_v26, %v4699_v26  ;;  %v10765_v26 = vld [vmem:[#allocation156_spill] sm:$0xff] }
 0x5f4   :  { %4736 = vmatprep.mubr.bf16.mxu0 %v4703_v10  ;;  %4777 = vmatprep.mubr.bf16.mxu1 %v4703_v10 }
 0x5f5   :  { %4737 = vmatmul.mubr.bf16.vlgmr.msra.gmra.mrb[36].mxu0 %v9337_v62  ;;  %4778 = vmatmul.mubr.bf16.vlgmr.msra.gmra.mrb[40].mxu1 %v9337_v62 }
 0x5f6   :  { %4787 = vmatpush1.bf16.msra.mxu0 %v10564_v1  ;;  %4828 = vmatpush1.bf16.msra.mxu1 %v8781_v18 }
 0x5f7   :  { %4818 = vmatprep.mubr.bf16.mxu0 %v4703_v10  ;;  %4859 = vmatprep.mubr.bf16.mxu1 %v4703_v10  ;;  %v10766_v10 = vld [vmem:[#allocation139_spill] sm:$0xff] }
 0x5f8   :  { %4788 = vmatprep.subr.bf16.mxu0 %v10565_v39  ;;  %4829 = vmatprep.subr.bf16.mxu1 %v8798_v9 }
 0x5fa   :  { %4789 = vmatpush1.bf16.msra.mxu0 %v10566_v35  ;;  %4830 = vmatpush1.bf16.msra.mxu1 %v8806_v58 }
 0x5fb   :  { %4790 = vmatprep.subr.bf16.mxu0 %v10567_v37  ;;  %4831 = vmatprep.subr.bf16.mxu1 %v8812_v4 }
 0x5fe   :  { %4791 = vmatpush1.bf16.msra.mxu0 %v10568_v45  ;;  %4832 = vmatpush1.bf16.msra.mxu1 %v8819_v5 }
 0x5ff   :  { %4792 = vmatprep.subr.bf16.mxu0 %v10569_v38  ;;  %4833 = vmatprep.subr.bf16.mxu1 %v8825_v56 }
 0x602   :  { %4793 = vmatpush1.bf16.msra.mxu0 %v10570_v0  ;;  %4834 = vmatpush1.bf16.msra.mxu1 %v8831_v8 }
 0x603   :  { %4794 = vmatprep.subr.bf16.mxu0 %v10571_v30  ;;  %4835 = vmatprep.subr.bf16.mxu1 %v8837_v13 }
 0x606   :  { %4795 = vmatpush1.bf16.msra.mxu0 %v10572_v28  ;;  %4836 = vmatpush1.bf16.msra.mxu1 %v8843_v51 }
 0x607   :  { %4796 = vmatprep.subr.bf16.mxu0 %v10573_v25  ;;  %4837 = vmatprep.subr.bf16.mxu1 %v10574_v17 }
 0x60a   :  { %4797 = vmatpush1.bf16.msra.mxu0 %v10575_v59  ;;  %4838 = vmatpush1.bf16.msra.mxu1 %v10654_v61 }
 0x60b   :  { %4798 = vmatprep.subr.bf16.mxu0 %v10576_v23  ;;  %4839 = vmatprep.subr.bf16.mxu1 %v10655_v6 }
 0x60e   :  { %4799 = vmatpush1.bf16.msra.mxu0 %v10577_v20  ;;  %4840 = vmatpush1.bf16.msra.mxu1 %v10656_v55 }
 0x60f   :  { %4800 = vmatprep.subr.bf16.mxu0 %v10578_v22  ;;  %4841 = vmatprep.subr.bf16.mxu1 %v10657_v36 }
 0x612   :  { %4801 = vmatpush1.bf16.msra.mxu0 %v10579_v43  ;;  %4842 = vmatpush1.bf16.msra.mxu1 %v10658_v40 }
 0x613   :  { %4802 = vmatprep.subr.bf16.mxu0 %v10580_v54  ;;  %4843 = vmatprep.subr.bf16.mxu1 %v10659_v33 }
 0x616   :  { %4803 = vmatpush1.bf16.msra.mxu0 %v10581_v53  ;;  %4844 = vmatpush1.bf16.msra.mxu1 %v10660_v16 }
 0x617   :  { %4804 = vmatprep.subr.bf16.mxu0 %v10582_v34  ;;  %4845 = vmatprep.subr.bf16.mxu1 %v10661_v32 }
 0x61a   :  { %4805 = vmatpush1.bf16.msra.mxu0 %v10583_v46  ;;  %4846 = vmatpush1.bf16.msra.mxu1 %v10662_v48 }
 0x61b   :  { %4806 = vmatprep.subr.bf16.mxu0 %v10584_v7  ;;  %4847 = vmatprep.subr.bf16.mxu1 %v10663_v27 }
 0x61e   :  { %4807 = vmatpush1.bf16.msra.mxu0 %v10585_v63  ;;  %4848 = vmatpush1.bf16.msra.mxu1 %v10749_v3 }
 0x61f   :  { %4808 = vmatprep.subr.bf16.mxu0 %v10750_v44  ;;  %4849 = vmatprep.subr.bf16.mxu1 %v10751_v31  ;;  %v10837_v31 = vld [vmem:[#allocation46_spill] sm:$0xff] }
 0x622   :  { %4809 = vmatpush1.bf16.msra.mxu0 %v10752_v14  ;;  %4850 = vmatpush1.bf16.msra.mxu1 %v10753_v21 }
 0x623   :  { %4810 = vmatprep.subr.bf16.mxu0 %v10754_v12  ;;  %4851 = vmatprep.subr.bf16.mxu1 %v10755_v57 }
 0x626   :  { %4811 = vmatpush1.bf16.msra.mxu0 %v10756_v29  ;;  %4852 = vmatpush1.bf16.msra.mxu1 %v10757_v24  ;;  %v10767_v29 = vld [vmem:[#allocation157_spill] sm:$0xff] }
 0x627   :  { %4812 = vmatprep.subr.bf16.mxu0 %v10758_v50  ;;  %4853 = vmatprep.subr.bf16.mxu1 %v10759_v52  ;;  %v10768_v24 = vld [vmem:[#allocation141_spill] sm:$0xff]  ;;  %v10769_v50 = vld [vmem:[#allocation158_spill] sm:$0xff] }
 0x628   :  { %v10770_v52 = vld [vmem:[#allocation25_spill] sm:$0xff] }
 0x62a   :  { %4813 = vmatpush1.bf16.msra.mxu0 %v10760_v41  ;;  %4854 = vmatpush1.bf16.msra.mxu1 %v10761_v49  ;;  %v10771_v41 = vld [vmem:[#allocation66_spill] sm:$0xff] }
 0x62b   :  { %4814 = vmatprep.subr.bf16.mxu0 %v10762_v19  ;;  %4855 = vmatprep.subr.bf16.mxu1 %v10763_v2  ;;  %v10772_v2 = vld [vmem:[#allocation26_spill] sm:$0xff]  ;;  %v10781_v19 = vld [vmem:[#allocation71_spill] sm:$0xff] }
 0x62e   :  { %4815 = vmatpush1.bf16.msra.mxu0 %v10764_v60  ;;  %4856 = vmatpush1.bf16.msra.mxu1 %v10765_v26  ;;  %v10773_v60 = vld [vmem:[#allocation67_spill] sm:$0xff] }
 0x62f   :  { %4816 = vmatprep.subr.bf16.mxu0 %v10766_v10  ;;  %4857 = vmatprep.subr.bf16.mxu1 %v10767_v29  ;;  %v10774_v26 = vld [vmem:[#allocation27_spill] sm:$0xff]  ;;  %v10775_v10 = vld [vmem:[#allocation68_spill] sm:$0xff] }
 0x630   :  { %v10776_v29 = vld [vmem:[#allocation28_spill] sm:$0xff] }
 0x632   :  { %4817 = vmatpush1.bf16.msra.mxu0 %v10768_v24  ;;  %4858 = vmatpush1.bf16.msra.mxu1 %v10769_v50  ;;  %v10777_v24 = vld [vmem:[#allocation69_spill] sm:$0xff] }
 0x633   :  { %4959 = vmatprep.subr.bf16.mxu0 %v10770_v52  ;;  %5000 = vmatprep.subr.bf16.mxu1 %v10771_v41  ;;  %v10778_v50 = vld [vmem:[#allocation29_spill] sm:$0xff]  ;;  %v10779_v52 = vld [vmem:[#allocation70_spill] sm:$0xff] }
 0x634   :  { %v10780_v41 = vld [vmem:[#allocation30_spill] sm:$0xff] }
 0x635   :  { %4819 = vmatmul.mubr.bf16.vlgmr.msra.gmra.mrb[40].mxu0 %v9337_v62  ;;  %4860 = vmatmul.mubr.bf16.vlgmr.msra.gmra.mrb[44].mxu1 %v9337_v62  ;;  %v10782_v62 = vld [vmem:[#allocation31_spill] sm:$0xff] }
 0x636   :  { %4960 = vmatpush1.bf16.msra.mxu0 %v10772_v2  ;;  %5001 = vmatpush1.bf16.msra.mxu1 %v10773_v60  ;;  %v10783_v2 = vld [vmem:[#allocation72_spill] sm:$0xff]  ;;  %v10784_v60 = vld [vmem:[#allocation33_spill] sm:$0xff] }
 0x637   :  { %4961 = vmatprep.subr.bf16.mxu0 %v10774_v26  ;;  %5002 = vmatprep.subr.bf16.mxu1 %v10775_v10  ;;  %v10785_v26 = vld [vmem:[#allocation73_spill] sm:$0xff]  ;;  %v10786_v10 = vld [vmem:[#allocation34_spill] sm:$0xff] }
 0x63a   :  { %4962 = vmatpush1.bf16.msra.mxu0 %v10776_v29  ;;  %5003 = vmatpush1.bf16.msra.mxu1 %v10777_v24  ;;  %v10787_v29 = vld [vmem:[#allocation74_spill] sm:$0xff]  ;;  %v10788_v24 = vld [vmem:[#allocation35_spill] sm:$0xff] }
 0x63b   :  { %4963 = vmatprep.subr.bf16.mxu0 %v10778_v50  ;;  %5004 = vmatprep.subr.bf16.mxu1 %v10779_v52  ;;  %v10789_v50 = vld [vmem:[#allocation75_spill] sm:$0xff]  ;;  %v10790_v52 = vld [vmem:[#allocation36_spill] sm:$0xff] }
 0x63e   :  { %4964 = vmatpush1.bf16.msra.mxu0 %v10780_v41  ;;  %5005 = vmatpush1.bf16.msra.mxu1 %v10781_v19  ;;  %v10791_v41 = vld [vmem:[#allocation76_spill] sm:$0xff]  ;;  %v10792_v19 = vld [vmem:[#allocation37_spill] sm:$0xff] }
 0x63f   :  { %4965 = vmatprep.subr.bf16.mxu0 %v10782_v62  ;;  %5006 = vmatprep.subr.bf16.mxu1 %v10783_v2  ;;  %v10793_v62 = vld [vmem:[#allocation77_spill] sm:$0xff]  ;;  %v10794_v2 = vld [vmem:[#allocation38_spill] sm:$0xff] }
 0x642   :  { %4966 = vmatpush1.bf16.msra.mxu0 %v10784_v60  ;;  %5007 = vmatpush1.bf16.msra.mxu1 %v10785_v26  ;;  %v10795_v60 = vld [vmem:[#allocation78_spill] sm:$0xff]  ;;  %v10796_v26 = vld [vmem:[#allocation39_spill] sm:$0xff] }
 0x643   :  { %4967 = vmatprep.subr.bf16.mxu0 %v10786_v10  ;;  %5008 = vmatprep.subr.bf16.mxu1 %v10787_v29  ;;  %v10797_v10 = vld [vmem:[#allocation79_spill] sm:$0xff]  ;;  %v10798_v29 = vld [vmem:[#allocation40_spill] sm:$0xff] }
 0x646   :  { %4968 = vmatpush1.bf16.msra.mxu0 %v10788_v24  ;;  %5009 = vmatpush1.bf16.msra.mxu1 %v10789_v50  ;;  %v10799_v24 = vld [vmem:[#allocation80_spill] sm:$0xff]  ;;  %v10800_v50 = vld [vmem:[#allocation41_spill] sm:$0xff] }
 0x647   :  { %4969 = vmatprep.subr.bf16.mxu0 %v10790_v52  ;;  %5010 = vmatprep.subr.bf16.mxu1 %v10791_v41  ;;  %v10801_v52 = vld [vmem:[#allocation81_spill] sm:$0xff]  ;;  %v10802_v41 = vld [vmem:[#allocation42_spill] sm:$0xff] }
 0x64a   :  { %4970 = vmatpush1.bf16.msra.mxu0 %v10792_v19  ;;  %5011 = vmatpush1.bf16.msra.mxu1 %v10793_v62  ;;  %v10803_v19 = vld [vmem:[#allocation83_spill] sm:$0xff] }
 0x64b   :  { %4971 = vmatprep.subr.bf16.mxu0 %v10794_v2  ;;  %5012 = vmatprep.subr.bf16.mxu1 %v10795_v60  ;;  %v10804_v62 = vld [vmem:[#allocation51_spill] sm:$0xff]  ;;  %v10805_v2 = vld [vmem:[#allocation85_spill] sm:$0xff]  ;;  %v10806_v60 = vld [vmem:[#allocation52_spill] sm:$0xff] }
 0x64e   :  { %4972 = vmatpush1.bf16.msra.mxu0 %v10796_v26  ;;  %5013 = vmatpush1.bf16.msra.mxu1 %v10797_v10  ;;  %v10807_v26 = vld [vmem:[#allocation87_spill] sm:$0xff]  ;;  %v10808_v10 = vld [vmem:[#allocation53_spill] sm:$0xff] }
 0x64f   :  { %4973 = vmatprep.subr.bf16.mxu0 %v10798_v29  ;;  %5014 = vmatprep.subr.bf16.mxu1 %v10799_v24  ;;  %v10809_v29 = vld [vmem:[#allocation89_spill] sm:$0xff]  ;;  %v10810_v24 = vld [vmem:[#allocation54_spill] sm:$0xff] }
 0x652   :  { %4974 = vmatpush1.bf16.msra.mxu0 %v10800_v50  ;;  %5015 = vmatpush1.bf16.msra.mxu1 %v10801_v52  ;;  %v10811_v50 = vld [vmem:[#allocation91_spill] sm:$0xff] }
 0x653   :  { %4975 = vmatprep.subr.bf16.mxu0 %v10802_v41  ;;  %5016 = vmatprep.subr.bf16.mxu1 %v10803_v19  ;;  %v10812_v52 = vld [vmem:[#allocation55_spill] sm:$0xff]  ;;  %v10813_v41 = vld [vmem:[#allocation93_spill] sm:$0xff]  ;;  %v10814_v19 = vld [vmem:[#allocation56_spill] sm:$0xff] }
 0x656   :  { %4976 = vmatpush1.bf16.msra.mxu0 %v10804_v62  ;;  %5017 = vmatpush1.bf16.msra.mxu1 %v10805_v2  ;;  %v10815_v62 = vld [vmem:[#allocation95_spill] sm:$0xff]  ;;  %v10816_v2 = vld [vmem:[#allocation57_spill] sm:$0xff] }
 0x657   :  { %4977 = vmatprep.subr.bf16.mxu0 %v10806_v60  ;;  %5018 = vmatprep.subr.bf16.mxu1 %v10807_v26  ;;  %v10817_v60 = vld [vmem:[#allocation97_spill] sm:$0xff]  ;;  %v10818_v26 = vld [vmem:[#allocation58_spill] sm:$0xff] }
 0x65a   :  { %4978 = vmatpush1.bf16.msra.mxu0 %v10808_v10  ;;  %5019 = vmatpush1.bf16.msra.mxu1 %v10809_v29  ;;  %v10819_v10 = vld [vmem:[#allocation99_spill] sm:$0xff] }
 0x65b   :  { %4979 = vmatprep.subr.bf16.mxu0 %v10810_v24  ;;  %5020 = vmatprep.subr.bf16.mxu1 %v10811_v50  ;;  %v10820_v29 = vld [vmem:[#allocation59_spill] sm:$0xff]  ;;  %v10821_v24 = vld [vmem:[#allocation101_spill] sm:$0xff]  ;;  %v10822_v50 = vld [vmem:[#allocation60_spill] sm:$0xff] }
 0x65e   :  { %4980 = vmatpush1.bf16.msra.mxu0 %v10812_v52  ;;  %5021 = vmatpush1.bf16.msra.mxu1 %v10813_v41  ;;  %v10823_v52 = vld [vmem:[#allocation103_spill] sm:$0xff]  ;;  %v10824_v41 = vld [vmem:[#allocation61_spill] sm:$0xff] }
 0x65f   :  { %4981 = vmatprep.subr.bf16.mxu0 %v10814_v19  ;;  %5022 = vmatprep.subr.bf16.mxu1 %v10815_v62  ;;  %v10825_v19 = vld [vmem:[#allocation105_spill] sm:$0xff]  ;;  %v10826_v62 = vld [vmem:[#allocation62_spill] sm:$0xff] }
 0x662   :  { %4982 = vmatpush1.bf16.msra.mxu0 %v10816_v2  ;;  %5023 = vmatpush1.bf16.msra.mxu1 %v10817_v60  ;;  %v10827_v2 = vld [vmem:[#allocation107_spill] sm:$0xff] }
 0x663   :  { %4983 = vmatprep.subr.bf16.mxu0 %v10818_v26  ;;  %5024 = vmatprep.subr.bf16.mxu1 %v10819_v10  ;;  %v10828_v60 = vld [vmem:[#allocation63_spill] sm:$0xff]  ;;  %v10829_v26 = vld [vmem:[#allocation108_spill] sm:$0xff] }
 0x664   :  { %v10830_v10 = vld [vmem:[#allocation64_spill] sm:$0xff] }
 0x666   :  { %4984 = vmatpush1.bf16.msra.mxu0 %v10820_v29  ;;  %5025 = vmatpush1.bf16.msra.mxu1 %v10821_v24  ;;  %v10831_v29 = vld [vmem:[#allocation109_spill] sm:$0xff] }
 0x667   :  { %4985 = vmatprep.subr.bf16.mxu0 %v10822_v50  ;;  %5026 = vmatprep.subr.bf16.mxu1 %v10823_v52  ;;  %v10832_v24 = vld [vmem:[#allocation65_spill] sm:$0xff]  ;;  %v10833_v50 = vld [vmem:[#allocation110_spill] sm:$0xff] }
 0x668   :  { %v10834_v52 = vld [vmem:[#allocation82_spill] sm:$0xff] }
 0x66a   :  { %4986 = vmatpush1.bf16.msra.mxu0 %v10824_v41  ;;  %5027 = vmatpush1.bf16.msra.mxu1 %v10825_v19  ;;  %v10835_v41 = vld [vmem:[#allocation111_spill] sm:$0xff] }
 0x66b   :  { %4987 = vmatprep.subr.bf16.mxu0 %v10826_v62  ;;  %5028 = vmatprep.subr.bf16.mxu1 %v10827_v2 }
 0x66e   :  { %4988 = vmatpush1.bf16.msra.mxu0 %v10828_v60  ;;  %5029 = vmatpush1.bf16.msra.mxu1 %v10829_v26 }
 0x66f   :  { %4989 = vmatprep.subr.bf16.mxu0 %v10830_v10  ;;  %5030 = vmatprep.subr.bf16.mxu1 %v10831_v29 }
 0x672   :  { %4990 = vmatpush1.bf16.msra.mxu0 %v10832_v24  ;;  %5031 = vmatpush1.bf16.msra.mxu1 %v10833_v50  ;;  %v10836_v50 = vld [vmem:[#allocation44_spill] sm:$0xff] }
 0x673   :  { %5041 = vmatprep.subr.bf16.mxu0 %v10834_v52  ;;  %5082 = vmatprep.subr.bf16.mxu1 %v10835_v41  ;;  %v10838_v52 = vcombine.high %v10836_v50, %v10837_v31 }
 0x6c8   :  { %v4738_v19 = vpop.f32.mrb[36].mxu0  ;;  %v4779_v62 = vpop.f32.mrb[40].mxu1 }
 0x6c9   :  { %v4740_v49 = vpop.f32.mrb[37].mxu0  ;;  %v4781_v2 = vpop.f32.mrb[41].mxu1 }
 0x6ca   :  { %v4876_v57 = vcombine.low %v4738_v19, %v4740_v49  ;;  %v4877_v60 = vcombine.low %v4779_v62, %v4781_v2  ;;  %v4742_v12 = vpop.f32.mrb[38].mxu0  ;;  %v4783_v26 = vpop.f32.mrb[42].mxu1 }
 0x6cb   :  { %v4743_v21 = vpop.f32.mrb[39].mxu0  ;;  %v4784_v10 = vpop.f32.mrb[43].mxu1 }
 0x6cc   :  { %v4884_v29 = vrot.slane %v4876_v57, %v8476_v11  ;;  %v4891_v24 = vrot.slane %v4877_v60, %v8476_v11 }
 0x6ce   :  { %v4892_v14 = vcombine.low %v4884_v29, %v4891_v24 }
 0x6d0   :  { %v4912_v44 = vadd.f32 %v4892_v14, %v10838_v52 }
 0x6d2   :  { %v4921_v41 = vrot.slane %v4912_v44, 4  ;;  %v6978_v63 = vmul.f32 -1.442695, %v4912_v44 }
 0x6d4   :  { %v6979_v3 = vmul.f32 -1.442695, %v4921_v41 }
 0x6d6   :  { %7827 = vpow2.f32 %v6979_v3 }
 0x6d7   :  { %7829 = vpow2.f32 %v6978_v63  ;;  %v10839_v63 = vcombine.high %v10746_v42, %v10747_v15 }
 0x6e0   :  { %v7828_v12 = vpop.eup %7827 }
 0x6e1   :  { %v7830_v26 = vpop.eup %7829  ;;  %v4926_v27 = vadd.f32 1.0, %v7828_v12 }
 0x6e2   :  { %v4917_v44 = vadd.f32 1.0, %v7830_v26 }
 0x6e3   :  { %7831 = vrcp.f32 %v4926_v27 }
 0x6e4   :  { %7833 = vrcp.f32 %v4917_v44  ;;  %v10843_v44 = vld [vmem:[#allocation127_spill] sm:$0xff] }
 0x708   :  { %v4820_v49 = vpop.f32.mrb[40].mxu0  ;;  %v4861_v19 = vpop.f32.mrb[44].mxu1 }
 0x709   :  { %v4822_v2 = vpop.f32.mrb[41].mxu0  ;;  %v4863_v21 = vpop.f32.mrb[45].mxu1 }
 0x70a   :  { %v4893_v10 = vcombine.low %v4820_v49, %v4822_v2  ;;  %v4894_v57 = vcombine.low %v4861_v19, %v4863_v21  ;;  %v4824_v62 = vpop.f32.mrb[42].mxu0  ;;  %v4865_v60 = vpop.f32.mrb[46].mxu1 }
 0x70b   :  { %v4825_v29 = vpop.f32.mrb[43].mxu0  ;;  %v4866_v24 = vpop.f32.mrb[47].mxu1 }
 0x70c   :  { %v4901_v31 = vrot.slane %v4893_v10, %v8476_v11  ;;  %v4908_v14 = vrot.slane %v4894_v57, %v8476_v11  ;;  %v7832_v49 = vpop.eup %7831 }
 0x70d   :  { %v7834_v19 = vpop.eup %7833  ;;  %v4939_v12 = vmul.f32 %v7832_v49, %v9333_v47  ;;  %v10840_v47 = vld [vmem:[#allocation147_spill] sm:$0xff]  ;;  %v10849_v49 = vld [vmem:[#allocation130_spill] sm:$0xff] }
 0x70e   :  { %v4909_v3 = vcombine.low %v4901_v31, %v4908_v14  ;;  %v10841_v31 = vld [vmem:[#allocation126_spill] sm:$0xff]  ;;  %v10842_v14 = vld [vmem:[#allocation148_spill] sm:$0xff] }
 0x710   :  { %v4913_v50 = vadd.f32 %v4909_v3, %v10839_v63  ;;  %v10844_v3 = vld [vmem:[#allocation149_spill] sm:$0xff]  ;;  %v10845_v63 = vld [vmem:[#allocation128_spill] sm:$0xff] }
 0x712   :  { %7835 = vtanh.f32 %v4913_v50  ;;  %v4931_v52 = vrot.slane %v4913_v50, 4  ;;  %v10846_v50 = vld [vmem:[#allocation150_spill] sm:$0xff] }
 0x714   :  { %v6980_v41 = vmul.f32 -1.442695, %v4931_v52  ;;  %v10847_v52 = vld [vmem:[#allocation129_spill] sm:$0xff] }
 0x716   :  { %7837 = vpow2.f32 %v6980_v41  ;;  %v10848_v41 = vld [vmem:[#allocation151_spill] sm:$0xff] }
 0x71c   :  { %v7836_v2 = vpop.eup %7835 }
 0x71d   :  { %v4940_v21 = vmul.f32 %v7836_v2, %v7834_v19  ;;  %v10850_v19 = vld [vmem:[#allocation152_spill] sm:$0xff]  ;;  %v10851_v2 = vld [vmem:[#allocation131_spill] sm:$0xff] }
 0x71f   :  { %v9482_v10 = vadd.f32 %v4940_v21, %v4939_v12  ;;  %v10852_v12 = vld [vmem:[#allocation153_spill] sm:$0xff] }
 0x720   :  { %v7838_v26 = vpop.eup %7837  ;;  %v10853_v21 = vld [vmem:[#allocation133_spill] sm:$0xff] }
 0x721   :  { %v4936_v57 = vadd.f32 1.0, %v7838_v26  ;;  %7839 = vtanh.f32 %v9482_v10  ;;  %v10854_v26 = vld [vmem:[#allocation154_spill] sm:$0xff] }
 0x723   :  { %7841 = vrcp.f32 %v4936_v57  ;;  %v10855_v57 = vld [vmem:[#allocation135_spill] sm:$0xff] }
 0x72b   :  { %v7840_v27 = vpop.eup %7839 }
 0x72d   :  { %v7842_v42 = vpop.eup %7841 }
 0x72e   :  { %v4943_v15 = vmul.f32 %v7842_v42, %v7840_v27  ;;  %v10856_v27 = vld [vmem:[#allocation155_spill] sm:$0xff]  ;;  %v10857_v42 = vld [vmem:[#allocation137_spill] sm:$0xff] }
 0x730   :  { %v4953_v62 = vrot.slane %v4943_v15, %v8476_v11  ;;  %v10858_v15 = vld [vmem:[#allocation156_spill] sm:$0xff] }
 0x732   :  { %v4954_v60 = vcombine.high %v4953_v62, %v4953_v62  ;;  %v9486_v24 = vpack.c.bf16 %v4953_v62, %v4953_v62  ;;  %v10859_v62 = vld [vmem:[#allocation139_spill] sm:$0xff] }
 0x734   :  { %v4958_v29 = vpack.c.bf16 %v4954_v60, %v4954_v60  ;;  %v10860_v60 = vld [vmem:[#allocation157_spill] sm:$0xff] }
 0x736   :  { %4991 = vmatprep.mubr.bf16.mxu0 %v4958_v29  ;;  %5032 = vmatprep.mubr.bf16.mxu1 %v4958_v29 }
 0x737   :  { %4992 = vmatmul.mubr.bf16.vlgmr.msra.gmra.mrb[44].mxu0 %v9486_v24  ;;  %5033 = vmatmul.mubr.bf16.vlgmr.msra.gmra.mrb[48].mxu1 %v9486_v24 }
 0x738   :  { %5042 = vmatpush1.bf16.msra.mxu0 %v10564_v1  ;;  %5083 = vmatpush1.bf16.msra.mxu1 %v8781_v18 }
 0x739   :  { %5073 = vmatprep.mubr.bf16.mxu0 %v4958_v29  ;;  %5114 = vmatprep.mubr.bf16.mxu1 %v4958_v29  ;;  %v10861_v29 = vld [vmem:[#allocation141_spill] sm:$0xff] }
 0x73a   :  { %5043 = vmatprep.subr.bf16.mxu0 %v10565_v39  ;;  %5084 = vmatprep.subr.bf16.mxu1 %v8798_v9 }
 0x73c   :  { %5044 = vmatpush1.bf16.msra.mxu0 %v10566_v35  ;;  %5085 = vmatpush1.bf16.msra.mxu1 %v8806_v58 }
 0x73d   :  { %5045 = vmatprep.subr.bf16.mxu0 %v10567_v37  ;;  %5086 = vmatprep.subr.bf16.mxu1 %v8812_v4 }
 0x740   :  { %5046 = vmatpush1.bf16.msra.mxu0 %v10568_v45  ;;  %5087 = vmatpush1.bf16.msra.mxu1 %v8819_v5 }
 0x741   :  { %5047 = vmatprep.subr.bf16.mxu0 %v10569_v38  ;;  %5088 = vmatprep.subr.bf16.mxu1 %v8825_v56 }
 0x744   :  { %5048 = vmatpush1.bf16.msra.mxu0 %v10570_v0  ;;  %5089 = vmatpush1.bf16.msra.mxu1 %v8831_v8 }
 0x745   :  { %5049 = vmatprep.subr.bf16.mxu0 %v10571_v30  ;;  %5090 = vmatprep.subr.bf16.mxu1 %v8837_v13 }
 0x748   :  { %5050 = vmatpush1.bf16.msra.mxu0 %v10572_v28  ;;  %5091 = vmatpush1.bf16.msra.mxu1 %v8843_v51 }
 0x749   :  { %5051 = vmatprep.subr.bf16.mxu0 %v10573_v25  ;;  %5092 = vmatprep.subr.bf16.mxu1 %v10574_v17 }
 0x74c   :  { %5052 = vmatpush1.bf16.msra.mxu0 %v10575_v59  ;;  %5093 = vmatpush1.bf16.msra.mxu1 %v10654_v61 }
 0x74d   :  { %5053 = vmatprep.subr.bf16.mxu0 %v10576_v23  ;;  %5094 = vmatprep.subr.bf16.mxu1 %v10655_v6 }
 0x750   :  { %5054 = vmatpush1.bf16.msra.mxu0 %v10577_v20  ;;  %5095 = vmatpush1.bf16.msra.mxu1 %v10656_v55 }
 0x751   :  { %5055 = vmatprep.subr.bf16.mxu0 %v10578_v22  ;;  %5096 = vmatprep.subr.bf16.mxu1 %v10657_v36 }
 0x754   :  { %5056 = vmatpush1.bf16.msra.mxu0 %v10579_v43  ;;  %5097 = vmatpush1.bf16.msra.mxu1 %v10658_v40 }
 0x755   :  { %5057 = vmatprep.subr.bf16.mxu0 %v10580_v54  ;;  %5098 = vmatprep.subr.bf16.mxu1 %v10659_v33 }
 0x758   :  { %5058 = vmatpush1.bf16.msra.mxu0 %v10581_v53  ;;  %5099 = vmatpush1.bf16.msra.mxu1 %v10660_v16 }
 0x759   :  { %5059 = vmatprep.subr.bf16.mxu0 %v10582_v34  ;;  %5100 = vmatprep.subr.bf16.mxu1 %v10661_v32 }
 0x75c   :  { %5060 = vmatpush1.bf16.msra.mxu0 %v10583_v46  ;;  %5101 = vmatpush1.bf16.msra.mxu1 %v10662_v48 }
 0x75d   :  { %5061 = vmatprep.subr.bf16.mxu0 %v10584_v7  ;;  %5102 = vmatprep.subr.bf16.mxu1 %v10840_v47 }
 0x760   :  { %5062 = vmatpush1.bf16.msra.mxu0 %v10841_v31  ;;  %5103 = vmatpush1.bf16.msra.mxu1 %v10842_v14 }
 0x761   :  { %5063 = vmatprep.subr.bf16.mxu0 %v10843_v44  ;;  %5104 = vmatprep.subr.bf16.mxu1 %v10844_v3 }
 0x764   :  { %5064 = vmatpush1.bf16.msra.mxu0 %v10845_v63  ;;  %5105 = vmatpush1.bf16.msra.mxu1 %v10846_v50  ;;  %v10930_v50 = vld [vmem:[#allocation49_spill] sm:$0xff] }
 0x765   :  { %5065 = vmatprep.subr.bf16.mxu0 %v10847_v52  ;;  %5106 = vmatprep.subr.bf16.mxu1 %v10848_v41 }
 0x768   :  { %5066 = vmatpush1.bf16.msra.mxu0 %v10849_v49  ;;  %5107 = vmatpush1.bf16.msra.mxu1 %v10850_v19 }
 0x769   :  { %5067 = vmatprep.subr.bf16.mxu0 %v10851_v2  ;;  %5108 = vmatprep.subr.bf16.mxu1 %v10852_v12  ;;  %v10862_v2 = vld [vmem:[#allocation158_spill] sm:$0xff]  ;;  %v10863_v12 = vld [vmem:[#allocation25_spill] sm:$0xff] }
 0x76c   :  { %5068 = vmatpush1.bf16.msra.mxu0 %v10853_v21  ;;  %5109 = vmatpush1.bf16.msra.mxu1 %v10854_v26  ;;  %v10864_v21 = vld [vmem:[#allocation66_spill] sm:$0xff] }
 0x76d   :  { %5069 = vmatprep.subr.bf16.mxu0 %v10855_v57  ;;  %5110 = vmatprep.subr.bf16.mxu1 %v10856_v27  ;;  %v10865_v27 = vld [vmem:[#allocation26_spill] sm:$0xff]  ;;  %v10874_v57 = vld [vmem:[#allocation71_spill] sm:$0xff] }
 0x770   :  { %5070 = vmatpush1.bf16.msra.mxu0 %v10857_v42  ;;  %5111 = vmatpush1.bf16.msra.mxu1 %v10858_v15  ;;  %v10866_v42 = vld [vmem:[#allocation67_spill] sm:$0xff] }
 0x771   :  { %5071 = vmatprep.subr.bf16.mxu0 %v10859_v62  ;;  %5112 = vmatprep.subr.bf16.mxu1 %v10860_v60  ;;  %v10867_v15 = vld [vmem:[#allocation27_spill] sm:$0xff]  ;;  %v10868_v62 = vld [vmem:[#allocation68_spill] sm:$0xff] }
 0x772   :  { %v10869_v60 = vld [vmem:[#allocation28_spill] sm:$0xff] }
 0x774   :  { %5072 = vmatpush1.bf16.msra.mxu0 %v10861_v29  ;;  %5113 = vmatpush1.bf16.msra.mxu1 %v10862_v2  ;;  %v10870_v29 = vld [vmem:[#allocation69_spill] sm:$0xff] }
 0x775   :  { %5214 = vmatprep.subr.bf16.mxu0 %v10863_v12  ;;  %5255 = vmatprep.subr.bf16.mxu1 %v10864_v21  ;;  %v10871_v2 = vld [vmem:[#allocation29_spill] sm:$0xff]  ;;  %v10872_v12 = vld [vmem:[#allocation70_spill] sm:$0xff] }
 0x776   :  { %v10873_v21 = vld [vmem:[#allocation30_spill] sm:$0xff] }
 0x777   :  { %5074 = vmatmul.mubr.bf16.vlgmr.msra.gmra.mrb[48].mxu0 %v9486_v24  ;;  %5115 = vmatmul.mubr.bf16.vlgmr.msra.gmra.mrb[52].mxu1 %v9486_v24  ;;  %v10875_v24 = vld [vmem:[#allocation31_spill] sm:$0xff] }
 0x778   :  { %5215 = vmatpush1.bf16.msra.mxu0 %v10865_v27  ;;  %5256 = vmatpush1.bf16.msra.mxu1 %v10866_v42  ;;  %v10876_v27 = vld [vmem:[#allocation72_spill] sm:$0xff]  ;;  %v10877_v42 = vld [vmem:[#allocation33_spill] sm:$0xff] }
 0x779   :  { %5216 = vmatprep.subr.bf16.mxu0 %v10867_v15  ;;  %5257 = vmatprep.subr.bf16.mxu1 %v10868_v62  ;;  %v10878_v15 = vld [vmem:[#allocation73_spill] sm:$0xff]  ;;  %v10879_v62 = vld [vmem:[#allocation34_spill] sm:$0xff] }
 0x77c   :  { %5217 = vmatpush1.bf16.msra.mxu0 %v10869_v60  ;;  %5258 = vmatpush1.bf16.msra.mxu1 %v10870_v29  ;;  %v10880_v60 = vld [vmem:[#allocation74_spill] sm:$0xff]  ;;  %v10881_v29 = vld [vmem:[#allocation35_spill] sm:$0xff] }
 0x77d   :  { %5218 = vmatprep.subr.bf16.mxu0 %v10871_v2  ;;  %5259 = vmatprep.subr.bf16.mxu1 %v10872_v12  ;;  %v10882_v2 = vld [vmem:[#allocation75_spill] sm:$0xff]  ;;  %v10883_v12 = vld [vmem:[#allocation36_spill] sm:$0xff] }
 0x780   :  { %5219 = vmatpush1.bf16.msra.mxu0 %v10873_v21  ;;  %5260 = vmatpush1.bf16.msra.mxu1 %v10874_v57  ;;  %v10884_v21 = vld [vmem:[#allocation76_spill] sm:$0xff]  ;;  %v10885_v57 = vld [vmem:[#allocation37_spill] sm:$0xff] }
 0x781   :  { %5220 = vmatprep.subr.bf16.mxu0 %v10875_v24  ;;  %5261 = vmatprep.subr.bf16.mxu1 %v10876_v27  ;;  %v10886_v24 = vld [vmem:[#allocation77_spill] sm:$0xff]  ;;  %v10887_v27 = vld [vmem:[#allocation38_spill] sm:$0xff] }
 0x784   :  { %5221 = vmatpush1.bf16.msra.mxu0 %v10877_v42  ;;  %5262 = vmatpush1.bf16.msra.mxu1 %v10878_v15  ;;  %v10888_v42 = vld [vmem:[#allocation78_spill] sm:$0xff]  ;;  %v10889_v15 = vld [vmem:[#allocation39_spill] sm:$0xff] }
 0x785   :  { %5222 = vmatprep.subr.bf16.mxu0 %v10879_v62  ;;  %5263 = vmatprep.subr.bf16.mxu1 %v10880_v60  ;;  %v10890_v62 = vld [vmem:[#allocation79_spill] sm:$0xff]  ;;  %v10891_v60 = vld [vmem:[#allocation40_spill] sm:$0xff] }
 0x788   :  { %5223 = vmatpush1.bf16.msra.mxu0 %v10881_v29  ;;  %5264 = vmatpush1.bf16.msra.mxu1 %v10882_v2  ;;  %v10892_v29 = vld [vmem:[#allocation80_spill] sm:$0xff]  ;;  %v10893_v2 = vld [vmem:[#allocation41_spill] sm:$0xff] }
 0x789   :  { %5224 = vmatprep.subr.bf16.mxu0 %v10883_v12  ;;  %5265 = vmatprep.subr.bf16.mxu1 %v10884_v21  ;;  %v10894_v12 = vld [vmem:[#allocation81_spill] sm:$0xff]  ;;  %v10895_v21 = vld [vmem:[#allocation42_spill] sm:$0xff] }
 0x78c   :  { %5225 = vmatpush1.bf16.msra.mxu0 %v10885_v57  ;;  %5266 = vmatpush1.bf16.msra.mxu1 %v10886_v24  ;;  %v10896_v57 = vld [vmem:[#allocation83_spill] sm:$0xff] }
 0x78d   :  { %5226 = vmatprep.subr.bf16.mxu0 %v10887_v27  ;;  %5267 = vmatprep.subr.bf16.mxu1 %v10888_v42  ;;  %v10897_v24 = vld [vmem:[#allocation51_spill] sm:$0xff]  ;;  %v10898_v27 = vld [vmem:[#allocation85_spill] sm:$0xff]  ;;  %v10899_v42 = vld [vmem:[#allocation52_spill] sm:$0xff] }
 0x790   :  { %5227 = vmatpush1.bf16.msra.mxu0 %v10889_v15  ;;  %5268 = vmatpush1.bf16.msra.mxu1 %v10890_v62  ;;  %v10900_v15 = vld [vmem:[#allocation87_spill] sm:$0xff]  ;;  %v10901_v62 = vld [vmem:[#allocation53_spill] sm:$0xff] }
 0x791   :  { %5228 = vmatprep.subr.bf16.mxu0 %v10891_v60  ;;  %5269 = vmatprep.subr.bf16.mxu1 %v10892_v29  ;;  %v10902_v60 = vld [vmem:[#allocation89_spill] sm:$0xff]  ;;  %v10903_v29 = vld [vmem:[#allocation54_spill] sm:$0xff] }
 0x794   :  { %5229 = vmatpush1.bf16.msra.mxu0 %v10893_v2  ;;  %5270 = vmatpush1.bf16.msra.mxu1 %v10894_v12  ;;  %v10904_v2 = vld [vmem:[#allocation91_spill] sm:$0xff] }
 0x795   :  { %5230 = vmatprep.subr.bf16.mxu0 %v10895_v21  ;;  %5271 = vmatprep.subr.bf16.mxu1 %v10896_v57  ;;  %v10905_v12 = vld [vmem:[#allocation55_spill] sm:$0xff]  ;;  %v10906_v21 = vld [vmem:[#allocation93_spill] sm:$0xff]  ;;  %v10907_v57 = vld [vmem:[#allocation56_spill] sm:$0xff] }
 0x798   :  { %5231 = vmatpush1.bf16.msra.mxu0 %v10897_v24  ;;  %5272 = vmatpush1.bf16.msra.mxu1 %v10898_v27  ;;  %v10908_v24 = vld [vmem:[#allocation95_spill] sm:$0xff]  ;;  %v10909_v27 = vld [vmem:[#allocation57_spill] sm:$0xff] }
 0x799   :  { %5232 = vmatprep.subr.bf16.mxu0 %v10899_v42  ;;  %5273 = vmatprep.subr.bf16.mxu1 %v10900_v15  ;;  %v10910_v42 = vld [vmem:[#allocation97_spill] sm:$0xff]  ;;  %v10911_v15 = vld [vmem:[#allocation58_spill] sm:$0xff] }
 0x79c   :  { %5233 = vmatpush1.bf16.msra.mxu0 %v10901_v62  ;;  %5274 = vmatpush1.bf16.msra.mxu1 %v10902_v60  ;;  %v10912_v62 = vld [vmem:[#allocation99_spill] sm:$0xff] }
 0x79d   :  { %5234 = vmatprep.subr.bf16.mxu0 %v10903_v29  ;;  %5275 = vmatprep.subr.bf16.mxu1 %v10904_v2  ;;  %v10913_v60 = vld [vmem:[#allocation59_spill] sm:$0xff]  ;;  %v10914_v29 = vld [vmem:[#allocation101_spill] sm:$0xff]  ;;  %v10915_v2 = vld [vmem:[#allocation60_spill] sm:$0xff] }
 0x7a0   :  { %5235 = vmatpush1.bf16.msra.mxu0 %v10905_v12  ;;  %5276 = vmatpush1.bf16.msra.mxu1 %v10906_v21  ;;  %v10916_v12 = vld [vmem:[#allocation103_spill] sm:$0xff]  ;;  %v10917_v21 = vld [vmem:[#allocation61_spill] sm:$0xff] }
 0x7a1   :  { %5236 = vmatprep.subr.bf16.mxu0 %v10907_v57  ;;  %5277 = vmatprep.subr.bf16.mxu1 %v10908_v24  ;;  %v10918_v57 = vld [vmem:[#allocation105_spill] sm:$0xff]  ;;  %v10919_v24 = vld [vmem:[#allocation62_spill] sm:$0xff] }
 0x7a4   :  { %5237 = vmatpush1.bf16.msra.mxu0 %v10909_v27  ;;  %5278 = vmatpush1.bf16.msra.mxu1 %v10910_v42  ;;  %v10920_v27 = vld [vmem:[#allocation107_spill] sm:$0xff] }
 0x7a5   :  { %5238 = vmatprep.subr.bf16.mxu0 %v10911_v15  ;;  %5279 = vmatprep.subr.bf16.mxu1 %v10912_v62  ;;  %v10921_v42 = vld [vmem:[#allocation63_spill] sm:$0xff]  ;;  %v10922_v15 = vld [vmem:[#allocation108_spill] sm:$0xff] }
 0x7a6   :  { %v10923_v62 = vld [vmem:[#allocation64_spill] sm:$0xff] }
 0x7a8   :  { %5239 = vmatpush1.bf16.msra.mxu0 %v10913_v60  ;;  %5280 = vmatpush1.bf16.msra.mxu1 %v10914_v29  ;;  %v10924_v60 = vld [vmem:[#allocation109_spill] sm:$0xff] }
 0x7a9   :  { %5240 = vmatprep.subr.bf16.mxu0 %v10915_v2  ;;  %5281 = vmatprep.subr.bf16.mxu1 %v10916_v12  ;;  %v10925_v29 = vld [vmem:[#allocation65_spill] sm:$0xff]  ;;  %v10926_v2 = vld [vmem:[#allocation110_spill] sm:$0xff] }
 0x7aa   :  { %v10927_v12 = vld [vmem:[#allocation82_spill] sm:$0xff] }
 0x7ac   :  { %5241 = vmatpush1.bf16.msra.mxu0 %v10917_v21  ;;  %5282 = vmatpush1.bf16.msra.mxu1 %v10918_v57  ;;  %v10928_v21 = vld [vmem:[#allocation111_spill] sm:$0xff] }
 0x7ad   :  { %5242 = vmatprep.subr.bf16.mxu0 %v10919_v24  ;;  %5283 = vmatprep.subr.bf16.mxu1 %v10920_v27 }
 0x7b0   :  { %5243 = vmatpush1.bf16.msra.mxu0 %v10921_v42  ;;  %5284 = vmatpush1.bf16.msra.mxu1 %v10922_v15 }
 0x7b1   :  { %5244 = vmatprep.subr.bf16.mxu0 %v10923_v62  ;;  %5285 = vmatprep.subr.bf16.mxu1 %v10924_v60 }
 0x7b4   :  { %5245 = vmatpush1.bf16.msra.mxu0 %v10925_v29  ;;  %5286 = vmatpush1.bf16.msra.mxu1 %v10926_v2  ;;  %v10929_v2 = vld [vmem:[#allocation47_spill] sm:$0xff] }
 0x7b5   :  { %5296 = vmatprep.subr.bf16.mxu0 %v10927_v12  ;;  %5337 = vmatprep.subr.bf16.mxu1 %v10928_v21  ;;  %v10931_v12 = vcombine.low %v10929_v2, %v10930_v50 }
 0x80a   :  { %v4993_v57 = vpop.f32.mrb[44].mxu0  ;;  %v5034_v24 = vpop.f32.mrb[48].mxu1 }
 0x80b   :  { %v4995_v26 = vpop.f32.mrb[45].mxu0  ;;  %v5036_v27 = vpop.f32.mrb[49].mxu1 }
 0x80c   :  { %v5131_v19 = vcombine.low %v4993_v57, %v4995_v26  ;;  %v5132_v42 = vcombine.low %v5034_v24, %v5036_v27  ;;  %v4997_v49 = vpop.f32.mrb[46].mxu0  ;;  %v5038_v15 = vpop.f32.mrb[50].mxu1 }
 0x80d   :  { %v4998_v41 = vpop.f32.mrb[47].mxu0  ;;  %v5039_v62 = vpop.f32.mrb[51].mxu1 }
 0x80e   :  { %v5139_v60 = vrot.slane %v5131_v19, %v8476_v11  ;;  %v5146_v29 = vrot.slane %v5132_v42, %v8476_v11 }
 0x810   :  { %v5147_v52 = vcombine.low %v5139_v60, %v5146_v29 }
 0x812   :  { %v5167_v63 = vadd.f32 %v5147_v52, %v10931_v12 }
 0x814   :  { %v5176_v21 = vrot.slane %v5167_v63, 4  ;;  %v6981_v44 = vmul.f32 -1.442695, %v5167_v63 }
 0x816   :  { %v6982_v3 = vmul.f32 -1.442695, %v5176_v21  ;;  %v10933_v21 = vld [vmem:[#allocation120_spill] sm:$0xff] }
 0x818   :  { %7843 = vpow2.f32 %v6982_v3 }
 0x819   :  { %7845 = vpow2.f32 %v6981_v44  ;;  %v10932_v44 = vld [vmem:[#allocation118_spill] sm:$0xff] }
 0x81a   :  { %v10934_v50 = vcombine.low %v10932_v44, %v10933_v21 }
 0x822   :  { %v7844_v49 = vpop.eup %7843 }
 0x823   :  { %v7846_v15 = vpop.eup %7845  ;;  %v5181_v14 = vadd.f32 1.0, %v7844_v49 }
 0x824   :  { %v5172_v63 = vadd.f32 1.0, %v7846_v15 }
 0x825   :  { %7847 = vrcp.f32 %v5181_v14 }
 0x826   :  { %7849 = vrcp.f32 %v5172_v63  ;;  %v10936_v63 = vld [vmem:[#allocation127_spill] sm:$0xff] }
 0x84a   :  { %v5075_v26 = vpop.f32.mrb[48].mxu0  ;;  %v5116_v57 = vpop.f32.mrb[52].mxu1 }
 0x84b   :  { %v5077_v27 = vpop.f32.mrb[49].mxu0  ;;  %v5118_v41 = vpop.f32.mrb[53].mxu1 }
 0x84c   :  { %v5148_v62 = vcombine.low %v5075_v26, %v5077_v27  ;;  %v5149_v19 = vcombine.low %v5116_v57, %v5118_v41  ;;  %v5079_v24 = vpop.f32.mrb[50].mxu0  ;;  %v5120_v42 = vpop.f32.mrb[54].mxu1 }
 0x84d   :  { %v5080_v60 = vpop.f32.mrb[51].mxu0  ;;  %v5121_v29 = vpop.f32.mrb[55].mxu1 }
 0x84e   :  { %v5156_v52 = vrot.slane %v5148_v62, %v8476_v11  ;;  %v5163_v12 = vrot.slane %v5149_v19, %v8476_v11  ;;  %v7848_v27 = vpop.eup %7847 }
 0x84f   :  { %v7850_v41 = vpop.eup %7849  ;;  %v5194_v49 = vmul.f32 %v7848_v27, %v9482_v10  ;;  %v10935_v10 = vld [vmem:[#allocation148_spill] sm:$0xff]  ;;  %v10940_v27 = vld [vmem:[#allocation129_spill] sm:$0xff] }
 0x850   :  { %v5164_v3 = vcombine.low %v5156_v52, %v5163_v12 }
 0x852   :  { %v5168_v2 = vadd.f32 %v5164_v3, %v10934_v50  ;;  %v10937_v3 = vld [vmem:[#allocation149_spill] sm:$0xff] }
 0x854   :  { %7851 = vtanh.f32 %v5168_v2  ;;  %v5186_v26 = vrot.slane %v5168_v2, 4 }
 0x856   :  { %v6983_v57 = vmul.f32 -1.442695, %v5186_v26  ;;  %v10938_v26 = vld [vmem:[#allocation128_spill] sm:$0xff] }
 0x858   :  { %7853 = vpow2.f32 %v6983_v57  ;;  %v10939_v57 = vld [vmem:[#allocation150_spill] sm:$0xff] }
 0x85e   :  { %v7852_v24 = vpop.eup %7851 }
 0x85f   :  { %v5195_v62 = vmul.f32 %v7852_v24, %v7850_v41  ;;  %v10941_v41 = vld [vmem:[#allocation151_spill] sm:$0xff]  ;;  %v10942_v24 = vld [vmem:[#allocation130_spill] sm:$0xff] }
 0x861   :  { %v9631_v42 = vadd.f32 %v5195_v62, %v5194_v49  ;;  %v10943_v49 = vld [vmem:[#allocation152_spill] sm:$0xff]  ;;  %v10944_v62 = vld [vmem:[#allocation131_spill] sm:$0xff] }
 0x862   :  { %v7854_v15 = vpop.eup %7853 }
 0x863   :  { %v5191_v19 = vadd.f32 1.0, %v7854_v15  ;;  %7855 = vtanh.f32 %v9631_v42  ;;  %v10945_v15 = vld [vmem:[#allocation153_spill] sm:$0xff] }
 0x865   :  { %7857 = vrcp.f32 %v5191_v19  ;;  %v10946_v19 = vld [vmem:[#allocation133_spill] sm:$0xff] }
 0x86d   :  { %v7856_v14 = vpop.eup %7855 }
 0x86f   :  { %v7858_v50 = vpop.eup %7857 }
 0x870   :  { %v5198_v60 = vmul.f32 %v7858_v50, %v7856_v14  ;;  %v10947_v14 = vld [vmem:[#allocation154_spill] sm:$0xff]  ;;  %v10948_v50 = vld [vmem:[#allocation135_spill] sm:$0xff] }
 0x872   :  { %v5208_v2 = vrot.slane %v5198_v60, %v8476_v11  ;;  %v10949_v60 = vld [vmem:[#allocation155_spill] sm:$0xff] }
 0x874   :  { %v5209_v29 = vcombine.high %v5208_v2, %v5208_v2  ;;  %v9635_v12 = vpack.c.bf16 %v5208_v2, %v5208_v2  ;;  %v10950_v2 = vld [vmem:[#allocation137_spill] sm:$0xff] }
 0x876   :  { %v5213_v52 = vpack.c.bf16 %v5209_v29, %v5209_v29  ;;  %v10951_v29 = vld [vmem:[#allocation156_spill] sm:$0xff] }
 0x878   :  { %5246 = vmatprep.mubr.bf16.mxu0 %v5213_v52  ;;  %5287 = vmatprep.mubr.bf16.mxu1 %v5213_v52 }
 0x879   :  { %5247 = vmatmul.mubr.bf16.vlgmr.msra.gmra.mrb[52].mxu0 %v9635_v12  ;;  %5288 = vmatmul.mubr.bf16.vlgmr.msra.gmra.mrb[56].mxu1 %v9635_v12 }
 0x87a   :  { %5297 = vmatpush1.bf16.msra.mxu0 %v10564_v1  ;;  %5338 = vmatpush1.bf16.msra.mxu1 %v8781_v18 }
 0x87b   :  { %5328 = vmatprep.mubr.bf16.mxu0 %v5213_v52  ;;  %5369 = vmatprep.mubr.bf16.mxu1 %v5213_v52  ;;  %v10952_v52 = vld [vmem:[#allocation139_spill] sm:$0xff] }
 0x87c   :  { %5298 = vmatprep.subr.bf16.mxu0 %v10565_v39  ;;  %5339 = vmatprep.subr.bf16.mxu1 %v8798_v9 }
 0x87e   :  { %5299 = vmatpush1.bf16.msra.mxu0 %v10566_v35  ;;  %5340 = vmatpush1.bf16.msra.mxu1 %v8806_v58 }
 0x87f   :  { %5300 = vmatprep.subr.bf16.mxu0 %v10567_v37  ;;  %5341 = vmatprep.subr.bf16.mxu1 %v8812_v4 }
 0x882   :  { %5301 = vmatpush1.bf16.msra.mxu0 %v10568_v45  ;;  %5342 = vmatpush1.bf16.msra.mxu1 %v8819_v5 }
 0x883   :  { %5302 = vmatprep.subr.bf16.mxu0 %v10569_v38  ;;  %5343 = vmatprep.subr.bf16.mxu1 %v8825_v56 }
 0x886   :  { %5303 = vmatpush1.bf16.msra.mxu0 %v10570_v0  ;;  %5344 = vmatpush1.bf16.msra.mxu1 %v8831_v8 }
 0x887   :  { %5304 = vmatprep.subr.bf16.mxu0 %v10571_v30  ;;  %5345 = vmatprep.subr.bf16.mxu1 %v8837_v13 }
 0x88a   :  { %5305 = vmatpush1.bf16.msra.mxu0 %v10572_v28  ;;  %5346 = vmatpush1.bf16.msra.mxu1 %v8843_v51 }
 0x88b   :  { %5306 = vmatprep.subr.bf16.mxu0 %v10573_v25  ;;  %5347 = vmatprep.subr.bf16.mxu1 %v10574_v17 }
 0x88e   :  { %5307 = vmatpush1.bf16.msra.mxu0 %v10575_v59  ;;  %5348 = vmatpush1.bf16.msra.mxu1 %v10654_v61 }
 0x88f   :  { %5308 = vmatprep.subr.bf16.mxu0 %v10576_v23  ;;  %5349 = vmatprep.subr.bf16.mxu1 %v10655_v6 }
 0x892   :  { %5309 = vmatpush1.bf16.msra.mxu0 %v10577_v20  ;;  %5350 = vmatpush1.bf16.msra.mxu1 %v10656_v55 }
 0x893   :  { %5310 = vmatprep.subr.bf16.mxu0 %v10578_v22  ;;  %5351 = vmatprep.subr.bf16.mxu1 %v10657_v36 }
 0x896   :  { %5311 = vmatpush1.bf16.msra.mxu0 %v10579_v43  ;;  %5352 = vmatpush1.bf16.msra.mxu1 %v10658_v40 }
 0x897   :  { %5312 = vmatprep.subr.bf16.mxu0 %v10580_v54  ;;  %5353 = vmatprep.subr.bf16.mxu1 %v10659_v33 }
 0x89a   :  { %5313 = vmatpush1.bf16.msra.mxu0 %v10581_v53  ;;  %5354 = vmatpush1.bf16.msra.mxu1 %v10660_v16 }
 0x89b   :  { %5314 = vmatprep.subr.bf16.mxu0 %v10582_v34  ;;  %5355 = vmatprep.subr.bf16.mxu1 %v10661_v32 }
 0x89e   :  { %5315 = vmatpush1.bf16.msra.mxu0 %v10583_v46  ;;  %5356 = vmatpush1.bf16.msra.mxu1 %v10662_v48 }
 0x89f   :  { %5316 = vmatprep.subr.bf16.mxu0 %v10584_v7  ;;  %5357 = vmatprep.subr.bf16.mxu1 %v10840_v47 }
 0x8a2   :  { %5317 = vmatpush1.bf16.msra.mxu0 %v10841_v31  ;;  %5358 = vmatpush1.bf16.msra.mxu1 %v10935_v10 }
 0x8a3   :  { %5318 = vmatprep.subr.bf16.mxu0 %v10936_v63  ;;  %5359 = vmatprep.subr.bf16.mxu1 %v10937_v3  ;;  %v11023_v3 = vld [vmem:[#allocation49_spill] sm:$0xff] }
 0x8a6   :  { %5319 = vmatpush1.bf16.msra.mxu0 %v10938_v26  ;;  %5360 = vmatpush1.bf16.msra.mxu1 %v10939_v57 }
 0x8a7   :  { %5320 = vmatprep.subr.bf16.mxu0 %v10940_v27  ;;  %5361 = vmatprep.subr.bf16.mxu1 %v10941_v41 }
 0x8aa   :  { %5321 = vmatpush1.bf16.msra.mxu0 %v10942_v24  ;;  %5362 = vmatpush1.bf16.msra.mxu1 %v10943_v49  ;;  %v10953_v24 = vld [vmem:[#allocation157_spill] sm:$0xff] }
 0x8ab   :  { %5322 = vmatprep.subr.bf16.mxu0 %v10944_v62  ;;  %5363 = vmatprep.subr.bf16.mxu1 %v10945_v15  ;;  %v10954_v49 = vld [vmem:[#allocation141_spill] sm:$0xff]  ;;  %v10955_v62 = vld [vmem:[#allocation158_spill] sm:$0xff] }
 0x8ac   :  { %v10956_v15 = vld [vmem:[#allocation25_spill] sm:$0xff] }
 0x8ae   :  { %5323 = vmatpush1.bf16.msra.mxu0 %v10946_v19  ;;  %5364 = vmatpush1.bf16.msra.mxu1 %v10947_v14  ;;  %v10957_v19 = vld [vmem:[#allocation66_spill] sm:$0xff] }
 0x8af   :  { %5324 = vmatprep.subr.bf16.mxu0 %v10948_v50  ;;  %5365 = vmatprep.subr.bf16.mxu1 %v10949_v60  ;;  %v10958_v60 = vld [vmem:[#allocation26_spill] sm:$0xff]  ;;  %v10967_v50 = vld [vmem:[#allocation71_spill] sm:$0xff] }
 0x8b2   :  { %5325 = vmatpush1.bf16.msra.mxu0 %v10950_v2  ;;  %5366 = vmatpush1.bf16.msra.mxu1 %v10951_v29  ;;  %v10959_v2 = vld [vmem:[#allocation67_spill] sm:$0xff] }
 0x8b3   :  { %5326 = vmatprep.subr.bf16.mxu0 %v10952_v52  ;;  %5367 = vmatprep.subr.bf16.mxu1 %v10953_v24  ;;  %v10960_v29 = vld [vmem:[#allocation27_spill] sm:$0xff]  ;;  %v10961_v52 = vld [vmem:[#allocation68_spill] sm:$0xff] }
 0x8b4   :  { %v10962_v24 = vld [vmem:[#allocation28_spill] sm:$0xff] }
 0x8b6   :  { %5327 = vmatpush1.bf16.msra.mxu0 %v10954_v49  ;;  %5368 = vmatpush1.bf16.msra.mxu1 %v10955_v62  ;;  %v10963_v49 = vld [vmem:[#allocation69_spill] sm:$0xff] }
 0x8b7   :  { %5469 = vmatprep.subr.bf16.mxu0 %v10956_v15  ;;  %5510 = vmatprep.subr.bf16.mxu1 %v10957_v19  ;;  %v10964_v62 = vld [vmem:[#allocation29_spill] sm:$0xff]  ;;  %v10965_v15 = vld [vmem:[#allocation70_spill] sm:$0xff] }
 0x8b8   :  { %v10966_v19 = vld [vmem:[#allocation30_spill] sm:$0xff] }
 0x8b9   :  { %5329 = vmatmul.mubr.bf16.vlgmr.msra.gmra.mrb[56].mxu0 %v9635_v12  ;;  %5370 = vmatmul.mubr.bf16.vlgmr.msra.gmra.mrb[60].mxu1 %v9635_v12  ;;  %v10968_v12 = vld [vmem:[#allocation31_spill] sm:$0xff] }
 0x8ba   :  { %5470 = vmatpush1.bf16.msra.mxu0 %v10958_v60  ;;  %5511 = vmatpush1.bf16.msra.mxu1 %v10959_v2  ;;  %v10969_v60 = vld [vmem:[#allocation72_spill] sm:$0xff]  ;;  %v10970_v2 = vld [vmem:[#allocation33_spill] sm:$0xff] }
 0x8bb   :  { %5471 = vmatprep.subr.bf16.mxu0 %v10960_v29  ;;  %5512 = vmatprep.subr.bf16.mxu1 %v10961_v52  ;;  %v10971_v29 = vld [vmem:[#allocation73_spill] sm:$0xff]  ;;  %v10972_v52 = vld [vmem:[#allocation34_spill] sm:$0xff] }
 0x8be   :  { %5472 = vmatpush1.bf16.msra.mxu0 %v10962_v24  ;;  %5513 = vmatpush1.bf16.msra.mxu1 %v10963_v49  ;;  %v10973_v24 = vld [vmem:[#allocation74_spill] sm:$0xff]  ;;  %v10974_v49 = vld [vmem:[#allocation35_spill] sm:$0xff] }
 0x8bf   :  { %5473 = vmatprep.subr.bf16.mxu0 %v10964_v62  ;;  %5514 = vmatprep.subr.bf16.mxu1 %v10965_v15  ;;  %v10975_v62 = vld [vmem:[#allocation75_spill] sm:$0xff]  ;;  %v10976_v15 = vld [vmem:[#allocation36_spill] sm:$0xff] }
 0x8c2   :  { %5474 = vmatpush1.bf16.msra.mxu0 %v10966_v19  ;;  %5515 = vmatpush1.bf16.msra.mxu1 %v10967_v50  ;;  %v10977_v19 = vld [vmem:[#allocation76_spill] sm:$0xff]  ;;  %v10978_v50 = vld [vmem:[#allocation37_spill] sm:$0xff] }
 0x8c3   :  { %5475 = vmatprep.subr.bf16.mxu0 %v10968_v12  ;;  %5516 = vmatprep.subr.bf16.mxu1 %v10969_v60  ;;  %v10979_v12 = vld [vmem:[#allocation77_spill] sm:$0xff]  ;;  %v10980_v60 = vld [vmem:[#allocation38_spill] sm:$0xff] }
 0x8c6   :  { %5476 = vmatpush1.bf16.msra.mxu0 %v10970_v2  ;;  %5517 = vmatpush1.bf16.msra.mxu1 %v10971_v29  ;;  %v10981_v2 = vld [vmem:[#allocation78_spill] sm:$0xff]  ;;  %v10982_v29 = vld [vmem:[#allocation39_spill] sm:$0xff] }
 0x8c7   :  { %5477 = vmatprep.subr.bf16.mxu0 %v10972_v52  ;;  %5518 = vmatprep.subr.bf16.mxu1 %v10973_v24  ;;  %v10983_v52 = vld [vmem:[#allocation79_spill] sm:$0xff]  ;;  %v10984_v24 = vld [vmem:[#allocation40_spill] sm:$0xff] }
 0x8ca   :  { %5478 = vmatpush1.bf16.msra.mxu0 %v10974_v49  ;;  %5519 = vmatpush1.bf16.msra.mxu1 %v10975_v62  ;;  %v10985_v49 = vld [vmem:[#allocation80_spill] sm:$0xff]  ;;  %v10986_v62 = vld [vmem:[#allocation41_spill] sm:$0xff] }
 0x8cb   :  { %5479 = vmatprep.subr.bf16.mxu0 %v10976_v15  ;;  %5520 = vmatprep.subr.bf16.mxu1 %v10977_v19  ;;  %v10987_v15 = vld [vmem:[#allocation81_spill] sm:$0xff]  ;;  %v10988_v19 = vld [vmem:[#allocation42_spill] sm:$0xff] }
 0x8ce   :  { %5480 = vmatpush1.bf16.msra.mxu0 %v10978_v50  ;;  %5521 = vmatpush1.bf16.msra.mxu1 %v10979_v12  ;;  %v10989_v50 = vld [vmem:[#allocation83_spill] sm:$0xff] }
 0x8cf   :  { %5481 = vmatprep.subr.bf16.mxu0 %v10980_v60  ;;  %5522 = vmatprep.subr.bf16.mxu1 %v10981_v2  ;;  %v10990_v12 = vld [vmem:[#allocation51_spill] sm:$0xff]  ;;  %v10991_v60 = vld [vmem:[#allocation85_spill] sm:$0xff]  ;;  %v10992_v2 = vld [vmem:[#allocation52_spill] sm:$0xff] }
 0x8d2   :  { %5482 = vmatpush1.bf16.msra.mxu0 %v10982_v29  ;;  %5523 = vmatpush1.bf16.msra.mxu1 %v10983_v52  ;;  %v10993_v29 = vld [vmem:[#allocation87_spill] sm:$0xff]  ;;  %v10994_v52 = vld [vmem:[#allocation53_spill] sm:$0xff] }
 0x8d3   :  { %5483 = vmatprep.subr.bf16.mxu0 %v10984_v24  ;;  %5524 = vmatprep.subr.bf16.mxu1 %v10985_v49  ;;  %v10995_v24 = vld [vmem:[#allocation89_spill] sm:$0xff]  ;;  %v10996_v49 = vld [vmem:[#allocation54_spill] sm:$0xff] }
 0x8d6   :  { %5484 = vmatpush1.bf16.msra.mxu0 %v10986_v62  ;;  %5525 = vmatpush1.bf16.msra.mxu1 %v10987_v15  ;;  %v10997_v62 = vld [vmem:[#allocation91_spill] sm:$0xff] }
 0x8d7   :  { %5485 = vmatprep.subr.bf16.mxu0 %v10988_v19  ;;  %5526 = vmatprep.subr.bf16.mxu1 %v10989_v50  ;;  %v10998_v15 = vld [vmem:[#allocation55_spill] sm:$0xff]  ;;  %v10999_v19 = vld [vmem:[#allocation93_spill] sm:$0xff]  ;;  %v11000_v50 = vld [vmem:[#allocation56_spill] sm:$0xff] }
 0x8da   :  { %5486 = vmatpush1.bf16.msra.mxu0 %v10990_v12  ;;  %5527 = vmatpush1.bf16.msra.mxu1 %v10991_v60  ;;  %v11001_v12 = vld [vmem:[#allocation95_spill] sm:$0xff]  ;;  %v11002_v60 = vld [vmem:[#allocation57_spill] sm:$0xff] }
 0x8db   :  { %5487 = vmatprep.subr.bf16.mxu0 %v10992_v2  ;;  %5528 = vmatprep.subr.bf16.mxu1 %v10993_v29  ;;  %v11003_v2 = vld [vmem:[#allocation97_spill] sm:$0xff]  ;;  %v11004_v29 = vld [vmem:[#allocation58_spill] sm:$0xff] }
 0x8de   :  { %5488 = vmatpush1.bf16.msra.mxu0 %v10994_v52  ;;  %5529 = vmatpush1.bf16.msra.mxu1 %v10995_v24  ;;  %v11005_v52 = vld [vmem:[#allocation99_spill] sm:$0xff] }
 0x8df   :  { %5489 = vmatprep.subr.bf16.mxu0 %v10996_v49  ;;  %5530 = vmatprep.subr.bf16.mxu1 %v10997_v62  ;;  %v11006_v24 = vld [vmem:[#allocation59_spill] sm:$0xff]  ;;  %v11007_v49 = vld [vmem:[#allocation101_spill] sm:$0xff]  ;;  %v11008_v62 = vld [vmem:[#allocation60_spill] sm:$0xff] }
 0x8e2   :  { %5490 = vmatpush1.bf16.msra.mxu0 %v10998_v15  ;;  %5531 = vmatpush1.bf16.msra.mxu1 %v10999_v19  ;;  %v11009_v15 = vld [vmem:[#allocation103_spill] sm:$0xff]  ;;  %v11010_v19 = vld [vmem:[#allocation61_spill] sm:$0xff] }
 0x8e3   :  { %5491 = vmatprep.subr.bf16.mxu0 %v11000_v50  ;;  %5532 = vmatprep.subr.bf16.mxu1 %v11001_v12  ;;  %v11011_v50 = vld [vmem:[#allocation105_spill] sm:$0xff]  ;;  %v11012_v12 = vld [vmem:[#allocation62_spill] sm:$0xff] }
 0x8e6   :  { %5492 = vmatpush1.bf16.msra.mxu0 %v11002_v60  ;;  %5533 = vmatpush1.bf16.msra.mxu1 %v11003_v2  ;;  %v11013_v60 = vld [vmem:[#allocation107_spill] sm:$0xff] }
 0x8e7   :  { %5493 = vmatprep.subr.bf16.mxu0 %v11004_v29  ;;  %5534 = vmatprep.subr.bf16.mxu1 %v11005_v52  ;;  %v11014_v2 = vld [vmem:[#allocation63_spill] sm:$0xff]  ;;  %v11015_v29 = vld [vmem:[#allocation108_spill] sm:$0xff] }
 0x8e8   :  { %v11016_v52 = vld [vmem:[#allocation64_spill] sm:$0xff] }
 0x8ea   :  { %5494 = vmatpush1.bf16.msra.mxu0 %v11006_v24  ;;  %5535 = vmatpush1.bf16.msra.mxu1 %v11007_v49  ;;  %v11017_v24 = vld [vmem:[#allocation109_spill] sm:$0xff] }
 0x8eb   :  { %5495 = vmatprep.subr.bf16.mxu0 %v11008_v62  ;;  %5536 = vmatprep.subr.bf16.mxu1 %v11009_v15  ;;  %v11018_v49 = vld [vmem:[#allocation65_spill] sm:$0xff]  ;;  %v11019_v62 = vld [vmem:[#allocation110_spill] sm:$0xff] }
 0x8ec   :  { %v11020_v15 = vld [vmem:[#allocation82_spill] sm:$0xff] }
 0x8ee   :  { %5496 = vmatpush1.bf16.msra.mxu0 %v11010_v19  ;;  %5537 = vmatpush1.bf16.msra.mxu1 %v11011_v50  ;;  %v11021_v19 = vld [vmem:[#allocation111_spill] sm:$0xff] }
 0x8ef   :  { %5497 = vmatprep.subr.bf16.mxu0 %v11012_v12  ;;  %5538 = vmatprep.subr.bf16.mxu1 %v11013_v60 }
 0x8f2   :  { %5498 = vmatpush1.bf16.msra.mxu0 %v11014_v2  ;;  %5539 = vmatpush1.bf16.msra.mxu1 %v11015_v29 }
 0x8f3   :  { %5499 = vmatprep.subr.bf16.mxu0 %v11016_v52  ;;  %5540 = vmatprep.subr.bf16.mxu1 %v11017_v24 }
 0x8f6   :  { %5500 = vmatpush1.bf16.msra.mxu0 %v11018_v49  ;;  %5541 = vmatpush1.bf16.msra.mxu1 %v11019_v62  ;;  %v11022_v62 = vld [vmem:[#allocation47_spill] sm:$0xff] }
 0x8f7   :  { %5551 = vmatprep.subr.bf16.mxu0 %v11020_v15  ;;  %5592 = vmatprep.subr.bf16.mxu1 %v11021_v19  ;;  %v11024_v15 = vcombine.high %v11022_v62, %v11023_v3 }
 0x94c   :  { %v5248_v50 = vpop.f32.mrb[52].mxu0  ;;  %v5289_v12 = vpop.f32.mrb[56].mxu1 }
 0x94d   :  { %v5250_v14 = vpop.f32.mrb[53].mxu0  ;;  %v5291_v60 = vpop.f32.mrb[57].mxu1 }
 0x94e   :  { %v5386_v41 = vcombine.low %v5248_v50, %v5250_v14  ;;  %v5387_v2 = vcombine.low %v5289_v12, %v5291_v60  ;;  %v5252_v27 = vpop.f32.mrb[54].mxu0  ;;  %v5293_v29 = vpop.f32.mrb[58].mxu1 }
 0x94f   :  { %v5253_v57 = vpop.f32.mrb[55].mxu0  ;;  %v5294_v52 = vpop.f32.mrb[59].mxu1 }
 0x950   :  { %v5394_v24 = vrot.slane %v5386_v41, %v8476_v11  ;;  %v5401_v49 = vrot.slane %v5387_v2, %v8476_v11 }
 0x952   :  { %v5402_v26 = vcombine.low %v5394_v24, %v5401_v49 }
 0x954   :  { %v5422_v63 = vadd.f32 %v5402_v26, %v11024_v15 }
 0x956   :  { %v5431_v19 = vrot.slane %v5422_v63, 4  ;;  %v6984_v31 = vmul.f32 -1.442695, %v5422_v63 }
 0x958   :  { %v6985_v10 = vmul.f32 -1.442695, %v5431_v19 }
 0x95a   :  { %7859 = vpow2.f32 %v6985_v10 }
 0x95b   :  { %7861 = vpow2.f32 %v6984_v31  ;;  %v11025_v31 = vcombine.high %v10932_v44, %v10933_v21 }
 0x964   :  { %v7860_v27 = vpop.eup %7859 }
 0x965   :  { %v7862_v29 = vpop.eup %7861  ;;  %v5436_v47 = vadd.f32 1.0, %v7860_v27 }
 0x966   :  { %v5427_v63 = vadd.f32 1.0, %v7862_v29 }
 0x967   :  { %7863 = vrcp.f32 %v5436_v47 }
 0x968   :  { %7865 = vrcp.f32 %v5427_v63  ;;  %v11029_v63 = vld [vmem:[#allocation127_spill] sm:$0xff] }
 0x98c   :  { %v5330_v14 = vpop.f32.mrb[56].mxu0  ;;  %v5371_v50 = vpop.f32.mrb[60].mxu1 }
 0x98d   :  { %v5332_v60 = vpop.f32.mrb[57].mxu0  ;;  %v5373_v57 = vpop.f32.mrb[61].mxu1 }
 0x98e   :  { %v5403_v52 = vcombine.low %v5330_v14, %v5332_v60  ;;  %v5404_v41 = vcombine.low %v5371_v50, %v5373_v57  ;;  %v5334_v12 = vpop.f32.mrb[58].mxu0  ;;  %v5375_v2 = vpop.f32.mrb[62].mxu1 }
 0x98f   :  { %v5335_v24 = vpop.f32.mrb[59].mxu0  ;;  %v5376_v49 = vpop.f32.mrb[63].mxu1 }
 0x990   :  { %v5411_v3 = vrot.slane %v5403_v52, %v8476_v11  ;;  %v5418_v26 = vrot.slane %v5404_v41, %v8476_v11  ;;  %v7864_v14 = vpop.eup %7863 }
 0x991   :  { %v7866_v50 = vpop.eup %7865  ;;  %v5449_v27 = vmul.f32 %v7864_v14, %v9631_v42  ;;  %v11026_v42 = vld [vmem:[#allocation147_spill] sm:$0xff]  ;;  %v11035_v14 = vld [vmem:[#allocation130_spill] sm:$0xff] }
 0x992   :  { %v5419_v10 = vcombine.low %v5411_v3, %v5418_v26  ;;  %v11027_v3 = vld [vmem:[#allocation126_spill] sm:$0xff]  ;;  %v11028_v26 = vld [vmem:[#allocation148_spill] sm:$0xff] }
 0x994   :  { %v5423_v62 = vadd.f32 %v5419_v10, %v11025_v31  ;;  %v11030_v10 = vld [vmem:[#allocation149_spill] sm:$0xff]  ;;  %v11031_v31 = vld [vmem:[#allocation128_spill] sm:$0xff] }
 0x996   :  { %7867 = vtanh.f32 %v5423_v62  ;;  %v5441_v15 = vrot.slane %v5423_v62, 4  ;;  %v11032_v62 = vld [vmem:[#allocation150_spill] sm:$0xff] }
 0x998   :  { %v6986_v19 = vmul.f32 -1.442695, %v5441_v15  ;;  %v11033_v15 = vld [vmem:[#allocation129_spill] sm:$0xff] }
 0x99a   :  { %7869 = vpow2.f32 %v6986_v19  ;;  %v11034_v19 = vld [vmem:[#allocation151_spill] sm:$0xff] }
 0x9a0   :  { %v7868_v60 = vpop.eup %7867 }
 0x9a1   :  { %v5450_v57 = vmul.f32 %v7868_v60, %v7866_v50  ;;  %v11036_v50 = vld [vmem:[#allocation152_spill] sm:$0xff]  ;;  %v11037_v60 = vld [vmem:[#allocation131_spill] sm:$0xff] }
 0x9a3   :  { %v9780_v52 = vadd.f32 %v5450_v57, %v5449_v27  ;;  %v11038_v27 = vld [vmem:[#allocation153_spill] sm:$0xff] }
 0x9a4   :  { %v7870_v29 = vpop.eup %7869  ;;  %v11039_v57 = vld [vmem:[#allocation133_spill] sm:$0xff] }
 0x9a5   :  { %v5446_v41 = vadd.f32 1.0, %v7870_v29  ;;  %7871 = vtanh.f32 %v9780_v52  ;;  %v11040_v29 = vld [vmem:[#allocation154_spill] sm:$0xff] }
 0x9a7   :  { %7873 = vrcp.f32 %v5446_v41  ;;  %v11041_v41 = vld [vmem:[#allocation135_spill] sm:$0xff] }
 0x9af   :  { %v7872_v47 = vpop.eup %7871 }
 0x9b1   :  { %v7874_v44 = vpop.eup %7873 }
 0x9b2   :  { %v5453_v21 = vmul.f32 %v7874_v44, %v7872_v47  ;;  %v11042_v47 = vld [vmem:[#allocation155_spill] sm:$0xff]  ;;  %v11043_v44 = vld [vmem:[#allocation137_spill] sm:$0xff] }
 0x9b4   :  { %v5463_v12 = vrot.slane %v5453_v21, %v8476_v11  ;;  %v11044_v21 = vld [vmem:[#allocation156_spill] sm:$0xff] }
 0x9b6   :  { %v5464_v2 = vcombine.high %v5463_v12, %v5463_v12  ;;  %v9784_v49 = vpack.c.bf16 %v5463_v12, %v5463_v12  ;;  %v11045_v12 = vld [vmem:[#allocation139_spill] sm:$0xff] }
 0x9b8   :  { %v5468_v24 = vpack.c.bf16 %v5464_v2, %v5464_v2  ;;  %v11046_v2 = vld [vmem:[#allocation157_spill] sm:$0xff] }
 0x9ba   :  { %5501 = vmatprep.mubr.bf16.mxu0 %v5468_v24  ;;  %5542 = vmatprep.mubr.bf16.mxu1 %v5468_v24 }
 0x9bb   :  { %5502 = vmatmul.mubr.bf16.vlgmr.msra.gmra.mrb[60].mxu0 %v9784_v49  ;;  %5543 = vmatmul.mubr.bf16.vlgmr.msra.gmra.mrb[64].mxu1 %v9784_v49 }
 0x9bc   :  { %5552 = vmatpush1.bf16.msra.mxu0 %v10564_v1  ;;  %5593 = vmatpush1.bf16.msra.mxu1 %v8781_v18 }
 0x9bd   :  { %5583 = vmatprep.mubr.bf16.mxu0 %v5468_v24  ;;  %5624 = vmatprep.mubr.bf16.mxu1 %v5468_v24  ;;  %v11047_v24 = vld [vmem:[#allocation141_spill] sm:$0xff] }
 0x9be   :  { %5553 = vmatprep.subr.bf16.mxu0 %v10565_v39  ;;  %5594 = vmatprep.subr.bf16.mxu1 %v8798_v9 }
 0x9c0   :  { %5554 = vmatpush1.bf16.msra.mxu0 %v10566_v35  ;;  %5595 = vmatpush1.bf16.msra.mxu1 %v8806_v58 }
 0x9c1   :  { %5555 = vmatprep.subr.bf16.mxu0 %v10567_v37  ;;  %5596 = vmatprep.subr.bf16.mxu1 %v8812_v4 }
 0x9c4   :  { %5556 = vmatpush1.bf16.msra.mxu0 %v10568_v45  ;;  %5597 = vmatpush1.bf16.msra.mxu1 %v8819_v5 }
 0x9c5   :  { %5557 = vmatprep.subr.bf16.mxu0 %v10569_v38  ;;  %5598 = vmatprep.subr.bf16.mxu1 %v8825_v56 }
 0x9c8   :  { %5558 = vmatpush1.bf16.msra.mxu0 %v10570_v0  ;;  %5599 = vmatpush1.bf16.msra.mxu1 %v8831_v8 }
 0x9c9   :  { %5559 = vmatprep.subr.bf16.mxu0 %v10571_v30  ;;  %5600 = vmatprep.subr.bf16.mxu1 %v8837_v13 }
 0x9cc   :  { %5560 = vmatpush1.bf16.msra.mxu0 %v10572_v28  ;;  %5601 = vmatpush1.bf16.msra.mxu1 %v8843_v51 }
 0x9cd   :  { %5561 = vmatprep.subr.bf16.mxu0 %v10573_v25  ;;  %5602 = vmatprep.subr.bf16.mxu1 %v10574_v17 }
 0x9d0   :  { %5562 = vmatpush1.bf16.msra.mxu0 %v10575_v59  ;;  %5603 = vmatpush1.bf16.msra.mxu1 %v10654_v61 }
 0x9d1   :  { %5563 = vmatprep.subr.bf16.mxu0 %v10576_v23  ;;  %5604 = vmatprep.subr.bf16.mxu1 %v10655_v6 }
 0x9d4   :  { %5564 = vmatpush1.bf16.msra.mxu0 %v10577_v20  ;;  %5605 = vmatpush1.bf16.msra.mxu1 %v10656_v55 }
 0x9d5   :  { %5565 = vmatprep.subr.bf16.mxu0 %v10578_v22  ;;  %5606 = vmatprep.subr.bf16.mxu1 %v10657_v36 }
 0x9d8   :  { %5566 = vmatpush1.bf16.msra.mxu0 %v10579_v43  ;;  %5607 = vmatpush1.bf16.msra.mxu1 %v10658_v40 }
 0x9d9   :  { %5567 = vmatprep.subr.bf16.mxu0 %v10580_v54  ;;  %5608 = vmatprep.subr.bf16.mxu1 %v10659_v33 }
 0x9dc   :  { %5568 = vmatpush1.bf16.msra.mxu0 %v10581_v53  ;;  %5609 = vmatpush1.bf16.msra.mxu1 %v10660_v16 }
 0x9dd   :  { %5569 = vmatprep.subr.bf16.mxu0 %v10582_v34  ;;  %5610 = vmatprep.subr.bf16.mxu1 %v10661_v32 }
 0x9e0   :  { %5570 = vmatpush1.bf16.msra.mxu0 %v10583_v46  ;;  %5611 = vmatpush1.bf16.msra.mxu1 %v10662_v48 }
 0x9e1   :  { %5571 = vmatprep.subr.bf16.mxu0 %v10584_v7  ;;  %5612 = vmatprep.subr.bf16.mxu1 %v11026_v42 }
 0x9e4   :  { %5572 = vmatpush1.bf16.msra.mxu0 %v11027_v3  ;;  %5613 = vmatpush1.bf16.msra.mxu1 %v11028_v26 }
 0x9e5   :  { %5573 = vmatprep.subr.bf16.mxu0 %v11029_v63  ;;  %5614 = vmatprep.subr.bf16.mxu1 %v11030_v10 }
 0x9e8   :  { %5574 = vmatpush1.bf16.msra.mxu0 %v11031_v31  ;;  %5615 = vmatpush1.bf16.msra.mxu1 %v11032_v62  ;;  %v11116_v62 = vld [vmem:[#allocation50_spill] sm:$0xff] }
 0x9e9   :  { %5575 = vmatprep.subr.bf16.mxu0 %v11033_v15  ;;  %5616 = vmatprep.subr.bf16.mxu1 %v11034_v19 }
 0x9ec   :  { %5576 = vmatpush1.bf16.msra.mxu0 %v11035_v14  ;;  %5617 = vmatpush1.bf16.msra.mxu1 %v11036_v50 }
 0x9ed   :  { %5577 = vmatprep.subr.bf16.mxu0 %v11037_v60  ;;  %5618 = vmatprep.subr.bf16.mxu1 %v11038_v27  ;;  %v11048_v60 = vld [vmem:[#allocation158_spill] sm:$0xff]  ;;  %v11049_v27 = vld [vmem:[#allocation25_spill] sm:$0xff] }
 0x9f0   :  { %5578 = vmatpush1.bf16.msra.mxu0 %v11039_v57  ;;  %5619 = vmatpush1.bf16.msra.mxu1 %v11040_v29  ;;  %v11050_v57 = vld [vmem:[#allocation66_spill] sm:$0xff] }
 0x9f1   :  { %5579 = vmatprep.subr.bf16.mxu0 %v11041_v41  ;;  %5620 = vmatprep.subr.bf16.mxu1 %v11042_v47  ;;  %v11051_v47 = vld [vmem:[#allocation26_spill] sm:$0xff]  ;;  %v11060_v41 = vld [vmem:[#allocation71_spill] sm:$0xff] }
 0x9f4   :  { %5580 = vmatpush1.bf16.msra.mxu0 %v11043_v44  ;;  %5621 = vmatpush1.bf16.msra.mxu1 %v11044_v21  ;;  %v11052_v44 = vld [vmem:[#allocation67_spill] sm:$0xff] }
 0x9f5   :  { %5581 = vmatprep.subr.bf16.mxu0 %v11045_v12  ;;  %5622 = vmatprep.subr.bf16.mxu1 %v11046_v2  ;;  %v11053_v21 = vld [vmem:[#allocation27_spill] sm:$0xff]  ;;  %v11054_v12 = vld [vmem:[#allocation68_spill] sm:$0xff] }
 0x9f6   :  { %v11055_v2 = vld [vmem:[#allocation28_spill] sm:$0xff] }
 0x9f8   :  { %5582 = vmatpush1.bf16.msra.mxu0 %v11047_v24  ;;  %5623 = vmatpush1.bf16.msra.mxu1 %v11048_v60  ;;  %v11056_v24 = vld [vmem:[#allocation69_spill] sm:$0xff] }
 0x9f9   :  { %5724 = vmatprep.subr.bf16.mxu0 %v11049_v27  ;;  %5765 = vmatprep.subr.bf16.mxu1 %v11050_v57  ;;  %v11057_v60 = vld [vmem:[#allocation29_spill] sm:$0xff]  ;;  %v11058_v27 = vld [vmem:[#allocation70_spill] sm:$0xff] }
 0x9fa   :  { %v11059_v57 = vld [vmem:[#allocation30_spill] sm:$0xff] }
 0x9fb   :  { %5584 = vmatmul.mubr.bf16.vlgmr.msra.gmra.mrb[64].mxu0 %v9784_v49  ;;  %5625 = vmatmul.mubr.bf16.vlgmr.msra.gmra.mrb[68].mxu1 %v9784_v49  ;;  %v11061_v49 = vld [vmem:[#allocation31_spill] sm:$0xff] }
 0x9fc   :  { %5725 = vmatpush1.bf16.msra.mxu0 %v11051_v47  ;;  %5766 = vmatpush1.bf16.msra.mxu1 %v11052_v44  ;;  %v11062_v47 = vld [vmem:[#allocation72_spill] sm:$0xff]  ;;  %v11063_v44 = vld [vmem:[#allocation33_spill] sm:$0xff] }
 0x9fd   :  { %5726 = vmatprep.subr.bf16.mxu0 %v11053_v21  ;;  %5767 = vmatprep.subr.bf16.mxu1 %v11054_v12  ;;  %v11064_v21 = vld [vmem:[#allocation73_spill] sm:$0xff]  ;;  %v11065_v12 = vld [vmem:[#allocation34_spill] sm:$0xff] }
 0xa00   :  { %5727 = vmatpush1.bf16.msra.mxu0 %v11055_v2  ;;  %5768 = vmatpush1.bf16.msra.mxu1 %v11056_v24  ;;  %v11066_v2 = vld [vmem:[#allocation74_spill] sm:$0xff]  ;;  %v11067_v24 = vld [vmem:[#allocation35_spill] sm:$0xff] }
 0xa01   :  { %5728 = vmatprep.subr.bf16.mxu0 %v11057_v60  ;;  %5769 = vmatprep.subr.bf16.mxu1 %v11058_v27  ;;  %v11068_v60 = vld [vmem:[#allocation75_spill] sm:$0xff]  ;;  %v11069_v27 = vld [vmem:[#allocation36_spill] sm:$0xff] }
 0xa04   :  { %5729 = vmatpush1.bf16.msra.mxu0 %v11059_v57  ;;  %5770 = vmatpush1.bf16.msra.mxu1 %v11060_v41  ;;  %v11070_v57 = vld [vmem:[#allocation76_spill] sm:$0xff]  ;;  %v11071_v41 = vld [vmem:[#allocation37_spill] sm:$0xff] }
 0xa05   :  { %5730 = vmatprep.subr.bf16.mxu0 %v11061_v49  ;;  %5771 = vmatprep.subr.bf16.mxu1 %v11062_v47  ;;  %v11072_v49 = vld [vmem:[#allocation77_spill] sm:$0xff]  ;;  %v11073_v47 = vld [vmem:[#allocation38_spill] sm:$0xff] }
 0xa08   :  { %5731 = vmatpush1.bf16.msra.mxu0 %v11063_v44  ;;  %5772 = vmatpush1.bf16.msra.mxu1 %v11064_v21  ;;  %v11074_v44 = vld [vmem:[#allocation78_spill] sm:$0xff]  ;;  %v11075_v21 = vld [vmem:[#allocation39_spill] sm:$0xff] }
 0xa09   :  { %5732 = vmatprep.subr.bf16.mxu0 %v11065_v12  ;;  %5773 = vmatprep.subr.bf16.mxu1 %v11066_v2  ;;  %v11076_v12 = vld [vmem:[#allocation79_spill] sm:$0xff]  ;;  %v11077_v2 = vld [vmem:[#allocation40_spill] sm:$0xff] }
 0xa0c   :  { %5733 = vmatpush1.bf16.msra.mxu0 %v11067_v24  ;;  %5774 = vmatpush1.bf16.msra.mxu1 %v11068_v60  ;;  %v11078_v24 = vld [vmem:[#allocation80_spill] sm:$0xff]  ;;  %v11079_v60 = vld [vmem:[#allocation41_spill] sm:$0xff] }
 0xa0d   :  { %5734 = vmatprep.subr.bf16.mxu0 %v11069_v27  ;;  %5775 = vmatprep.subr.bf16.mxu1 %v11070_v57  ;;  %v11080_v27 = vld [vmem:[#allocation81_spill] sm:$0xff]  ;;  %v11081_v57 = vld [vmem:[#allocation42_spill] sm:$0xff] }
 0xa10   :  { %5735 = vmatpush1.bf16.msra.mxu0 %v11071_v41  ;;  %5776 = vmatpush1.bf16.msra.mxu1 %v11072_v49  ;;  %v11082_v41 = vld [vmem:[#allocation83_spill] sm:$0xff] }
 0xa11   :  { %5736 = vmatprep.subr.bf16.mxu0 %v11073_v47  ;;  %5777 = vmatprep.subr.bf16.mxu1 %v11074_v44  ;;  %v11083_v49 = vld [vmem:[#allocation51_spill] sm:$0xff]  ;;  %v11084_v47 = vld [vmem:[#allocation85_spill] sm:$0xff]  ;;  %v11085_v44 = vld [vmem:[#allocation52_spill] sm:$0xff] }
 0xa14   :  { %5737 = vmatpush1.bf16.msra.mxu0 %v11075_v21  ;;  %5778 = vmatpush1.bf16.msra.mxu1 %v11076_v12  ;;  %v11086_v21 = vld [vmem:[#allocation87_spill] sm:$0xff]  ;;  %v11087_v12 = vld [vmem:[#allocation53_spill] sm:$0xff] }
 0xa15   :  { %5738 = vmatprep.subr.bf16.mxu0 %v11077_v2  ;;  %5779 = vmatprep.subr.bf16.mxu1 %v11078_v24  ;;  %v11088_v2 = vld [vmem:[#allocation89_spill] sm:$0xff]  ;;  %v11089_v24 = vld [vmem:[#allocation54_spill] sm:$0xff] }
 0xa18   :  { %5739 = vmatpush1.bf16.msra.mxu0 %v11079_v60  ;;  %5780 = vmatpush1.bf16.msra.mxu1 %v11080_v27  ;;  %v11090_v60 = vld [vmem:[#allocation91_spill] sm:$0xff] }
 0xa19   :  { %5740 = vmatprep.subr.bf16.mxu0 %v11081_v57  ;;  %5781 = vmatprep.subr.bf16.mxu1 %v11082_v41  ;;  %v11091_v27 = vld [vmem:[#allocation55_spill] sm:$0xff]  ;;  %v11092_v57 = vld [vmem:[#allocation93_spill] sm:$0xff]  ;;  %v11093_v41 = vld [vmem:[#allocation56_spill] sm:$0xff] }
 0xa1c   :  { %5741 = vmatpush1.bf16.msra.mxu0 %v11083_v49  ;;  %5782 = vmatpush1.bf16.msra.mxu1 %v11084_v47  ;;  %v11094_v49 = vld [vmem:[#allocation95_spill] sm:$0xff]  ;;  %v11095_v47 = vld [vmem:[#allocation57_spill] sm:$0xff] }
 0xa1d   :  { %5742 = vmatprep.subr.bf16.mxu0 %v11085_v44  ;;  %5783 = vmatprep.subr.bf16.mxu1 %v11086_v21  ;;  %v11096_v44 = vld [vmem:[#allocation97_spill] sm:$0xff]  ;;  %v11097_v21 = vld [vmem:[#allocation58_spill] sm:$0xff] }
 0xa20   :  { %5743 = vmatpush1.bf16.msra.mxu0 %v11087_v12  ;;  %5784 = vmatpush1.bf16.msra.mxu1 %v11088_v2  ;;  %v11098_v12 = vld [vmem:[#allocation99_spill] sm:$0xff] }
 0xa21   :  { %5744 = vmatprep.subr.bf16.mxu0 %v11089_v24  ;;  %5785 = vmatprep.subr.bf16.mxu1 %v11090_v60  ;;  %v11099_v2 = vld [vmem:[#allocation59_spill] sm:$0xff]  ;;  %v11100_v24 = vld [vmem:[#allocation101_spill] sm:$0xff]  ;;  %v11101_v60 = vld [vmem:[#allocation60_spill] sm:$0xff] }
 0xa24   :  { %5745 = vmatpush1.bf16.msra.mxu0 %v11091_v27  ;;  %5786 = vmatpush1.bf16.msra.mxu1 %v11092_v57  ;;  %v11102_v27 = vld [vmem:[#allocation103_spill] sm:$0xff]  ;;  %v11103_v57 = vld [vmem:[#allocation61_spill] sm:$0xff] }
 0xa25   :  { %5746 = vmatprep.subr.bf16.mxu0 %v11093_v41  ;;  %5787 = vmatprep.subr.bf16.mxu1 %v11094_v49  ;;  %v11104_v41 = vld [vmem:[#allocation105_spill] sm:$0xff]  ;;  %v11105_v49 = vld [vmem:[#allocation62_spill] sm:$0xff] }
 0xa28   :  { %5747 = vmatpush1.bf16.msra.mxu0 %v11095_v47  ;;  %5788 = vmatpush1.bf16.msra.mxu1 %v11096_v44  ;;  %v11106_v47 = vld [vmem:[#allocation107_spill] sm:$0xff] }
 0xa29   :  { %5748 = vmatprep.subr.bf16.mxu0 %v11097_v21  ;;  %5789 = vmatprep.subr.bf16.mxu1 %v11098_v12  ;;  %v11107_v44 = vld [vmem:[#allocation63_spill] sm:$0xff]  ;;  %v11108_v21 = vld [vmem:[#allocation108_spill] sm:$0xff] }
 0xa2a   :  { %v11109_v12 = vld [vmem:[#allocation64_spill] sm:$0xff] }
 0xa2c   :  { %5749 = vmatpush1.bf16.msra.mxu0 %v11099_v2  ;;  %5790 = vmatpush1.bf16.msra.mxu1 %v11100_v24  ;;  %v11110_v2 = vld [vmem:[#allocation109_spill] sm:$0xff] }
 0xa2d   :  { %5750 = vmatprep.subr.bf16.mxu0 %v11101_v60  ;;  %5791 = vmatprep.subr.bf16.mxu1 %v11102_v27  ;;  %v11111_v24 = vld [vmem:[#allocation65_spill] sm:$0xff]  ;;  %v11112_v60 = vld [vmem:[#allocation110_spill] sm:$0xff] }
 0xa2e   :  { %v11113_v27 = vld [vmem:[#allocation82_spill] sm:$0xff] }
 0xa30   :  { %5751 = vmatpush1.bf16.msra.mxu0 %v11103_v57  ;;  %5792 = vmatpush1.bf16.msra.mxu1 %v11104_v41  ;;  %v11114_v57 = vld [vmem:[#allocation111_spill] sm:$0xff] }
 0xa31   :  { %5752 = vmatprep.subr.bf16.mxu0 %v11105_v49  ;;  %5793 = vmatprep.subr.bf16.mxu1 %v11106_v47 }
 0xa34   :  { %5753 = vmatpush1.bf16.msra.mxu0 %v11107_v44  ;;  %5794 = vmatpush1.bf16.msra.mxu1 %v11108_v21 }
 0xa35   :  { %5754 = vmatprep.subr.bf16.mxu0 %v11109_v12  ;;  %5795 = vmatprep.subr.bf16.mxu1 %v11110_v2 }
 0xa38   :  { %5755 = vmatpush1.bf16.msra.mxu0 %v11111_v24  ;;  %5796 = vmatpush1.bf16.msra.mxu1 %v11112_v60  ;;  %v11115_v60 = vld [vmem:[#allocation48_spill] sm:$0xff] }
 0xa39   :  { %5806 = vmatprep.subr.bf16.mxu0 %v11113_v27  ;;  %5847 = vmatprep.subr.bf16.mxu1 %v11114_v57  ;;  %v11117_v27 = vcombine.low %v11115_v60, %v11116_v62 }
 0xa8e   :  { %v5503_v41 = vpop.f32.mrb[60].mxu0  ;;  %v5544_v49 = vpop.f32.mrb[64].mxu1 }
 0xa8f   :  { %v5505_v29 = vpop.f32.mrb[61].mxu0  ;;  %v5546_v47 = vpop.f32.mrb[65].mxu1 }
 0xa90   :  { %v5641_v50 = vcombine.low %v5503_v41, %v5505_v29  ;;  %v5642_v44 = vcombine.low %v5544_v49, %v5546_v47  ;;  %v5507_v14 = vpop.f32.mrb[62].mxu0  ;;  %v5548_v21 = vpop.f32.mrb[66].mxu1 }
 0xa91   :  { %v5508_v19 = vpop.f32.mrb[63].mxu0  ;;  %v5549_v12 = vpop.f32.mrb[67].mxu1 }
 0xa92   :  { %v5649_v2 = vrot.slane %v5641_v50, %v8476_v11  ;;  %v5656_v24 = vrot.slane %v5642_v44, %v8476_v11 }
 0xa94   :  { %v5657_v15 = vcombine.low %v5649_v2, %v5656_v24 }
 0xa96   :  { %v5677_v31 = vadd.f32 %v5657_v15, %v11117_v27 }
 0xa98   :  { %v5686_v57 = vrot.slane %v5677_v31, 4  ;;  %v6987_v63 = vmul.f32 -1.442695, %v5677_v31 }
 0xa9a   :  { %v6988_v10 = vmul.f32 -1.442695, %v5686_v57  ;;  %v11119_v57 = vld [vmem:[#allocation121_spill] sm:$0xff] }
 0xa9c   :  { %7875 = vpow2.f32 %v6988_v10 }
 0xa9d   :  { %7877 = vpow2.f32 %v6987_v63  ;;  %v11118_v63 = vld [vmem:[#allocation119_spill] sm:$0xff] }
 0xa9e   :  { %v11120_v62 = vcombine.low %v11118_v63, %v11119_v57 }
 0xaa6   :  { %v7876_v14 = vpop.eup %7875 }
 0xaa7   :  { %v7878_v47 = vpop.eup %7877  ;;  %v5691_v26 = vadd.f32 1.0, %v7876_v14 }
 0xaa8   :  { %v5682_v31 = vadd.f32 1.0, %v7878_v47 }
 0xaa9   :  { %7879 = vrcp.f32 %v5691_v26 }
 0xaaa   :  { %7881 = vrcp.f32 %v5682_v31 }
 0xace   :  { %v5585_v29 = vpop.f32.mrb[64].mxu0  ;;  %v5626_v41 = vpop.f32.mrb[68].mxu1 }
 0xacf   :  { %v5587_v49 = vpop.f32.mrb[65].mxu0  ;;  %v5628_v19 = vpop.f32.mrb[69].mxu1 }
 0xad0   :  { %v5658_v21 = vcombine.low %v5585_v29, %v5587_v49  ;;  %v5659_v50 = vcombine.low %v5626_v41, %v5628_v19  ;;  %v5589_v12 = vpop.f32.mrb[66].mxu0  ;;  %v5630_v44 = vpop.f32.mrb[70].mxu1 }
 0xad1   :  { %v5590_v2 = vpop.f32.mrb[67].mxu0  ;;  %v5631_v24 = vpop.f32.mrb[71].mxu1 }
 0xad2   :  { %v5666_v15 = vrot.slane %v5658_v21, %v8476_v11  ;;  %v5673_v27 = vrot.slane %v5659_v50, %v8476_v11  ;;  %v7880_v49 = vpop.eup %7879 }
 0xad3   :  { %v7882_v19 = vpop.eup %7881  ;;  %v5704_v14 = vmul.f32 %v7880_v49, %v9780_v52 }
 0xad4   :  { %v5674_v10 = vcombine.low %v5666_v15, %v5673_v27 }
 0xad6   :  { %v5678_v60 = vadd.f32 %v5674_v10, %v11120_v62 }
 0xad8   :  { %7883 = vtanh.f32 %v5678_v60  ;;  %v5696_v29 = vrot.slane %v5678_v60, 4 }
 0xada   :  { %v6989_v41 = vmul.f32 -1.442695, %v5696_v29 }
 0xadc   :  { %7885 = vpow2.f32 %v6989_v41 }
 0xae2   :  { %v7884_v12 = vpop.eup %7883 }
 0xae3   :  { %v5705_v21 = vmul.f32 %v7884_v12, %v7882_v19 }
 0xae5   :  { %v9929_v44 = vadd.f32 %v5705_v21, %v5704_v14 }
 0xae6   :  { %v7886_v47 = vpop.eup %7885 }
 0xae7   :  { %v5701_v50 = vadd.f32 1.0, %v7886_v47  ;;  %7887 = vtanh.f32 %v9929_v44  ;;  %v11142_v47 = vld [vmem:[#allocation48_spill] sm:$0xff] }
 0xae9   :  { %7889 = vrcp.f32 %v5701_v50  ;;  %v11143_v50 = vld [vmem:[#allocation50_spill] sm:$0xff] }
 0xaf1   :  { %v7888_v26 = vpop.eup %7887 }
 0xaf3   :  { %v7890_v62 = vpop.eup %7889 }
 0xaf4   :  { %v5708_v2 = vmul.f32 %v7890_v62, %v7888_v26  ;;  %v11144_v26 = vcombine.high %v11142_v47, %v11143_v50  ;;  %v6329_v47 = vld [vmem:[%s10085_s7] sm:$0xff]  ;;  %v6330_v50 = vld [vmem:[%s10085_s7 + $0x8] sm:$0xff] }
 0xaf6   :  { %v5718_v60 = vrot.slane %v5708_v2, %v8476_v11 }
 0xaf8   :  { %v5719_v24 = vcombine.high %v5718_v60, %v5718_v60  ;;  %v9933_v27 = vpack.c.bf16 %v5718_v60, %v5718_v60 }
 0xafa   :  { %v5723_v15 = vpack.c.bf16 %v5719_v24, %v5719_v24 }
 0xafc   :  { %5756 = vmatprep.mubr.bf16.mxu0 %v5723_v15  ;;  %5797 = vmatprep.mubr.bf16.mxu1 %v5723_v15 }
 0xafd   :  { %5757 = vmatmul.mubr.bf16.vlgmr.msra.gmra.mrb[68].mxu0 %v9933_v27  ;;  %5798 = vmatmul.mubr.bf16.vlgmr.msra.gmra.mrb[72].mxu1 %v9933_v27 }
 0xafe   :  { %5807 = vmatpush1.bf16.msra.mxu0 %v10564_v1  ;;  %5848 = vmatpush1.bf16.msra.mxu1 %v8781_v18  ;;  %v11123_v18 = vld [vmem:[#allocation149_spill] sm:$0xff]  ;;  %v11134_v1 = vld [vmem:[#allocation135_spill] sm:$0xff] }
 0xaff   :  { %5838 = vmatprep.mubr.bf16.mxu0 %v5723_v15  ;;  %5879 = vmatprep.mubr.bf16.mxu1 %v5723_v15 }
 0xb00   :  { %5808 = vmatprep.subr.bf16.mxu0 %v10565_v39  ;;  %5849 = vmatprep.subr.bf16.mxu1 %v8798_v9  ;;  %v11124_v9 = vld [vmem:[#allocation128_spill] sm:$0xff]  ;;  %v11135_v39 = vld [vmem:[#allocation155_spill] sm:$0xff] }
 0xb02   :  { %5809 = vmatpush1.bf16.msra.mxu0 %v10566_v35  ;;  %5850 = vmatpush1.bf16.msra.mxu1 %v8806_v58  ;;  %v11122_v58 = vld [vmem:[#allocation127_spill] sm:$0xff]  ;;  %v11136_v35 = vld [vmem:[#allocation137_spill] sm:$0xff] }
 0xb03   :  { %5810 = vmatprep.subr.bf16.mxu0 %v10567_v37  ;;  %5851 = vmatprep.subr.bf16.mxu1 %v8812_v4  ;;  %v11121_v4 = vld [vmem:[#allocation148_spill] sm:$0xff] }
 0xb04   :  { %v11137_v37 = vld [vmem:[#allocation156_spill] sm:$0xff] }
 0xb06   :  { %5811 = vmatpush1.bf16.msra.mxu0 %v10568_v45  ;;  %5852 = vmatpush1.bf16.msra.mxu1 %v8819_v5  ;;  %v11125_v5 = vld [vmem:[#allocation150_spill] sm:$0xff]  ;;  %v11138_v45 = vld [vmem:[#allocation139_spill] sm:$0xff] }
 0xb07   :  { %5812 = vmatprep.subr.bf16.mxu0 %v10569_v38  ;;  %5853 = vmatprep.subr.bf16.mxu1 %v8825_v56  ;;  %v11126_v56 = vld [vmem:[#allocation129_spill] sm:$0xff] }
 0xb08   :  { %v11139_v38 = vld [vmem:[#allocation157_spill] sm:$0xff] }
 0xb0a   :  { %5813 = vmatpush1.bf16.msra.mxu0 %v10570_v0  ;;  %5854 = vmatpush1.bf16.msra.mxu1 %v8831_v8  ;;  %v11127_v8 = vld [vmem:[#allocation151_spill] sm:$0xff]  ;;  %v11140_v0 = vld [vmem:[#allocation141_spill] sm:$0xff] }
 0xb0b   :  { %5814 = vmatprep.subr.bf16.mxu0 %v10571_v30  ;;  %5855 = vmatprep.subr.bf16.mxu1 %v8837_v13  ;;  %v11128_v13 = vld [vmem:[#allocation130_spill] sm:$0xff] }
 0xb0c   :  { %v11141_v30 = vld [vmem:[#allocation158_spill] sm:$0xff] }
 0xb0e   :  { %5815 = vmatpush1.bf16.msra.mxu0 %v10572_v28  ;;  %5856 = vmatpush1.bf16.msra.mxu1 %v8843_v51  ;;  %v11129_v51 = vld [vmem:[#allocation152_spill] sm:$0xff] }
 0xb0f   :  { %5816 = vmatprep.subr.bf16.mxu0 %v10573_v25  ;;  %5857 = vmatprep.subr.bf16.mxu1 %v10574_v17  ;;  %v7723_v28 = vld [vmem:[#allocation14 + $0x40] sm:$0xff]   ;;  %v7725_v17 = vld [vmem:[#allocation14 + $0x48] sm:$0xff]  }
 0xb10   :  { %v7724_v25 = vld [vmem:[#allocation14] sm:$0xff]  }
 0xb12   :  { %5817 = vmatpush1.bf16.msra.mxu0 %v10575_v59  ;;  %5858 = vmatpush1.bf16.msra.mxu1 %v10654_v61  ;;  %v7726_v59 = vld [vmem:[#allocation14 + $0x8] sm:$0xff]   ;;  %v7732_v61 = vld [vmem:[#allocation14 + $0x20] sm:$0xff]  }
 0xb13   :  { %5818 = vmatprep.subr.bf16.mxu0 %v10576_v23  ;;  %5859 = vmatprep.subr.bf16.mxu1 %v10655_v6  ;;  %v7727_v23 = vld [vmem:[#allocation14 + $0x50] sm:$0xff]   ;;  %v7733_v6 = vld [vmem:[#allocation14 + $0x68] sm:$0xff]  }
 0xb16   :  { %5819 = vmatpush1.bf16.msra.mxu0 %v10577_v20  ;;  %5860 = vmatpush1.bf16.msra.mxu1 %v10656_v55  ;;  %v7728_v20 = vld [vmem:[#allocation14 + $0x10] sm:$0xff]   ;;  %v7734_v55 = vld [vmem:[#allocation14 + $0x28] sm:$0xff]  }
 0xb17   :  { %5820 = vmatprep.subr.bf16.mxu0 %v10578_v22  ;;  %5861 = vmatprep.subr.bf16.mxu1 %v10657_v36  ;;  %v7729_v22 = vld [vmem:[#allocation14 + $0x58] sm:$0xff]   ;;  %v7735_v36 = vld [vmem:[#allocation14 + $0x70] sm:$0xff]  }
 0xb1a   :  { %5821 = vmatpush1.bf16.msra.mxu0 %v10579_v43  ;;  %5862 = vmatpush1.bf16.msra.mxu1 %v10658_v40  ;;  %v7730_v43 = vld [vmem:[#allocation14 + $0x18] sm:$0xff]   ;;  %v7736_v40 = vld [vmem:[#allocation14 + $0x30] sm:$0xff]  }
 0xb1b   :  { %5822 = vmatprep.subr.bf16.mxu0 %v10580_v54  ;;  %5863 = vmatprep.subr.bf16.mxu1 %v10659_v33  ;;  %v7731_v54 = vld [vmem:[#allocation14 + $0x60] sm:$0xff]   ;;  %v7737_v33 = vld [vmem:[#allocation14 + $0x78] sm:$0xff]  }
 0xb1e   :  { %5823 = vmatpush1.bf16.msra.mxu0 %v10581_v53  ;;  %5864 = vmatpush1.bf16.msra.mxu1 %v10660_v16  ;;  %v11130_v53 = vld [vmem:[#allocation131_spill] sm:$0xff] }
 0xb1f   :  { %5824 = vmatprep.subr.bf16.mxu0 %v10582_v34  ;;  %5865 = vmatprep.subr.bf16.mxu1 %v10661_v32  ;;  %v11131_v34 = vld [vmem:[#allocation153_spill] sm:$0xff]  ;;  %v7738_v16 = vld [vmem:[#allocation14 + $0x38] sm:$0xff]  }
 0xb20   :  { %v7739_v32 = vld [vmem:[#allocation14 + $0xc0] sm:$0xff]  }
 0xb22   :  { %5825 = vmatpush1.bf16.msra.mxu0 %v10583_v46  ;;  %5866 = vmatpush1.bf16.msra.mxu1 %v10662_v48  ;;  %v11132_v46 = vld [vmem:[#allocation133_spill] sm:$0xff] }
 0xb23   :  { %5826 = vmatprep.subr.bf16.mxu0 %v10584_v7  ;;  %5867 = vmatprep.subr.bf16.mxu1 %v11026_v42  ;;  %v11133_v7 = vld [vmem:[#allocation154_spill] sm:$0xff] }
 0xb26   :  { %5827 = vmatpush1.bf16.msra.mxu0 %v11027_v3  ;;  %5868 = vmatpush1.bf16.msra.mxu1 %v11121_v4 }
 0xb27   :  { %5828 = vmatprep.subr.bf16.mxu0 %v11122_v58  ;;  %5869 = vmatprep.subr.bf16.mxu1 %v11123_v18 }
 0xb2a   :  { %5829 = vmatpush1.bf16.msra.mxu0 %v11124_v9  ;;  %5870 = vmatpush1.bf16.msra.mxu1 %v11125_v5 }
 0xb2b   :  { %5830 = vmatprep.subr.bf16.mxu0 %v11126_v56  ;;  %5871 = vmatprep.subr.bf16.mxu1 %v11127_v8 }
 0xb2e   :  { %5831 = vmatpush1.bf16.msra.mxu0 %v11128_v13  ;;  %5872 = vmatpush1.bf16.msra.mxu1 %v11129_v51 }
 0xb2f   :  { %5832 = vmatprep.subr.bf16.mxu0 %v11130_v53  ;;  %5873 = vmatprep.subr.bf16.mxu1 %v11131_v34 }
 0xb32   :  { %5833 = vmatpush1.bf16.msra.mxu0 %v11132_v46  ;;  %5874 = vmatpush1.bf16.msra.mxu1 %v11133_v7 }
 0xb33   :  { %5834 = vmatprep.subr.bf16.mxu0 %v11134_v1  ;;  %5875 = vmatprep.subr.bf16.mxu1 %v11135_v39 }
 0xb36   :  { %5835 = vmatpush1.bf16.msra.mxu0 %v11136_v35  ;;  %5876 = vmatpush1.bf16.msra.mxu1 %v11137_v37  ;;  %v11145_v35 = vcombine.high %v11118_v63, %v11119_v57 }
 0xb37   :  { %5836 = vmatprep.subr.bf16.mxu0 %v11138_v45  ;;  %5877 = vmatprep.subr.bf16.mxu1 %v11139_v38 }
 0xb3a   :  { %5837 = vmatpush1.bf16.msra.mxu0 %v11140_v0  ;;  %5878 = vmatpush1.bf16.msra.mxu1 %v11141_v30 }
 0xb3b   :  { %7027 = vmatprep.subr.bf16.mxu0 %v7723_v28 }
 0xb3d   :  { %5839 = vmatmul.mubr.bf16.vlgmr.msra.gmra.mrb[72].mxu0 %v9933_v27  ;;  %5880 = vmatmul.mubr.bf16.vlgmr.msra.gmra.mrb[76].mxu1 %v9933_v27 }
 0xb3e   :  { %7028 = vmatpush3.bf16.msra.mxu0 %v7724_v25 }
 0xb3f   :  { %7029 = vmatprep.subr.bf16.mxu0 %v7725_v17 }
 0xb42   :  { %7030 = vmatpush3.bf16.msra.mxu0 %v7726_v59 }
 0xb43   :  { %7031 = vmatprep.subr.bf16.mxu0 %v7727_v23 }
 0xb46   :  { %7032 = vmatpush3.bf16.msra.mxu0 %v7728_v20 }
 0xb47   :  { %7033 = vmatprep.subr.bf16.mxu0 %v7729_v22 }
 0xb4a   :  { %7034 = vmatpush3.bf16.msra.mxu0 %v7730_v43 }
 0xb4b   :  { %7035 = vmatprep.subr.bf16.mxu0 %v7731_v54 }
 0xb4e   :  { %7036 = vmatpush3.bf16.msra.mxu0 %v7732_v61  ;;  %v11146_v61 = vld [vmem:[#allocation159_spill] sm:$0xff] }
 0xb4f   :  { %7037 = vmatprep.subr.bf16.mxu0 %v7733_v6  ;;  %v5978_v6 = vrot.slane %v11146_v61, 6 }
 0xb52   :  { %7038 = vmatpush3.bf16.msra.mxu0 %v7734_v55 }
 0xb53   :  { %7039 = vmatprep.subr.bf16.mxu0 %v7735_v36  ;;  %v7740_v36 = vld [vmem:[#allocation14 + $0x80] sm:$0xff]  }
 0xb56   :  { %7040 = vmatpush3.bf16.msra.mxu0 %v7736_v40 }
 0xb57   :  { %7041 = vmatprep.subr.bf16.mxu0 %v7737_v33  ;;  %v7741_v33 = vld [vmem:[#allocation14 + $0xc8] sm:$0xff]  }
 0xb5a   :  { %7042 = vmatpush3.bf16.msra.mxu0 %v7738_v16  ;;  %v5984_v16 = vpack.c.bf16 %v5978_v6, %v5978_v6 }
 0xb5b   :  { %7049 = vmatprep.subr.bf16.mxu0 %v7739_v32  ;;  %v7743_v32 = vld [vmem:[#allocation14 + $0xd0] sm:$0xff]  }
 0xbd0   :  { %v5758_v48 = vpop.f32.mrb[68].mxu0  ;;  %v5799_v52 = vpop.f32.mrb[72].mxu1 }
 0xbd1   :  { %v5760_v42 = vpop.f32.mrb[69].mxu0  ;;  %v5801_v3 = vpop.f32.mrb[73].mxu1 }
 0xbd2   :  { %v5896_v31 = vcombine.low %v5758_v48, %v5760_v42  ;;  %v5897_v10 = vcombine.low %v5799_v52, %v5801_v3  ;;  %v5762_v29 = vpop.f32.mrb[70].mxu0  ;;  %v5803_v41 = vpop.f32.mrb[74].mxu1  ;;  %v7744_v48 = vld [vmem:[#allocation14 + $0x90] sm:$0xff]   ;;  %v7745_v52 = vld [vmem:[#allocation14 + $0xd8] sm:$0xff]   ;;  %v7747_v42 = vld [vmem:[#allocation14 + $0xe0] sm:$0xff]  }
 0xbd3   :  { %v5763_v49 = vpop.f32.mrb[71].mxu0  ;;  %v5804_v19 = vpop.f32.mrb[75].mxu1  ;;  %v7748_v3 = vld [vmem:[#allocation14 + $0xa0] sm:$0xff]   ;;  %v7751_v29 = vld [vmem:[#allocation14 + $0xf0] sm:$0xff]  }
 0xbd4   :  { %v5904_v12 = vrot.slane %v5896_v31, %v8476_v11  ;;  %v5911_v14 = vrot.slane %v5897_v10, %v8476_v11  ;;  %v7749_v31 = vld [vmem:[#allocation14 + $0xe8] sm:$0xff]   ;;  %v7752_v41 = vld [vmem:[#allocation14 + $0xb0] sm:$0xff]   ;;  %v7753_v49 = vld [vmem:[#allocation14 + $0xf8] sm:$0xff]  }
 0xbd5   :  { %v7750_v10 = vld [vmem:[#allocation14 + $0xa8] sm:$0xff]   ;;  %v7754_v19 = vld [vmem:[#allocation14 + $0xb8] sm:$0xff]  }
 0xbd6   :  { %v5912_v21 = vcombine.low %v5904_v12, %v5911_v14  ;;  %v11147_v12 = vld [vmem:[#allocation32_spill] sm:$0xff] }
 0xbd7   :  { %v5977_v14 = vrot.slane %v11147_v12, 6 }
 0xbd8   :  { %v5932_v62 = vadd.f32 %v5912_v21, %v11144_v26  ;;  %v6331_v26 = vld [vmem:[%s10085_s7 + $0x10] sm:$0xff] }
 0xbd9   :  { %v5983_v21 = vpack.c.bf16 %v5977_v14, %v5977_v14 }
 0xbda   :  { %v5941_v2 = vrot.slane %v5932_v62, 4  ;;  %v6990_v24 = vmul.f32 -1.442695, %v5932_v62  ;;  %v8127_v62 = vmov 0.0|0.0  }
 0xbdb   :  { %7123 = vmatprep.subr.bf16.mxu1 %v8127_v62 }
 0xbdc   :  { %v6991_v60 = vmul.f32 -1.442695, %v5941_v2  ;;  %v7124_v2 = vpack.c.bf16 %v6330_v50, %v6329_v47 }
 0xbde   :  { %7891 = vpow2.f32 %v6991_v60  ;;  %v6332_v60 = vld [vmem:[%s10085_s7 + $0x18] sm:$0xff]  ;;  %7125 = vmatpush3.bf16.msra.mxu1 %v7124_v2 }
 0xbdf   :  { %7893 = vpow2.f32 %v6990_v24  ;;  %v7127_v24 = vpack.c.bf16 %v6332_v60, %v6331_v26  ;;  %7126 = vmatprep.subr.bf16.mxu1 %v8127_v62 }
 0xbe2   :  { %7128 = vmatpush3.bf16.msra.mxu1 %v7127_v24 }
 0xbe3   :  { %7129 = vmatprep.subr.bf16.mxu1 %v8127_v62 }
 0xbe8   :  { %v7892_v4 = vpop.eup %7891 }
 0xbe9   :  { %v7894_v9 = vpop.eup %7893  ;;  %v5946_v34 = vadd.f32 1.0, %v7892_v4 }
 0xbea   :  { %v5937_v1 = vadd.f32 1.0, %v7894_v9 }
 0xbeb   :  { %7895 = vrcp.f32 %v5946_v34  ;;  %v6341_v34 = vld [vmem:[%s10085_s7 + $0x60] sm:$0xff] }
 0xbec   :  { %7897 = vrcp.f32 %v5937_v1  ;;  %v6343_v1 = vld [vmem:[%s10085_s7 + $0x70] sm:$0xff] }
 0xbf5   :  { %v7896_v0 = vpop.eup %7895 }
 0xbf6   :  { %v7898_v30 = vpop.eup %7897  ;;  %v5959_v17 = vmul.f32 %v7896_v0, %v9929_v44  ;;  %v7742_v44 = vld [vmem:[#allocation14 + $0x88] sm:$0xff]  }
 0xc10   :  { %v5840_v15 = vpop.f32.mrb[72].mxu0  ;;  %v5881_v27 = vpop.f32.mrb[76].mxu1 }
 0xc11   :  { %v5842_v58 = vpop.f32.mrb[73].mxu0  ;;  %v5883_v18 = vpop.f32.mrb[77].mxu1 }
 0xc12   :  { %v5913_v5 = vcombine.low %v5840_v15, %v5842_v58  ;;  %v5914_v56 = vcombine.low %v5881_v27, %v5883_v18  ;;  %v5844_v8 = vpop.f32.mrb[74].mxu0  ;;  %v5885_v13 = vpop.f32.mrb[78].mxu1  ;;  %v6333_v15 = vld [vmem:[%s10085_s7 + $0x20] sm:$0xff]  ;;  %v6334_v27 = vld [vmem:[%s10085_s7 + $0x28] sm:$0xff]  ;;  %v6335_v58 = vld [vmem:[%s10085_s7 + $0x30] sm:$0xff] }
 0xc13   :  { %v5845_v51 = vpop.f32.mrb[75].mxu0  ;;  %v5886_v53 = vpop.f32.mrb[79].mxu1  ;;  %v7130_v4 = vpack.c.bf16 %v6334_v27, %v6333_v15  ;;  %v6336_v18 = vld [vmem:[%s10085_s7 + $0x38] sm:$0xff]  ;;  %v6339_v13 = vld [vmem:[%s10085_s7 + $0x50] sm:$0xff] }
 0xc14   :  { %v5921_v46 = vrot.slane %v5913_v5, %v8476_v11  ;;  %v5928_v7 = vrot.slane %v5914_v56, %v8476_v11  ;;  %v7133_v9 = vpack.c.bf16 %v6336_v18, %v6335_v58  ;;  %v6337_v5 = vld [vmem:[%s10085_s7 + $0x40] sm:$0xff]  ;;  %v6338_v56 = vld [vmem:[%s10085_s7 + $0x48] sm:$0xff]  ;;  %v6340_v51 = vld [vmem:[%s10085_s7 + $0x58] sm:$0xff] }
 0xc15   :  { %7131 = vmatpush3.bf16.msra.mxu1 %v7130_v4  ;;  %v7136_v8 = vpack.c.bf16 %v6338_v56, %v6337_v5  ;;  %v7139_v53 = vpack.c.bf16 %v6340_v51, %v6339_v13 }
 0xc16   :  { %v5929_v39 = vcombine.low %v5921_v46, %v5928_v7  ;;  %7132 = vmatprep.subr.bf16.mxu1 %v8127_v62  ;;  %v6342_v46 = vld [vmem:[%s10085_s7 + $0x68] sm:$0xff] }
 0xc17   :  { %v7142_v7 = vpack.c.bf16 %v6342_v46, %v6341_v34 }
 0xc18   :  { %v5933_v37 = vadd.f32 %v5929_v39, %v11145_v35  ;;  %v6344_v39 = vld [vmem:[%s10085_s7 + $0x78] sm:$0xff]  ;;  %s8130_s7 = smov [#allocation18]  }
 0xc19   :  { %7134 = vmatpush3.bf16.msra.mxu1 %v7133_v9  ;;  %v7145_v35 = vpack.c.bf16 %v6344_v39, %v6343_v1  ;;  %s6441_s2 = sshll.u32 %s8130_s7, 4  ;;  %s6442_s2 = int_to_ptr.vmem [resolvable:$true] %s6441_s2 }
 0xc1a   :  { %7899 = vtanh.f32 %v5933_v37  ;;  %v5951_v45 = vrot.slane %v5933_v37, 4  ;;  %7135 = vmatprep.subr.bf16.mxu1 %v8127_v62  ;;  %v8129_v37 = vmov 0.0   ;;  %s8075_s10 = scalar_lea.vmem %s6442_s2, 32  ;;  %p8080_p4 = scmp.lt.s32.totalorder %s6442_s2, %s6442_s2 }
 0xc1b   :  { %7120 = vmatprep.mubr.msk.f32.mxu1 %vm8128_vm1, %v8129_v37  ;;  %p8076_p3 = scmp.ne.s32.totalorder %s6442_s2, %s8075_s10  ;;  %p8081_p5 = scmp.lt.s32.totalorder %s8075_s10, %s8075_s10 }
 0xc1c   :  { %v6992_v38 = vmul.f32 -1.442695, %v5951_v45 }
 0xc1d   :  { %7137 = vmatpush3.bf16.msra.mxu1 %v7136_v8  ;;  %p8082_p6 = por %p8081_p5, %p8080_p4 }
 0xc1e   :  { %7901 = vpow2.f32 %v6992_v38  ;;  %7138 = vmatprep.subr.bf16.mxu1 %v8127_v62 }
 0xc1f   :  { %p8083_p7 = pnand %p8082_p6, %p8076_p3 }
 0xc21   :  { %7140 = vmatpush3.bf16.msra.mxu1 %v7139_v53 }
 0xc22   :  { %7141 = vmatprep.subr.bf16.mxu1 %v8127_v62 }
 0xc24   :  { %v7900_v28 = vpop.eup %7899 }
 0xc25   :  { %v5960_v25 = vmul.f32 %v7900_v28, %v7898_v30  ;;  %7143 = vmatpush3.bf16.msra.mxu1 %v7142_v7 }
 0xc26   :  { %7144 = vmatprep.subr.bf16.mxu1 %v8127_v62 }
 0xc27   :  { %v5961_v59 = vadd.f32 %v5960_v25, %v5959_v17  ;;  %v6993_v25 = vld [vmem:[#allocation15] ss:$0 sm:$0xff] }
 0xc28   :  { %v7902_v23 = vpop.eup %7901 }
 0xc29   :  { %v5956_v20 = vadd.f32 1.0, %v7902_v23  ;;  %7903 = vtanh.f32 %v5961_v59  ;;  %7146 = vmatpush3.bf16.msra.mxu1 %v7145_v35 }
 0xc2b   :  { %7905 = vrcp.f32 %v5956_v20 }
 0xc33   :  { %v7904_v22 = vpop.eup %7903 }
 0xc35   :  { %v7906_v43 = vpop.eup %7905 }
 0xc36   :  { %v5963_v63 = vmul.f32 %v7906_v43, %v7904_v22 }
 0xc38   :  { %v5971_v57 = vrot.slane %v5963_v63, %v8476_v11  ;;  %v7746_v11 = vld [vmem:[#allocation14 + $0x98] sm:$0xff]  }
 0xc3a   :  { %v5972_v54 = vcombine.high %v5971_v57, %v5971_v57  ;;  %v5981_v40 = vpack.c.bf16 %v5971_v57, %v5971_v57 }
 0xc3c   :  { %v5982_v55 = vpack.c.bf16 %v5972_v54, %v5972_v54  ;;  %v7026_v54 = vld [vmem:[#allocation17] ss:$0 sm:$0xff] }
 0xc3e   :  { %6280 = vmatprep.mubr.bf16.mxu0 %v5982_v55 }
 0xc3f   :  { %6281 = vmatmul.mubr.bf16.vlgmr.msra.gmra.mrb[76].mxu0 %v5981_v40 }
 0xc40   :  { %7050 = vmatpush3.bf16.msra.mxu0 %v7740_v36  ;;  %6320 = vmatprep.mubr.bf16.mxu0 %v5984_v16 }
 0xc41   :  { %7051 = vmatprep.subr.bf16.mxu0 %v7741_v33 }
 0xc44   :  { %7052 = vmatpush3.bf16.msra.mxu0 %v7742_v44 }
 0xc45   :  { %7053 = vmatprep.subr.bf16.mxu0 %v7743_v32 }
 0xc48   :  { %7054 = vmatpush3.bf16.msra.mxu0 %v7744_v48 }
 0xc49   :  { %7055 = vmatprep.subr.bf16.mxu0 %v7745_v52 }
 0xc4c   :  { %7056 = vmatpush3.bf16.msra.mxu0 %v7746_v11 }
 0xc4d   :  { %7057 = vmatprep.subr.bf16.mxu0 %v7747_v42 }
 0xc50   :  { %7058 = vmatpush3.bf16.msra.mxu0 %v7748_v3 }
 0xc51   :  { %7059 = vmatprep.subr.bf16.mxu0 %v7749_v31 }
 0xc54   :  { %7060 = vmatpush3.bf16.msra.mxu0 %v7750_v10 }
 0xc55   :  { %7061 = vmatprep.subr.bf16.mxu0 %v7751_v29 }
 0xc58   :  { %7062 = vmatpush3.bf16.msra.mxu0 %v7752_v41 }
 0xc59   :  { %7063 = vmatprep.subr.bf16.mxu0 %v7753_v49 }
 0xc5c   :  { %7064 = vmatpush3.bf16.msra.mxu0 %v7754_v19 }
 0xc5f   :  { %6321 = vmatmul.mubr.bf16.vlgmr.msra.gmra.mrb[80].mxu0 %v5983_v21 }
 0xd12   :  { %v7043_v45 = vpop.f32.mrb[76].mxu0 }
 0xd13   :  { %v7044_v38 = vpop.f32.mrb[77].mxu0 }
 0xd14   :  { %v7045_v0 = vadd.f32 %v7044_v38, %v7043_v45  ;;  %v7046_v30 = vpop.f32.mrb[78].mxu0 }
 0xd15   :  { %v7047_v28 = vpop.f32.mrb[79].mxu0 }
 0xd16   :  { %v6283_v23 = vadd.f32 %v7045_v0, %v6993_v25 }
 0xd32   :  { %v7065_v17 = vpop.f32.mrb[80].mxu0 }
 0xd33   :  { %v7066_v59 = vpop.f32.mrb[81].mxu0 }
 0xd34   :  { %v7067_v20 = vadd.f32 %v7066_v59, %v7065_v17  ;;  %v7068_v22 = vpop.f32.mrb[82].mxu0 }
 0xd35   :  { %v7069_v43 = vpop.f32.mrb[83].mxu0 }
 0xd36   :  { %v6323_v63 = vadd.f32 %v7067_v20, %v6283_v23 }
 0xd38   :  { %v6328_v57 = vmax.f32 %v6323_v63, 0.0 }
 0xd3a   :  { %7121 = vmatmul.mubr.f32.vlgmr.msra.gmra.mrb[80].mxu1 %v6328_v57 }
 0xe0d   :  { %v6418_v61 = vpop.f32.mrb[80].mxu1 }
 0xe0e   :  { %v6419_v6 = vadd.f32 %v7026_v54, %v6418_v61  ;;  %v7122_v55 = vpop.f32.mrb[81].mxu1 }
 0xe10   :  { %v6423_v36 = vsel %vm6422_vm2, %v6419_v6, -inf }
 0xe11   :  { %6424 = vmax.xlane.f32.xlu0 %v6423_v36 }
 0xe9e   :  { %v6425_v40 = vpop.xlane.xlu0 %6424 }
 0xe9f   :  { %v6426_v33 = vsub.f32 %v6419_v6, %v6425_v40 }
 0xea1   :  { %v6427_v16 = vmul.f32 1.442695, %v6426_v33 }
 0xea3   :  { %7907 = vpow2.f32 %v6427_v16 }
 0xead   :  { %v7908_v44 = vpop.eup %7907 }
 0xeae   :  { %v6429_v32 = vsel %vm6422_vm2, %v7908_v44, 0.0 }
 0xeaf   :  { %6430 = vadd.xlane.f32.xlu0 %v6429_v32 }
 0xf3c   :  { %v6431_v48 = vpop.xlane.xlu0 %6430 }
 0xf3d   :  { %7909 = vrcp.f32 %v6431_v48 }
 0xf47   :  { %v7910_v52 = vpop.eup %7909 }
 0xf48   :  { %v6433_v11 = vmul.f32 %v7910_v52, %v7908_v44 }
 0xf4a   :  { %6434 = vst.msk [vmem:[#allocation18] sm:$0x3] %vm6422_vm2, %v6433_v11 }
 0xf4b   :  { %8086 = shalt.err (!%p8083_p7)
}
 0xf4c   :  { %s8087_s5 = scalar_lea.hbm %s10087_s9, 32 }
 0xf4d   :  { %p8088_p8 = scmp.ne.s32.totalorder %s10087_s9, %s8087_s5  ;;  %p8091_p9 = scmp.lt.u32.totalorder %s8087_s5, %s10087_s9 }
 0xf4f   :  { %p8093_p10 = pnand %p8091_p9, %p8088_p8 }
 0xf51   :  { %8096 = shalt.err (!%p8093_p10)
}
 0xf52   :  { %6444 = dma.vmem_to_hbm [thread:$0]  %s6442_s2, 32, %s10087_s9, [#allocation6]  }
 0xf53   :  { %8107 = dma.done.wait [#allocation6], 32  }
 0xf54   :  { %8108 = vsyncadd [#allocation6], 4294967264 }
 0xf55   :  { %6448 = vsyncpa [#allocation5], 1 }
 0xf56   :  { %6449 = vsyncpa [#allocation10], 1 }
 0xf57   :  { %6450 = vsyncpa [#allocation13], 1 }
 0xf58   :  { %6451 = vsyncpa [#allocation16], 1 }
 0xf59   :  { %6452 = vsyncpa [#allocation6], 1 }
 0xf5a   :  { %6453 = vsyncpa [#allocation7], 1 }

</bundles_post_ra>
